<compile_context>
chip_gen: v7x
topology: tpu7x:2x2x1
jax: 0.10.0
libtpu: 0.0.40
codegen_flags: <defaults>
</compile_context>

<pallas_src>
import jax
import jax.numpy as jnp
from jax.experimental import pallas as pl
from jax.experimental.pallas import tpu as pltpu

ACTIONS = 3
LIN1_IN = 64 * 7 * 7            # 3136 (PyTorch linear_1 input features)
LIN1_OUT = 784
HID_PAD = 896                   # 784 -> 896 = 7*128 (lane-dense hidden dim)
VMEM_LIMIT = 32 * 1024 * 1024   # scoped default on v6e/v7x; < v7x 64 MiB physical


# ------------------------------ Pallas kernels ------------------------------ #

def _conv_mm_kernel(x_ref, w_ref, b_ref, o_ref):
    """One M-tile of: relu(patches @ w + b); bf16 operands, f32 accumulate."""
    acc = jnp.dot(x_ref[...], w_ref[...], preferred_element_type=jnp.float32)
    o_ref[...] = jnp.maximum(acc + b_ref[...], 0.0).astype(o_ref.dtype)


def _head_kernel(x_ref, w1_ref, b1_ref, w2_ref, b2_ref, o_ref):
    """Fused linear_1 (+ReLU) + linear_2 for one M-tile.

    K = 3136 is a single full-dim block (w1 stays resident in VMEM across the
    M-parallel grid), so no cross-step accumulator / pl.when is needed.
    """
    h = jnp.dot(x_ref[...], w1_ref[...], preferred_element_type=jnp.float32)
    h = jnp.maximum(h + b1_ref[...], 0.0)                       # relu(lin1), f32
    y = jnp.dot(h.astype(w2_ref.dtype), w2_ref[...],
                preferred_element_type=jnp.float32)             # lin2
    o_ref[...] = (y + b2_ref[...]).astype(o_ref.dtype)


# ------------------------------ Pallas wrappers ----------------------------- #

def _pick_tm(m, rows_per_image, target=512):
    """Image-row-aligned, 8-aligned M tile near `target` (no ragged remainder
    for typical batches); full-dim block when the array is smaller."""
    tile = rows_per_image
    while tile % 8:                 # smallest multiple of rows_per_image that is 8-aligned
        tile += rows_per_image
    tile *= max(1, target // tile)
    return m if tile >= m else tile


def conv_matmul_bias_relu(patches, w_mat, b_row, *, rows_per_image):
    """relu(patches @ w_mat + b). patches:(M,K) bf16, w:(K,N) bf16, b:(1,N) f32."""
    M, K = patches.shape
    K2, N = w_mat.shape
    assert K == K2, (K, K2)
    tm = _pick_tm(M, rows_per_image)
    grid_m = pl.cdiv(M, tm)         # boundary rows (if any) masked on store
    # TODO(synk): cout (32/64) < 128 -> masked vst on the output store; the conv
    # kernels are input-DMA bound so this is minor, but a (tm*cout/128, 128)
    # lane-dense out declaration would remove it.
    return pl.pallas_call(
        _conv_mm_kernel,
        out_shape=jax.ShapeDtypeStruct((M, N), jnp.bfloat16),
        grid=(grid_m,),
        in_specs=[
            pl.BlockSpec((tm, K), lambda i: (i, 0)),
            pl.BlockSpec((K, N), lambda i: (0, 0)),
            pl.BlockSpec((1, N), lambda i: (0, 0)),
        ],
        out_specs=pl.BlockSpec((tm, N), lambda i: (i, 0)),
        compiler_params=pltpu.CompilerParams(
            dimension_semantics=("parallel",),
            vmem_limit_bytes=VMEM_LIMIT),
    )(patches, w_mat, b_row)


def mlp_head(x, w1, b1, w2, b2, *, tm=256):
    """Fused y = relu(x @ w1 + b1) @ w2 + b2, M-tiled ('parallel') grid."""
    M, K = x.shape
    K2, H = w1.shape
    H2, A = w2.shape
    assert K == K2 and H == H2, (K, K2, H, H2)
    tm = min(tm, M)
    grid_m = pl.cdiv(M, tm)
    return pl.pallas_call(
        _head_kernel,
        out_shape=jax.ShapeDtypeStruct((M, A), jnp.float32),
        grid=(grid_m,),
        in_specs=[
            pl.BlockSpec((tm, K), lambda i: (i, 0)),   # activation tile, bf16
            pl.BlockSpec((K, H), lambda i: (0, 0)),    # w1 resident (bf16, ~5.6 MB)
            pl.BlockSpec((1, H), lambda i: (0, 0)),    # b1 (f32)
            pl.BlockSpec((H, A), lambda i: (0, 0)),    # w2 (bf16, tiny)
            pl.BlockSpec((1, A), lambda i: (0, 0)),    # b2 (f32)
        ],
        out_specs=pl.BlockSpec((tm, A), lambda i: (i, 0)),
        compiler_params=pltpu.CompilerParams(
            dimension_semantics=("parallel",),
            vmem_limit_bytes=VMEM_LIMIT),
    )(x, w1, b1, w2, b2)


# -------------------------------- conv glue --------------------------------- #

def _im2col(x_nhwc, kh, kw, stride):
    # TODO(synk): fold this gather into the Pallas pipeline (manual DMA of
    # shifted input rows) to avoid materializing the bf16 patch matrix in HBM.
    N, H, W, C = x_nhwc.shape
    oh = (H - kh) // stride + 1
    ow = (W - kw) // stride + 1
    cols = []
    for i in range(kh):
        for j in range(kw):
            cols.append(
                x_nhwc[:, i:i + stride * oh:stride, j:j + stride * ow:stride, :]
            )
    patches = jnp.stack(cols, axis=3)               # (N, oh, ow, kh*kw, C)
    return patches.reshape(N * oh * ow, kh * kw * C), oh, ow


def conv2d_relu_nhwc(x_nhwc, w_mat, b_row, *, kh, kw, stride):
    """Valid strided conv + ReLU on NHWC bf16 activations, im2col + Pallas matmul."""
    N = x_nhwc.shape[0]
    patches, oh, ow = _im2col(x_nhwc, kh, kw, stride)
    cout = w_mat.shape[1]
    out = conv_matmul_bias_relu(patches, w_mat, b_row, rows_per_image=oh * ow)
    return out.reshape(N, oh, ow, cout)             # stays NHWC, bf16


# ---------------------------- params / forward ------------------------------ #

def init_params(key):
    """PyTorch-shaped parameters (same layout as the nn.Module)."""
    keys = jax.random.split(key, 10)

    def init(k, shape, fan_in):
        return jax.random.normal(k, shape, jnp.float32) / jnp.sqrt(float(fan_in))

    return dict(
        conv1_w=init(keys[0], (32, 4, 8, 8), 4 * 8 * 8),
        conv1_b=init(keys[1], (32,), 4 * 8 * 8),
        conv2_w=init(keys[2], (64, 32, 4, 4), 32 * 4 * 4),
        conv2_b=init(keys[3], (64,), 32 * 4 * 4),
        conv3_w=init(keys[4], (64, 64, 3, 3), 64 * 3 * 3),
        conv3_b=init(keys[5], (64,), 64 * 3 * 3),
        lin1_w=init(keys[6], (LIN1_OUT, LIN1_IN), LIN1_IN),   # PyTorch Linear: (out, in)
        lin1_b=init(keys[7], (LIN1_OUT,), LIN1_IN),
        lin2_w=init(keys[8], (ACTIONS, LIN1_OUT), LIN1_OUT),
        lin2_b=init(keys[9], (ACTIONS,), LIN1_OUT),
    )


def prepare_params(p):
    """One-time (outside jit) relayout: bf16 weights, NHWC ordering, 896-pad."""
    def conv_w(w):
        cout, cin, kh, kw = w.shape
        # im2col patch ordering is (kh, kw, cin) -> weight rows must match.
        return (jnp.transpose(w, (2, 3, 1, 0))
                .reshape(kh * kw * cin, cout).astype(jnp.bfloat16))

    # linear_1: PyTorch columns follow the NCHW flatten (c, h, w); our flatten
    # is NHWC (h, w, c) -> permute the input axis once.  Pad the hidden dim
    # 784 -> 896 (zero columns) and pad l2_w with zero rows (result exact).
    w1 = p["lin1_w"].reshape(LIN1_OUT, 64, 7, 7)          # [out, c, h, w]
    w1 = jnp.transpose(w1, (2, 3, 1, 0)).reshape(LIN1_IN, LIN1_OUT)
    w1 = jnp.pad(w1, ((0, 0), (0, HID_PAD - LIN1_OUT))).astype(jnp.bfloat16)   # (3136,896)
    b1 = jnp.pad(p["lin1_b"], (0, HID_PAD - LIN1_OUT)).reshape(1, HID_PAD)     # f32
    w2 = jnp.pad(p["lin2_w"].T,
                 ((0, HID_PAD - LIN1_OUT), (0, 0))).astype(jnp.bfloat16)       # (896, 3)

    return dict(
        c1_w=conv_w(p["conv1_w"]), c1_b=p["conv1_b"].reshape(1, -1),
        c2_w=conv_w(p["conv2_w"]), c2_b=p["conv2_b"].reshape(1, -1),
        c3_w=conv_w(p["conv3_w"]), c3_b=p["conv3_b"].reshape(1, -1),
        l1_w=w1, l1_b=b1,
        l2_w=w2, l2_b=p["lin2_b"].reshape(1, -1),
    )


def cnn_forward(pp, x_nchw):
    # x: (N, 4, 84, 84) NCHW float32 (84x84 is forced by linear_1's 3136 inputs).
    # TODO(synk): the NCHW->NHWC transpose belongs in the host data pipeline.
    x = jnp.transpose(x_nchw, (0, 2, 3, 1)).astype(jnp.bfloat16)
    x = conv2d_relu_nhwc(x, pp["c1_w"], pp["c1_b"], kh=8, kw=8, stride=4)  # (N,20,20,32)
    x = conv2d_relu_nhwc(x, pp["c2_w"], pp["c2_b"], kh=4, kw=4, stride=2)  # (N, 9, 9,64)
    x = conv2d_relu_nhwc(x, pp["c3_w"], pp["c3_b"], kh=3, kw=3, stride=1)  # (N, 7, 7,64)
    N = x.shape[0]
    x = x.reshape(N, LIN1_IN)     # free view: contiguous NHWC (h,w,c) flatten
    return mlp_head(x, pp["l1_w"], pp["l1_b"], pp["l2_w"], pp["l2_b"])     # (N, 3) f32


if __name__ == "__main__":
    key = jax.random.PRNGKey(0)
    pkey, xkey = jax.random.split(key)
    params = init_params(pkey)
    prepared = prepare_params(params)       # one-time relayout, outside jit
    # Small batch; spatial size must be 84 so conv_3's output flattens to 3136.
    x = jax.random.normal(xkey, (2, 4, 84, 84), jnp.float32)

    out = jax.jit(cnn_forward)(prepared, x)
    out = jax.block_until_ready(out)
    assert out.shape == (2, ACTIONS), out.shape
    assert bool(jnp.all(jnp.isfinite(out))), "non-finite output"
    print("KERNEL_OK")
</pallas_src>

<mosaic_0001>
module attributes {stable_mosaic.version = 11 : i64} {
  func.func @_conv_mm_kernel(%arg0: i32, %arg1: memref<400x256xbf16, #tpu.memory_space<vmem>>, %arg2: memref<256x32xbf16, #tpu.memory_space<vmem>>, %arg3: memref<1x32xf32, #tpu.memory_space<vmem>>, %arg4: memref<400x32xbf16, #tpu.memory_space<vmem>>) attributes {dimension_semantics = [#tpu.dimension_semantics<parallel>], iteration_bounds = array<i64: 2>, scalar_prefetch = 0 : i64, scratch_operands = 0 : i64, tpu.core_type = #tpu.core_type<tc>, window_params = [{transform_indices = @transform_0, window_bounds = array<i64: 400, 256>}, {pipeline_mode = #tpu.pipeline_mode<synchronous>, transform_indices = @transform_1, window_bounds = array<i64: 256, 32>}, {pipeline_mode = #tpu.pipeline_mode<synchronous>, transform_indices = @transform_2, window_bounds = array<i64: 1, 32>}, {transform_indices = @transform_3, window_bounds = array<i64: 400, 32>}]} {
    %c0 = arith.constant 0 : index
    %c0_0 = arith.constant 0 : index
    %0 = vector.load %arg1[%c0, %c0_0] : memref<400x256xbf16, #tpu.memory_space<vmem>>, vector<400x256xbf16>
    %c0_1 = arith.constant 0 : index
    %c0_2 = arith.constant 0 : index
    %1 = vector.load %arg2[%c0_1, %c0_2] : memref<256x32xbf16, #tpu.memory_space<vmem>>, vector<256x32xbf16>
    %cst = arith.constant dense<0.000000e+00> : vector<400x32xf32>
    %2 = tpu.matmul %0, %1, %cst {dimension_numbers = #tpu.dot_dimension_numbers<[1], [0], [0], [1], [0, 0, 1, 1], [], []>} : vector<400x256xbf16>, vector<256x32xbf16>, vector<400x32xf32> -> vector<400x32xf32>
    %c0_3 = arith.constant 0 : index
    %c0_4 = arith.constant 0 : index
    %3 = vector.load %arg3[%c0_3, %c0_4] : memref<1x32xf32, #tpu.memory_space<vmem>>, vector<1x32xf32>
    %4 = vector.broadcast %3 : vector<1x32xf32> to vector<400x32xf32>
    %5 = arith.addf %2, %4 : vector<400x32xf32>
    %cst_5 = arith.constant 0.000000e+00 : f32
    %6 = vector.broadcast %cst_5 : f32 to vector<400x32xf32>
    %7 = arith.maximumf %5, %6 : vector<400x32xf32>
    %8 = arith.truncf %7 : vector<400x32xf32> to vector<400x32xbf16>
    %c0_6 = arith.constant 0 : index
    %c0_7 = arith.constant 0 : index
    %9 = vector.load %arg4[%c0_6, %c0_7] : memref<400x32xbf16, #tpu.memory_space<vmem>>, vector<400x32xbf16>
    tpu.vector_store %arg4[%c0_6, %c0_7], %8 {strides = array<i32>} : memref<400x32xbf16, #tpu.memory_space<vmem>>, vector<400x32xbf16>,
    return
  }
  func.func @transform_0(%arg0: i32) -> (i32, i32) {
    %c0_i32 = arith.constant 0 : i32
    %c0_i32_0 = arith.constant 0 : i32
    return %arg0, %c0_i32 : i32, i32
  }
  func.func @transform_1(%arg0: i32) -> (i32, i32) {
    %c0_i32 = arith.constant 0 : i32
    %c0_i32_0 = arith.constant 0 : i32
    %c0_i32_1 = arith.constant 0 : i32
    return %c0_i32, %c0_i32_0 : i32, i32
  }
  func.func @transform_2(%arg0: i32) -> (i32, i32) {
    %c0_i32 = arith.constant 0 : i32
    %c0_i32_0 = arith.constant 0 : i32
    %c0_i32_1 = arith.constant 0 : i32
    return %c0_i32, %c0_i32_0 : i32, i32
  }
  func.func @transform_3(%arg0: i32) -> (i32, i32) {
    %c0_i32 = arith.constant 0 : i32
    %c0_i32_0 = arith.constant 0 : i32
    return %arg0, %c0_i32 : i32, i32
  }
}

module attributes {stable_mosaic.version = 11 : i64} {
  func.func @_conv_mm_kernel(%arg0: i32, %arg1: memref<162x512xbf16, #tpu.memory_space<vmem>>, %arg2: memref<512x64xbf16, #tpu.memory_space<vmem>>, %arg3: memref<1x64xf32, #tpu.memory_space<vmem>>, %arg4: memref<162x64xbf16, #tpu.memory_space<vmem>>) attributes {dimension_semantics = [#tpu.dimension_semantics<parallel>], iteration_bounds = array<i64: 1>, scalar_prefetch = 0 : i64, scratch_operands = 0 : i64, tpu.core_type = #tpu.core_type<tc>, window_params = [{transform_indices = @transform_0, window_bounds = array<i64: 162, 512>}, {pipeline_mode = #tpu.pipeline_mode<synchronous>, transform_indices = @transform_1, window_bounds = array<i64: 512, 64>}, {pipeline_mode = #tpu.pipeline_mode<synchronous>, transform_indices = @transform_2, window_bounds = array<i64: 1, 64>}, {transform_indices = @transform_3, window_bounds = array<i64: 162, 64>}]} {
    %c0 = arith.constant 0 : index
    %c0_0 = arith.constant 0 : index
    %0 = vector.load %arg1[%c0, %c0_0] : memref<162x512xbf16, #tpu.memory_space<vmem>>, vector<162x512xbf16>
    %c0_1 = arith.constant 0 : index
    %c0_2 = arith.constant 0 : index
    %1 = vector.load %arg2[%c0_1, %c0_2] : memref<512x64xbf16, #tpu.memory_space<vmem>>, vector<512x64xbf16>
    %cst = arith.constant dense<0.000000e+00> : vector<162x64xf32>
    %2 = tpu.matmul %0, %1, %cst {dimension_numbers = #tpu.dot_dimension_numbers<[1], [0], [0], [1], [0, 0, 1, 1], [], []>} : vector<162x512xbf16>, vector<512x64xbf16>, vector<162x64xf32> -> vector<162x64xf32>
    %c0_3 = arith.constant 0 : index
    %c0_4 = arith.constant 0 : index
    %3 = vector.load %arg3[%c0_3, %c0_4] : memref<1x64xf32, #tpu.memory_space<vmem>>, vector<1x64xf32>
    %4 = vector.broadcast %3 : vector<1x64xf32> to vector<162x64xf32>
    %5 = arith.addf %2, %4 : vector<162x64xf32>
    %cst_5 = arith.constant 0.000000e+00 : f32
    %6 = vector.broadcast %cst_5 : f32 to vector<162x64xf32>
    %7 = arith.maximumf %5, %6 : vector<162x64xf32>
    %8 = arith.truncf %7 : vector<162x64xf32> to vector<162x64xbf16>
    %c0_6 = arith.constant 0 : index
    %c0_7 = arith.constant 0 : index
    %9 = vector.load %arg4[%c0_6, %c0_7] : memref<162x64xbf16, #tpu.memory_space<vmem>>, vector<162x64xbf16>
    tpu.vector_store %arg4[%c0_6, %c0_7], %8 {strides = array<i32>} : memref<162x64xbf16, #tpu.memory_space<vmem>>, vector<162x64xbf16>,
    return
  }
  func.func @transform_0(%arg0: i32) -> (i32, i32) {
    %c0_i32 = arith.constant 0 : i32
    %c0_i32_0 = arith.constant 0 : i32
    return %arg0, %c0_i32 : i32, i32
  }
  func.func @transform_1(%arg0: i32) -> (i32, i32) {
    %c0_i32 = arith.constant 0 : i32
    %c0_i32_0 = arith.constant 0 : i32
    %c0_i32_1 = arith.constant 0 : i32
    return %c0_i32, %c0_i32_0 : i32, i32
  }
  func.func @transform_2(%arg0: i32) -> (i32, i32) {
    %c0_i32 = arith.constant 0 : i32
    %c0_i32_0 = arith.constant 0 : i32
    %c0_i32_1 = arith.constant 0 : i32
    return %c0_i32, %c0_i32_0 : i32, i32
  }
  func.func @transform_3(%arg0: i32) -> (i32, i32) {
    %c0_i32 = arith.constant 0 : i32
    %c0_i32_0 = arith.constant 0 : i32
    return %arg0, %c0_i32 : i32, i32
  }
}

module attributes {stable_mosaic.version = 11 : i64} {
  func.func @_conv_mm_kernel(%arg0: i32, %arg1: memref<98x576xbf16, #tpu.memory_space<vmem>>, %arg2: memref<576x64xbf16, #tpu.memory_space<vmem>>, %arg3: memref<1x64xf32, #tpu.memory_space<vmem>>, %arg4: memref<98x64xbf16, #tpu.memory_space<vmem>>) attributes {dimension_semantics = [#tpu.dimension_semantics<parallel>], iteration_bounds = array<i64: 1>, scalar_prefetch = 0 : i64, scratch_operands = 0 : i64, tpu.core_type = #tpu.core_type<tc>, window_params = [{transform_indices = @transform_0, window_bounds = array<i64: 98, 576>}, {pipeline_mode = #tpu.pipeline_mode<synchronous>, transform_indices = @transform_1, window_bounds = array<i64: 576, 64>}, {pipeline_mode = #tpu.pipeline_mode<synchronous>, transform_indices = @transform_2, window_bounds = array<i64: 1, 64>}, {transform_indices = @transform_3, window_bounds = array<i64: 98, 64>}]} {
    %c0 = arith.constant 0 : index
    %c0_0 = arith.constant 0 : index
    %0 = vector.load %arg1[%c0, %c0_0] : memref<98x576xbf16, #tpu.memory_space<vmem>>, vector<98x576xbf16>
    %c0_1 = arith.constant 0 : index
    %c0_2 = arith.constant 0 : index
    %1 = vector.load %arg2[%c0_1, %c0_2] : memref<576x64xbf16, #tpu.memory_space<vmem>>, vector<576x64xbf16>
    %cst = arith.constant dense<0.000000e+00> : vector<98x64xf32>
    %2 = tpu.matmul %0, %1, %cst {dimension_numbers = #tpu.dot_dimension_numbers<[1], [0], [0], [1], [0, 0, 1, 1], [], []>} : vector<98x576xbf16>, vector<576x64xbf16>, vector<98x64xf32> -> vector<98x64xf32>
    %c0_3 = arith.constant 0 : index
    %c0_4 = arith.constant 0 : index
    %3 = vector.load %arg3[%c0_3, %c0_4] : memref<1x64xf32, #tpu.memory_space<vmem>>, vector<1x64xf32>
    %4 = vector.broadcast %3 : vector<1x64xf32> to vector<98x64xf32>
    %5 = arith.addf %2, %4 : vector<98x64xf32>
    %cst_5 = arith.constant 0.000000e+00 : f32
    %6 = vector.broadcast %cst_5 : f32 to vector<98x64xf32>
    %7 = arith.maximumf %5, %6 : vector<98x64xf32>
    %8 = arith.truncf %7 : vector<98x64xf32> to vector<98x64xbf16>
    %c0_6 = arith.constant 0 : index
    %c0_7 = arith.constant 0 : index
    %9 = vector.load %arg4[%c0_6, %c0_7] : memref<98x64xbf16, #tpu.memory_space<vmem>>, vector<98x64xbf16>
    tpu.vector_store %arg4[%c0_6, %c0_7], %8 {strides = array<i32>} : memref<98x64xbf16, #tpu.memory_space<vmem>>, vector<98x64xbf16>,
    return
  }
  func.func @transform_0(%arg0: i32) -> (i32, i32) {
    %c0_i32 = arith.constant 0 : i32
    %c0_i32_0 = arith.constant 0 : i32
    return %arg0, %c0_i32 : i32, i32
  }
  func.func @transform_1(%arg0: i32) -> (i32, i32) {
    %c0_i32 = arith.constant 0 : i32
    %c0_i32_0 = arith.constant 0 : i32
    %c0_i32_1 = arith.constant 0 : i32
    return %c0_i32, %c0_i32_0 : i32, i32
  }
  func.func @transform_2(%arg0: i32) -> (i32, i32) {
    %c0_i32 = arith.constant 0 : i32
    %c0_i32_0 = arith.constant 0 : i32
    %c0_i32_1 = arith.constant 0 : i32
    return %c0_i32, %c0_i32_0 : i32, i32
  }
  func.func @transform_3(%arg0: i32) -> (i32, i32) {
    %c0_i32 = arith.constant 0 : i32
    %c0_i32_0 = arith.constant 0 : i32
    return %arg0, %c0_i32 : i32, i32
  }
}

module attributes {stable_mosaic.version = 11 : i64} {
  func.func @_head_kernel(%arg0: i32, %arg1: memref<2x3136xbf16, #tpu.memory_space<vmem>>, %arg2: memref<3136x896xbf16, #tpu.memory_space<vmem>>, %arg3: memref<1x896xf32, #tpu.memory_space<vmem>>, %arg4: memref<896x3xbf16, #tpu.memory_space<vmem>>, %arg5: memref<1x3xf32, #tpu.memory_space<vmem>>, %arg6: memref<2x3xf32, #tpu.memory_space<vmem>>) attributes {dimension_semantics = [#tpu.dimension_semantics<parallel>], iteration_bounds = array<i64: 1>, scalar_prefetch = 0 : i64, scratch_operands = 0 : i64, tpu.core_type = #tpu.core_type<tc>, window_params = [{transform_indices = @transform_0, window_bounds = array<i64: 2, 3136>}, {pipeline_mode = #tpu.pipeline_mode<synchronous>, transform_indices = @transform_1, window_bounds = array<i64: 3136, 896>}, {pipeline_mode = #tpu.pipeline_mode<synchronous>, transform_indices = @transform_2, window_bounds = array<i64: 1, 896>}, {pipeline_mode = #tpu.pipeline_mode<synchronous>, transform_indices = @transform_3, window_bounds = array<i64: 896, 3>}, {pipeline_mode = #tpu.pipeline_mode<synchronous>, transform_indices = @transform_4, window_bounds = array<i64: 1, 3>}, {transform_indices = @transform_5, window_bounds = array<i64: 2, 3>}]} {
    %c0 = arith.constant 0 : index
    %c0_0 = arith.constant 0 : index
    %0 = vector.load %arg1[%c0, %c0_0] : memref<2x3136xbf16, #tpu.memory_space<vmem>>, vector<2x3136xbf16>
    %c0_1 = arith.constant 0 : index
    %c0_2 = arith.constant 0 : index
    %1 = vector.load %arg2[%c0_1, %c0_2] : memref<3136x896xbf16, #tpu.memory_space<vmem>>, vector<3136x896xbf16>
    %cst = arith.constant dense<0.000000e+00> : vector<2x896xf32>
    %2 = tpu.matmul %0, %1, %cst {dimension_numbers = #tpu.dot_dimension_numbers<[1], [0], [0], [1], [0, 0, 1, 1], [], []>} : vector<2x3136xbf16>, vector<3136x896xbf16>, vector<2x896xf32> -> vector<2x896xf32>
    %c0_3 = arith.constant 0 : index
    %c0_4 = arith.constant 0 : index
    %3 = vector.load %arg3[%c0_3, %c0_4] : memref<1x896xf32, #tpu.memory_space<vmem>>, vector<1x896xf32>
    %4 = vector.broadcast %3 : vector<1x896xf32> to vector<2x896xf32>
    %5 = arith.addf %2, %4 : vector<2x896xf32>
    %cst_5 = arith.constant 0.000000e+00 : f32
    %6 = vector.broadcast %cst_5 : f32 to vector<2x896xf32>
    %7 = arith.maximumf %5, %6 : vector<2x896xf32>
    %8 = arith.truncf %7 : vector<2x896xf32> to vector<2x896xbf16>
    %c0_6 = arith.constant 0 : index
    %c0_7 = arith.constant 0 : index
    %9 = vector.load %arg4[%c0_6, %c0_7] : memref<896x3xbf16, #tpu.memory_space<vmem>>, vector<896x3xbf16>
    %cst_8 = arith.constant dense<0.000000e+00> : vector<2x3xf32>
    %10 = tpu.matmul %8, %9, %cst_8 {dimension_numbers = #tpu.dot_dimension_numbers<[1], [0], [0], [1], [0, 0, 1, 1], [], []>} : vector<2x896xbf16>, vector<896x3xbf16>, vector<2x3xf32> -> vector<2x3xf32>
    %c0_9 = arith.constant 0 : index
    %c0_10 = arith.constant 0 : index
    %11 = vector.load %arg5[%c0_9, %c0_10] : memref<1x3xf32, #tpu.memory_space<vmem>>, vector<1x3xf32>
    %12 = vector.broadcast %11 : vector<1x3xf32> to vector<2x3xf32>
    %13 = arith.addf %10, %12 : vector<2x3xf32>
    %c0_11 = arith.constant 0 : index
    %c0_12 = arith.constant 0 : index
    %14 = vector.load %arg6[%c0_11, %c0_12] : memref<2x3xf32, #tpu.memory_space<vmem>>, vector<2x3xf32>
    tpu.vector_store %arg6[%c0_11, %c0_12], %13 {strides = array<i32>} : memref<2x3xf32, #tpu.memory_space<vmem>>, vector<2x3xf32>,
    return
  }
  func.func @transform_0(%arg0: i32) -> (i32, i32) {
    %c0_i32 = arith.constant 0 : i32
    %c0_i32_0 = arith.constant 0 : i32
    return %arg0, %c0_i32 : i32, i32
  }
  func.func @transform_1(%arg0: i32) -> (i32, i32) {
    %c0_i32 = arith.constant 0 : i32
    %c0_i32_0 = arith.constant 0 : i32
    %c0_i32_1 = arith.constant 0 : i32
    return %c0_i32, %c0_i32_0 : i32, i32
  }
  func.func @transform_2(%arg0: i32) -> (i32, i32) {
    %c0_i32 = arith.constant 0 : i32
    %c0_i32_0 = arith.constant 0 : i32
    %c0_i32_1 = arith.constant 0 : i32
    return %c0_i32, %c0_i32_0 : i32, i32
  }
  func.func @transform_3(%arg0: i32) -> (i32, i32) {
    %c0_i32 = arith.constant 0 : i32
    %c0_i32_0 = arith.constant 0 : i32
    %c0_i32_1 = arith.constant 0 : i32
    return %c0_i32, %c0_i32_0 : i32, i32
  }
  func.func @transform_4(%arg0: i32) -> (i32, i32) {
    %c0_i32 = arith.constant 0 : i32
    %c0_i32_0 = arith.constant 0 : i32
    %c0_i32_1 = arith.constant 0 : i32
    return %c0_i32, %c0_i32_0 : i32, i32
  }
  func.func @transform_5(%arg0: i32) -> (i32, i32) {
    %c0_i32 = arith.constant 0 : i32
    %c0_i32_0 = arith.constant 0 : i32
    return %arg0, %c0_i32 : i32, i32
  }
}

</mosaic_0001>

<bundles_post_ra>
// kernel: cnn_forward.4
= control target key start
LH: loop header
LB: loop body
LE: loop exit
PB: predicated region body
PF: predicated region fallthrough
CT: control target
= control target key end

     0   :  { %s1542_s12 = smov 0   ;;  %s1852_s0 = inlined_call_operand.vmem [shape: bf16[800,256], index: 0, kind: input, shape index: {}]   ;;  %s1853_s1 = inlined_call_operand.vmem [shape: bf16[256,32], index: 1, kind: input, shape index: {}]   ;;  %s1854_s2 = inlined_call_operand.vmem [shape: f32[1,32], index: 2, kind: input, shape index: {}]   ;;  %s1855_s3 = inlined_call_operand.vmem [shape: bf16[800,32], index: 3, kind: output, shape index: {}]  }
   0x1 LB: > { %s1203_s13 = sadd.s32 4294967295, %s1519_s12   ;;  %p1207_p0 = scmp.ge.s32.totalorder %s1519_s12, 1  ;;  %s1519_s12 = sphi %s1542_s12, %s13_s12  }
   0x2   : > { %p139_p1 = scmp.lt.s32.totalorder %s1519_s12, 3 }
   0x4   : > { %p140_p2 = pnand %p1207_p0, %p139_p1 }
   0x5   : > { %v1422_v0 = vld [vmem:[%s1853_s1] sm:$0xff] (!%p140_p2)   ;;  %v1521_v1 = vmov (!%p140_p2), 0   ;;  %s164_s16 = smul.u32 (!%p140_p2), 50, %s1203_s13  ;;  %v1423_v2 = vld [vmem:[%s1853_s1 + $0x8] sm:$0xff] (!%p140_p2)   ;;  %v1424_v3 = vld [vmem:[%s1853_s1 + $0x10] sm:$0xff] (!%p140_p2)   ;;  %vm1096_vm0 = vcmask (!%p140_p2), 257024  }
   0x6   : > { %143 = sbr.rel (%p140_p2) target bundleno = 387 (0x183), region = 32  ;;  %613 = vmatprep.subr.bf16.mxu0 (!%p140_p2), %v1521_v1  ;;  %1381 = vmatprep.subr.bf16.mxu1 (!%p140_p2), %v1521_v1  ;;  %v1425_v4 = vld [vmem:[%s1853_s1 + $0x18] sm:$0xff] (!%p140_p2)   ;;  %v1426_v5 = vld [vmem:[%s1853_s1 + $0x20] sm:$0xff] (!%p140_p2)   ;;  %v1427_v7 = vld [vmem:[%s1853_s1 + $0x28] sm:$0xff] (!%p140_p2)  }
   0x7   : > { %614 = vmatpush1.bf16.msra.mxu0 (!%p140_p2), %v1422_v0  ;;  %1397 = vmatpush1.bf16.msra.mxu1 (!%p140_p2), %v1422_v0  ;;  %p165_p3 = scmp.lt.s32.totalorder (!%p140_p2), %s164_s16, 99  ;;  %v1428_v9 = vld [vmem:[%s1853_s1 + $0x30] sm:$0xff] (!%p140_p2)   ;;  %v1429_v10 = vld [vmem:[%s1853_s1 + $0x38] sm:$0xff] (!%p140_p2)   ;;  %v1430_v11 = vld [vmem:[%s1853_s1 + $0x40] sm:$0xff] (!%p140_p2)  }
   0x8   : > { %615 = vmatprep.subr.bf16.mxu0 (!%p140_p2), %v1521_v1  ;;  %1382 = vmatprep.subr.bf16.mxu1 (!%p140_p2), %v1521_v1  ;;  %v1431_v12 = vld [vmem:[%s1853_s1 + $0x48] sm:$0xff] (!%p140_p2)   ;;  %v1432_v13 = vld [vmem:[%s1853_s1 + $0x50] sm:$0xff] (!%p140_p2)   ;;  %v1433_v14 = vld [vmem:[%s1853_s1 + $0x58] sm:$0xff] (!%p140_p2)  }
   0x9   : > { %v1434_v15 = vld [vmem:[%s1853_s1 + $0x60] sm:$0xff] (!%p140_p2)   ;;  %v1435_v16 = vld [vmem:[%s1853_s1 + $0x68] sm:$0xff] (!%p140_p2)   ;;  %v1436_v17 = vld [vmem:[%s1853_s1 + $0x70] sm:$0xff] (!%p140_p2)  }
   0xa   : > { %v1437_v18 = vld [vmem:[%s1853_s1 + $0x78] sm:$0xff] (!%p140_p2)  }
   0xb   : > { %616 = vmatpush1.bf16.msra.mxu0 (!%p140_p2), %v1423_v2  ;;  %1398 = vmatpush1.bf16.msra.mxu1 (!%p140_p2), %v1423_v2 }
   0xc   : > { %617 = vmatprep.subr.bf16.mxu0 (!%p140_p2), %v1521_v1  ;;  %1383 = vmatprep.subr.bf16.mxu1 (!%p140_p2), %v1521_v1 }
   0xd   : > { %s1857_s16 = smov (!%p165_p3, %s164_s16), 99 }
   0xe   : > { %s1330_s23 = sshll.u32 %s1857_s16, 3  ;;  %s1210_s29 = sshll.u32 %s1857_s16, 2 }
   0xf   : > { %618 = vmatpush1.bf16.msra.mxu0 %v1424_v3  ;;  %1399 = vmatpush1.bf16.msra.mxu1 %v1424_v3  ;;  %s1579_s28 = scalar_lea.vmem %s1852_s0, %s1330_s23  ;;  %v1691_v3 = vld [vmem:[%s1854_s2] ss:$0 sm:$0xff]  ;;  %s1701_s16 = scalar_lea.vmem %s1855_s3, %s1210_s29 }
  0x10   : > { %619 = vmatprep.subr.bf16.mxu0 %v1521_v1  ;;  %1384 = vmatprep.subr.bf16.mxu1 %v1521_v1  ;;  %v1440_v6 = vld [vmem:[%s1579_s28 + $0x4] ss:$8 sps:$4 sm:$0xff]   ;;  %v1443_v8 = vld [vmem:[%s1579_s28 + $0xd4] ss:$8 sps:$4 sm:$0xff]   ;;  %v1438_v19 = vld [vmem:[%s1579_s28] ss:$8 sps:$4 sm:$0xff]  }
  0x11   : > { %645 = vmatprep.mubr.bf16.mxu0 %v1440_v6  ;;  %749 = vmatprep.mubr.bf16.mxu1 %v1443_v8  ;;  %v1441_v20 = vld [vmem:[%s1579_s28 + $0xd0] ss:$8 sps:$4 sm:$0xff]   ;;  %v1444_v21 = vld [vmem:[%s1579_s28 + $0x14] ss:$8 sps:$4 sm:$0xff]   ;;  %v1447_v22 = vld [vmem:[%s1579_s28 + $0xe4] ss:$8 sps:$4 sm:$0xff]  }
  0x12   : > { %v1446_v23 = vld [vmem:[%s1579_s28 + $0x10] ss:$8 sps:$4 sm:$0xff]   ;;  %v1449_v24 = vld [vmem:[%s1579_s28 + $0xe0] ss:$8 sps:$4 sm:$0xff]   ;;  %v1450_v25 = vld [vmem:[%s1579_s28 + $0x24] ss:$8 sps:$4 sm:$0xff]  }
  0x13   : > { %620 = vmatpush1.bf16.msra.mxu0 %v1425_v4  ;;  %1400 = vmatpush1.bf16.msra.mxu1 %v1425_v4  ;;  %v1453_v26 = vld [vmem:[%s1579_s28 + $0xf4] ss:$8 sps:$4 sm:$0xff]   ;;  %v1452_v27 = vld [vmem:[%s1579_s28 + $0x20] ss:$8 sps:$4 sm:$0xff]   ;;  %v1455_v28 = vld [vmem:[%s1579_s28 + $0xf0] ss:$8 sps:$4 sm:$0xff]  }
  0x14   : > { %621 = vmatprep.subr.bf16.mxu0 %v1521_v1  ;;  %1385 = vmatprep.subr.bf16.mxu1 %v1521_v1  ;;  %v1456_v29 = vld [vmem:[%s1579_s28 + $0x34] ss:$8 sps:$4 sm:$0xff]   ;;  %v1459_v30 = vld [vmem:[%s1579_s28 + $0x104] ss:$8 sps:$4 sm:$0xff]   ;;  %v1458_v31 = vld [vmem:[%s1579_s28 + $0x30] ss:$8 sps:$4 sm:$0xff]  }
  0x15   : > { %v1461_v32 = vld [vmem:[%s1579_s28 + $0x100] ss:$8 sps:$4 sm:$0xff]   ;;  %v1462_v33 = vld [vmem:[%s1579_s28 + $0x44] ss:$8 sps:$4 sm:$0xff]   ;;  %v1465_v34 = vld [vmem:[%s1579_s28 + $0x114] ss:$8 sps:$4 sm:$0xff]  }
  0x16   : > { %v1464_v35 = vld [vmem:[%s1579_s28 + $0x40] ss:$8 sps:$4 sm:$0xff]   ;;  %v1467_v36 = vld [vmem:[%s1579_s28 + $0x110] ss:$8 sps:$4 sm:$0xff]   ;;  %v1468_v37 = vld [vmem:[%s1579_s28 + $0x54] ss:$8 sps:$4 sm:$0xff]  }
  0x17   : > { %622 = vmatpush1.bf16.msra.mxu0 %v1426_v5  ;;  %1401 = vmatpush1.bf16.msra.mxu1 %v1426_v5  ;;  %v1471_v38 = vld [vmem:[%s1579_s28 + $0x124] ss:$8 sps:$4 sm:$0xff]   ;;  %v1470_v39 = vld [vmem:[%s1579_s28 + $0x50] ss:$8 sps:$4 sm:$0xff]   ;;  %v1473_v40 = vld [vmem:[%s1579_s28 + $0x120] ss:$8 sps:$4 sm:$0xff]  }
  0x18   : > { %623 = vmatprep.subr.bf16.mxu0 %v1521_v1  ;;  %1386 = vmatprep.subr.bf16.mxu1 %v1521_v1  ;;  %v1474_v41 = vld [vmem:[%s1579_s28 + $0x64] ss:$8 sps:$4 sm:$0xff]   ;;  %v1477_v42 = vld [vmem:[%s1579_s28 + $0x134] ss:$8 sps:$4 sm:$0xff]   ;;  %v1476_v43 = vld [vmem:[%s1579_s28 + $0x60] ss:$8 sps:$4 sm:$0xff]  }
  0x19   : > { %v1479_v44 = vld [vmem:[%s1579_s28 + $0x130] ss:$8 sps:$4 sm:$0xff]   ;;  %v1480_v45 = vld [vmem:[%s1579_s28 + $0x74] ss:$8 sps:$4 sm:$0xff]   ;;  %v1483_v46 = vld [vmem:[%s1579_s28 + $0x144] ss:$8 sps:$4 sm:$0xff]  }
  0x1a   : > { %v1482_v47 = vld [vmem:[%s1579_s28 + $0x70] ss:$8 sps:$4 sm:$0xff]   ;;  %v1485_v48 = vld [vmem:[%s1579_s28 + $0x140] ss:$8 sps:$4 sm:$0xff]   ;;  %v1486_v49 = vld [vmem:[%s1579_s28 + $0x84] ss:$8 sps:$4 sm:$0xff]  }
  0x1b   : > { %624 = vmatpush1.bf16.msra.mxu0 %v1427_v7  ;;  %1402 = vmatpush1.bf16.msra.mxu1 %v1427_v7  ;;  %v1489_v50 = vld [vmem:[%s1579_s28 + $0x154] ss:$8 sps:$4 sm:$0xff]   ;;  %v1488_v51 = vld [vmem:[%s1579_s28 + $0x80] ss:$8 sps:$4 sm:$0xff]   ;;  %v1491_v52 = vld [vmem:[%s1579_s28 + $0x150] ss:$8 sps:$4 sm:$0xff]  }
  0x1c   : > { %625 = vmatprep.subr.bf16.mxu0 %v1521_v1  ;;  %1387 = vmatprep.subr.bf16.mxu1 %v1521_v1  ;;  %v1492_v53 = vld [vmem:[%s1579_s28 + $0x94] ss:$8 sps:$4 sm:$0xff]   ;;  %v1495_v54 = vld [vmem:[%s1579_s28 + $0x164] ss:$8 sps:$4 sm:$0xff]   ;;  %v1494_v55 = vld [vmem:[%s1579_s28 + $0x90] ss:$8 sps:$4 sm:$0xff]  }
  0x1d   : > { %v1497_v56 = vld [vmem:[%s1579_s28 + $0x160] ss:$8 sps:$4 sm:$0xff]   ;;  %v1498_v57 = vld [vmem:[%s1579_s28 + $0xa4] ss:$8 sps:$4 sm:$0xff]   ;;  %v1501_v58 = vld [vmem:[%s1579_s28 + $0x174] ss:$8 sps:$4 sm:$0xff]  }
  0x1e   : > { %v1500_v59 = vld [vmem:[%s1579_s28 + $0xa0] ss:$8 sps:$4 sm:$0xff]   ;;  %v1503_v60 = vld [vmem:[%s1579_s28 + $0x170] ss:$8 sps:$4 sm:$0xff]   ;;  %v1504_v61 = vld [vmem:[%s1579_s28 + $0xb4] ss:$8 sps:$4 sm:$0xff]  }
  0x1f   : > { %626 = vmatpush1.bf16.msra.mxu0 %v1428_v9  ;;  %1403 = vmatpush1.bf16.msra.mxu1 %v1428_v9  ;;  %v1507_v62 = vld [vmem:[%s1579_s28 + $0x184] ss:$8 sps:$4 sm:$0xff]   ;;  %v1506_v63 = vld [vmem:[%s1579_s28 + $0xb0] ss:$8 sps:$4 sm:$0xff]   ;;  %v1509_v0 = vld [vmem:[%s1579_s28 + $0x180] ss:$8 sps:$4 sm:$0xff]  }
  0x20   : > { %627 = vmatprep.subr.bf16.mxu0 %v1521_v1  ;;  %1388 = vmatprep.subr.bf16.mxu1 %v1521_v1  ;;  %v1512_v2 = vld [vmem:[%s1579_s28 + $0xc0] ss:$8 sps:$4 sm:$0xff]  }
  0x23   : > { %628 = vmatpush1.bf16.msra.mxu0 %v1429_v10  ;;  %1404 = vmatpush1.bf16.msra.mxu1 %v1429_v10 }
  0x24   : > { %629 = vmatprep.subr.bf16.mxu0 %v1521_v1  ;;  %1389 = vmatprep.subr.bf16.mxu1 %v1521_v1 }
  0x27   : > { %630 = vmatpush1.bf16.msra.mxu0 %v1430_v11  ;;  %1405 = vmatpush1.bf16.msra.mxu1 %v1430_v11 }
  0x28   : > { %631 = vmatprep.subr.bf16.mxu0 %v1521_v1  ;;  %1390 = vmatprep.subr.bf16.mxu1 %v1521_v1 }
  0x2b   : > { %632 = vmatpush1.bf16.msra.mxu0 %v1431_v12  ;;  %1406 = vmatpush1.bf16.msra.mxu1 %v1431_v12 }
  0x2c   : > { %633 = vmatprep.subr.bf16.mxu0 %v1521_v1  ;;  %1391 = vmatprep.subr.bf16.mxu1 %v1521_v1 }
  0x2f   : > { %634 = vmatpush1.bf16.msra.mxu0 %v1432_v13  ;;  %1407 = vmatpush1.bf16.msra.mxu1 %v1432_v13 }
  0x30   : > { %635 = vmatprep.subr.bf16.mxu0 %v1521_v1  ;;  %1392 = vmatprep.subr.bf16.mxu1 %v1521_v1 }
  0x33   : > { %636 = vmatpush1.bf16.msra.mxu0 %v1433_v14  ;;  %1408 = vmatpush1.bf16.msra.mxu1 %v1433_v14 }
  0x34   : > { %637 = vmatprep.subr.bf16.mxu0 %v1521_v1  ;;  %1393 = vmatprep.subr.bf16.mxu1 %v1521_v1 }
  0x37   : > { %638 = vmatpush1.bf16.msra.mxu0 %v1434_v15  ;;  %1409 = vmatpush1.bf16.msra.mxu1 %v1434_v15 }
  0x38   : > { %639 = vmatprep.subr.bf16.mxu0 %v1521_v1  ;;  %1394 = vmatprep.subr.bf16.mxu1 %v1521_v1 }
  0x3b   : > { %640 = vmatpush1.bf16.msra.mxu0 %v1435_v16  ;;  %1410 = vmatpush1.bf16.msra.mxu1 %v1435_v16 }
  0x3c   : > { %641 = vmatprep.subr.bf16.mxu0 %v1521_v1  ;;  %1395 = vmatprep.subr.bf16.mxu1 %v1521_v1 }
  0x3f   : > { %642 = vmatpush1.bf16.msra.mxu0 %v1436_v17  ;;  %1411 = vmatpush1.bf16.msra.mxu1 %v1436_v17 }
  0x40   : > { %643 = vmatprep.subr.bf16.mxu0 %v1521_v1  ;;  %1396 = vmatprep.subr.bf16.mxu1 %v1521_v1  ;;  %v1510_v1 = vld [vmem:[%s1579_s28 + $0xc4] ss:$8 sps:$4 sm:$0xff]  }
  0x43   : > { %644 = vmatpush1.bf16.msra.mxu0 %v1437_v18  ;;  %1412 = vmatpush1.bf16.msra.mxu1 %v1437_v18 }
  0x46   : > { %646 = vmatmul.mubr.bf16.vlgmr.msra.gmra.mrb[0].mxu0 %v1438_v19  ;;  %750 = vmatmul.mubr.bf16.vlgmr.msra.gmra.mrb[0].mxu1 %v1441_v20 }
  0x47   : > { %653 = vmatprep.mubr.bf16.mxu0 %v1444_v21  ;;  %757 = vmatprep.mubr.bf16.mxu1 %v1447_v22 }
  0x4e   : > { %654 = vmatmul.mubr.bf16.gmra.mrb[4].mxu0 %v1446_v23  ;;  %758 = vmatmul.mubr.bf16.gmra.mrb[4].mxu1 %v1449_v24 }
  0x4f   : > { %661 = vmatprep.mubr.bf16.mxu0 %v1450_v25  ;;  %765 = vmatprep.mubr.bf16.mxu1 %v1453_v26 }
  0x56   : > { %662 = vmatmul.mubr.bf16.gmra.mrb[8].mxu0 %v1452_v27  ;;  %766 = vmatmul.mubr.bf16.gmra.mrb[8].mxu1 %v1455_v28 }
  0x57   : > { %669 = vmatprep.mubr.bf16.mxu0 %v1456_v29  ;;  %773 = vmatprep.mubr.bf16.mxu1 %v1459_v30 }
  0x5e   : > { %670 = vmatmul.mubr.bf16.gmra.mrb[12].mxu0 %v1458_v31  ;;  %774 = vmatmul.mubr.bf16.gmra.mrb[12].mxu1 %v1461_v32 }
  0x5f   : > { %677 = vmatprep.mubr.bf16.mxu0 %v1462_v33  ;;  %781 = vmatprep.mubr.bf16.mxu1 %v1465_v34 }
  0x66   : > { %678 = vmatmul.mubr.bf16.gmra.mrb[16].mxu0 %v1464_v35  ;;  %782 = vmatmul.mubr.bf16.gmra.mrb[16].mxu1 %v1467_v36 }
  0x67   : > { %685 = vmatprep.mubr.bf16.mxu0 %v1468_v37  ;;  %789 = vmatprep.mubr.bf16.mxu1 %v1471_v38 }
  0x6e   : > { %686 = vmatmul.mubr.bf16.gmra.mrb[20].mxu0 %v1470_v39  ;;  %790 = vmatmul.mubr.bf16.gmra.mrb[20].mxu1 %v1473_v40 }
  0x6f   : > { %693 = vmatprep.mubr.bf16.mxu0 %v1474_v41  ;;  %797 = vmatprep.mubr.bf16.mxu1 %v1477_v42 }
  0x76   : > { %694 = vmatmul.mubr.bf16.gmra.mrb[24].mxu0 %v1476_v43  ;;  %798 = vmatmul.mubr.bf16.gmra.mrb[24].mxu1 %v1479_v44 }
  0x77   : > { %701 = vmatprep.mubr.bf16.mxu0 %v1480_v45  ;;  %805 = vmatprep.mubr.bf16.mxu1 %v1483_v46 }
  0x7e   : > { %702 = vmatmul.mubr.bf16.gmra.mrb[28].mxu0 %v1482_v47  ;;  %806 = vmatmul.mubr.bf16.gmra.mrb[28].mxu1 %v1485_v48 }
  0x7f   : > { %709 = vmatprep.mubr.bf16.mxu0 %v1486_v49  ;;  %813 = vmatprep.mubr.bf16.mxu1 %v1489_v50 }
  0x86   : > { %710 = vmatmul.mubr.bf16.gmra.mrb[32].mxu0 %v1488_v51  ;;  %814 = vmatmul.mubr.bf16.gmra.mrb[32].mxu1 %v1491_v52 }
  0x87   : > { %717 = vmatprep.mubr.bf16.mxu0 %v1492_v53  ;;  %821 = vmatprep.mubr.bf16.mxu1 %v1495_v54 }
  0x8e   : > { %718 = vmatmul.mubr.bf16.gmra.mrb[36].mxu0 %v1494_v55  ;;  %822 = vmatmul.mubr.bf16.gmra.mrb[36].mxu1 %v1497_v56 }
  0x8f   : > { %725 = vmatprep.mubr.bf16.mxu0 %v1498_v57  ;;  %829 = vmatprep.mubr.bf16.mxu1 %v1501_v58 }
  0x96   : > { %726 = vmatmul.mubr.bf16.gmra.mrb[40].mxu0 %v1500_v59  ;;  %830 = vmatmul.mubr.bf16.gmra.mrb[40].mxu1 %v1503_v60 }
  0x97   : > { %733 = vmatprep.mubr.bf16.mxu0 %v1504_v61  ;;  %837 = vmatprep.mubr.bf16.mxu1 %v1507_v62 }
  0x9e   : > { %734 = vmatmul.mubr.bf16.gmra.mrb[44].mxu0 %v1506_v63  ;;  %838 = vmatmul.mubr.bf16.gmra.mrb[44].mxu1 %v1509_v0 }
  0x9f   : > { %741 = vmatprep.mubr.bf16.mxu0 %v1510_v1 }
  0xa6   : > { %742 = vmatmul.mubr.bf16.gmra.mrb[48].mxu0 %v1512_v2 }
 0x119   : > { %v647_v4 = vpop.f32.mrb[0].mxu0  ;;  %v751_v5 = vpop.f32.mrb[0].mxu1 }
 0x11a   : > { %v648_v6 = vadd.f32 %v1691_v3, %v647_v4  ;;  %v649_v7 = vpop.f32.mrb[1].mxu0  ;;  %v752_v8 = vadd.f32 %v1691_v3, %v751_v5  ;;  %v753_v9 = vpop.f32.mrb[1].mxu1 }
 0x11b   : > { %v650_v10 = vpop.f32.mrb[2].mxu0  ;;  %v754_v11 = vpop.f32.mrb[2].mxu1 }
 0x11c   : > { %v846_v12 = vmax.f32 %v648_v6, 0.0  ;;  %v651_v13 = vadd.f32 %v1691_v3, %v650_v10  ;;  %v652_v14 = vpop.f32.mrb[3].mxu0  ;;  %v872_v15 = vmax.f32 %v752_v8, 0.0  ;;  %v755_v16 = vadd.f32 %v1691_v3, %v754_v11  ;;  %v756_v17 = vpop.f32.mrb[3].mxu1 }
 0x11e   : > { %v1331_v18 = vpack.c.bf16 %v846_v12, %v846_v12  ;;  %v847_v19 = vmax.f32 %v651_v13, 0.0  ;;  %v1357_v20 = vpack.c.bf16 %v872_v15, %v872_v15  ;;  %v873_v21 = vmax.f32 %v755_v16, 0.0 }
 0x120   : > { %1097 = vst.msk [vmem:[%s1701_s16] sm:$0xf] %vm1096_vm0, %v1331_v18  ;;  %v1332_v22 = vpack.c.bf16 %v847_v19, %v847_v19  ;;  %1123 = vst.msk [vmem:[%s1701_s16 + $0x68] sm:$0xf] %vm1096_vm0, %v1357_v20  ;;  %v1358_v23 = vpack.c.bf16 %v873_v21, %v873_v21 }
 0x121   : > { %v655_v24 = vpop.f32.mrb[4].mxu0  ;;  %v759_v25 = vpop.f32.mrb[4].mxu1 }
 0x122   : > { %1098 = vst.msk [vmem:[%s1701_s16 + $0x4] sm:$0xf] %vm1096_vm0, %v1332_v22  ;;  %1124 = vst.msk [vmem:[%s1701_s16 + $0x6c] sm:$0xf] %vm1096_vm0, %v1358_v23  ;;  %v656_v26 = vadd.f32 %v1691_v3, %v655_v24  ;;  %v657_v27 = vpop.f32.mrb[5].mxu0  ;;  %v760_v28 = vadd.f32 %v1691_v3, %v759_v25  ;;  %v761_v29 = vpop.f32.mrb[5].mxu1 }
 0x123   : > { %v658_v30 = vpop.f32.mrb[6].mxu0  ;;  %v762_v31 = vpop.f32.mrb[6].mxu1 }
 0x124   : > { %v848_v32 = vmax.f32 %v656_v26, 0.0  ;;  %v659_v33 = vadd.f32 %v1691_v3, %v658_v30  ;;  %v660_v34 = vpop.f32.mrb[7].mxu0  ;;  %v874_v35 = vmax.f32 %v760_v28, 0.0  ;;  %v763_v36 = vadd.f32 %v1691_v3, %v762_v31  ;;  %v764_v37 = vpop.f32.mrb[7].mxu1 }
 0x126   : > { %v1333_v38 = vpack.c.bf16 %v848_v32, %v848_v32  ;;  %v849_v39 = vmax.f32 %v659_v33, 0.0  ;;  %v1359_v40 = vpack.c.bf16 %v874_v35, %v874_v35  ;;  %v875_v41 = vmax.f32 %v763_v36, 0.0 }
 0x128   : > { %1099 = vst.msk [vmem:[%s1701_s16 + $0x8] sm:$0xf] %vm1096_vm0, %v1333_v38  ;;  %v1334_v42 = vpack.c.bf16 %v849_v39, %v849_v39  ;;  %1125 = vst.msk [vmem:[%s1701_s16 + $0x70] sm:$0xf] %vm1096_vm0, %v1359_v40  ;;  %v1360_v43 = vpack.c.bf16 %v875_v41, %v875_v41 }
 0x129   : > { %v663_v44 = vpop.f32.mrb[8].mxu0  ;;  %v767_v45 = vpop.f32.mrb[8].mxu1 }
 0x12a   : > { %1100 = vst.msk [vmem:[%s1701_s16 + $0xc] sm:$0xf] %vm1096_vm0, %v1334_v42  ;;  %1126 = vst.msk [vmem:[%s1701_s16 + $0x74] sm:$0xf] %vm1096_vm0, %v1360_v43  ;;  %v664_v46 = vadd.f32 %v1691_v3, %v663_v44  ;;  %v665_v47 = vpop.f32.mrb[9].mxu0  ;;  %v768_v48 = vadd.f32 %v1691_v3, %v767_v45  ;;  %v769_v49 = vpop.f32.mrb[9].mxu1 }
 0x12b   : > { %v666_v50 = vpop.f32.mrb[10].mxu0  ;;  %v770_v51 = vpop.f32.mrb[10].mxu1 }
 0x12c   : > { %v850_v52 = vmax.f32 %v664_v46, 0.0  ;;  %v667_v53 = vadd.f32 %v1691_v3, %v666_v50  ;;  %v668_v54 = vpop.f32.mrb[11].mxu0  ;;  %v876_v55 = vmax.f32 %v768_v48, 0.0  ;;  %v771_v56 = vadd.f32 %v1691_v3, %v770_v51  ;;  %v772_v57 = vpop.f32.mrb[11].mxu1 }
 0x12e   : > { %v1335_v58 = vpack.c.bf16 %v850_v52, %v850_v52  ;;  %v851_v59 = vmax.f32 %v667_v53, 0.0  ;;  %v1361_v60 = vpack.c.bf16 %v876_v55, %v876_v55  ;;  %v877_v61 = vmax.f32 %v771_v56, 0.0 }
 0x130   : > { %1101 = vst.msk [vmem:[%s1701_s16 + $0x10] sm:$0xf] %vm1096_vm0, %v1335_v58  ;;  %v1336_v62 = vpack.c.bf16 %v851_v59, %v851_v59  ;;  %1127 = vst.msk [vmem:[%s1701_s16 + $0x78] sm:$0xf] %vm1096_vm0, %v1361_v60  ;;  %v1362_v63 = vpack.c.bf16 %v877_v61, %v877_v61 }
 0x131   : > { %v671_v0 = vpop.f32.mrb[12].mxu0  ;;  %v775_v1 = vpop.f32.mrb[12].mxu1 }
 0x132   : > { %1102 = vst.msk [vmem:[%s1701_s16 + $0x14] sm:$0xf] %vm1096_vm0, %v1336_v62  ;;  %1128 = vst.msk [vmem:[%s1701_s16 + $0x7c] sm:$0xf] %vm1096_vm0, %v1362_v63  ;;  %v672_v2 = vadd.f32 %v1691_v3, %v671_v0  ;;  %v673_v4 = vpop.f32.mrb[13].mxu0  ;;  %v776_v5 = vadd.f32 %v1691_v3, %v775_v1  ;;  %v777_v6 = vpop.f32.mrb[13].mxu1 }
 0x133   : > { %v674_v7 = vpop.f32.mrb[14].mxu0  ;;  %v778_v8 = vpop.f32.mrb[14].mxu1 }
 0x134   : > { %v852_v9 = vmax.f32 %v672_v2, 0.0  ;;  %v675_v10 = vadd.f32 %v1691_v3, %v674_v7  ;;  %v676_v11 = vpop.f32.mrb[15].mxu0  ;;  %v878_v12 = vmax.f32 %v776_v5, 0.0  ;;  %v779_v13 = vadd.f32 %v1691_v3, %v778_v8  ;;  %v780_v14 = vpop.f32.mrb[15].mxu1 }
 0x136   : > { %v1337_v15 = vpack.c.bf16 %v852_v9, %v852_v9  ;;  %v853_v16 = vmax.f32 %v675_v10, 0.0  ;;  %v1363_v17 = vpack.c.bf16 %v878_v12, %v878_v12  ;;  %v879_v18 = vmax.f32 %v779_v13, 0.0 }
 0x138   : > { %1103 = vst.msk [vmem:[%s1701_s16 + $0x18] sm:$0xf] %vm1096_vm0, %v1337_v15  ;;  %v1338_v19 = vpack.c.bf16 %v853_v16, %v853_v16  ;;  %1129 = vst.msk [vmem:[%s1701_s16 + $0x80] sm:$0xf] %vm1096_vm0, %v1363_v17  ;;  %v1364_v20 = vpack.c.bf16 %v879_v18, %v879_v18 }
 0x139   : > { %v679_v21 = vpop.f32.mrb[16].mxu0  ;;  %v783_v22 = vpop.f32.mrb[16].mxu1 }
 0x13a   : > { %1104 = vst.msk [vmem:[%s1701_s16 + $0x1c] sm:$0xf] %vm1096_vm0, %v1338_v19  ;;  %1130 = vst.msk [vmem:[%s1701_s16 + $0x84] sm:$0xf] %vm1096_vm0, %v1364_v20  ;;  %v680_v23 = vadd.f32 %v1691_v3, %v679_v21  ;;  %v681_v24 = vpop.f32.mrb[17].mxu0  ;;  %v784_v25 = vadd.f32 %v1691_v3, %v783_v22  ;;  %v785_v26 = vpop.f32.mrb[17].mxu1 }
 0x13b   : > { %v682_v27 = vpop.f32.mrb[18].mxu0  ;;  %v786_v28 = vpop.f32.mrb[18].mxu1 }
 0x13c   : > { %v854_v29 = vmax.f32 %v680_v23, 0.0  ;;  %v683_v30 = vadd.f32 %v1691_v3, %v682_v27  ;;  %v684_v31 = vpop.f32.mrb[19].mxu0  ;;  %v880_v32 = vmax.f32 %v784_v25, 0.0  ;;  %v787_v33 = vadd.f32 %v1691_v3, %v786_v28  ;;  %v788_v34 = vpop.f32.mrb[19].mxu1 }
 0x13e   : > { %v1339_v35 = vpack.c.bf16 %v854_v29, %v854_v29  ;;  %v855_v36 = vmax.f32 %v683_v30, 0.0  ;;  %v1365_v37 = vpack.c.bf16 %v880_v32, %v880_v32  ;;  %v881_v38 = vmax.f32 %v787_v33, 0.0 }
 0x140   : > { %1105 = vst.msk [vmem:[%s1701_s16 + $0x20] sm:$0xf] %vm1096_vm0, %v1339_v35  ;;  %v1340_v39 = vpack.c.bf16 %v855_v36, %v855_v36  ;;  %1131 = vst.msk [vmem:[%s1701_s16 + $0x88] sm:$0xf] %vm1096_vm0, %v1365_v37  ;;  %v1366_v40 = vpack.c.bf16 %v881_v38, %v881_v38 }
 0x141   : > { %v687_v41 = vpop.f32.mrb[20].mxu0  ;;  %v791_v42 = vpop.f32.mrb[20].mxu1 }
 0x142   : > { %1106 = vst.msk [vmem:[%s1701_s16 + $0x24] sm:$0xf] %vm1096_vm0, %v1340_v39  ;;  %1132 = vst.msk [vmem:[%s1701_s16 + $0x8c] sm:$0xf] %vm1096_vm0, %v1366_v40  ;;  %v688_v43 = vadd.f32 %v1691_v3, %v687_v41  ;;  %v689_v44 = vpop.f32.mrb[21].mxu0  ;;  %v792_v45 = vadd.f32 %v1691_v3, %v791_v42  ;;  %v793_v46 = vpop.f32.mrb[21].mxu1 }
 0x143   : > { %v690_v47 = vpop.f32.mrb[22].mxu0  ;;  %v794_v48 = vpop.f32.mrb[22].mxu1 }
 0x144   : > { %v856_v49 = vmax.f32 %v688_v43, 0.0  ;;  %v691_v50 = vadd.f32 %v1691_v3, %v690_v47  ;;  %v692_v51 = vpop.f32.mrb[23].mxu0  ;;  %v882_v52 = vmax.f32 %v792_v45, 0.0  ;;  %v795_v53 = vadd.f32 %v1691_v3, %v794_v48  ;;  %v796_v54 = vpop.f32.mrb[23].mxu1 }
 0x146   : > { %v1341_v55 = vpack.c.bf16 %v856_v49, %v856_v49  ;;  %v857_v56 = vmax.f32 %v691_v50, 0.0  ;;  %v1367_v57 = vpack.c.bf16 %v882_v52, %v882_v52  ;;  %v883_v58 = vmax.f32 %v795_v53, 0.0 }
 0x148   : > { %1107 = vst.msk [vmem:[%s1701_s16 + $0x28] sm:$0xf] %vm1096_vm0, %v1341_v55  ;;  %v1342_v59 = vpack.c.bf16 %v857_v56, %v857_v56  ;;  %1133 = vst.msk [vmem:[%s1701_s16 + $0x90] sm:$0xf] %vm1096_vm0, %v1367_v57  ;;  %v1368_v60 = vpack.c.bf16 %v883_v58, %v883_v58 }
 0x149   : > { %v695_v61 = vpop.f32.mrb[24].mxu0  ;;  %v799_v62 = vpop.f32.mrb[24].mxu1 }
 0x14a   : > { %1108 = vst.msk [vmem:[%s1701_s16 + $0x2c] sm:$0xf] %vm1096_vm0, %v1342_v59  ;;  %1134 = vst.msk [vmem:[%s1701_s16 + $0x94] sm:$0xf] %vm1096_vm0, %v1368_v60  ;;  %v696_v63 = vadd.f32 %v1691_v3, %v695_v61  ;;  %v697_v0 = vpop.f32.mrb[25].mxu0  ;;  %v800_v1 = vadd.f32 %v1691_v3, %v799_v62  ;;  %v801_v2 = vpop.f32.mrb[25].mxu1 }
 0x14b   : > { %v698_v4 = vpop.f32.mrb[26].mxu0  ;;  %v802_v5 = vpop.f32.mrb[26].mxu1 }
 0x14c   : > { %v858_v6 = vmax.f32 %v696_v63, 0.0  ;;  %v699_v7 = vadd.f32 %v1691_v3, %v698_v4  ;;  %v700_v8 = vpop.f32.mrb[27].mxu0  ;;  %v884_v9 = vmax.f32 %v800_v1, 0.0  ;;  %v803_v10 = vadd.f32 %v1691_v3, %v802_v5  ;;  %v804_v11 = vpop.f32.mrb[27].mxu1 }
 0x14e   : > { %v1343_v12 = vpack.c.bf16 %v858_v6, %v858_v6  ;;  %v859_v13 = vmax.f32 %v699_v7, 0.0  ;;  %v1369_v14 = vpack.c.bf16 %v884_v9, %v884_v9  ;;  %v885_v15 = vmax.f32 %v803_v10, 0.0 }
 0x150   : > { %1109 = vst.msk [vmem:[%s1701_s16 + $0x30] sm:$0xf] %vm1096_vm0, %v1343_v12  ;;  %v1344_v16 = vpack.c.bf16 %v859_v13, %v859_v13  ;;  %1135 = vst.msk [vmem:[%s1701_s16 + $0x98] sm:$0xf] %vm1096_vm0, %v1369_v14  ;;  %v1370_v17 = vpack.c.bf16 %v885_v15, %v885_v15 }
 0x151   : > { %v703_v18 = vpop.f32.mrb[28].mxu0  ;;  %v807_v19 = vpop.f32.mrb[28].mxu1 }
 0x152   : > { %1110 = vst.msk [vmem:[%s1701_s16 + $0x34] sm:$0xf] %vm1096_vm0, %v1344_v16  ;;  %1136 = vst.msk [vmem:[%s1701_s16 + $0x9c] sm:$0xf] %vm1096_vm0, %v1370_v17  ;;  %v704_v20 = vadd.f32 %v1691_v3, %v703_v18  ;;  %v705_v21 = vpop.f32.mrb[29].mxu0  ;;  %v808_v22 = vadd.f32 %v1691_v3, %v807_v19  ;;  %v809_v23 = vpop.f32.mrb[29].mxu1 }
 0x153   : > { %v706_v24 = vpop.f32.mrb[30].mxu0  ;;  %v810_v25 = vpop.f32.mrb[30].mxu1 }
 0x154   : > { %v860_v26 = vmax.f32 %v704_v20, 0.0  ;;  %v707_v27 = vadd.f32 %v1691_v3, %v706_v24  ;;  %v708_v28 = vpop.f32.mrb[31].mxu0  ;;  %v886_v29 = vmax.f32 %v808_v22, 0.0  ;;  %v811_v30 = vadd.f32 %v1691_v3, %v810_v25  ;;  %v812_v31 = vpop.f32.mrb[31].mxu1 }
 0x156   : > { %v1345_v32 = vpack.c.bf16 %v860_v26, %v860_v26  ;;  %v861_v33 = vmax.f32 %v707_v27, 0.0  ;;  %v1371_v34 = vpack.c.bf16 %v886_v29, %v886_v29  ;;  %v887_v35 = vmax.f32 %v811_v30, 0.0 }
 0x158   : > { %1111 = vst.msk [vmem:[%s1701_s16 + $0x38] sm:$0xf] %vm1096_vm0, %v1345_v32  ;;  %v1346_v36 = vpack.c.bf16 %v861_v33, %v861_v33  ;;  %1137 = vst.msk [vmem:[%s1701_s16 + $0xa0] sm:$0xf] %vm1096_vm0, %v1371_v34  ;;  %v1372_v37 = vpack.c.bf16 %v887_v35, %v887_v35 }
 0x159   : > { %v711_v38 = vpop.f32.mrb[32].mxu0  ;;  %v815_v39 = vpop.f32.mrb[32].mxu1 }
 0x15a   : > { %1112 = vst.msk [vmem:[%s1701_s16 + $0x3c] sm:$0xf] %vm1096_vm0, %v1346_v36  ;;  %1138 = vst.msk [vmem:[%s1701_s16 + $0xa4] sm:$0xf] %vm1096_vm0, %v1372_v37  ;;  %v712_v40 = vadd.f32 %v1691_v3, %v711_v38  ;;  %v713_v41 = vpop.f32.mrb[33].mxu0  ;;  %v816_v42 = vadd.f32 %v1691_v3, %v815_v39  ;;  %v817_v43 = vpop.f32.mrb[33].mxu1 }
 0x15b   : > { %v714_v44 = vpop.f32.mrb[34].mxu0  ;;  %v818_v45 = vpop.f32.mrb[34].mxu1 }
 0x15c   : > { %v862_v46 = vmax.f32 %v712_v40, 0.0  ;;  %v715_v47 = vadd.f32 %v1691_v3, %v714_v44  ;;  %v716_v48 = vpop.f32.mrb[35].mxu0  ;;  %v888_v49 = vmax.f32 %v816_v42, 0.0  ;;  %v819_v50 = vadd.f32 %v1691_v3, %v818_v45  ;;  %v820_v51 = vpop.f32.mrb[35].mxu1 }
 0x15e   : > { %v1347_v52 = vpack.c.bf16 %v862_v46, %v862_v46  ;;  %v863_v53 = vmax.f32 %v715_v47, 0.0  ;;  %v1373_v54 = vpack.c.bf16 %v888_v49, %v888_v49  ;;  %v889_v55 = vmax.f32 %v819_v50, 0.0 }
 0x160   : > { %1113 = vst.msk [vmem:[%s1701_s16 + $0x40] sm:$0xf] %vm1096_vm0, %v1347_v52  ;;  %v1348_v56 = vpack.c.bf16 %v863_v53, %v863_v53  ;;  %1139 = vst.msk [vmem:[%s1701_s16 + $0xa8] sm:$0xf] %vm1096_vm0, %v1373_v54  ;;  %v1374_v57 = vpack.c.bf16 %v889_v55, %v889_v55 }
 0x161   : > { %v719_v58 = vpop.f32.mrb[36].mxu0  ;;  %v823_v59 = vpop.f32.mrb[36].mxu1 }
 0x162   : > { %1114 = vst.msk [vmem:[%s1701_s16 + $0x44] sm:$0xf] %vm1096_vm0, %v1348_v56  ;;  %1140 = vst.msk [vmem:[%s1701_s16 + $0xac] sm:$0xf] %vm1096_vm0, %v1374_v57  ;;  %v720_v60 = vadd.f32 %v1691_v3, %v719_v58  ;;  %v721_v61 = vpop.f32.mrb[37].mxu0  ;;  %v824_v62 = vadd.f32 %v1691_v3, %v823_v59  ;;  %v825_v63 = vpop.f32.mrb[37].mxu1 }
 0x163   : > { %v722_v0 = vpop.f32.mrb[38].mxu0  ;;  %v826_v1 = vpop.f32.mrb[38].mxu1 }
 0x164   : > { %v864_v2 = vmax.f32 %v720_v60, 0.0  ;;  %v723_v4 = vadd.f32 %v1691_v3, %v722_v0  ;;  %v724_v5 = vpop.f32.mrb[39].mxu0  ;;  %v890_v6 = vmax.f32 %v824_v62, 0.0  ;;  %v827_v7 = vadd.f32 %v1691_v3, %v826_v1  ;;  %v828_v8 = vpop.f32.mrb[39].mxu1 }
 0x166   : > { %v1349_v9 = vpack.c.bf16 %v864_v2, %v864_v2  ;;  %v865_v10 = vmax.f32 %v723_v4, 0.0  ;;  %v1375_v11 = vpack.c.bf16 %v890_v6, %v890_v6  ;;  %v891_v12 = vmax.f32 %v827_v7, 0.0 }
 0x168   : > { %1115 = vst.msk [vmem:[%s1701_s16 + $0x48] sm:$0xf] %vm1096_vm0, %v1349_v9  ;;  %v1350_v13 = vpack.c.bf16 %v865_v10, %v865_v10  ;;  %1141 = vst.msk [vmem:[%s1701_s16 + $0xb0] sm:$0xf] %vm1096_vm0, %v1375_v11  ;;  %v1376_v14 = vpack.c.bf16 %v891_v12, %v891_v12 }
 0x169   : > { %v727_v15 = vpop.f32.mrb[40].mxu0  ;;  %v831_v16 = vpop.f32.mrb[40].mxu1 }
 0x16a   : > { %1116 = vst.msk [vmem:[%s1701_s16 + $0x4c] sm:$0xf] %vm1096_vm0, %v1350_v13  ;;  %1142 = vst.msk [vmem:[%s1701_s16 + $0xb4] sm:$0xf] %vm1096_vm0, %v1376_v14  ;;  %v728_v17 = vadd.f32 %v1691_v3, %v727_v15  ;;  %v729_v18 = vpop.f32.mrb[41].mxu0  ;;  %v832_v19 = vadd.f32 %v1691_v3, %v831_v16  ;;  %v833_v20 = vpop.f32.mrb[41].mxu1 }
 0x16b   : > { %v730_v21 = vpop.f32.mrb[42].mxu0  ;;  %v834_v22 = vpop.f32.mrb[42].mxu1 }
 0x16c   : > { %v866_v23 = vmax.f32 %v728_v17, 0.0  ;;  %v731_v24 = vadd.f32 %v1691_v3, %v730_v21  ;;  %v732_v25 = vpop.f32.mrb[43].mxu0  ;;  %v892_v26 = vmax.f32 %v832_v19, 0.0  ;;  %v835_v27 = vadd.f32 %v1691_v3, %v834_v22  ;;  %v836_v28 = vpop.f32.mrb[43].mxu1 }
 0x16e   : > { %v1351_v29 = vpack.c.bf16 %v866_v23, %v866_v23  ;;  %v867_v30 = vmax.f32 %v731_v24, 0.0  ;;  %v1377_v31 = vpack.c.bf16 %v892_v26, %v892_v26  ;;  %v893_v32 = vmax.f32 %v835_v27, 0.0 }
 0x170   : > { %1117 = vst.msk [vmem:[%s1701_s16 + $0x50] sm:$0xf] %vm1096_vm0, %v1351_v29  ;;  %v1352_v33 = vpack.c.bf16 %v867_v30, %v867_v30  ;;  %1143 = vst.msk [vmem:[%s1701_s16 + $0xb8] sm:$0xf] %vm1096_vm0, %v1377_v31  ;;  %v1378_v34 = vpack.c.bf16 %v893_v32, %v893_v32 }
 0x171   : > { %v735_v35 = vpop.f32.mrb[44].mxu0  ;;  %v839_v36 = vpop.f32.mrb[44].mxu1 }
 0x172   : > { %1118 = vst.msk [vmem:[%s1701_s16 + $0x54] sm:$0xf] %vm1096_vm0, %v1352_v33  ;;  %1144 = vst.msk [vmem:[%s1701_s16 + $0xbc] sm:$0xf] %vm1096_vm0, %v1378_v34  ;;  %v736_v37 = vadd.f32 %v1691_v3, %v735_v35  ;;  %v737_v38 = vpop.f32.mrb[45].mxu0  ;;  %v840_v39 = vadd.f32 %v1691_v3, %v839_v36  ;;  %v841_v40 = vpop.f32.mrb[45].mxu1 }
 0x173   : > { %v738_v41 = vpop.f32.mrb[46].mxu0  ;;  %v842_v42 = vpop.f32.mrb[46].mxu1 }
 0x174   : > { %v868_v43 = vmax.f32 %v736_v37, 0.0  ;;  %v739_v44 = vadd.f32 %v1691_v3, %v738_v41  ;;  %v740_v45 = vpop.f32.mrb[47].mxu0  ;;  %v894_v46 = vmax.f32 %v840_v39, 0.0  ;;  %v843_v47 = vadd.f32 %v1691_v3, %v842_v42  ;;  %v844_v48 = vpop.f32.mrb[47].mxu1 }
 0x176   : > { %v1353_v49 = vpack.c.bf16 %v868_v43, %v868_v43  ;;  %v869_v50 = vmax.f32 %v739_v44, 0.0  ;;  %v1379_v51 = vpack.c.bf16 %v894_v46, %v894_v46  ;;  %v895_v52 = vmax.f32 %v843_v47, 0.0 }
 0x178   : > { %1119 = vst.msk [vmem:[%s1701_s16 + $0x58] sm:$0xf] %vm1096_vm0, %v1353_v49  ;;  %v1354_v53 = vpack.c.bf16 %v869_v50, %v869_v50  ;;  %1145 = vst.msk [vmem:[%s1701_s16 + $0xc0] sm:$0xf] %vm1096_vm0, %v1379_v51  ;;  %v1380_v54 = vpack.c.bf16 %v895_v52, %v895_v52 }
 0x179   : > { %v743_v55 = vpop.f32.mrb[48].mxu0 }
 0x17a   : > { %1120 = vst.msk [vmem:[%s1701_s16 + $0x5c] sm:$0xf] %vm1096_vm0, %v1354_v53  ;;  %1146 = vst.msk [vmem:[%s1701_s16 + $0xc4] sm:$0xf] %vm1096_vm0, %v1380_v54  ;;  %v744_v56 = vadd.f32 %v1691_v3, %v743_v55  ;;  %v745_v57 = vpop.f32.mrb[49].mxu0 }
 0x17b   : > { %v746_v58 = vpop.f32.mrb[50].mxu0 }
 0x17c   : > { %v870_v59 = vmax.f32 %v744_v56, 0.0  ;;  %v747_v60 = vadd.f32 %v1691_v3, %v746_v58  ;;  %v748_v61 = vpop.f32.mrb[51].mxu0 }
 0x17e   : > { %v1355_v62 = vpack.c.bf16 %v870_v59, %v870_v59  ;;  %v871_v63 = vmax.f32 %v747_v60, 0.0 }
 0x180   : > { %1121 = vst.msk [vmem:[%s1701_s16 + $0x60] sm:$0xf] %vm1096_vm0, %v1355_v62  ;;  %v1356_v0 = vpack.c.bf16 %v871_v63, %v871_v63 }
 0x182   : > { %1122 = vst.msk [vmem:[%s1701_s16 + $0x64] sm:$0xf] %vm1096_vm0, %v1356_v0 }
 0x183 PF: > { %s13_s12 = sadd.s32 1, %s1519_s12  }
 0x184   : > { %p10_p4 = scmp.ge.s32.totalorder %s13_s12, 4  }
 0x186   :  { %12 = sbr.rel (!%p10_p4) target bundleno = 1 (0x1), region = 62 }

// kernel: cnn_forward.5
= control target key start
LH: loop header
LB: loop body
LE: loop exit
PB: predicated region body
PF: predicated region fallthrough
CT: control target
= control target key end

     0   :  { %vm880_vm0 = vcmask 519168   ;;  %vm901_vm1 = vcmask 516096   ;;  %s1637_s1 = inlined_call_operand.vmem [shape: bf16[512,64], index: 1, kind: input, shape index: {}]   ;;  %s1638_s0 = inlined_call_operand.vmem [shape: bf16[162,512], index: 0, kind: input, shape index: {}]   ;;  %s1639_s2 = inlined_call_operand.vmem [shape: f32[1,64], index: 2, kind: input, shape index: {}]   ;;  %s1640_s3 = inlined_call_operand.vmem [shape: bf16[162,64], index: 3, kind: output, shape index: {}]  }
   0x1   :  { %v1190_v0 = vld [vmem:[%s1637_s1 + $0x40] sm:$0xff]   ;;  %v1194_v4 = vld [vmem:[%s1637_s1 + $0x48] sm:$0xff]   ;;  %v1198_v8 = vld [vmem:[%s1637_s1 + $0x50] sm:$0xff]  }
   0x2   :  { %v1191_v1 = vld [vmem:[%s1637_s1 + $0xc0] sm:$0xff]   ;;  %1026 = vmatprep.subr.bf16.mxu0 %v1190_v0  ;;  %v1195_v5 = vld [vmem:[%s1637_s1 + $0xc8] sm:$0xff]   ;;  %v1199_v9 = vld [vmem:[%s1637_s1 + $0xd0] sm:$0xff]  }
   0x3   :  { %v1192_v2 = vld [vmem:[%s1637_s1] sm:$0xff]   ;;  %1108 = vmatprep.subr.bf16.mxu1 %v1191_v1  ;;  %v1196_v6 = vld [vmem:[%s1637_s1 + $0x8] sm:$0xff]   ;;  %v1200_v10 = vld [vmem:[%s1637_s1 + $0x10] sm:$0xff]  }
   0x4   :  { %v1193_v3 = vld [vmem:[%s1637_s1 + $0x80] sm:$0xff]   ;;  %1027 = vmatpush3.bf16.msra.mxu0 %v1192_v2  ;;  %v1197_v7 = vld [vmem:[%s1637_s1 + $0x88] sm:$0xff]   ;;  %v1201_v11 = vld [vmem:[%s1637_s1 + $0x90] sm:$0xff]  }
   0x5   :  { %1109 = vmatpush3.bf16.msra.mxu1 %v1193_v3  ;;  %1028 = vmatprep.subr.bf16.mxu0 %v1194_v4  ;;  %v1202_v12 = vld [vmem:[%s1637_s1 + $0x58] sm:$0xff]   ;;  %v1206_v16 = vld [vmem:[%s1637_s1 + $0x60] sm:$0xff]   ;;  %v1210_v20 = vld [vmem:[%s1637_s1 + $0x68] sm:$0xff]  }
   0x6   :  { %1110 = vmatprep.subr.bf16.mxu1 %v1195_v5  ;;  %v1203_v13 = vld [vmem:[%s1637_s1 + $0xd8] sm:$0xff]   ;;  %v1207_v17 = vld [vmem:[%s1637_s1 + $0xe0] sm:$0xff]   ;;  %v1211_v21 = vld [vmem:[%s1637_s1 + $0xe8] sm:$0xff]  }
   0x7   :  { %v1204_v14 = vld [vmem:[%s1637_s1 + $0x18] sm:$0xff]   ;;  %v1208_v18 = vld [vmem:[%s1637_s1 + $0x20] sm:$0xff]   ;;  %v1212_v22 = vld [vmem:[%s1637_s1 + $0x28] sm:$0xff]  }
   0x8   :  { %1029 = vmatpush3.bf16.msra.mxu0 %v1196_v6  ;;  %v1205_v15 = vld [vmem:[%s1637_s1 + $0x98] sm:$0xff]   ;;  %v1209_v19 = vld [vmem:[%s1637_s1 + $0xa0] sm:$0xff]   ;;  %v1213_v23 = vld [vmem:[%s1637_s1 + $0xa8] sm:$0xff]  }
   0x9   :  { %1111 = vmatpush3.bf16.msra.mxu1 %v1197_v7  ;;  %1030 = vmatprep.subr.bf16.mxu0 %v1198_v8  ;;  %v1214_v24 = vld [vmem:[%s1637_s1 + $0x70] sm:$0xff]   ;;  %v1218_v28 = vld [vmem:[%s1637_s1 + $0x78] sm:$0xff]   ;;  %v55_v6 = vld [vmem:[%s1638_s0 + $0x140] sm:$0x11] }
   0xa   :  { %1112 = vmatprep.subr.bf16.mxu1 %v1199_v9  ;;  %v1215_v25 = vld [vmem:[%s1637_s1 + $0xf0] sm:$0xff]   ;;  %v1219_v29 = vld [vmem:[%s1637_s1 + $0xf8] sm:$0xff]   ;;  %v56_v7 = vld [vmem:[%s1638_s0 + $0x148] sm:$0x11] }
   0xb   :  { %v1216_v26 = vld [vmem:[%s1637_s1 + $0x30] sm:$0xff]   ;;  %v1220_v30 = vld [vmem:[%s1637_s1 + $0x38] sm:$0xff]  }
   0xc   :  { %1031 = vmatpush3.bf16.msra.mxu0 %v1200_v10  ;;  %v1217_v27 = vld [vmem:[%s1637_s1 + $0xb0] sm:$0xff]   ;;  %v1221_v31 = vld [vmem:[%s1637_s1 + $0xb8] sm:$0xff]   ;;  %v949_v10 = vcombine.high %v55_v6, %v55_v6 }
   0xd   :  { %1113 = vmatpush3.bf16.msra.mxu1 %v1201_v11  ;;  %1032 = vmatprep.subr.bf16.mxu0 %v1202_v12  ;;  %v1222_v32 = vld [vmem:[%s1638_s0] ss:$16 sps:$4 sm:$0xff]   ;;  %v1224_v33 = vld [vmem:[%s1638_s0 + $0x4] ss:$16 sps:$4 sm:$0xff]   ;;  %v1225_v34 = vld [vmem:[%s1638_s0 + $0x8] ss:$16 sps:$4 sm:$0xff]   ;;  %v951_v11 = vcombine.high %v56_v7, %v56_v7  ;;  %v948_v12 = vcombine.low %v55_v6, %v55_v6 }
   0xe   :  { %1114 = vmatprep.subr.bf16.mxu1 %v1203_v13  ;;  %v1227_v35 = vld [vmem:[%s1638_s0 + $0xc] ss:$16 sps:$4 sm:$0xff]   ;;  %566 = vmatprep.mubr.bf16.mxu0 %v1224_v33  ;;  %v1228_v36 = vld [vmem:[%s1638_s0 + $0x24] ss:$16 sps:$4 sm:$0xff]   ;;  %v1232_v38 = vld [vmem:[%s1638_s0 + $0x20] ss:$16 sps:$4 sm:$0xff]   ;;  %v950_v13 = vcombine.low %v56_v7, %v56_v7 }
   0xf   :  { %686 = vmatprep.mubr.bf16.mxu1 %v1227_v35  ;;  %v1230_v37 = vld [vmem:[%s1638_s0 + $0x2c] ss:$16 sps:$4 sm:$0xff]   ;;  %v1233_v39 = vld [vmem:[%s1638_s0 + $0x28] ss:$16 sps:$4 sm:$0xff]   ;;  %v1234_v40 = vld [vmem:[%s1638_s0 + $0x44] ss:$16 sps:$4 sm:$0xff]  }
  0x10   :  { %1033 = vmatpush3.bf16.msra.mxu0 %v1204_v14  ;;  %v1236_v41 = vld [vmem:[%s1638_s0 + $0x4c] ss:$16 sps:$4 sm:$0xff]   ;;  %v1238_v42 = vld [vmem:[%s1638_s0 + $0x40] ss:$16 sps:$4 sm:$0xff]   ;;  %v1239_v43 = vld [vmem:[%s1638_s0 + $0x48] ss:$16 sps:$4 sm:$0xff]  }
  0x11   :  { %1115 = vmatpush3.bf16.msra.mxu1 %v1205_v15  ;;  %1034 = vmatprep.subr.bf16.mxu0 %v1206_v16  ;;  %v1240_v44 = vld [vmem:[%s1638_s0 + $0x64] ss:$16 sps:$4 sm:$0xff]   ;;  %v1242_v45 = vld [vmem:[%s1638_s0 + $0x6c] ss:$16 sps:$4 sm:$0xff]   ;;  %v1244_v46 = vld [vmem:[%s1638_s0 + $0x60] ss:$16 sps:$4 sm:$0xff]  }
  0x12   :  { %1116 = vmatprep.subr.bf16.mxu1 %v1207_v17  ;;  %v1245_v47 = vld [vmem:[%s1638_s0 + $0x68] ss:$16 sps:$4 sm:$0xff]   ;;  %v1246_v48 = vld [vmem:[%s1638_s0 + $0x84] ss:$16 sps:$4 sm:$0xff]   ;;  %v1248_v49 = vld [vmem:[%s1638_s0 + $0x8c] ss:$16 sps:$4 sm:$0xff]  }
  0x13   :  { %v1250_v50 = vld [vmem:[%s1638_s0 + $0x80] ss:$16 sps:$4 sm:$0xff]   ;;  %v1251_v51 = vld [vmem:[%s1638_s0 + $0x88] ss:$16 sps:$4 sm:$0xff]   ;;  %v1252_v52 = vld [vmem:[%s1638_s0 + $0xa4] ss:$16 sps:$4 sm:$0xff]  }
  0x14   :  { %1035 = vmatpush3.bf16.msra.mxu0 %v1208_v18  ;;  %v1254_v53 = vld [vmem:[%s1638_s0 + $0xac] ss:$16 sps:$4 sm:$0xff]   ;;  %v1256_v54 = vld [vmem:[%s1638_s0 + $0xa0] ss:$16 sps:$4 sm:$0xff]   ;;  %v1257_v55 = vld [vmem:[%s1638_s0 + $0xa8] ss:$16 sps:$4 sm:$0xff]  }
  0x15   :  { %1117 = vmatpush3.bf16.msra.mxu1 %v1209_v19  ;;  %1036 = vmatprep.subr.bf16.mxu0 %v1210_v20  ;;  %v1258_v56 = vld [vmem:[%s1638_s0 + $0xc4] ss:$16 sps:$4 sm:$0xff]   ;;  %v1260_v57 = vld [vmem:[%s1638_s0 + $0xcc] ss:$16 sps:$4 sm:$0xff]   ;;  %v1262_v58 = vld [vmem:[%s1638_s0 + $0xc0] ss:$16 sps:$4 sm:$0xff]  }
  0x16   :  { %1118 = vmatprep.subr.bf16.mxu1 %v1211_v21  ;;  %v1263_v59 = vld [vmem:[%s1638_s0 + $0xc8] ss:$16 sps:$4 sm:$0xff]   ;;  %v1264_v60 = vld [vmem:[%s1638_s0 + $0xe4] ss:$16 sps:$4 sm:$0xff]   ;;  %v1266_v61 = vld [vmem:[%s1638_s0 + $0xec] ss:$16 sps:$4 sm:$0xff]  }
  0x17   :  { %v1268_v62 = vld [vmem:[%s1638_s0 + $0xe0] ss:$16 sps:$4 sm:$0xff]   ;;  %v1269_v63 = vld [vmem:[%s1638_s0 + $0xe8] ss:$16 sps:$4 sm:$0xff]   ;;  %v1270_v0 = vld [vmem:[%s1638_s0 + $0x104] ss:$16 sps:$4 sm:$0xff]  }
  0x18   :  { %1037 = vmatpush3.bf16.msra.mxu0 %v1212_v22  ;;  %v1272_v1 = vld [vmem:[%s1638_s0 + $0x10c] ss:$16 sps:$4 sm:$0xff]   ;;  %v1274_v2 = vld [vmem:[%s1638_s0 + $0x100] ss:$16 sps:$4 sm:$0xff]   ;;  %v1275_v3 = vld [vmem:[%s1638_s0 + $0x108] ss:$16 sps:$4 sm:$0xff]  }
  0x19   :  { %1119 = vmatpush3.bf16.msra.mxu1 %v1213_v23  ;;  %1038 = vmatprep.subr.bf16.mxu0 %v1214_v24  ;;  %v1276_v4 = vld [vmem:[%s1638_s0 + $0x124] ss:$16 sps:$4 sm:$0xff]   ;;  %v1278_v5 = vld [vmem:[%s1638_s0 + $0x12c] ss:$16 sps:$4 sm:$0xff]   ;;  %v1280_v8 = vld [vmem:[%s1638_s0 + $0x120] ss:$16 sps:$4 sm:$0xff]  }
  0x1a   :  { %1120 = vmatprep.subr.bf16.mxu1 %v1215_v25  ;;  %v1281_v9 = vld [vmem:[%s1638_s0 + $0x128] ss:$16 sps:$4 sm:$0xff]   ;;  %v1531_v16 = vld [vmem:[%s1639_s2] ss:$0 sm:$0xff] }
  0x1c   :  { %1039 = vmatpush3.bf16.msra.mxu0 %v1216_v26 }
  0x1d   :  { %1121 = vmatpush3.bf16.msra.mxu1 %v1217_v27  ;;  %1040 = vmatprep.subr.bf16.mxu0 %v1218_v28 }
  0x1e   :  { %1122 = vmatprep.subr.bf16.mxu1 %v1219_v29 }
  0x20   :  { %1041 = vmatpush3.bf16.msra.mxu0 %v1220_v30 }
  0x21   :  { %1123 = vmatpush3.bf16.msra.mxu1 %v1221_v31 }
  0x23   :  { %567 = vmatmul.mubr.bf16.vlgmr.msra.gmra.mrb[0].mxu0 %v1222_v32 }
  0x24   :  { %687 = vmatmul.mubr.bf16.vlgmr.msra.gmra.mrb[0].mxu1 %v1225_v34  ;;  %574 = vmatprep.mubr.bf16.mxu0 %v1228_v36 }
  0x25   :  { %694 = vmatprep.mubr.bf16.mxu1 %v1230_v37 }
  0x2b   :  { %575 = vmatmul.mubr.bf16.gmra.mrb[4].mxu0 %v1232_v38 }
  0x2c   :  { %695 = vmatmul.mubr.bf16.gmra.mrb[4].mxu1 %v1233_v39  ;;  %582 = vmatprep.mubr.bf16.mxu0 %v1234_v40 }
  0x2d   :  { %702 = vmatprep.mubr.bf16.mxu1 %v1236_v41 }
  0x33   :  { %583 = vmatmul.mubr.bf16.gmra.mrb[8].mxu0 %v1238_v42 }
  0x34   :  { %703 = vmatmul.mubr.bf16.gmra.mrb[8].mxu1 %v1239_v43  ;;  %590 = vmatprep.mubr.bf16.mxu0 %v1240_v44 }
  0x35   :  { %710 = vmatprep.mubr.bf16.mxu1 %v1242_v45 }
  0x3b   :  { %591 = vmatmul.mubr.bf16.gmra.mrb[12].mxu0 %v1244_v46 }
  0x3c   :  { %711 = vmatmul.mubr.bf16.gmra.mrb[12].mxu1 %v1245_v47  ;;  %598 = vmatprep.mubr.bf16.mxu0 %v1246_v48 }
  0x3d   :  { %718 = vmatprep.mubr.bf16.mxu1 %v1248_v49 }
  0x43   :  { %599 = vmatmul.mubr.bf16.gmra.mrb[16].mxu0 %v1250_v50 }
  0x44   :  { %719 = vmatmul.mubr.bf16.gmra.mrb[16].mxu1 %v1251_v51  ;;  %606 = vmatprep.mubr.bf16.mxu0 %v1252_v52 }
  0x45   :  { %726 = vmatprep.mubr.bf16.mxu1 %v1254_v53 }
  0x4b   :  { %607 = vmatmul.mubr.bf16.gmra.mrb[20].mxu0 %v1256_v54 }
  0x4c   :  { %727 = vmatmul.mubr.bf16.gmra.mrb[20].mxu1 %v1257_v55  ;;  %614 = vmatprep.mubr.bf16.mxu0 %v1258_v56 }
  0x4d   :  { %734 = vmatprep.mubr.bf16.mxu1 %v1260_v57 }
  0x53   :  { %615 = vmatmul.mubr.bf16.gmra.mrb[24].mxu0 %v1262_v58 }
  0x54   :  { %735 = vmatmul.mubr.bf16.gmra.mrb[24].mxu1 %v1263_v59  ;;  %622 = vmatprep.mubr.bf16.mxu0 %v1264_v60 }
  0x55   :  { %742 = vmatprep.mubr.bf16.mxu1 %v1266_v61 }
  0x5b   :  { %623 = vmatmul.mubr.bf16.gmra.mrb[28].mxu0 %v1268_v62 }
  0x5c   :  { %743 = vmatmul.mubr.bf16.gmra.mrb[28].mxu1 %v1269_v63  ;;  %630 = vmatprep.mubr.bf16.mxu0 %v1270_v0 }
  0x5d   :  { %750 = vmatprep.mubr.bf16.mxu1 %v1272_v1 }
  0x63   :  { %631 = vmatmul.mubr.bf16.gmra.mrb[32].mxu0 %v1274_v2 }
  0x64   :  { %751 = vmatmul.mubr.bf16.gmra.mrb[32].mxu1 %v1275_v3  ;;  %638 = vmatprep.mubr.bf16.mxu0 %v1276_v4 }
  0x65   :  { %758 = vmatprep.mubr.bf16.mxu1 %v1278_v5 }
  0x6b   :  { %639 = vmatmul.mubr.bf16.gmra.mrb[36].mxu0 %v1280_v8 }
  0x6c   :  { %759 = vmatmul.mubr.bf16.gmra.mrb[36].mxu1 %v1281_v9  ;;  %646 = vmatprep.mubr.bf16.mxu0 %v949_v10 }
  0x6d   :  { %766 = vmatprep.mubr.bf16.mxu1 %v951_v11 }
  0x73   :  { %647 = vmatmul.mubr.bf16.gmra.mrb[40].mxu0 %v948_v12 }
  0x74   :  { %767 = vmatmul.mubr.bf16.gmra.mrb[40].mxu1 %v950_v13 }
  0xf6   :  { %v1042_v14 = vpop.f32.mrb[0].mxu0 }
  0xf7   :  { %v1124_v15 = vpop.f32.mrb[0].mxu1  ;;  %v1043_v17 = vpop.f32.mrb[1].mxu0 }
  0xf8   :  { %v1044_v18 = vadd.f32 %v1043_v17, %v1042_v14  ;;  %v1125_v19 = vpop.f32.mrb[1].mxu1  ;;  %v1045_v20 = vpop.f32.mrb[2].mxu0 }
  0xf9   :  { %v1126_v21 = vadd.f32 %v1125_v19, %v1124_v15  ;;  %v1127_v22 = vpop.f32.mrb[2].mxu1  ;;  %v1046_v23 = vpop.f32.mrb[3].mxu0 }
  0xfa   :  { %v569_v24 = vadd.f32 %v1044_v18, %v1531_v16  ;;  %v1047_v25 = vadd.f32 %v1046_v23, %v1045_v20  ;;  %v1128_v26 = vpop.f32.mrb[3].mxu1 }
  0xfb   :  { %v1129_v27 = vadd.f32 %v1128_v26, %v1127_v22 }
  0xfc   :  { %v689_v28 = vadd.f32 %v1126_v21, %v569_v24  ;;  %v572_v29 = vadd.f32 %v1047_v25, %v1531_v16 }
  0xfe   :  { %v774_v30 = vmax.f32 %v689_v28, 0.0  ;;  %v692_v31 = vadd.f32 %v1129_v27, %v572_v29  ;;  %v1048_v32 = vpop.f32.mrb[4].mxu0 }
  0xff   :  { %v1130_v33 = vpop.f32.mrb[4].mxu1  ;;  %v1049_v34 = vpop.f32.mrb[5].mxu0 }
 0x100   :  { %v1005_v35 = vpack.c.bf16 %v774_v30, %v774_v30  ;;  %v775_v36 = vmax.f32 %v692_v31, 0.0  ;;  %v1050_v37 = vadd.f32 %v1049_v34, %v1048_v32  ;;  %v1131_v38 = vpop.f32.mrb[5].mxu1  ;;  %v1051_v39 = vpop.f32.mrb[6].mxu0 }
 0x101   :  { %v1132_v40 = vadd.f32 %v1131_v38, %v1130_v33  ;;  %v1133_v41 = vpop.f32.mrb[6].mxu1  ;;  %v1052_v42 = vpop.f32.mrb[7].mxu0 }
 0x102   :  { %881 = vst.msk [vmem:[%s1640_s3] sm:$0xf] %vm880_vm0, %v1005_v35  ;;  %v1006_v43 = vpack.c.bf16 %v775_v36, %v775_v36  ;;  %v577_v44 = vadd.f32 %v1050_v37, %v1531_v16  ;;  %v1053_v45 = vadd.f32 %v1052_v42, %v1051_v39  ;;  %v1134_v46 = vpop.f32.mrb[7].mxu1 }
 0x103   :  { %v1135_v47 = vadd.f32 %v1134_v46, %v1133_v41 }
 0x104   :  { %882 = vst.msk [vmem:[%s1640_s3 + $0x4] sm:$0xf] %vm880_vm0, %v1006_v43  ;;  %v697_v48 = vadd.f32 %v1132_v40, %v577_v44  ;;  %v580_v49 = vadd.f32 %v1053_v45, %v1531_v16 }
 0x106   :  { %v776_v50 = vmax.f32 %v697_v48, 0.0  ;;  %v700_v51 = vadd.f32 %v1135_v47, %v580_v49  ;;  %v1054_v52 = vpop.f32.mrb[8].mxu0 }
 0x107   :  { %v1136_v53 = vpop.f32.mrb[8].mxu1  ;;  %v1055_v54 = vpop.f32.mrb[9].mxu0 }
 0x108   :  { %v1007_v55 = vpack.c.bf16 %v776_v50, %v776_v50  ;;  %v777_v56 = vmax.f32 %v700_v51, 0.0  ;;  %v1056_v57 = vadd.f32 %v1055_v54, %v1054_v52  ;;  %v1137_v58 = vpop.f32.mrb[9].mxu1  ;;  %v1057_v59 = vpop.f32.mrb[10].mxu0 }
 0x109   :  { %v1138_v60 = vadd.f32 %v1137_v58, %v1136_v53  ;;  %v1139_v61 = vpop.f32.mrb[10].mxu1  ;;  %v1058_v62 = vpop.f32.mrb[11].mxu0 }
 0x10a   :  { %883 = vst.msk [vmem:[%s1640_s3 + $0x8] sm:$0xf] %vm880_vm0, %v1007_v55  ;;  %v1008_v63 = vpack.c.bf16 %v777_v56, %v777_v56  ;;  %v585_v0 = vadd.f32 %v1056_v57, %v1531_v16  ;;  %v1059_v1 = vadd.f32 %v1058_v62, %v1057_v59  ;;  %v1140_v2 = vpop.f32.mrb[11].mxu1 }
 0x10b   :  { %v1141_v3 = vadd.f32 %v1140_v2, %v1139_v61 }
 0x10c   :  { %884 = vst.msk [vmem:[%s1640_s3 + $0xc] sm:$0xf] %vm880_vm0, %v1008_v63  ;;  %v705_v4 = vadd.f32 %v1138_v60, %v585_v0  ;;  %v588_v5 = vadd.f32 %v1059_v1, %v1531_v16 }
 0x10e   :  { %v778_v6 = vmax.f32 %v705_v4, 0.0  ;;  %v708_v7 = vadd.f32 %v1141_v3, %v588_v5  ;;  %v1060_v8 = vpop.f32.mrb[12].mxu0 }
 0x10f   :  { %v1142_v9 = vpop.f32.mrb[12].mxu1  ;;  %v1061_v10 = vpop.f32.mrb[13].mxu0 }
 0x110   :  { %v1009_v11 = vpack.c.bf16 %v778_v6, %v778_v6  ;;  %v779_v12 = vmax.f32 %v708_v7, 0.0  ;;  %v1062_v13 = vadd.f32 %v1061_v10, %v1060_v8  ;;  %v1143_v14 = vpop.f32.mrb[13].mxu1  ;;  %v1063_v15 = vpop.f32.mrb[14].mxu0 }
 0x111   :  { %v1144_v17 = vadd.f32 %v1143_v14, %v1142_v9  ;;  %v1145_v18 = vpop.f32.mrb[14].mxu1  ;;  %v1064_v19 = vpop.f32.mrb[15].mxu0 }
 0x112   :  { %885 = vst.msk [vmem:[%s1640_s3 + $0x10] sm:$0xf] %vm880_vm0, %v1009_v11  ;;  %v1010_v20 = vpack.c.bf16 %v779_v12, %v779_v12  ;;  %v593_v21 = vadd.f32 %v1062_v13, %v1531_v16  ;;  %v1065_v22 = vadd.f32 %v1064_v19, %v1063_v15  ;;  %v1146_v23 = vpop.f32.mrb[15].mxu1 }
 0x113   :  { %v1147_v24 = vadd.f32 %v1146_v23, %v1145_v18 }
 0x114   :  { %886 = vst.msk [vmem:[%s1640_s3 + $0x14] sm:$0xf] %vm880_vm0, %v1010_v20  ;;  %v713_v25 = vadd.f32 %v1144_v17, %v593_v21  ;;  %v596_v26 = vadd.f32 %v1065_v22, %v1531_v16 }
 0x116   :  { %v780_v27 = vmax.f32 %v713_v25, 0.0  ;;  %v716_v28 = vadd.f32 %v1147_v24, %v596_v26  ;;  %v1066_v29 = vpop.f32.mrb[16].mxu0 }
 0x117   :  { %v1148_v30 = vpop.f32.mrb[16].mxu1  ;;  %v1067_v31 = vpop.f32.mrb[17].mxu0 }
 0x118   :  { %v1011_v32 = vpack.c.bf16 %v780_v27, %v780_v27  ;;  %v781_v33 = vmax.f32 %v716_v28, 0.0  ;;  %v1068_v34 = vadd.f32 %v1067_v31, %v1066_v29  ;;  %v1149_v35 = vpop.f32.mrb[17].mxu1  ;;  %v1069_v36 = vpop.f32.mrb[18].mxu0 }
 0x119   :  { %v1150_v37 = vadd.f32 %v1149_v35, %v1148_v30  ;;  %v1151_v38 = vpop.f32.mrb[18].mxu1  ;;  %v1070_v39 = vpop.f32.mrb[19].mxu0 }
 0x11a   :  { %887 = vst.msk [vmem:[%s1640_s3 + $0x18] sm:$0xf] %vm880_vm0, %v1011_v32  ;;  %v1012_v40 = vpack.c.bf16 %v781_v33, %v781_v33  ;;  %v601_v41 = vadd.f32 %v1068_v34, %v1531_v16  ;;  %v1071_v42 = vadd.f32 %v1070_v39, %v1069_v36  ;;  %v1152_v43 = vpop.f32.mrb[19].mxu1 }
 0x11b   :  { %v1153_v44 = vadd.f32 %v1152_v43, %v1151_v38 }
 0x11c   :  { %888 = vst.msk [vmem:[%s1640_s3 + $0x1c] sm:$0xf] %vm880_vm0, %v1012_v40  ;;  %v721_v45 = vadd.f32 %v1150_v37, %v601_v41  ;;  %v604_v46 = vadd.f32 %v1071_v42, %v1531_v16 }
 0x11e   :  { %v782_v47 = vmax.f32 %v721_v45, 0.0  ;;  %v724_v48 = vadd.f32 %v1153_v44, %v604_v46  ;;  %v1072_v49 = vpop.f32.mrb[20].mxu0 }
 0x11f   :  { %v1154_v50 = vpop.f32.mrb[20].mxu1  ;;  %v1073_v51 = vpop.f32.mrb[21].mxu0 }
 0x120   :  { %v1013_v52 = vpack.c.bf16 %v782_v47, %v782_v47  ;;  %v783_v53 = vmax.f32 %v724_v48, 0.0  ;;  %v1074_v54 = vadd.f32 %v1073_v51, %v1072_v49  ;;  %v1155_v55 = vpop.f32.mrb[21].mxu1  ;;  %v1075_v56 = vpop.f32.mrb[22].mxu0 }
 0x121   :  { %v1156_v57 = vadd.f32 %v1155_v55, %v1154_v50  ;;  %v1157_v58 = vpop.f32.mrb[22].mxu1  ;;  %v1076_v59 = vpop.f32.mrb[23].mxu0 }
 0x122   :  { %889 = vst.msk [vmem:[%s1640_s3 + $0x20] sm:$0xf] %vm880_vm0, %v1013_v52  ;;  %v1014_v60 = vpack.c.bf16 %v783_v53, %v783_v53  ;;  %v609_v61 = vadd.f32 %v1074_v54, %v1531_v16  ;;  %v1077_v62 = vadd.f32 %v1076_v59, %v1075_v56  ;;  %v1158_v63 = vpop.f32.mrb[23].mxu1 }
 0x123   :  { %v1159_v0 = vadd.f32 %v1158_v63, %v1157_v58 }
 0x124   :  { %890 = vst.msk [vmem:[%s1640_s3 + $0x24] sm:$0xf] %vm880_vm0, %v1014_v60  ;;  %v729_v1 = vadd.f32 %v1156_v57, %v609_v61  ;;  %v612_v2 = vadd.f32 %v1077_v62, %v1531_v16 }
 0x126   :  { %v784_v3 = vmax.f32 %v729_v1, 0.0  ;;  %v732_v4 = vadd.f32 %v1159_v0, %v612_v2  ;;  %v1078_v5 = vpop.f32.mrb[24].mxu0 }
 0x127   :  { %v1160_v6 = vpop.f32.mrb[24].mxu1  ;;  %v1079_v7 = vpop.f32.mrb[25].mxu0 }
 0x128   :  { %v1015_v8 = vpack.c.bf16 %v784_v3, %v784_v3  ;;  %v785_v9 = vmax.f32 %v732_v4, 0.0  ;;  %v1080_v10 = vadd.f32 %v1079_v7, %v1078_v5  ;;  %v1161_v11 = vpop.f32.mrb[25].mxu1  ;;  %v1081_v12 = vpop.f32.mrb[26].mxu0 }
 0x129   :  { %v1162_v13 = vadd.f32 %v1161_v11, %v1160_v6  ;;  %v1163_v14 = vpop.f32.mrb[26].mxu1  ;;  %v1082_v15 = vpop.f32.mrb[27].mxu0 }
 0x12a   :  { %891 = vst.msk [vmem:[%s1640_s3 + $0x28] sm:$0xf] %vm880_vm0, %v1015_v8  ;;  %v1016_v17 = vpack.c.bf16 %v785_v9, %v785_v9  ;;  %v617_v18 = vadd.f32 %v1080_v10, %v1531_v16  ;;  %v1083_v19 = vadd.f32 %v1082_v15, %v1081_v12  ;;  %v1164_v20 = vpop.f32.mrb[27].mxu1 }
 0x12b   :  { %v1165_v21 = vadd.f32 %v1164_v20, %v1163_v14 }
 0x12c   :  { %892 = vst.msk [vmem:[%s1640_s3 + $0x2c] sm:$0xf] %vm880_vm0, %v1016_v17  ;;  %v737_v22 = vadd.f32 %v1162_v13, %v617_v18  ;;  %v620_v23 = vadd.f32 %v1083_v19, %v1531_v16 }
 0x12e   :  { %v786_v24 = vmax.f32 %v737_v22, 0.0  ;;  %v740_v25 = vadd.f32 %v1165_v21, %v620_v23  ;;  %v1084_v26 = vpop.f32.mrb[28].mxu0 }
 0x12f   :  { %v1166_v27 = vpop.f32.mrb[28].mxu1  ;;  %v1085_v28 = vpop.f32.mrb[29].mxu0 }
 0x130   :  { %v1017_v29 = vpack.c.bf16 %v786_v24, %v786_v24  ;;  %v787_v30 = vmax.f32 %v740_v25, 0.0  ;;  %v1086_v31 = vadd.f32 %v1085_v28, %v1084_v26  ;;  %v1167_v32 = vpop.f32.mrb[29].mxu1  ;;  %v1087_v33 = vpop.f32.mrb[30].mxu0 }
 0x131   :  { %v1168_v34 = vadd.f32 %v1167_v32, %v1166_v27  ;;  %v1169_v35 = vpop.f32.mrb[30].mxu1  ;;  %v1088_v36 = vpop.f32.mrb[31].mxu0 }
 0x132   :  { %893 = vst.msk [vmem:[%s1640_s3 + $0x30] sm:$0xf] %vm880_vm0, %v1017_v29  ;;  %v1018_v37 = vpack.c.bf16 %v787_v30, %v787_v30  ;;  %v625_v38 = vadd.f32 %v1086_v31, %v1531_v16  ;;  %v1089_v39 = vadd.f32 %v1088_v36, %v1087_v33  ;;  %v1170_v40 = vpop.f32.mrb[31].mxu1 }
 0x133   :  { %v1171_v41 = vadd.f32 %v1170_v40, %v1169_v35 }
 0x134   :  { %894 = vst.msk [vmem:[%s1640_s3 + $0x34] sm:$0xf] %vm880_vm0, %v1018_v37  ;;  %v745_v42 = vadd.f32 %v1168_v34, %v625_v38  ;;  %v628_v43 = vadd.f32 %v1089_v39, %v1531_v16 }
 0x136   :  { %v788_v44 = vmax.f32 %v745_v42, 0.0  ;;  %v748_v45 = vadd.f32 %v1171_v41, %v628_v43  ;;  %v1090_v46 = vpop.f32.mrb[32].mxu0 }
 0x137   :  { %v1172_v47 = vpop.f32.mrb[32].mxu1  ;;  %v1091_v48 = vpop.f32.mrb[33].mxu0 }
 0x138   :  { %v1019_v49 = vpack.c.bf16 %v788_v44, %v788_v44  ;;  %v789_v50 = vmax.f32 %v748_v45, 0.0  ;;  %v1092_v51 = vadd.f32 %v1091_v48, %v1090_v46  ;;  %v1173_v52 = vpop.f32.mrb[33].mxu1  ;;  %v1093_v53 = vpop.f32.mrb[34].mxu0 }
 0x139   :  { %v1174_v54 = vadd.f32 %v1173_v52, %v1172_v47  ;;  %v1175_v55 = vpop.f32.mrb[34].mxu1  ;;  %v1094_v56 = vpop.f32.mrb[35].mxu0 }
 0x13a   :  { %895 = vst.msk [vmem:[%s1640_s3 + $0x38] sm:$0xf] %vm880_vm0, %v1019_v49  ;;  %v1020_v57 = vpack.c.bf16 %v789_v50, %v789_v50  ;;  %v633_v58 = vadd.f32 %v1092_v51, %v1531_v16  ;;  %v1095_v59 = vadd.f32 %v1094_v56, %v1093_v53  ;;  %v1176_v60 = vpop.f32.mrb[35].mxu1 }
 0x13b   :  { %v1177_v61 = vadd.f32 %v1176_v60, %v1175_v55 }
 0x13c   :  { %896 = vst.msk [vmem:[%s1640_s3 + $0x3c] sm:$0xf] %vm880_vm0, %v1020_v57  ;;  %v753_v62 = vadd.f32 %v1174_v54, %v633_v58  ;;  %v636_v63 = vadd.f32 %v1095_v59, %v1531_v16 }
 0x13e   :  { %v790_v0 = vmax.f32 %v753_v62, 0.0  ;;  %v756_v1 = vadd.f32 %v1177_v61, %v636_v63  ;;  %v1096_v2 = vpop.f32.mrb[36].mxu0 }
 0x13f   :  { %v1178_v3 = vpop.f32.mrb[36].mxu1  ;;  %v1097_v4 = vpop.f32.mrb[37].mxu0 }
 0x140   :  { %v1021_v5 = vpack.c.bf16 %v790_v0, %v790_v0  ;;  %v791_v6 = vmax.f32 %v756_v1, 0.0  ;;  %v1098_v7 = vadd.f32 %v1097_v4, %v1096_v2  ;;  %v1179_v8 = vpop.f32.mrb[37].mxu1  ;;  %v1099_v9 = vpop.f32.mrb[38].mxu0 }
 0x141   :  { %v1180_v10 = vadd.f32 %v1179_v8, %v1178_v3  ;;  %v1181_v11 = vpop.f32.mrb[38].mxu1  ;;  %v1100_v12 = vpop.f32.mrb[39].mxu0 }
 0x142   :  { %897 = vst.msk [vmem:[%s1640_s3 + $0x40] sm:$0xf] %vm880_vm0, %v1021_v5  ;;  %v1022_v13 = vpack.c.bf16 %v791_v6, %v791_v6  ;;  %v641_v14 = vadd.f32 %v1098_v7, %v1531_v16  ;;  %v1101_v15 = vadd.f32 %v1100_v12, %v1099_v9  ;;  %v1182_v17 = vpop.f32.mrb[39].mxu1 }
 0x143   :  { %v1183_v18 = vadd.f32 %v1182_v17, %v1181_v11 }
 0x144   :  { %898 = vst.msk [vmem:[%s1640_s3 + $0x44] sm:$0xf] %vm880_vm0, %v1022_v13  ;;  %v761_v19 = vadd.f32 %v1180_v10, %v641_v14  ;;  %v644_v20 = vadd.f32 %v1101_v15, %v1531_v16 }
 0x146   :  { %v792_v21 = vmax.f32 %v761_v19, 0.0  ;;  %v764_v22 = vadd.f32 %v1183_v18, %v644_v20  ;;  %v1102_v23 = vpop.f32.mrb[40].mxu0 }
 0x147   :  { %v1184_v24 = vpop.f32.mrb[40].mxu1  ;;  %v1103_v25 = vpop.f32.mrb[41].mxu0 }
 0x148   :  { %v1023_v26 = vpack.c.bf16 %v792_v21, %v792_v21  ;;  %v793_v27 = vmax.f32 %v764_v22, 0.0  ;;  %v1104_v28 = vadd.f32 %v1103_v25, %v1102_v23  ;;  %v1185_v29 = vpop.f32.mrb[41].mxu1  ;;  %v1105_v30 = vpop.f32.mrb[42].mxu0 }
 0x149   :  { %v1186_v31 = vadd.f32 %v1185_v29, %v1184_v24  ;;  %v1187_v32 = vpop.f32.mrb[42].mxu1  ;;  %v1106_v33 = vpop.f32.mrb[43].mxu0 }
 0x14a   :  { %899 = vst.msk [vmem:[%s1640_s3 + $0x48] sm:$0xf] %vm880_vm0, %v1023_v26  ;;  %v1024_v34 = vpack.c.bf16 %v793_v27, %v793_v27  ;;  %v649_v35 = vadd.f32 %v1104_v28, %v1531_v16  ;;  %v1188_v36 = vpop.f32.mrb[43].mxu1 }
 0x14c   :  { %900 = vst.msk [vmem:[%s1640_s3 + $0x4c] sm:$0xf] %vm880_vm0, %v1024_v34  ;;  %v769_v37 = vadd.f32 %v1186_v31, %v649_v35 }
 0x14e   :  { %v794_v38 = vmax.f32 %v769_v37, 0.0 }
 0x150   :  { %v1025_v39 = vpack.c.bf16 %v794_v38, %v794_v38 }
 0x152   :  { %902 = vst.msk [vmem:[%s1640_s3 + $0x50] sm:$0x1] %vm901_vm1, %v1025_v39 }

// kernel: cnn_forward.6
= control target key start
LH: loop header
LB: loop body
LE: loop exit
PB: predicated region body
PF: predicated region fallthrough
CT: control target
= control target key end

     0   :  { %v1248_v34 = vmov 0.0   ;;  %vm1249_vm0 = vmmov 0   ;;  %vm516_vm1 = vcmask 523264   ;;  %vm868_vm2 = vcmask 519168   ;;  %s1599_s1 = inlined_call_operand.vmem [shape: bf16[576,64], index: 1, kind: input, shape index: {}]   ;;  %s1600_s0 = inlined_call_operand.vmem [shape: bf16[98,576], index: 0, kind: input, shape index: {}]   ;;  %s1601_s2 = inlined_call_operand.vmem [shape: f32[1,64], index: 2, kind: input, shape index: {}]   ;;  %s1602_s3 = inlined_call_operand.vmem [shape: bf16[98,64], index: 3, kind: output, shape index: {}]  }
   0x1   :  { %v1165_v0 = vld [vmem:[%s1599_s1 + $0x40] sm:$0xff]   ;;  %v1169_v4 = vld [vmem:[%s1599_s1 + $0x48] sm:$0xff]   ;;  %v1173_v8 = vld [vmem:[%s1599_s1 + $0x50] sm:$0xff]   ;;  %vm881_vm3 = vcmask 516096  }
   0x2   :  { %v1166_v1 = vld [vmem:[%s1599_s1 + $0xc0] sm:$0xff]   ;;  %992 = vmatprep.subr.bf16.mxu0 %v1165_v0  ;;  %v1170_v5 = vld [vmem:[%s1599_s1 + $0xc8] sm:$0xff]   ;;  %v1174_v9 = vld [vmem:[%s1599_s1 + $0xd0] sm:$0xff]  }
   0x3   :  { %v1167_v2 = vld [vmem:[%s1599_s1] sm:$0xff]   ;;  %1050 = vmatprep.subr.bf16.mxu1 %v1166_v1  ;;  %v1171_v6 = vld [vmem:[%s1599_s1 + $0x8] sm:$0xff]   ;;  %v1175_v10 = vld [vmem:[%s1599_s1 + $0x10] sm:$0xff]  }
   0x4   :  { %v1168_v3 = vld [vmem:[%s1599_s1 + $0x80] sm:$0xff]   ;;  %993 = vmatpush3.bf16.msra.mxu0 %v1167_v2  ;;  %v1172_v7 = vld [vmem:[%s1599_s1 + $0x88] sm:$0xff]   ;;  %v1176_v11 = vld [vmem:[%s1599_s1 + $0x90] sm:$0xff]  }
   0x5   :  { %1051 = vmatpush3.bf16.msra.mxu1 %v1168_v3  ;;  %994 = vmatprep.subr.bf16.mxu0 %v1169_v4  ;;  %v1177_v12 = vld [vmem:[%s1599_s1 + $0x58] sm:$0xff]   ;;  %v1181_v16 = vld [vmem:[%s1599_s1 + $0x60] sm:$0xff]   ;;  %v1185_v20 = vld [vmem:[%s1599_s1 + $0x68] sm:$0xff]  }
   0x6   :  { %1052 = vmatprep.subr.bf16.mxu1 %v1170_v5  ;;  %v1178_v13 = vld [vmem:[%s1599_s1 + $0xd8] sm:$0xff]   ;;  %v1182_v17 = vld [vmem:[%s1599_s1 + $0xe0] sm:$0xff]   ;;  %v1186_v21 = vld [vmem:[%s1599_s1 + $0xe8] sm:$0xff]  }
   0x7   :  { %v1179_v14 = vld [vmem:[%s1599_s1 + $0x18] sm:$0xff]   ;;  %v1183_v18 = vld [vmem:[%s1599_s1 + $0x20] sm:$0xff]   ;;  %v1187_v22 = vld [vmem:[%s1599_s1 + $0x28] sm:$0xff]  }
   0x8   :  { %995 = vmatpush3.bf16.msra.mxu0 %v1171_v6  ;;  %v1180_v15 = vld [vmem:[%s1599_s1 + $0x98] sm:$0xff]   ;;  %v1184_v19 = vld [vmem:[%s1599_s1 + $0xa0] sm:$0xff]   ;;  %v1188_v23 = vld [vmem:[%s1599_s1 + $0xa8] sm:$0xff]  }
   0x9   :  { %1053 = vmatpush3.bf16.msra.mxu1 %v1172_v7  ;;  %996 = vmatprep.subr.bf16.mxu0 %v1173_v8  ;;  %v1189_v24 = vld [vmem:[%s1599_s1 + $0x70] sm:$0xff]   ;;  %v1193_v28 = vld [vmem:[%s1599_s1 + $0x78] sm:$0xff]   ;;  %v1202_v36 = vld [vmem:[%s1600_s0 + $0xc] ss:$20 sps:$4 sm:$0xff]  }
   0xa   :  { %1054 = vmatprep.subr.bf16.mxu1 %v1174_v9  ;;  %v1190_v25 = vld [vmem:[%s1599_s1 + $0xf0] sm:$0xff]   ;;  %v1194_v29 = vld [vmem:[%s1599_s1 + $0xf8] sm:$0xff]   ;;  %v1203_v37 = vld [vmem:[%s1599_s1 + $0x100] sm:$0xff]   ;;  %658 = vmatprep.mubr.bf16.mxu1 %v1202_v36 }
   0xb   :  { %v1191_v26 = vld [vmem:[%s1599_s1 + $0x30] sm:$0xff]   ;;  %v1195_v30 = vld [vmem:[%s1599_s1 + $0x38] sm:$0xff]   ;;  %v1204_v38 = vld [vmem:[%s1600_s0 + $0x2c] ss:$20 sps:$4 sm:$0xff]  }
   0xc   :  { %997 = vmatpush3.bf16.msra.mxu0 %v1175_v10  ;;  %v1192_v27 = vld [vmem:[%s1599_s1 + $0xb0] sm:$0xff]   ;;  %v1196_v31 = vld [vmem:[%s1599_s1 + $0xb8] sm:$0xff]   ;;  %v1214_v43 = vld [vmem:[%s1599_s1 + $0x108] sm:$0xff]  }
   0xd   :  { %1055 = vmatpush3.bf16.msra.mxu1 %v1176_v11  ;;  %998 = vmatprep.subr.bf16.mxu0 %v1177_v12  ;;  %v1197_v32 = vld [vmem:[%s1600_s0] ss:$20 sps:$4 sm:$0xff]   ;;  %v1199_v33 = vld [vmem:[%s1600_s0 + $0x4] ss:$20 sps:$4 sm:$0xff]   ;;  %v1200_v35 = vld [vmem:[%s1600_s0 + $0x8] ss:$20 sps:$4 sm:$0xff]  }
   0xe   :  { %1056 = vmatprep.subr.bf16.mxu1 %v1178_v13  ;;  %570 = vmatprep.mubr.bf16.mxu0 %v1199_v33  ;;  %v1206_v39 = vld [vmem:[%s1600_s0 + $0x34] ss:$20 sps:$4 sm:$0xff]   ;;  %v1209_v41 = vld [vmem:[%s1600_s0 + $0x30] ss:$20 sps:$4 sm:$0xff]   ;;  %v1216_v47 = vld [vmem:[%s1600_s0 + $0x58] ss:$20 sps:$4 sm:$0xff]  }
   0xf   :  { %v1208_v40 = vld [vmem:[%s1600_s0 + $0x28] ss:$20 sps:$4 sm:$0xff]   ;;  %v1223_v45 = vld [vmem:[%s1599_s1 + $0x110] sm:$0xff]   ;;  %v1219_v49 = vld [vmem:[%s1600_s0 + $0x84] ss:$20 sps:$4 sm:$0xff]  }
  0x10   :  { %999 = vmatpush3.bf16.msra.mxu0 %v1179_v14  ;;  %v1210_v42 = vld [vmem:[%s1600_s0 + $0x54] ss:$20 sps:$4 sm:$0xff]   ;;  %v1212_v44 = vld [vmem:[%s1600_s0 + $0x5c] ss:$20 sps:$4 sm:$0xff]   ;;  %v1221_v51 = vld [vmem:[%s1600_s0 + $0x78] ss:$20 sps:$4 sm:$0xff]  }
  0x11   :  { %1057 = vmatpush3.bf16.msra.mxu1 %v1180_v15  ;;  %1000 = vmatprep.subr.bf16.mxu0 %v1181_v16  ;;  %v1215_v46 = vld [vmem:[%s1600_s0 + $0x50] ss:$20 sps:$4 sm:$0xff]   ;;  %v1236_v50 = vld [vmem:[%s1599_s1 + $0x118] sm:$0xff]   ;;  %v1222_v52 = vld [vmem:[%s1600_s0 + $0x80] ss:$20 sps:$4 sm:$0xff]  }
  0x12   :  { %1058 = vmatprep.subr.bf16.mxu1 %v1182_v17  ;;  %v1217_v48 = vld [vmem:[%s1600_s0 + $0x7c] ss:$20 sps:$4 sm:$0xff]   ;;  %v1224_v53 = vld [vmem:[%s1600_s0 + $0xa4] ss:$20 sps:$4 sm:$0xff]   ;;  %v1226_v54 = vld [vmem:[%s1600_s0 + $0xac] ss:$20 sps:$4 sm:$0xff]  }
  0x13   :  { %v1228_v55 = vld [vmem:[%s1600_s0 + $0xa0] ss:$20 sps:$4 sm:$0xff]   ;;  %v1229_v56 = vld [vmem:[%s1600_s0 + $0xa8] ss:$20 sps:$4 sm:$0xff]   ;;  %v1235_v62 = vld [vmem:[%s1600_s0 + $0xd0] ss:$20 sps:$4 sm:$0xff]  }
  0x14   :  { %1001 = vmatpush3.bf16.msra.mxu0 %v1183_v18  ;;  %v1230_v57 = vld [vmem:[%s1600_s0 + $0xcc] ss:$20 sps:$4 sm:$0xff]   ;;  %v1232_v58 = vld [vmem:[%s1600_s0 + $0xd4] ss:$20 sps:$4 sm:$0xff]   ;;  %v52_v60 = vld [vmem:[%s1600_s0 + $0xf8] sm:$0x11] }
  0x15   :  { %1059 = vmatpush3.bf16.msra.mxu1 %v1184_v19  ;;  %1002 = vmatprep.subr.bf16.mxu0 %v1185_v20  ;;  %v51_v59 = vld [vmem:[%s1600_s0 + $0xf0] sm:$0x11]  ;;  %v1234_v61 = vld [vmem:[%s1600_s0 + $0xc8] ss:$20 sps:$4 sm:$0xff]   ;;  %v921_v0 = vcombine.high %v52_v60, %v52_v60  ;;  %v920_v2 = vcombine.low %v52_v60, %v52_v60  ;;  %v1243_v5 = vld [vmem:[%s1600_s0 + $0x38] ss:$20 sps:$4 sm:$0xff]  }
  0x16   :  { %1060 = vmatprep.subr.bf16.mxu1 %v1186_v21  ;;  %v919_v63 = vcombine.high %v51_v59, %v51_v59  ;;  %v918_v1 = vcombine.low %v51_v59, %v51_v59  ;;  %v1241_v3 = vld [vmem:[%s1600_s0 + $0x10] ss:$20 sps:$4 sm:$0xff]   ;;  %v1244_v6 = vld [vmem:[%s1600_s0 + $0xd8] ss:$20 sps:$4 sm:$0xff]   ;;  %v1245_v7 = vld [vmem:[%s1600_s0 + $0x60] ss:$20 sps:$4 sm:$0xff]  }
  0x17   :  { %v1242_v4 = vld [vmem:[%s1600_s0 + $0xb0] ss:$20 sps:$4 sm:$0xff]   ;;  %v1246_v8 = vld [vmem:[%s1600_s0 + $0x100] ss:$0 sps:$4 sm:$0x11]  }
  0x18   :  { %1003 = vmatpush3.bf16.msra.mxu0 %v1187_v22  ;;  %v1247_v9 = vld [vmem:[%s1600_s0 + $0x88] ss:$20 sps:$4 sm:$0xff]   ;;  %v1509_v11 = vld [vmem:[%s1601_s2] ss:$0 sm:$0xff] }
  0x19   :  { %1061 = vmatpush3.bf16.msra.mxu1 %v1188_v23  ;;  %1004 = vmatprep.subr.bf16.mxu0 %v1189_v24 }
  0x1a   :  { %1062 = vmatprep.subr.bf16.mxu1 %v1190_v25 }
  0x1c   :  { %1005 = vmatpush3.bf16.msra.mxu0 %v1191_v26 }
  0x1d   :  { %1063 = vmatpush3.bf16.msra.mxu1 %v1192_v27  ;;  %1006 = vmatprep.subr.bf16.mxu0 %v1193_v28 }
  0x1e   :  { %1064 = vmatprep.subr.bf16.mxu1 %v1194_v29 }
  0x20   :  { %1007 = vmatpush3.bf16.msra.mxu0 %v1195_v30 }
  0x21   :  { %1065 = vmatpush3.bf16.msra.mxu1 %v1196_v31  ;;  %1119 = vmatprep.subr.bf16.mxu0 %v1248_v34 }
  0x22   :  { %1155 = vmatprep.subr.bf16.mxu1 %v1248_v34 }
  0x23   :  { %571 = vmatmul.mubr.bf16.vlgmr.msra.gmra.mrb[0].mxu0 %v1197_v32 }
  0x24   :  { %659 = vmatmul.mubr.bf16.vlgmr.msra.gmra.mrb[0].mxu1 %v1200_v35  ;;  %1120 = vmatpush3.bf16.msra.mxu0 %v1203_v37 }
  0x25   :  { %578 = vmatprep.mubr.bf16.mxu0 %v1204_v38  ;;  %1159 = vmatpush3.bf16.msra.mxu1 %v1203_v37 }
  0x26   :  { %666 = vmatprep.mubr.bf16.mxu1 %v1206_v39  ;;  %1121 = vmatprep.subr.bf16.mxu0 %v1248_v34 }
  0x27   :  { %1156 = vmatprep.subr.bf16.mxu1 %v1248_v34 }
  0x28   :  { %1122 = vmatpush3.bf16.msra.mxu0 %v1214_v43 }
  0x29   :  { %1160 = vmatpush3.bf16.msra.mxu1 %v1214_v43  ;;  %1123 = vmatprep.subr.bf16.mxu0 %v1248_v34 }
  0x2a   :  { %1157 = vmatprep.subr.bf16.mxu1 %v1248_v34 }
  0x2b   :  { %579 = vmatmul.mubr.bf16.gmra.mrb[4].mxu0 %v1208_v40 }
  0x2c   :  { %667 = vmatmul.mubr.bf16.gmra.mrb[4].mxu1 %v1209_v41  ;;  %586 = vmatprep.mubr.bf16.mxu0 %v1210_v42 }
  0x2d   :  { %674 = vmatprep.mubr.bf16.mxu1 %v1212_v44  ;;  %1124 = vmatpush3.bf16.msra.mxu0 %v1223_v45 }
  0x2e   :  { %1161 = vmatpush3.bf16.msra.mxu1 %v1223_v45  ;;  %1125 = vmatprep.subr.bf16.mxu0 %v1248_v34 }
  0x2f   :  { %1158 = vmatprep.subr.bf16.mxu1 %v1248_v34 }
  0x31   :  { %1126 = vmatpush3.bf16.msra.mxu0 %v1236_v50 }
  0x32   :  { %1162 = vmatpush3.bf16.msra.mxu1 %v1236_v50 }
  0x33   :  { %587 = vmatmul.mubr.bf16.gmra.mrb[8].mxu0 %v1215_v46 }
  0x34   :  { %675 = vmatmul.mubr.bf16.gmra.mrb[8].mxu1 %v1216_v47  ;;  %594 = vmatprep.mubr.bf16.mxu0 %v1217_v48 }
  0x35   :  { %682 = vmatprep.mubr.bf16.mxu1 %v1219_v49 }
  0x3b   :  { %595 = vmatmul.mubr.bf16.gmra.mrb[12].mxu0 %v1221_v51 }
  0x3c   :  { %683 = vmatmul.mubr.bf16.gmra.mrb[12].mxu1 %v1222_v52  ;;  %602 = vmatprep.mubr.bf16.mxu0 %v1224_v53 }
  0x3d   :  { %690 = vmatprep.mubr.bf16.mxu1 %v1226_v54 }
  0x43   :  { %603 = vmatmul.mubr.bf16.gmra.mrb[16].mxu0 %v1228_v55 }
  0x44   :  { %691 = vmatmul.mubr.bf16.gmra.mrb[16].mxu1 %v1229_v56  ;;  %610 = vmatprep.mubr.bf16.mxu0 %v1230_v57 }
  0x45   :  { %698 = vmatprep.mubr.bf16.mxu1 %v1232_v58 }
  0x4b   :  { %611 = vmatmul.mubr.bf16.gmra.mrb[20].mxu0 %v1234_v61 }
  0x4c   :  { %699 = vmatmul.mubr.bf16.gmra.mrb[20].mxu1 %v1235_v62  ;;  %618 = vmatprep.mubr.bf16.mxu0 %v919_v63 }
  0x4d   :  { %706 = vmatprep.mubr.bf16.mxu1 %v921_v0 }
  0x53   :  { %619 = vmatmul.mubr.bf16.gmra.mrb[24].mxu0 %v918_v1 }
  0x54   :  { %707 = vmatmul.mubr.bf16.gmra.mrb[24].mxu1 %v920_v2  ;;  %1127 = vmatprep.mubr.msk.bf16.mxu0 %vm1249_vm0, %v1248_v34 }
  0x55   :  { %1143 = vmatprep.mubr.msk.bf16.mxu1 %vm1249_vm0, %v1248_v34 }
  0x5b   :  { %1128 = vmatmul.mubr.msk.bf16.vlgmr.msra.gmra.mrb[28].mxu0 %vm516_vm1, %v1241_v3 }
  0x5c   :  { %1144 = vmatmul.mubr.msk.bf16.vlgmr.msra.gmra.mrb[28].mxu1 %vm516_vm1, %v1242_v4  ;;  %1131 = vmatprep.mubr.msk.bf16.mxu0 %vm1249_vm0, %v1248_v34 }
  0x5d   :  { %1147 = vmatprep.mubr.msk.bf16.mxu1 %vm1249_vm0, %v1248_v34 }
  0x63   :  { %1132 = vmatmul.mubr.msk.bf16.gmra.mrb[32].mxu0 %vm516_vm1, %v1243_v5 }
  0x64   :  { %1148 = vmatmul.mubr.msk.bf16.gmra.mrb[32].mxu1 %vm516_vm1, %v1244_v6  ;;  %1135 = vmatprep.mubr.msk.bf16.mxu0 %vm1249_vm0, %v1248_v34 }
  0x65   :  { %1151 = vmatprep.mubr.msk.bf16.mxu1 %vm1249_vm0, %v1248_v34 }
  0x6b   :  { %1136 = vmatmul.mubr.msk.bf16.gmra.mrb[36].mxu0 %vm516_vm1, %v1245_v7 }
  0x6c   :  { %1152 = vmatmul.mubr.msk.bf16.gmra.mrb[36].mxu1 %vm516_vm1, %v1246_v8  ;;  %1139 = vmatprep.mubr.msk.bf16.mxu0 %vm1249_vm0, %v1248_v34 }
  0x73   :  { %1140 = vmatmul.mubr.msk.bf16.gmra.mrb[40].mxu0 %vm516_vm1, %v1247_v9 }
  0xf6   :  { %v1008_v10 = vpop.f32.mrb[0].mxu0 }
  0xf7   :  { %v1009_v12 = vpop.f32.mrb[1].mxu0  ;;  %v1066_v13 = vpop.f32.mrb[0].mxu1 }
  0xf8   :  { %v1010_v14 = vadd.f32 %v1009_v12, %v1008_v10  ;;  %v1011_v15 = vpop.f32.mrb[2].mxu0  ;;  %v1067_v16 = vpop.f32.mrb[1].mxu1 }
  0xf9   :  { %v1012_v17 = vpop.f32.mrb[3].mxu0  ;;  %v1068_v18 = vadd.f32 %v1067_v16, %v1066_v13  ;;  %v1069_v19 = vpop.f32.mrb[2].mxu1 }
  0xfa   :  { %v573_v20 = vadd.f32 %v1010_v14, %v1509_v11  ;;  %v1013_v21 = vadd.f32 %v1012_v17, %v1011_v15  ;;  %v1070_v22 = vpop.f32.mrb[3].mxu1 }
  0xfb   :  { %v1071_v23 = vadd.f32 %v1070_v22, %v1069_v19 }
  0xfc   :  { %v576_v24 = vadd.f32 %v1013_v21, %v1509_v11  ;;  %v1513_v25 = vadd.f32 %v1068_v18, %v573_v20 }
  0xfe   :  { %v1014_v26 = vpop.f32.mrb[4].mxu0  ;;  %v1515_v27 = vadd.f32 %v1071_v23, %v576_v24 }
  0xff   :  { %v1015_v28 = vpop.f32.mrb[5].mxu0  ;;  %v1072_v29 = vpop.f32.mrb[4].mxu1 }
 0x100   :  { %v1016_v30 = vadd.f32 %v1015_v28, %v1014_v26  ;;  %v1017_v31 = vpop.f32.mrb[6].mxu0  ;;  %v1073_v32 = vpop.f32.mrb[5].mxu1 }
 0x101   :  { %v1018_v33 = vpop.f32.mrb[7].mxu0  ;;  %v1074_v34 = vadd.f32 %v1073_v32, %v1072_v29  ;;  %v1075_v35 = vpop.f32.mrb[6].mxu1 }
 0x102   :  { %v581_v36 = vadd.f32 %v1016_v30, %v1509_v11  ;;  %v1019_v37 = vadd.f32 %v1018_v33, %v1017_v31  ;;  %v1076_v38 = vpop.f32.mrb[7].mxu1 }
 0x103   :  { %v1077_v39 = vadd.f32 %v1076_v38, %v1075_v35 }
 0x104   :  { %v584_v40 = vadd.f32 %v1019_v37, %v1509_v11  ;;  %v1519_v41 = vadd.f32 %v1074_v34, %v581_v36 }
 0x106   :  { %v1020_v42 = vpop.f32.mrb[8].mxu0  ;;  %v1521_v43 = vadd.f32 %v1077_v39, %v584_v40 }
 0x107   :  { %v1021_v44 = vpop.f32.mrb[9].mxu0  ;;  %v1078_v45 = vpop.f32.mrb[8].mxu1 }
 0x108   :  { %v1022_v46 = vadd.f32 %v1021_v44, %v1020_v42  ;;  %v1023_v47 = vpop.f32.mrb[10].mxu0  ;;  %v1079_v48 = vpop.f32.mrb[9].mxu1 }
 0x109   :  { %v1024_v49 = vpop.f32.mrb[11].mxu0  ;;  %v1080_v50 = vadd.f32 %v1079_v48, %v1078_v45  ;;  %v1081_v51 = vpop.f32.mrb[10].mxu1 }
 0x10a   :  { %v589_v52 = vadd.f32 %v1022_v46, %v1509_v11  ;;  %v1025_v53 = vadd.f32 %v1024_v49, %v1023_v47  ;;  %v1082_v54 = vpop.f32.mrb[11].mxu1 }
 0x10b   :  { %v1083_v55 = vadd.f32 %v1082_v54, %v1081_v51 }
 0x10c   :  { %v592_v56 = vadd.f32 %v1025_v53, %v1509_v11  ;;  %v1525_v57 = vadd.f32 %v1080_v50, %v589_v52 }
 0x10e   :  { %v1026_v58 = vpop.f32.mrb[12].mxu0  ;;  %v1527_v59 = vadd.f32 %v1083_v55, %v592_v56 }
 0x10f   :  { %v1027_v60 = vpop.f32.mrb[13].mxu0  ;;  %v1084_v61 = vpop.f32.mrb[12].mxu1 }
 0x110   :  { %v1028_v62 = vadd.f32 %v1027_v60, %v1026_v58  ;;  %v1029_v63 = vpop.f32.mrb[14].mxu0  ;;  %v1085_v0 = vpop.f32.mrb[13].mxu1 }
 0x111   :  { %v1030_v1 = vpop.f32.mrb[15].mxu0  ;;  %v1086_v2 = vadd.f32 %v1085_v0, %v1084_v61  ;;  %v1087_v3 = vpop.f32.mrb[14].mxu1 }
 0x112   :  { %v597_v4 = vadd.f32 %v1028_v62, %v1509_v11  ;;  %v1031_v5 = vadd.f32 %v1030_v1, %v1029_v63  ;;  %v1088_v6 = vpop.f32.mrb[15].mxu1 }
 0x113   :  { %v1089_v7 = vadd.f32 %v1088_v6, %v1087_v3 }
 0x114   :  { %v600_v8 = vadd.f32 %v1031_v5, %v1509_v11  ;;  %v1531_v9 = vadd.f32 %v1086_v2, %v597_v4 }
 0x116   :  { %v1032_v10 = vpop.f32.mrb[16].mxu0  ;;  %v1533_v12 = vadd.f32 %v1089_v7, %v600_v8 }
 0x117   :  { %v1033_v13 = vpop.f32.mrb[17].mxu0  ;;  %v1090_v14 = vpop.f32.mrb[16].mxu1 }
 0x118   :  { %v1034_v15 = vadd.f32 %v1033_v13, %v1032_v10  ;;  %v1035_v16 = vpop.f32.mrb[18].mxu0  ;;  %v1091_v17 = vpop.f32.mrb[17].mxu1 }
 0x119   :  { %v1036_v18 = vpop.f32.mrb[19].mxu0  ;;  %v1092_v19 = vadd.f32 %v1091_v17, %v1090_v14  ;;  %v1093_v20 = vpop.f32.mrb[18].mxu1 }
 0x11a   :  { %v605_v21 = vadd.f32 %v1034_v15, %v1509_v11  ;;  %v1037_v22 = vadd.f32 %v1036_v18, %v1035_v16  ;;  %v1094_v23 = vpop.f32.mrb[19].mxu1 }
 0x11b   :  { %v1095_v24 = vadd.f32 %v1094_v23, %v1093_v20 }
 0x11c   :  { %v608_v26 = vadd.f32 %v1037_v22, %v1509_v11  ;;  %v693_v28 = vadd.f32 %v1092_v19, %v605_v21 }
 0x11e   :  { %v1038_v29 = vpop.f32.mrb[20].mxu0  ;;  %v696_v30 = vadd.f32 %v1095_v24, %v608_v26 }
 0x11f   :  { %v1039_v31 = vpop.f32.mrb[21].mxu0  ;;  %v1096_v32 = vpop.f32.mrb[20].mxu1 }
 0x120   :  { %v1040_v33 = vadd.f32 %v1039_v31, %v1038_v29  ;;  %v1041_v34 = vpop.f32.mrb[22].mxu0  ;;  %v1097_v35 = vpop.f32.mrb[21].mxu1 }
 0x121   :  { %v1042_v36 = vpop.f32.mrb[23].mxu0  ;;  %v1098_v37 = vadd.f32 %v1097_v35, %v1096_v32  ;;  %v1099_v38 = vpop.f32.mrb[22].mxu1 }
 0x122   :  { %v613_v39 = vadd.f32 %v1040_v33, %v1509_v11  ;;  %v1043_v40 = vadd.f32 %v1042_v36, %v1041_v34  ;;  %v1100_v42 = vpop.f32.mrb[23].mxu1 }
 0x123   :  { %v1101_v44 = vadd.f32 %v1100_v42, %v1099_v38 }
 0x124   :  { %v616_v45 = vadd.f32 %v1043_v40, %v1509_v11  ;;  %v701_v46 = vadd.f32 %v1098_v37, %v613_v39 }
 0x126   :  { %v1044_v47 = vpop.f32.mrb[24].mxu0  ;;  %v704_v48 = vadd.f32 %v1101_v44, %v616_v45 }
 0x127   :  { %v1045_v49 = vpop.f32.mrb[25].mxu0  ;;  %v1102_v50 = vpop.f32.mrb[24].mxu1 }
 0x128   :  { %v1046_v51 = vadd.f32 %v1045_v49, %v1044_v47  ;;  %v1047_v52 = vpop.f32.mrb[26].mxu0  ;;  %v1103_v53 = vpop.f32.mrb[25].mxu1 }
 0x129   :  { %v1048_v54 = vpop.f32.mrb[27].mxu0  ;;  %v1104_v55 = vadd.f32 %v1103_v53, %v1102_v50  ;;  %v1105_v56 = vpop.f32.mrb[26].mxu1 }
 0x12a   :  { %v621_v58 = vadd.f32 %v1046_v51, %v1509_v11  ;;  %v1106_v60 = vpop.f32.mrb[27].mxu1 }
 0x12c   :  { %v709_v61 = vadd.f32 %v1104_v55, %v621_v58 }
 0x12e   :  { %v748_v62 = vpop.f32.mrb[28].mxu0 }
 0x12f   :  { %v749_v63 = vadd.f32 %v748_v62, %v1513_v25  ;;  %v780_v0 = vpop.f32.mrb[28].mxu1  ;;  %v1129_v1 = vpop.f32.mrb[29].mxu0 }
 0x130   :  { %v781_v2 = vadd.f32 %v780_v0, %v693_v28  ;;  %v1145_v3 = vpop.f32.mrb[29].mxu1  ;;  %v751_v4 = vpop.f32.mrb[30].mxu0 }
 0x131   :  { %v802_v5 = vmax.f32 %v749_v63, 0.0  ;;  %v752_v6 = vadd.f32 %v751_v4, %v1515_v27  ;;  %v783_v7 = vpop.f32.mrb[30].mxu1  ;;  %v1130_v8 = vpop.f32.mrb[31].mxu0 }
 0x132   :  { %v810_v10 = vmax.f32 %v781_v2, 0.0  ;;  %v784_v13 = vadd.f32 %v783_v7, %v696_v30  ;;  %v1146_v14 = vpop.f32.mrb[31].mxu1 }
 0x133   :  { %v979_v11 = vpack.c.bf16 %v802_v5, %v802_v5  ;;  %v803_v15 = vmax.f32 %v752_v6, 0.0 }
 0x134   :  { %v987_v16 = vpack.c.bf16 %v810_v10, %v810_v10  ;;  %v811_v17 = vmax.f32 %v784_v13, 0.0 }
 0x135   :  { %869 = vst.msk [vmem:[%s1602_s3] sm:$0xf] %vm868_vm2, %v979_v11  ;;  %v980_v25 = vpack.c.bf16 %v803_v15, %v803_v15 }
 0x136   :  { %877 = vst.msk [vmem:[%s1602_s3 + $0x20] sm:$0xf] %vm868_vm2, %v987_v16  ;;  %v988_v27 = vpack.c.bf16 %v811_v17, %v811_v17  ;;  %v756_v18 = vpop.f32.mrb[32].mxu0 }
 0x137   :  { %870 = vst.msk [vmem:[%s1602_s3 + $0x4] sm:$0xf] %vm868_vm2, %v980_v25  ;;  %v757_v19 = vadd.f32 %v756_v18, %v1519_v41  ;;  %v788_v20 = vpop.f32.mrb[32].mxu1  ;;  %v1133_v21 = vpop.f32.mrb[33].mxu0 }
 0x138   :  { %878 = vst.msk [vmem:[%s1602_s3 + $0x24] sm:$0xf] %vm868_vm2, %v988_v27  ;;  %v789_v22 = vadd.f32 %v788_v20, %v701_v46  ;;  %v1149_v23 = vpop.f32.mrb[33].mxu1  ;;  %v759_v24 = vpop.f32.mrb[34].mxu0 }
 0x139   :  { %v804_v26 = vmax.f32 %v757_v19, 0.0  ;;  %v760_v28 = vadd.f32 %v759_v24, %v1521_v43  ;;  %v791_v29 = vpop.f32.mrb[34].mxu1  ;;  %v1134_v30 = vpop.f32.mrb[35].mxu0 }
 0x13a   :  { %v812_v31 = vmax.f32 %v789_v22, 0.0  ;;  %v792_v32 = vadd.f32 %v791_v29, %v704_v48  ;;  %v1150_v33 = vpop.f32.mrb[35].mxu1 }
 0x13b   :  { %v981_v34 = vpack.c.bf16 %v804_v26, %v804_v26  ;;  %v805_v41 = vmax.f32 %v760_v28, 0.0 }
 0x13c   :  { %v989_v35 = vpack.c.bf16 %v812_v31, %v812_v31  ;;  %v813_v36 = vmax.f32 %v792_v32, 0.0 }
 0x13d   :  { %871 = vst.msk [vmem:[%s1602_s3 + $0x8] sm:$0xf] %vm868_vm2, %v981_v34  ;;  %v982_v37 = vpack.c.bf16 %v805_v41, %v805_v41 }
 0x13e   :  { %879 = vst.msk [vmem:[%s1602_s3 + $0x28] sm:$0xf] %vm868_vm2, %v989_v35  ;;  %v990_v43 = vpack.c.bf16 %v813_v36, %v813_v36  ;;  %v764_v38 = vpop.f32.mrb[36].mxu0 }
 0x13f   :  { %872 = vst.msk [vmem:[%s1602_s3 + $0xc] sm:$0xf] %vm868_vm2, %v982_v37  ;;  %v765_v39 = vadd.f32 %v764_v38, %v1525_v57  ;;  %v796_v40 = vpop.f32.mrb[36].mxu1  ;;  %v1137_v42 = vpop.f32.mrb[37].mxu0 }
 0x140   :  { %880 = vst.msk [vmem:[%s1602_s3 + $0x2c] sm:$0xf] %vm868_vm2, %v990_v43  ;;  %v797_v44 = vadd.f32 %v796_v40, %v709_v61  ;;  %v767_v45 = vpop.f32.mrb[38].mxu0  ;;  %v1153_v46 = vpop.f32.mrb[37].mxu1 }
 0x141   :  { %v806_v47 = vmax.f32 %v765_v39, 0.0  ;;  %v768_v48 = vadd.f32 %v767_v45, %v1527_v59  ;;  %v1138_v49 = vpop.f32.mrb[39].mxu0  ;;  %v799_v50 = vpop.f32.mrb[38].mxu1 }
 0x142   :  { %v814_v51 = vmax.f32 %v797_v44, 0.0  ;;  %v1154_v52 = vpop.f32.mrb[39].mxu1 }
 0x143   :  { %v983_v53 = vpack.c.bf16 %v806_v47, %v806_v47  ;;  %v807_v57 = vmax.f32 %v768_v48, 0.0 }
 0x144   :  { %v991_v54 = vpack.c.bf16 %v814_v51, %v814_v51 }
 0x145   :  { %873 = vst.msk [vmem:[%s1602_s3 + $0x10] sm:$0xf] %vm868_vm2, %v983_v53  ;;  %v984_v55 = vpack.c.bf16 %v807_v57, %v807_v57 }
 0x146   :  { %882 = vst.msk [vmem:[%s1602_s3 + $0x30] sm:$0x1] %vm881_vm3, %v991_v54  ;;  %v772_v56 = vpop.f32.mrb[40].mxu0 }
 0x147   :  { %874 = vst.msk [vmem:[%s1602_s3 + $0x14] sm:$0xf] %vm868_vm2, %v984_v55  ;;  %v773_v59 = vadd.f32 %v772_v56, %v1531_v9  ;;  %v1141_v58 = vpop.f32.mrb[41].mxu0 }
 0x148   :  { %v775_v60 = vpop.f32.mrb[42].mxu0 }
 0x149   :  { %v808_v61 = vmax.f32 %v773_v59, 0.0  ;;  %v776_v62 = vadd.f32 %v775_v60, %v1533_v12  ;;  %v1142_v63 = vpop.f32.mrb[43].mxu0 }
 0x14b   :  { %v985_v0 = vpack.c.bf16 %v808_v61, %v808_v61  ;;  %v809_v1 = vmax.f32 %v776_v62, 0.0 }
 0x14d   :  { %875 = vst.msk [vmem:[%s1602_s3 + $0x18] sm:$0xf] %vm868_vm2, %v985_v0  ;;  %v986_v2 = vpack.c.bf16 %v809_v1, %v809_v1 }
 0x14f   :  { %876 = vst.msk [vmem:[%s1602_s3 + $0x1c] sm:$0xf] %vm868_vm2, %v986_v2 }

// kernel: cnn_forward.7
= control target key start
LH: loop header
LB: loop body
LE: loop exit
PB: predicated region body
PF: predicated region fallthrough
CT: control target
= control target key end

     0   :  { %v1596_v36 = vlaneseq  ;;  %v15654_v37 = vmov 1966171168   ;;  %vm8876_vm0 = vcmask 523264   ;;  %s20308_s0 = inlined_call_operand.vmem [shape: bf16[2,3136], index: 0, kind: input, shape index: {}]   ;;  %s20309_s1 = inlined_call_operand.vmem [shape: bf16[3136,896], index: 1, kind: input, shape index: {}]   ;;  %s20310_s2 = inlined_call_operand.vmem [shape: f32[1,896], index: 2, kind: input, shape index: {}]   ;;  %s20311_s3 = inlined_call_operand.vmem [shape: bf16[896,3], index: 3, kind: input, shape index: {}]   ;;  %s20312_s4 = inlined_call_operand.vmem [shape: f32[1,3], index: 4, kind: input, shape index: {}]   ;;  %s20313_s5 = inlined_call_operand.hbm [shape: f32[2,3], index: 5, kind: output, shape index: {}]  }
   0x1   :  { %v13607_v0 = vld [vmem:[%s20309_s1 + $0x4] ss:$28 sps:$4 sm:$0xff]   ;;  %v13613_v4 = vld [vmem:[%s20309_s1 + $0x3c] ss:$28 sps:$4 sm:$0xff]   ;;  %v13619_v8 = vld [vmem:[%s20309_s1 + $0x74] ss:$28 sps:$4 sm:$0xff]   ;;  %v1637_v38 = vunpack.c.l.s4 %v15654_v37 }
   0x2   :  { %v13609_v1 = vld [vmem:[%s20309_s1 + $0x704] ss:$28 sps:$4 sm:$0xff]   ;;  %8880 = vmatprep.subr.bf16.mxu1 %v13607_v0  ;;  %v13615_v5 = vld [vmem:[%s20309_s1 + $0x73c] ss:$28 sps:$4 sm:$0xff]   ;;  %v13621_v9 = vld [vmem:[%s20309_s1 + $0x774] ss:$28 sps:$4 sm:$0xff]  }
   0x3   :  { %v13611_v2 = vld [vmem:[%s20309_s1] ss:$28 sps:$4 sm:$0xff]   ;;  %8962 = vmatprep.subr.bf16.mxu0 %v13609_v1  ;;  %v13617_v6 = vld [vmem:[%s20309_s1 + $0x38] ss:$28 sps:$4 sm:$0xff]   ;;  %v13623_v10 = vld [vmem:[%s20309_s1 + $0x70] ss:$28 sps:$4 sm:$0xff]   ;;  %v1638_v43 = vunpack.c.0.s8 %v1637_v38 }
   0x4   :  { %v13612_v3 = vld [vmem:[%s20309_s1 + $0x700] ss:$28 sps:$4 sm:$0xff]   ;;  %8881 = vmatpush1.bf16.msra.mxu1 %v13611_v2  ;;  %v13618_v7 = vld [vmem:[%s20309_s1 + $0x738] ss:$28 sps:$4 sm:$0xff]   ;;  %v13624_v11 = vld [vmem:[%s20309_s1 + $0x770] ss:$28 sps:$4 sm:$0xff]  }
   0x5   :  { %8963 = vmatpush1.bf16.msra.mxu0 %v13612_v3  ;;  %8882 = vmatprep.subr.bf16.mxu1 %v13613_v4  ;;  %v13625_v12 = vld [vmem:[%s20309_s1 + $0xac] ss:$28 sps:$4 sm:$0xff]   ;;  %v13631_v16 = vld [vmem:[%s20309_s1 + $0xe4] ss:$28 sps:$4 sm:$0xff]   ;;  %v13637_v20 = vld [vmem:[%s20309_s1 + $0x11c] ss:$28 sps:$4 sm:$0xff]  }
   0x6   :  { %8964 = vmatprep.subr.bf16.mxu0 %v13615_v5  ;;  %v13627_v13 = vld [vmem:[%s20309_s1 + $0x7ac] ss:$28 sps:$4 sm:$0xff]   ;;  %v13633_v17 = vld [vmem:[%s20309_s1 + $0x7e4] ss:$28 sps:$4 sm:$0xff]   ;;  %v13639_v21 = vld [vmem:[%s20309_s1 + $0x81c] ss:$28 sps:$4 sm:$0xff]  }
   0x7   :  { %v13629_v14 = vld [vmem:[%s20309_s1 + $0xa8] ss:$28 sps:$4 sm:$0xff]   ;;  %v13635_v18 = vld [vmem:[%s20309_s1 + $0xe0] ss:$28 sps:$4 sm:$0xff]   ;;  %v13641_v22 = vld [vmem:[%s20309_s1 + $0x118] ss:$28 sps:$4 sm:$0xff]  }
   0x8   :  { %8883 = vmatpush1.bf16.msra.mxu1 %v13617_v6  ;;  %v13630_v15 = vld [vmem:[%s20309_s1 + $0x7a8] ss:$28 sps:$4 sm:$0xff]   ;;  %v13636_v19 = vld [vmem:[%s20309_s1 + $0x7e0] ss:$28 sps:$4 sm:$0xff]   ;;  %v13642_v23 = vld [vmem:[%s20309_s1 + $0x818] ss:$28 sps:$4 sm:$0xff]  }
   0x9   :  { %8965 = vmatpush1.bf16.msra.mxu0 %v13618_v7  ;;  %8884 = vmatprep.subr.bf16.mxu1 %v13619_v8  ;;  %v13643_v24 = vld [vmem:[%s20309_s1 + $0x154] ss:$28 sps:$4 sm:$0xff]   ;;  %v13649_v28 = vld [vmem:[%s20309_s1 + $0x18c] ss:$28 sps:$4 sm:$0xff]   ;;  %v13655_v32 = vld [vmem:[%s20309_s1 + $0x1c4] ss:$28 sps:$4 sm:$0xff]  }
   0xa   :  { %8966 = vmatprep.subr.bf16.mxu0 %v13621_v9  ;;  %v13645_v25 = vld [vmem:[%s20309_s1 + $0x854] ss:$28 sps:$4 sm:$0xff]   ;;  %v13651_v29 = vld [vmem:[%s20309_s1 + $0x88c] ss:$28 sps:$4 sm:$0xff]   ;;  %v13657_v33 = vld [vmem:[%s20309_s1 + $0x8c4] ss:$28 sps:$4 sm:$0xff]  }
   0xb   :  { %v13647_v26 = vld [vmem:[%s20309_s1 + $0x150] ss:$28 sps:$4 sm:$0xff]   ;;  %v13653_v30 = vld [vmem:[%s20309_s1 + $0x188] ss:$28 sps:$4 sm:$0xff]   ;;  %v13659_v34 = vld [vmem:[%s20309_s1 + $0x1c0] ss:$28 sps:$4 sm:$0xff]  }
   0xc   :  { %8885 = vmatpush1.bf16.msra.mxu1 %v13623_v10  ;;  %v13648_v27 = vld [vmem:[%s20309_s1 + $0x850] ss:$28 sps:$4 sm:$0xff]   ;;  %v13654_v31 = vld [vmem:[%s20309_s1 + $0x888] ss:$28 sps:$4 sm:$0xff]   ;;  %v13660_v35 = vld [vmem:[%s20309_s1 + $0x8c0] ss:$28 sps:$4 sm:$0xff]  }
   0xd   :  { %8967 = vmatpush1.bf16.msra.mxu0 %v13624_v11  ;;  %8886 = vmatprep.subr.bf16.mxu1 %v13625_v12  ;;  %v13661_v39 = vld [vmem:[%s20309_s1 + $0x1fc] ss:$28 sps:$4 sm:$0xff]   ;;  %v15806_v42 = vshrl.u32 %v1596_v36, 7  ;;  %v13667_v45 = vld [vmem:[%s20309_s1 + $0x234] ss:$28 sps:$4 sm:$0xff]   ;;  %v22_v52 = vld [vmem:[%s20308_s0] sm:$0xff] }
   0xe   :  { %8968 = vmatprep.subr.bf16.mxu0 %v13627_v13  ;;  %v13663_v40 = vld [vmem:[%s20309_s1 + $0x8fc] ss:$28 sps:$4 sm:$0xff]   ;;  %v13669_v46 = vld [vmem:[%s20309_s1 + $0x934] ss:$28 sps:$4 sm:$0xff]   ;;  %v13673_v50 = vld [vmem:[%s20309_s1 + $0x26c] ss:$28 sps:$4 sm:$0xff]   ;;  %v1635_v55 = vcombine.high %v22_v52, %v22_v52 }
   0xf   :  { %v13665_v41 = vld [vmem:[%s20309_s1 + $0x1f8] ss:$28 sps:$4 sm:$0xff]   ;;  %v13671_v47 = vld [vmem:[%s20309_s1 + $0x230] ss:$28 sps:$4 sm:$0xff]   ;;  %v15824_v49 = vsub.s32 %v1638_v43, %v15806_v42  ;;  %v13677_v53 = vld [vmem:[%s20309_s1 + $0x268] ss:$28 sps:$4 sm:$0xff]  }
  0x10   :  { %8887 = vmatpush1.bf16.msra.mxu1 %v13629_v14  ;;  %v13666_v44 = vld [vmem:[%s20309_s1 + $0x8f8] ss:$28 sps:$4 sm:$0xff]   ;;  %v13672_v48 = vld [vmem:[%s20309_s1 + $0x930] ss:$28 sps:$4 sm:$0xff]   ;;  %v13678_v56 = vld [vmem:[%s20309_s1 + $0x968] ss:$28 sps:$4 sm:$0xff]  }
  0x11   :  { %8969 = vmatpush1.bf16.msra.mxu0 %v13630_v15  ;;  %8888 = vmatprep.subr.bf16.mxu1 %v13631_v16  ;;  %v13675_v51 = vld [vmem:[%s20309_s1 + $0x96c] ss:$28 sps:$4 sm:$0xff]   ;;  %v1642_v54 = vrot.slane %v22_v52, %v15824_v49  ;;  %v13679_v57 = vld [vmem:[%s20309_s1 + $0x2a4] ss:$28 sps:$4 sm:$0xff]   ;;  %v1649_v60 = vrot.slane %v1635_v55, %v15824_v49  ;;  %v13685_v1 = vld [vmem:[%s20309_s1 + $0x2dc] ss:$28 sps:$4 sm:$0xff]  }
  0x12   :  { %8970 = vmatprep.subr.bf16.mxu0 %v13633_v17  ;;  %v13681_v58 = vld [vmem:[%s20309_s1 + $0x9a4] ss:$28 sps:$4 sm:$0xff]   ;;  %v13687_v2 = vld [vmem:[%s20309_s1 + $0x9dc] ss:$28 sps:$4 sm:$0xff]   ;;  %v13691_v6 = vld [vmem:[%s20309_s1 + $0x314] ss:$28 sps:$4 sm:$0xff]  }
  0x13   :  { %v1650_v59 = vcombine.high %v1642_v54, %v1642_v54  ;;  %v13683_v61 = vld [vmem:[%s20309_s1 + $0x2a0] ss:$28 sps:$4 sm:$0xff]   ;;  %v1651_v63 = vcombine.high %v1649_v60, %v1649_v60  ;;  %v13689_v4 = vld [vmem:[%s20309_s1 + $0x2d8] ss:$28 sps:$4 sm:$0xff]   ;;  %v13695_v8 = vld [vmem:[%s20309_s1 + $0x310] ss:$28 sps:$4 sm:$0xff]   ;;  %v15909_v17 = vrot.slane %v1642_v54, %v15824_v49 }
  0x14   :  { %8889 = vmatpush1.bf16.msra.mxu1 %v13635_v18  ;;  %v13684_v0 = vld [vmem:[%s20309_s1 + $0x9a0] ss:$28 sps:$4 sm:$0xff]   ;;  %v13690_v5 = vld [vmem:[%s20309_s1 + $0x9d8] ss:$28 sps:$4 sm:$0xff]   ;;  %v13696_v9 = vld [vmem:[%s20309_s1 + $0xa10] ss:$28 sps:$4 sm:$0xff]   ;;  %v15912_v18 = vrot.slane %v1649_v60, %v15824_v49 }
  0x15   :  { %8971 = vmatpush1.bf16.msra.mxu0 %v13636_v19  ;;  %8890 = vmatprep.subr.bf16.mxu1 %v13637_v20  ;;  %v15853_v62 = vrot.slane %v1650_v59, %v15824_v49  ;;  %v15865_v3 = vrot.slane %v1651_v63, %v15824_v49  ;;  %v13693_v7 = vld [vmem:[%s20309_s1 + $0xa14] ss:$28 sps:$4 sm:$0xff]   ;;  %v13697_v10 = vld [vmem:[%s20309_s1 + $0x34c] ss:$28 sps:$4 sm:$0xff]   ;;  %v13705_v14 = vld [vmem:[%s20309_s1 + $0x384] ss:$28 sps:$4 sm:$0xff]  }
  0x16   :  { %8972 = vmatprep.subr.bf16.mxu0 %v13639_v21  ;;  %v13699_v11 = vld [vmem:[%s20309_s1 + $0xa4c] ss:$28 sps:$4 sm:$0xff]   ;;  %v13709_v15 = vld [vmem:[%s20309_s1 + $0xa84] ss:$28 sps:$4 sm:$0xff]   ;;  %v13712_v20 = vld [vmem:[%s20309_s1 + $0x3bc] ss:$28 sps:$4 sm:$0xff]  }
  0x17   :  { %8912 = vmatprep.mubr.bf16.mxu1 %v15853_v62  ;;  %8994 = vmatprep.mubr.bf16.mxu0 %v15865_v3  ;;  %v13701_v12 = vld [vmem:[%s20309_s1 + $0x348] ss:$28 sps:$4 sm:$0xff]   ;;  %v13703_v16 = vld [vmem:[%s20309_s1 + $0x380] ss:$28 sps:$4 sm:$0xff]   ;;  %v13742_v43 = vld [vmem:[%s20309_s1 + $0x4d4] ss:$28 sps:$4 sm:$0xff]  }
  0x18   :  { %8891 = vmatpush1.bf16.msra.mxu1 %v13641_v22  ;;  %v13702_v13 = vld [vmem:[%s20309_s1 + $0xa48] ss:$28 sps:$4 sm:$0xff]   ;;  %v13707_v19 = vld [vmem:[%s20309_s1 + $0xa80] ss:$28 sps:$4 sm:$0xff]   ;;  %v15925_v22 = vcombine.high %v15853_v62, %v15853_v62  ;;  %v13761_v59 = vld [vmem:[%s20309_s1 + $0xc78] ss:$28 sps:$4 sm:$0xff]  }
  0x19   :  { %8973 = vmatpush1.bf16.msra.mxu0 %v13642_v23  ;;  %8892 = vmatprep.subr.bf16.mxu1 %v13643_v24  ;;  %v13715_v21 = vld [vmem:[%s20309_s1 + $0xabc] ss:$28 sps:$4 sm:$0xff]   ;;  %v15929_v23 = vcombine.high %v15865_v3, %v15865_v3  ;;  %v13754_v52 = vld [vmem:[%s20309_s1 + $0x544] ss:$28 sps:$4 sm:$0xff]   ;;  %v13766_v60 = vld [vmem:[%s20309_s1 + $0x5b4] ss:$28 sps:$4 sm:$0xff]  }
  0x1a   :  { %8974 = vmatprep.subr.bf16.mxu0 %v13645_v25  ;;  %v13710_v24 = vld [vmem:[%s20309_s1 + $0x3b8] ss:$28 sps:$4 sm:$0xff]   ;;  %v13728_v36 = vld [vmem:[%s20309_s1 + $0x460] ss:$28 sps:$4 sm:$0xff]   ;;  %v13764_v63 = vld [vmem:[%s20309_s1 + $0x5b0] ss:$28 sps:$4 sm:$0xff]  }
  0x1b   :  { %v13713_v25 = vld [vmem:[%s20309_s1 + $0xab8] ss:$28 sps:$4 sm:$0xff]   ;;  %v13731_v37 = vld [vmem:[%s20309_s1 + $0xb60] ss:$28 sps:$4 sm:$0xff]  }
  0x1c   :  { %8893 = vmatpush1.bf16.msra.mxu1 %v13647_v26  ;;  %v13718_v26 = vld [vmem:[%s20309_s1 + $0x3f4] ss:$28 sps:$4 sm:$0xff]   ;;  %v13736_v38 = vld [vmem:[%s20309_s1 + $0x49c] ss:$28 sps:$4 sm:$0xff]  }
  0x1d   :  { %8975 = vmatpush1.bf16.msra.mxu0 %v13648_v27  ;;  %8894 = vmatprep.subr.bf16.mxu1 %v13649_v28  ;;  %v13721_v27 = vld [vmem:[%s20309_s1 + $0xaf4] ss:$28 sps:$4 sm:$0xff]   ;;  %v13752_v54 = vld [vmem:[%s20309_s1 + $0x540] ss:$28 sps:$4 sm:$0xff]  }
  0x1e   :  { %8976 = vmatprep.subr.bf16.mxu0 %v13651_v29  ;;  %v13716_v28 = vld [vmem:[%s20309_s1 + $0x3f0] ss:$28 sps:$4 sm:$0xff]   ;;  %v13755_v55 = vld [vmem:[%s20309_s1 + $0xc40] ss:$28 sps:$4 sm:$0xff]  }
  0x1f   :  { %v13719_v29 = vld [vmem:[%s20309_s1 + $0xaf0] ss:$28 sps:$4 sm:$0xff]  }
  0x20   :  { %8895 = vmatpush1.bf16.msra.mxu1 %v13653_v30  ;;  %v13724_v30 = vld [vmem:[%s20309_s1 + $0x42c] ss:$28 sps:$4 sm:$0xff]  }
  0x21   :  { %8977 = vmatpush1.bf16.msra.mxu0 %v13654_v31  ;;  %8896 = vmatprep.subr.bf16.mxu1 %v13655_v32  ;;  %v13727_v31 = vld [vmem:[%s20309_s1 + $0xb2c] ss:$28 sps:$4 sm:$0xff]  }
  0x22   :  { %8978 = vmatprep.subr.bf16.mxu0 %v13657_v33  ;;  %v13722_v32 = vld [vmem:[%s20309_s1 + $0x428] ss:$28 sps:$4 sm:$0xff]  }
  0x23   :  { %v13725_v33 = vld [vmem:[%s20309_s1 + $0xb28] ss:$28 sps:$4 sm:$0xff]  }
  0x24   :  { %8897 = vmatpush1.bf16.msra.mxu1 %v13659_v34  ;;  %v13730_v34 = vld [vmem:[%s20309_s1 + $0x464] ss:$28 sps:$4 sm:$0xff]  }
  0x25   :  { %8979 = vmatpush1.bf16.msra.mxu0 %v13660_v35  ;;  %8898 = vmatprep.subr.bf16.mxu1 %v13661_v39  ;;  %v13733_v35 = vld [vmem:[%s20309_s1 + $0xb64] ss:$28 sps:$4 sm:$0xff]   ;;  %v13739_v39 = vld [vmem:[%s20309_s1 + $0xb9c] ss:$28 sps:$4 sm:$0xff]  }
  0x26   :  { %8980 = vmatprep.subr.bf16.mxu0 %v13663_v40  ;;  %v13734_v40 = vld [vmem:[%s20309_s1 + $0x498] ss:$28 sps:$4 sm:$0xff]  }
  0x28   :  { %8899 = vmatpush1.bf16.msra.mxu1 %v13665_v41  ;;  %v13737_v41 = vld [vmem:[%s20309_s1 + $0xb98] ss:$28 sps:$4 sm:$0xff]  }
  0x29   :  { %8981 = vmatpush1.bf16.msra.mxu0 %v13666_v44  ;;  %8900 = vmatprep.subr.bf16.mxu1 %v13667_v45  ;;  %v13745_v44 = vld [vmem:[%s20309_s1 + $0xbd4] ss:$28 sps:$4 sm:$0xff]  }
  0x2a   :  { %8982 = vmatprep.subr.bf16.mxu0 %v13669_v46  ;;  %v13740_v45 = vld [vmem:[%s20309_s1 + $0x4d0] ss:$28 sps:$4 sm:$0xff]  }
  0x2b   :  { %v13743_v46 = vld [vmem:[%s20309_s1 + $0xbd0] ss:$28 sps:$4 sm:$0xff]  }
  0x2c   :  { %8901 = vmatpush1.bf16.msra.mxu1 %v13671_v47  ;;  %v13748_v47 = vld [vmem:[%s20309_s1 + $0x50c] ss:$28 sps:$4 sm:$0xff]  }
  0x2d   :  { %8983 = vmatpush1.bf16.msra.mxu0 %v13672_v48  ;;  %8902 = vmatprep.subr.bf16.mxu1 %v13673_v50  ;;  %v13751_v48 = vld [vmem:[%s20309_s1 + $0xc0c] ss:$28 sps:$4 sm:$0xff]  }
  0x2e   :  { %8984 = vmatprep.subr.bf16.mxu0 %v13675_v51  ;;  %v13746_v50 = vld [vmem:[%s20309_s1 + $0x508] ss:$28 sps:$4 sm:$0xff]  }
  0x2f   :  { %v13749_v51 = vld [vmem:[%s20309_s1 + $0xc08] ss:$28 sps:$4 sm:$0xff]  }
  0x30   :  { %8903 = vmatpush1.bf16.msra.mxu1 %v13677_v53  ;;  %v13757_v53 = vld [vmem:[%s20309_s1 + $0xc44] ss:$28 sps:$4 sm:$0xff]  }
  0x31   :  { %8985 = vmatpush1.bf16.msra.mxu0 %v13678_v56  ;;  %8904 = vmatprep.subr.bf16.mxu1 %v13679_v57  ;;  %v13760_v56 = vld [vmem:[%s20309_s1 + $0x57c] ss:$28 sps:$4 sm:$0xff]  }
  0x32   :  { %8986 = vmatprep.subr.bf16.mxu0 %v13681_v58  ;;  %v13763_v57 = vld [vmem:[%s20309_s1 + $0xc7c] ss:$28 sps:$4 sm:$0xff]  }
  0x33   :  { %v13758_v58 = vld [vmem:[%s20309_s1 + $0x578] ss:$28 sps:$4 sm:$0xff]  }
  0x34   :  { %8905 = vmatpush1.bf16.msra.mxu1 %v13683_v61  ;;  %v13769_v61 = vld [vmem:[%s20309_s1 + $0xcb4] ss:$28 sps:$4 sm:$0xff]  }
  0x35   :  { %8987 = vmatpush1.bf16.msra.mxu0 %v13684_v0  ;;  %8906 = vmatprep.subr.bf16.mxu1 %v13685_v1  ;;  %v13767_v0 = vld [vmem:[%s20309_s1 + $0xcb0] ss:$28 sps:$4 sm:$0xff]  }
  0x36   :  { %8988 = vmatprep.subr.bf16.mxu0 %v13687_v2  ;;  %v13772_v1 = vld [vmem:[%s20309_s1 + $0x5ec] ss:$28 sps:$4 sm:$0xff]  }
  0x37   :  { %v13775_v2 = vld [vmem:[%s20309_s1 + $0xcec] ss:$28 sps:$4 sm:$0xff]  }
  0x38   :  { %8907 = vmatpush1.bf16.msra.mxu1 %v13689_v4  ;;  %v13770_v4 = vld [vmem:[%s20309_s1 + $0x5e8] ss:$28 sps:$4 sm:$0xff]  }
  0x39   :  { %8989 = vmatpush1.bf16.msra.mxu0 %v13690_v5  ;;  %8908 = vmatprep.subr.bf16.mxu1 %v13691_v6  ;;  %v13773_v5 = vld [vmem:[%s20309_s1 + $0xce8] ss:$28 sps:$4 sm:$0xff]  }
  0x3a   :  { %8990 = vmatprep.subr.bf16.mxu0 %v13693_v7  ;;  %v13778_v6 = vld [vmem:[%s20309_s1 + $0x624] ss:$28 sps:$4 sm:$0xff]  }
  0x3b   :  { %v13781_v7 = vld [vmem:[%s20309_s1 + $0xd24] ss:$28 sps:$4 sm:$0xff]  }
  0x3c   :  { %8909 = vmatpush1.bf16.msra.mxu1 %v13695_v8  ;;  %v13776_v8 = vld [vmem:[%s20309_s1 + $0x620] ss:$28 sps:$4 sm:$0xff]  }
  0x3d   :  { %8991 = vmatpush1.bf16.msra.mxu0 %v13696_v9  ;;  %8910 = vmatprep.subr.bf16.mxu1 %v13697_v10  ;;  %v13779_v9 = vld [vmem:[%s20309_s1 + $0xd20] ss:$28 sps:$4 sm:$0xff]  }
  0x3e   :  { %8992 = vmatprep.subr.bf16.mxu0 %v13699_v11  ;;  %v13784_v10 = vld [vmem:[%s20309_s1 + $0x65c] ss:$28 sps:$4 sm:$0xff]  }
  0x3f   :  { %v13787_v11 = vld [vmem:[%s20309_s1 + $0xd5c] ss:$28 sps:$4 sm:$0xff]  }
  0x40   :  { %8911 = vmatpush1.bf16.msra.mxu1 %v13701_v12  ;;  %v13782_v12 = vld [vmem:[%s20309_s1 + $0x658] ss:$28 sps:$4 sm:$0xff]  }
  0x41   :  { %8993 = vmatpush1.bf16.msra.mxu0 %v13702_v13  ;;  %8921 = vmatprep.subr.bf16.mxu1 %v13705_v14  ;;  %v13785_v13 = vld [vmem:[%s20309_s1 + $0xd58] ss:$28 sps:$4 sm:$0xff]  }
  0x42   :  { %9003 = vmatprep.subr.bf16.mxu0 %v13709_v15  ;;  %v13790_v14 = vld [vmem:[%s20309_s1 + $0x694] ss:$28 sps:$4 sm:$0xff]  }
  0x43   :  { %8913 = vmatmul.mubr.bf16.vlgmr.msra.gmra.mrb[0].mxu1 %v15909_v17  ;;  %v13793_v15 = vld [vmem:[%s20309_s1 + $0xd94] ss:$28 sps:$4 sm:$0xff]  }
  0x44   :  { %8995 = vmatmul.mubr.bf16.vlgmr.msra.gmra.mrb[0].mxu0 %v15912_v18  ;;  %8922 = vmatpush1.bf16.msra.mxu1 %v13703_v16  ;;  %v13788_v16 = vld [vmem:[%s20309_s1 + $0x690] ss:$28 sps:$4 sm:$0xff]  }
  0x45   :  { %9004 = vmatpush1.bf16.msra.mxu0 %v13707_v19  ;;  %8923 = vmatprep.subr.bf16.mxu1 %v13712_v20  ;;  %v13791_v19 = vld [vmem:[%s20309_s1 + $0xd90] ss:$28 sps:$4 sm:$0xff]  }
  0x46   :  { %9005 = vmatprep.subr.bf16.mxu0 %v13715_v21  ;;  %8953 = vmatprep.mubr.bf16.mxu1 %v15925_v22  ;;  %v13796_v20 = vld [vmem:[%s20309_s1 + $0x6cc] ss:$28 sps:$4 sm:$0xff]  }
  0x47   :  { %9035 = vmatprep.mubr.bf16.mxu0 %v15929_v23  ;;  %v13799_v21 = vld [vmem:[%s20309_s1 + $0xdcc] ss:$28 sps:$4 sm:$0xff]  }
  0x48   :  { %8924 = vmatpush1.bf16.msra.mxu1 %v13710_v24  ;;  %v13794_v24 = vld [vmem:[%s20309_s1 + $0x6c8] ss:$28 sps:$4 sm:$0xff]  }
  0x49   :  { %9006 = vmatpush1.bf16.msra.mxu0 %v13713_v25  ;;  %8925 = vmatprep.subr.bf16.mxu1 %v13718_v26  ;;  %v13797_v25 = vld [vmem:[%s20309_s1 + $0xdc8] ss:$28 sps:$4 sm:$0xff]  }
  0x4a   :  { %9007 = vmatprep.subr.bf16.mxu0 %v13721_v27  ;;  %v13802_v26 = vld [vmem:[%s20309_s1 + $0xe04] ss:$28 sps:$4 sm:$0xff]   ;;  %v13805_v27 = vld [vmem:[%s20309_s1 + $0xc] ss:$28 sps:$4 sm:$0xff]  }
  0x4c   :  { %8926 = vmatpush1.bf16.msra.mxu1 %v13716_v28  ;;  %v13800_v28 = vld [vmem:[%s20309_s1 + $0xe00] ss:$28 sps:$4 sm:$0xff]  }
  0x4d   :  { %9008 = vmatpush1.bf16.msra.mxu0 %v13719_v29  ;;  %8927 = vmatprep.subr.bf16.mxu1 %v13724_v30  ;;  %v16120_v29 = vcombine.high %v15909_v17, %v15909_v17  ;;  %v16124_v30 = vcombine.high %v15912_v18, %v15912_v18 }
  0x4e   :  { %9009 = vmatprep.subr.bf16.mxu0 %v13727_v31  ;;  %v13803_v31 = vld [vmem:[%s20309_s1 + $0x8] ss:$28 sps:$4 sm:$0xff]  }
  0x50   :  { %8928 = vmatpush1.bf16.msra.mxu1 %v13722_v32  ;;  %v16132_v32 = vld [vmem:[%s20308_s0 + $0x8] sm:$0xff] }
  0x51   :  { %9010 = vmatpush1.bf16.msra.mxu0 %v13725_v33  ;;  %8929 = vmatprep.subr.bf16.mxu1 %v13730_v34  ;;  %v13808_v33 = vld [vmem:[%s20309_s1 + $0xe3c] ss:$28 sps:$4 sm:$0xff]   ;;  %v13811_v34 = vld [vmem:[%s20309_s1 + $0x44] ss:$28 sps:$4 sm:$0xff]  }
  0x52   :  { %9011 = vmatprep.subr.bf16.mxu0 %v13733_v35  ;;  %v16142_v35 = vrot.slane %v16132_v32, %v15824_v49 }
  0x54   :  { %8930 = vmatpush1.bf16.msra.mxu1 %v13728_v36  ;;  %v1699_v36 = vcombine.high %v16142_v35, %v16142_v35 }
  0x55   :  { %9012 = vmatpush1.bf16.msra.mxu0 %v13731_v37  ;;  %8931 = vmatprep.subr.bf16.mxu1 %v13736_v38  ;;  %v13806_v37 = vld [vmem:[%s20309_s1 + $0xe38] ss:$28 sps:$4 sm:$0xff]   ;;  %v13809_v38 = vld [vmem:[%s20309_s1 + $0x40] ss:$28 sps:$4 sm:$0xff]  }
  0x56   :  { %9013 = vmatprep.subr.bf16.mxu0 %v13739_v39  ;;  %v13814_v39 = vld [vmem:[%s20309_s1 + $0xe74] ss:$28 sps:$4 sm:$0xff]  }
  0x58   :  { %8932 = vmatpush1.bf16.msra.mxu1 %v13734_v40  ;;  %v13817_v40 = vld [vmem:[%s20309_s1 + $0x7c] ss:$28 sps:$4 sm:$0xff]  }
  0x59   :  { %9014 = vmatpush1.bf16.msra.mxu0 %v13737_v41  ;;  %8933 = vmatprep.subr.bf16.mxu1 %v13742_v43  ;;  %v16161_v41 = vrot.slane %v1699_v36, %v15824_v49  ;;  %v13812_v43 = vld [vmem:[%s20309_s1 + $0xe70] ss:$28 sps:$4 sm:$0xff]  }
  0x5a   :  { %9015 = vmatprep.subr.bf16.mxu0 %v13745_v44  ;;  %v13815_v44 = vld [vmem:[%s20309_s1 + $0x78] ss:$28 sps:$4 sm:$0xff]  }
  0x5b   :  { %v13886_v36 = vld [vmem:[%s20309_s1 + $0x1114] ss:$28 sps:$4 sm:$0xff]  }
  0x5c   :  { %8934 = vmatpush1.bf16.msra.mxu1 %v13740_v45  ;;  %v13820_v45 = vld [vmem:[%s20309_s1 + $0xeac] ss:$28 sps:$4 sm:$0xff]  }
  0x5d   :  { %9016 = vmatpush1.bf16.msra.mxu0 %v13743_v46  ;;  %8935 = vmatprep.subr.bf16.mxu1 %v13748_v47  ;;  %v13823_v46 = vld [vmem:[%s20309_s1 + $0xb4] ss:$28 sps:$4 sm:$0xff]   ;;  %v13818_v47 = vld [vmem:[%s20309_s1 + $0xea8] ss:$28 sps:$4 sm:$0xff]  }
  0x5e   :  { %9017 = vmatprep.subr.bf16.mxu0 %v13751_v48  ;;  %v13821_v48 = vld [vmem:[%s20309_s1 + $0xb0] ss:$28 sps:$4 sm:$0xff]  }
  0x60   :  { %8936 = vmatpush1.bf16.msra.mxu1 %v13746_v50  ;;  %v13826_v50 = vld [vmem:[%s20309_s1 + $0xee4] ss:$28 sps:$4 sm:$0xff]  }
  0x61   :  { %9018 = vmatpush1.bf16.msra.mxu0 %v13749_v51  ;;  %8937 = vmatprep.subr.bf16.mxu1 %v13754_v52  ;;  %v13829_v51 = vld [vmem:[%s20309_s1 + $0xec] ss:$28 sps:$4 sm:$0xff]   ;;  %v13824_v52 = vld [vmem:[%s20309_s1 + $0xee0] ss:$28 sps:$4 sm:$0xff]  }
  0x62   :  { %9019 = vmatprep.subr.bf16.mxu0 %v13757_v53  ;;  %v13827_v53 = vld [vmem:[%s20309_s1 + $0xe8] ss:$28 sps:$4 sm:$0xff]  }
  0x64   :  { %8938 = vmatpush1.bf16.msra.mxu1 %v13752_v54  ;;  %v13832_v54 = vld [vmem:[%s20309_s1 + $0xf1c] ss:$28 sps:$4 sm:$0xff]  }
  0x65   :  { %9020 = vmatpush1.bf16.msra.mxu0 %v13755_v55  ;;  %8939 = vmatprep.subr.bf16.mxu1 %v13760_v56  ;;  %v13835_v55 = vld [vmem:[%s20309_s1 + $0x124] ss:$28 sps:$4 sm:$0xff]   ;;  %v13830_v56 = vld [vmem:[%s20309_s1 + $0xf18] ss:$28 sps:$4 sm:$0xff]  }
  0x66   :  { %9021 = vmatprep.subr.bf16.mxu0 %v13763_v57  ;;  %v13833_v57 = vld [vmem:[%s20309_s1 + $0x120] ss:$28 sps:$4 sm:$0xff]  }
  0x68   :  { %8940 = vmatpush1.bf16.msra.mxu1 %v13758_v58  ;;  %v13838_v58 = vld [vmem:[%s20309_s1 + $0xf54] ss:$28 sps:$4 sm:$0xff]  }
  0x69   :  { %9022 = vmatpush1.bf16.msra.mxu0 %v13761_v59  ;;  %8941 = vmatprep.subr.bf16.mxu1 %v13766_v60  ;;  %v13841_v59 = vld [vmem:[%s20309_s1 + $0x15c] ss:$28 sps:$4 sm:$0xff]   ;;  %v13836_v60 = vld [vmem:[%s20309_s1 + $0xf50] ss:$28 sps:$4 sm:$0xff]  }
  0x6a   :  { %9023 = vmatprep.subr.bf16.mxu0 %v13769_v61  ;;  %v13839_v61 = vld [vmem:[%s20309_s1 + $0x158] ss:$28 sps:$4 sm:$0xff]  }
  0x6c   :  { %8942 = vmatpush1.bf16.msra.mxu1 %v13764_v63  ;;  %v13844_v63 = vld [vmem:[%s20309_s1 + $0xf8c] ss:$28 sps:$4 sm:$0xff]  }
  0x6d   :  { %9024 = vmatpush1.bf16.msra.mxu0 %v13767_v0  ;;  %8943 = vmatprep.subr.bf16.mxu1 %v13772_v1  ;;  %v13847_v0 = vld [vmem:[%s20309_s1 + $0x194] ss:$28 sps:$4 sm:$0xff]   ;;  %v13842_v1 = vld [vmem:[%s20309_s1 + $0xf88] ss:$28 sps:$4 sm:$0xff]  }
  0x6e   :  { %9025 = vmatprep.subr.bf16.mxu0 %v13775_v2  ;;  %v13845_v2 = vld [vmem:[%s20309_s1 + $0x190] ss:$28 sps:$4 sm:$0xff]  }
  0x70   :  { %8944 = vmatpush1.bf16.msra.mxu1 %v13770_v4  ;;  %v13850_v4 = vld [vmem:[%s20309_s1 + $0xfc4] ss:$28 sps:$4 sm:$0xff]  }
  0x71   :  { %9026 = vmatpush1.bf16.msra.mxu0 %v13773_v5  ;;  %8945 = vmatprep.subr.bf16.mxu1 %v13778_v6  ;;  %v13853_v5 = vld [vmem:[%s20309_s1 + $0x1cc] ss:$28 sps:$4 sm:$0xff]   ;;  %v13848_v6 = vld [vmem:[%s20309_s1 + $0xfc0] ss:$28 sps:$4 sm:$0xff]  }
  0x72   :  { %9027 = vmatprep.subr.bf16.mxu0 %v13781_v7  ;;  %v13851_v7 = vld [vmem:[%s20309_s1 + $0x1c8] ss:$28 sps:$4 sm:$0xff]  }
  0x74   :  { %8946 = vmatpush1.bf16.msra.mxu1 %v13776_v8  ;;  %v13856_v8 = vld [vmem:[%s20309_s1 + $0xffc] ss:$28 sps:$4 sm:$0xff]  }
  0x75   :  { %9028 = vmatpush1.bf16.msra.mxu0 %v13779_v9  ;;  %8947 = vmatprep.subr.bf16.mxu1 %v13784_v10  ;;  %v13859_v9 = vld [vmem:[%s20309_s1 + $0x204] ss:$28 sps:$4 sm:$0xff]   ;;  %v13854_v10 = vld [vmem:[%s20309_s1 + $0xff8] ss:$28 sps:$4 sm:$0xff]  }
  0x76   :  { %9029 = vmatprep.subr.bf16.mxu0 %v13787_v11  ;;  %v13857_v11 = vld [vmem:[%s20309_s1 + $0x200] ss:$28 sps:$4 sm:$0xff]  }
  0x78   :  { %8948 = vmatpush1.bf16.msra.mxu1 %v13782_v12  ;;  %v13862_v12 = vld [vmem:[%s20309_s1 + $0x1034] ss:$28 sps:$4 sm:$0xff]  }
  0x79   :  { %9030 = vmatpush1.bf16.msra.mxu0 %v13785_v13  ;;  %8949 = vmatprep.subr.bf16.mxu1 %v13790_v14  ;;  %v13865_v13 = vld [vmem:[%s20309_s1 + $0x23c] ss:$28 sps:$4 sm:$0xff]   ;;  %v13860_v14 = vld [vmem:[%s20309_s1 + $0x1030] ss:$28 sps:$4 sm:$0xff]  }
  0x7a   :  { %9031 = vmatprep.subr.bf16.mxu0 %v13793_v15  ;;  %v13863_v15 = vld [vmem:[%s20309_s1 + $0x238] ss:$28 sps:$4 sm:$0xff]  }
  0x7c   :  { %8950 = vmatpush1.bf16.msra.mxu1 %v13788_v16  ;;  %v13868_v16 = vld [vmem:[%s20309_s1 + $0x106c] ss:$28 sps:$4 sm:$0xff]  }
  0x7d   :  { %9032 = vmatpush1.bf16.msra.mxu0 %v13791_v19  ;;  %8951 = vmatprep.subr.bf16.mxu1 %v13796_v20  ;;  %v13871_v19 = vld [vmem:[%s20309_s1 + $0x274] ss:$28 sps:$4 sm:$0xff]   ;;  %v13866_v20 = vld [vmem:[%s20309_s1 + $0x1068] ss:$28 sps:$4 sm:$0xff]  }
  0x7e   :  { %9033 = vmatprep.subr.bf16.mxu0 %v13799_v21  ;;  %v13869_v21 = vld [vmem:[%s20309_s1 + $0x270] ss:$28 sps:$4 sm:$0xff]  }
  0x80   :  { %8952 = vmatpush1.bf16.msra.mxu1 %v13794_v24  ;;  %v13874_v24 = vld [vmem:[%s20309_s1 + $0x10a4] ss:$28 sps:$4 sm:$0xff]  }
  0x81   :  { %9034 = vmatpush1.bf16.msra.mxu0 %v13797_v25  ;;  %9413 = vmatprep.subr.bf16.mxu1 %v13805_v27  ;;  %v13877_v25 = vld [vmem:[%s20309_s1 + $0x2ac] ss:$28 sps:$4 sm:$0xff]  }
  0x82   :  { %9044 = vmatprep.subr.bf16.mxu0 %v13802_v26  ;;  %v13872_v26 = vld [vmem:[%s20309_s1 + $0x10a0] ss:$28 sps:$4 sm:$0xff]   ;;  %v13875_v27 = vld [vmem:[%s20309_s1 + $0x2a8] ss:$28 sps:$4 sm:$0xff]  }
  0x83   :  { %8954 = vmatmul.mubr.bf16.vlgmr.msra.gmra.mrb[0].mxu1 %v16120_v29 }
  0x84   :  { %9036 = vmatmul.mubr.bf16.vlgmr.msra.gmra.mrb[0].mxu0 %v16124_v30  ;;  %9414 = vmatpush1.bf16.msra.mxu1 %v13803_v31  ;;  %v13883_v31 = vld [vmem:[%s20309_s1 + $0x2e4] ss:$28 sps:$4 sm:$0xff]  }
  0x85   :  { %9045 = vmatpush1.bf16.msra.mxu0 %v13800_v28  ;;  %9415 = vmatprep.subr.bf16.mxu1 %v13811_v34  ;;  %v13880_v28 = vld [vmem:[%s20309_s1 + $0x10dc] ss:$28 sps:$4 sm:$0xff]  }
  0x86   :  { %9046 = vmatprep.subr.bf16.mxu0 %v13808_v33  ;;  %9445 = vmatprep.mubr.bf16.mxu1 %v15853_v62  ;;  %v13878_v33 = vld [vmem:[%s20309_s1 + $0x10d8] ss:$28 sps:$4 sm:$0xff]   ;;  %v13881_v34 = vld [vmem:[%s20309_s1 + $0x2e0] ss:$28 sps:$4 sm:$0xff]  }
  0x87   :  { %9076 = vmatprep.mubr.bf16.mxu0 %v16161_v41 }
  0x88   :  { %9416 = vmatpush1.bf16.msra.mxu1 %v13809_v38  ;;  %v13884_v38 = vld [vmem:[%s20309_s1 + $0x1110] ss:$28 sps:$4 sm:$0xff]  }
  0x89   :  { %9047 = vmatpush1.bf16.msra.mxu0 %v13806_v37  ;;  %9417 = vmatprep.subr.bf16.mxu1 %v13817_v40  ;;  %v13889_v37 = vld [vmem:[%s20309_s1 + $0x31c] ss:$28 sps:$4 sm:$0xff]   ;;  %v13892_v40 = vld [vmem:[%s20309_s1 + $0x114c] ss:$28 sps:$4 sm:$0xff]  }
  0x8a   :  { %9048 = vmatprep.subr.bf16.mxu0 %v13814_v39  ;;  %v13887_v39 = vld [vmem:[%s20309_s1 + $0x318] ss:$28 sps:$4 sm:$0xff]  }
  0x8c   :  { %9418 = vmatpush1.bf16.msra.mxu1 %v13815_v44  ;;  %v13890_v44 = vld [vmem:[%s20309_s1 + $0x1148] ss:$28 sps:$4 sm:$0xff]  }
  0x8d   :  { %9049 = vmatpush1.bf16.msra.mxu0 %v13812_v43  ;;  %9419 = vmatprep.subr.bf16.mxu1 %v13823_v46  ;;  %v13895_v43 = vld [vmem:[%s20309_s1 + $0x354] ss:$28 sps:$4 sm:$0xff]   ;;  %v13898_v46 = vld [vmem:[%s20309_s1 + $0x1184] ss:$28 sps:$4 sm:$0xff]  }
  0x8e   :  { %9050 = vmatprep.subr.bf16.mxu0 %v13820_v45  ;;  %v13893_v45 = vld [vmem:[%s20309_s1 + $0x350] ss:$28 sps:$4 sm:$0xff]  }
  0x90   :  { %9420 = vmatpush1.bf16.msra.mxu1 %v13821_v48  ;;  %v16335_v48 = vrot.slane %v16142_v35, %v15824_v49  ;;  %v13907_v35 = vld [vmem:[%s20309_s1 + $0x3c4] ss:$28 sps:$4 sm:$0xff]  }
  0x91   :  { %9051 = vmatpush1.bf16.msra.mxu0 %v13818_v47  ;;  %9421 = vmatprep.subr.bf16.mxu1 %v13829_v51  ;;  %v13901_v47 = vld [vmem:[%s20309_s1 + $0x38c] ss:$28 sps:$4 sm:$0xff]  }
  0x92   :  { %9052 = vmatprep.subr.bf16.mxu0 %v13826_v50  ;;  %v13896_v50 = vld [vmem:[%s20309_s1 + $0x1180] ss:$28 sps:$4 sm:$0xff]   ;;  %v13899_v51 = vld [vmem:[%s20309_s1 + $0x388] ss:$28 sps:$4 sm:$0xff]  }
  0x94   :  { %9422 = vmatpush1.bf16.msra.mxu1 %v13827_v53  ;;  %v16351_v53 = vcombine.high %v16161_v41, %v16161_v41 }
  0x95   :  { %9053 = vmatpush1.bf16.msra.mxu0 %v13824_v52  ;;  %9423 = vmatprep.subr.bf16.mxu1 %v13835_v55  ;;  %v13904_v52 = vld [vmem:[%s20309_s1 + $0x11bc] ss:$28 sps:$4 sm:$0xff]  }
  0x96   :  { %9054 = vmatprep.subr.bf16.mxu0 %v13832_v54  ;;  %v13902_v54 = vld [vmem:[%s20309_s1 + $0x11b8] ss:$28 sps:$4 sm:$0xff]   ;;  %v13905_v55 = vld [vmem:[%s20309_s1 + $0x3c0] ss:$28 sps:$4 sm:$0xff]  }
  0x98   :  { %9424 = vmatpush1.bf16.msra.mxu1 %v13833_v57  ;;  %v13913_v57 = vld [vmem:[%s20309_s1 + $0x3fc] ss:$28 sps:$4 sm:$0xff]  }
  0x99   :  { %9055 = vmatpush1.bf16.msra.mxu0 %v13830_v56  ;;  %9425 = vmatprep.subr.bf16.mxu1 %v13841_v59  ;;  %v13910_v56 = vld [vmem:[%s20309_s1 + $0x11f4] ss:$28 sps:$4 sm:$0xff]  }
  0x9a   :  { %9056 = vmatprep.subr.bf16.mxu0 %v13838_v58  ;;  %v13908_v58 = vld [vmem:[%s20309_s1 + $0x11f0] ss:$28 sps:$4 sm:$0xff]   ;;  %v13911_v59 = vld [vmem:[%s20309_s1 + $0x3f8] ss:$28 sps:$4 sm:$0xff]  }
  0x9c   :  { %9426 = vmatpush1.bf16.msra.mxu1 %v13839_v61  ;;  %v13919_v61 = vld [vmem:[%s20309_s1 + $0x434] ss:$28 sps:$4 sm:$0xff]  }
  0x9d   :  { %9057 = vmatpush1.bf16.msra.mxu0 %v13836_v60  ;;  %9427 = vmatprep.subr.bf16.mxu1 %v13847_v0  ;;  %v13916_v60 = vld [vmem:[%s20309_s1 + $0x122c] ss:$28 sps:$4 sm:$0xff]  }
  0x9e   :  { %9058 = vmatprep.subr.bf16.mxu0 %v13844_v63  ;;  %v13914_v63 = vld [vmem:[%s20309_s1 + $0x1228] ss:$28 sps:$4 sm:$0xff]   ;;  %v13917_v0 = vld [vmem:[%s20309_s1 + $0x430] ss:$28 sps:$4 sm:$0xff]  }
  0xa0   :  { %9428 = vmatpush1.bf16.msra.mxu1 %v13845_v2  ;;  %v13925_v2 = vld [vmem:[%s20309_s1 + $0x46c] ss:$28 sps:$4 sm:$0xff]  }
  0xa1   :  { %9059 = vmatpush1.bf16.msra.mxu0 %v13842_v1  ;;  %9429 = vmatprep.subr.bf16.mxu1 %v13853_v5  ;;  %v13922_v1 = vld [vmem:[%s20309_s1 + $0x1264] ss:$28 sps:$4 sm:$0xff]  }
  0xa2   :  { %9060 = vmatprep.subr.bf16.mxu0 %v13850_v4  ;;  %v13920_v4 = vld [vmem:[%s20309_s1 + $0x1260] ss:$28 sps:$4 sm:$0xff]   ;;  %v13923_v5 = vld [vmem:[%s20309_s1 + $0x468] ss:$28 sps:$4 sm:$0xff]  }
  0xa4   :  { %9430 = vmatpush1.bf16.msra.mxu1 %v13851_v7  ;;  %v13931_v7 = vld [vmem:[%s20309_s1 + $0x4a4] ss:$28 sps:$4 sm:$0xff]  }
  0xa5   :  { %9061 = vmatpush1.bf16.msra.mxu0 %v13848_v6  ;;  %9431 = vmatprep.subr.bf16.mxu1 %v13859_v9  ;;  %v13928_v6 = vld [vmem:[%s20309_s1 + $0x129c] ss:$28 sps:$4 sm:$0xff]  }
  0xa6   :  { %9062 = vmatprep.subr.bf16.mxu0 %v13856_v8  ;;  %v13926_v8 = vld [vmem:[%s20309_s1 + $0x1298] ss:$28 sps:$4 sm:$0xff]   ;;  %v13929_v9 = vld [vmem:[%s20309_s1 + $0x4a0] ss:$28 sps:$4 sm:$0xff]  }
  0xa8   :  { %9432 = vmatpush1.bf16.msra.mxu1 %v13857_v11  ;;  %v13937_v11 = vld [vmem:[%s20309_s1 + $0x4dc] ss:$28 sps:$4 sm:$0xff]  }
  0xa9   :  { %9063 = vmatpush1.bf16.msra.mxu0 %v13854_v10  ;;  %9433 = vmatprep.subr.bf16.mxu1 %v13865_v13  ;;  %v13934_v10 = vld [vmem:[%s20309_s1 + $0x12d4] ss:$28 sps:$4 sm:$0xff]  }
  0xaa   :  { %9064 = vmatprep.subr.bf16.mxu0 %v13862_v12  ;;  %v13932_v12 = vld [vmem:[%s20309_s1 + $0x12d0] ss:$28 sps:$4 sm:$0xff]   ;;  %v13935_v13 = vld [vmem:[%s20309_s1 + $0x4d8] ss:$28 sps:$4 sm:$0xff]  }
  0xac   :  { %9434 = vmatpush1.bf16.msra.mxu1 %v13863_v15  ;;  %v13943_v15 = vld [vmem:[%s20309_s1 + $0x514] ss:$28 sps:$4 sm:$0xff]  }
  0xad   :  { %9065 = vmatpush1.bf16.msra.mxu0 %v13860_v14  ;;  %9435 = vmatprep.subr.bf16.mxu1 %v13871_v19  ;;  %v13940_v14 = vld [vmem:[%s20309_s1 + $0x130c] ss:$28 sps:$4 sm:$0xff]  }
  0xae   :  { %9066 = vmatprep.subr.bf16.mxu0 %v13868_v16  ;;  %v13938_v16 = vld [vmem:[%s20309_s1 + $0x1308] ss:$28 sps:$4 sm:$0xff]   ;;  %v13941_v19 = vld [vmem:[%s20309_s1 + $0x510] ss:$28 sps:$4 sm:$0xff]  }
  0xb0   :  { %9436 = vmatpush1.bf16.msra.mxu1 %v13869_v21  ;;  %v13949_v21 = vld [vmem:[%s20309_s1 + $0x54c] ss:$28 sps:$4 sm:$0xff]  }
  0xb1   :  { %9067 = vmatpush1.bf16.msra.mxu0 %v13866_v20  ;;  %9437 = vmatprep.subr.bf16.mxu1 %v13877_v25  ;;  %v13946_v20 = vld [vmem:[%s20309_s1 + $0x1344] ss:$28 sps:$4 sm:$0xff]  }
  0xb2   :  { %9068 = vmatprep.subr.bf16.mxu0 %v13874_v24  ;;  %v13944_v24 = vld [vmem:[%s20309_s1 + $0x1340] ss:$28 sps:$4 sm:$0xff]   ;;  %v13947_v25 = vld [vmem:[%s20309_s1 + $0x548] ss:$28 sps:$4 sm:$0xff]  }
  0xb4   :  { %9438 = vmatpush1.bf16.msra.mxu1 %v13875_v27  ;;  %v13955_v27 = vld [vmem:[%s20309_s1 + $0x584] ss:$28 sps:$4 sm:$0xff]  }
  0xb5   :  { %9069 = vmatpush1.bf16.msra.mxu0 %v13872_v26  ;;  %9439 = vmatprep.subr.bf16.mxu1 %v13883_v31  ;;  %v13952_v26 = vld [vmem:[%s20309_s1 + $0x137c] ss:$28 sps:$4 sm:$0xff]  }
  0xb6   :  { %9070 = vmatprep.subr.bf16.mxu0 %v13880_v28  ;;  %v13950_v28 = vld [vmem:[%s20309_s1 + $0x1378] ss:$28 sps:$4 sm:$0xff]   ;;  %v13953_v31 = vld [vmem:[%s20309_s1 + $0x580] ss:$28 sps:$4 sm:$0xff]  }
  0xb8   :  { %9440 = vmatpush1.bf16.msra.mxu1 %v13881_v34  ;;  %v13961_v34 = vld [vmem:[%s20309_s1 + $0x5bc] ss:$28 sps:$4 sm:$0xff]  }
  0xb9   :  { %9071 = vmatpush1.bf16.msra.mxu0 %v13878_v33  ;;  %9441 = vmatprep.subr.bf16.mxu1 %v13889_v37  ;;  %v13958_v33 = vld [vmem:[%s20309_s1 + $0x13b4] ss:$28 sps:$4 sm:$0xff]  }
  0xba   :  { %9072 = vmatprep.subr.bf16.mxu0 %v13886_v36  ;;  %v13956_v36 = vld [vmem:[%s20309_s1 + $0x13b0] ss:$28 sps:$4 sm:$0xff]   ;;  %v13959_v37 = vld [vmem:[%s20309_s1 + $0x5b8] ss:$28 sps:$4 sm:$0xff]  }
  0xbc   :  { %9442 = vmatpush1.bf16.msra.mxu1 %v13887_v39  ;;  %v13967_v39 = vld [vmem:[%s20309_s1 + $0x5f4] ss:$28 sps:$4 sm:$0xff]  }
  0xbd   :  { %9073 = vmatpush1.bf16.msra.mxu0 %v13884_v38  ;;  %9443 = vmatprep.subr.bf16.mxu1 %v13895_v43  ;;  %v13964_v38 = vld [vmem:[%s20309_s1 + $0x13ec] ss:$28 sps:$4 sm:$0xff]  }
  0xbe   :  { %9074 = vmatprep.subr.bf16.mxu0 %v13892_v40  ;;  %v13962_v40 = vld [vmem:[%s20309_s1 + $0x13e8] ss:$28 sps:$4 sm:$0xff]   ;;  %v13965_v43 = vld [vmem:[%s20309_s1 + $0x5f0] ss:$28 sps:$4 sm:$0xff]  }
  0xc0   :  { %9444 = vmatpush1.bf16.msra.mxu1 %v13893_v45  ;;  %v13973_v45 = vld [vmem:[%s20309_s1 + $0x62c] ss:$28 sps:$4 sm:$0xff]  }
  0xc1   :  { %9075 = vmatpush1.bf16.msra.mxu0 %v13890_v44  ;;  %9454 = vmatprep.subr.bf16.mxu1 %v13901_v47  ;;  %v13970_v44 = vld [vmem:[%s20309_s1 + $0x1424] ss:$28 sps:$4 sm:$0xff]  }
  0xc2   :  { %9085 = vmatprep.subr.bf16.mxu0 %v13898_v46  ;;  %v13968_v46 = vld [vmem:[%s20309_s1 + $0x1420] ss:$28 sps:$4 sm:$0xff]   ;;  %v13971_v47 = vld [vmem:[%s20309_s1 + $0x628] ss:$28 sps:$4 sm:$0xff]  }
  0xc3   :  { %9446 = vmatmul.mubr.bf16.vlgmr.msra.gmra.mrb[4].mxu1 %v15909_v17 }
  0xc4   :  { %9077 = vmatmul.mubr.bf16.vlgmr.msra.gmra.mrb[0].mxu0 %v16335_v48  ;;  %9455 = vmatpush1.bf16.msra.mxu1 %v13899_v51  ;;  %v13979_v51 = vld [vmem:[%s20309_s1 + $0x664] ss:$28 sps:$4 sm:$0xff]  }
  0xc5   :  { %9086 = vmatpush1.bf16.msra.mxu0 %v13896_v50  ;;  %9456 = vmatprep.subr.bf16.mxu1 %v13907_v35  ;;  %v13976_v50 = vld [vmem:[%s20309_s1 + $0x145c] ss:$28 sps:$4 sm:$0xff]  }
  0xc6   :  { %9087 = vmatprep.subr.bf16.mxu0 %v13904_v52  ;;  %9117 = vmatprep.mubr.bf16.mxu0 %v16351_v53  ;;  %v13974_v52 = vld [vmem:[%s20309_s1 + $0x1458] ss:$28 sps:$4 sm:$0xff]   ;;  %v13977_v35 = vld [vmem:[%s20309_s1 + $0x660] ss:$28 sps:$4 sm:$0xff]  }
  0xc7   :  { %9486 = vmatprep.mubr.bf16.mxu1 %v15925_v22 }
  0xc8   :  { %9457 = vmatpush1.bf16.msra.mxu1 %v13905_v55  ;;  %v13985_v55 = vld [vmem:[%s20309_s1 + $0x69c] ss:$28 sps:$4 sm:$0xff]  }
  0xc9   :  { %9088 = vmatpush1.bf16.msra.mxu0 %v13902_v54  ;;  %9458 = vmatprep.subr.bf16.mxu1 %v13913_v57  ;;  %v13982_v54 = vld [vmem:[%s20309_s1 + $0x1494] ss:$28 sps:$4 sm:$0xff]  }
  0xca   :  { %9089 = vmatprep.subr.bf16.mxu0 %v13910_v56  ;;  %v1684_v56 = vcombine.high %v16132_v32, %v16132_v32  ;;  %v13980_v57 = vld [vmem:[%s20309_s1 + $0x1490] ss:$28 sps:$4 sm:$0xff]  }
  0xcb   :  { %v13991_v32 = vld [vmem:[%s20309_s1 + $0x6d4] ss:$28 sps:$4 sm:$0xff]  }
  0xcc   :  { %9459 = vmatpush1.bf16.msra.mxu1 %v13911_v59  ;;  %v13988_v59 = vld [vmem:[%s20309_s1 + $0x14cc] ss:$28 sps:$4 sm:$0xff]  }
  0xcd   :  { %9090 = vmatpush1.bf16.msra.mxu0 %v13908_v58  ;;  %9460 = vmatprep.subr.bf16.mxu1 %v13919_v61  ;;  %v13983_v58 = vld [vmem:[%s20309_s1 + $0x698] ss:$28 sps:$4 sm:$0xff]   ;;  %v13986_v61 = vld [vmem:[%s20309_s1 + $0x14c8] ss:$28 sps:$4 sm:$0xff]  }
  0xce   :  { %9091 = vmatprep.subr.bf16.mxu0 %v13916_v60  ;;  %v16528_v60 = vrot.slane %v1684_v56, %v15824_v49  ;;  %v14054_v56 = vld [vmem:[%s20309_s1 + $0x1734] ss:$28 sps:$4 sm:$0xff]  }
  0xd0   :  { %9461 = vmatpush1.bf16.msra.mxu1 %v13917_v0  ;;  %v13994_v0 = vld [vmem:[%s20309_s1 + $0x1504] ss:$28 sps:$4 sm:$0xff]  }
  0xd1   :  { %9092 = vmatpush1.bf16.msra.mxu0 %v13914_v63  ;;  %9462 = vmatprep.subr.bf16.mxu1 %v13925_v2  ;;  %v13989_v63 = vld [vmem:[%s20309_s1 + $0x6d0] ss:$28 sps:$4 sm:$0xff]   ;;  %v1700_v2 = vcombine.high %v16528_v60, %v16528_v60 }
  0xd2   :  { %9093 = vmatprep.subr.bf16.mxu0 %v13922_v1  ;;  %v13997_v1 = vld [vmem:[%s20309_s1 + $0x70c] ss:$28 sps:$4 sm:$0xff]  }
  0xd4   :  { %9463 = vmatpush1.bf16.msra.mxu1 %v13923_v5  ;;  %v13992_v5 = vld [vmem:[%s20309_s1 + $0x1500] ss:$28 sps:$4 sm:$0xff]  }
  0xd5   :  { %9094 = vmatpush1.bf16.msra.mxu0 %v13920_v4  ;;  %9464 = vmatprep.subr.bf16.mxu1 %v13931_v7  ;;  %v16546_v4 = vcombine.high %v16335_v48, %v16335_v48  ;;  %v14000_v7 = vld [vmem:[%s20309_s1 + $0x153c] ss:$28 sps:$4 sm:$0xff]  }
  0xd6   :  { %9095 = vmatprep.subr.bf16.mxu0 %v13928_v6  ;;  %v13995_v6 = vld [vmem:[%s20309_s1 + $0x708] ss:$28 sps:$4 sm:$0xff]  }
  0xd8   :  { %9465 = vmatpush1.bf16.msra.mxu1 %v13929_v9  ;;  %v16561_v9 = vrot.slane %v1700_v2, %v15824_v49  ;;  %v14069_v2 = vld [vmem:[%s20309_s1 + $0x9ac] ss:$28 sps:$4 sm:$0xff]  }
  0xd9   :  { %9096 = vmatpush1.bf16.msra.mxu0 %v13926_v8  ;;  %9466 = vmatprep.subr.bf16.mxu1 %v13937_v11  ;;  %v14003_v8 = vld [vmem:[%s20309_s1 + $0x744] ss:$28 sps:$4 sm:$0xff]  }
  0xda   :  { %9097 = vmatprep.subr.bf16.mxu0 %v13934_v10  ;;  %v13998_v10 = vld [vmem:[%s20309_s1 + $0x1538] ss:$28 sps:$4 sm:$0xff]   ;;  %v14001_v11 = vld [vmem:[%s20309_s1 + $0x740] ss:$28 sps:$4 sm:$0xff]  }
  0xdc   :  { %9467 = vmatpush1.bf16.msra.mxu1 %v13935_v13  ;;  %v14009_v13 = vld [vmem:[%s20309_s1 + $0x77c] ss:$28 sps:$4 sm:$0xff]  }
  0xdd   :  { %9098 = vmatpush1.bf16.msra.mxu0 %v13932_v12  ;;  %9468 = vmatprep.subr.bf16.mxu1 %v13943_v15  ;;  %v14006_v12 = vld [vmem:[%s20309_s1 + $0x1574] ss:$28 sps:$4 sm:$0xff]  }
  0xde   :  { %9099 = vmatprep.subr.bf16.mxu0 %v13940_v14  ;;  %v14004_v14 = vld [vmem:[%s20309_s1 + $0x1570] ss:$28 sps:$4 sm:$0xff]   ;;  %v14007_v15 = vld [vmem:[%s20309_s1 + $0x778] ss:$28 sps:$4 sm:$0xff]  }
  0xe0   :  { %9469 = vmatpush1.bf16.msra.mxu1 %v13941_v19  ;;  %v14015_v19 = vld [vmem:[%s20309_s1 + $0x7b4] ss:$28 sps:$4 sm:$0xff]  }
  0xe1   :  { %9100 = vmatpush1.bf16.msra.mxu0 %v13938_v16  ;;  %9470 = vmatprep.subr.bf16.mxu1 %v13949_v21  ;;  %v14012_v16 = vld [vmem:[%s20309_s1 + $0x15ac] ss:$28 sps:$4 sm:$0xff]  }
  0xe2   :  { %9101 = vmatprep.subr.bf16.mxu0 %v13946_v20  ;;  %v14010_v20 = vld [vmem:[%s20309_s1 + $0x15a8] ss:$28 sps:$4 sm:$0xff]   ;;  %v14013_v21 = vld [vmem:[%s20309_s1 + $0x7b0] ss:$28 sps:$4 sm:$0xff]  }
  0xe4   :  { %9471 = vmatpush1.bf16.msra.mxu1 %v13947_v25  ;;  %v14021_v25 = vld [vmem:[%s20309_s1 + $0x7ec] ss:$28 sps:$4 sm:$0xff]  }
  0xe5   :  { %9102 = vmatpush1.bf16.msra.mxu0 %v13944_v24  ;;  %9472 = vmatprep.subr.bf16.mxu1 %v13955_v27  ;;  %v14018_v24 = vld [vmem:[%s20309_s1 + $0x15e4] ss:$28 sps:$4 sm:$0xff]  }
  0xe6   :  { %9103 = vmatprep.subr.bf16.mxu0 %v13952_v26  ;;  %v14016_v26 = vld [vmem:[%s20309_s1 + $0x15e0] ss:$28 sps:$4 sm:$0xff]   ;;  %v14019_v27 = vld [vmem:[%s20309_s1 + $0x7e8] ss:$28 sps:$4 sm:$0xff]  }
  0xe8   :  { %9473 = vmatpush1.bf16.msra.mxu1 %v13953_v31  ;;  %v14027_v31 = vld [vmem:[%s20309_s1 + $0x824] ss:$28 sps:$4 sm:$0xff]  }
  0xe9   :  { %9104 = vmatpush1.bf16.msra.mxu0 %v13950_v28  ;;  %9474 = vmatprep.subr.bf16.mxu1 %v13961_v34  ;;  %v14024_v28 = vld [vmem:[%s20309_s1 + $0x161c] ss:$28 sps:$4 sm:$0xff]  }
  0xea   :  { %9105 = vmatprep.subr.bf16.mxu0 %v13958_v33  ;;  %v14022_v33 = vld [vmem:[%s20309_s1 + $0x1618] ss:$28 sps:$4 sm:$0xff]   ;;  %v14025_v34 = vld [vmem:[%s20309_s1 + $0x820] ss:$28 sps:$4 sm:$0xff]  }
  0xec   :  { %9475 = vmatpush1.bf16.msra.mxu1 %v13959_v37  ;;  %v14033_v37 = vld [vmem:[%s20309_s1 + $0x85c] ss:$28 sps:$4 sm:$0xff]  }
  0xed   :  { %9106 = vmatpush1.bf16.msra.mxu0 %v13956_v36  ;;  %9476 = vmatprep.subr.bf16.mxu1 %v13967_v39  ;;  %v14030_v36 = vld [vmem:[%s20309_s1 + $0x1654] ss:$28 sps:$4 sm:$0xff]  }
  0xee   :  { %9107 = vmatprep.subr.bf16.mxu0 %v13964_v38  ;;  %v14028_v38 = vld [vmem:[%s20309_s1 + $0x1650] ss:$28 sps:$4 sm:$0xff]   ;;  %v14031_v39 = vld [vmem:[%s20309_s1 + $0x858] ss:$28 sps:$4 sm:$0xff]  }
  0xf0   :  { %9477 = vmatpush1.bf16.msra.mxu1 %v13965_v43  ;;  %v14039_v43 = vld [vmem:[%s20309_s1 + $0x894] ss:$28 sps:$4 sm:$0xff]  }
  0xf1   :  { %9108 = vmatpush1.bf16.msra.mxu0 %v13962_v40  ;;  %9478 = vmatprep.subr.bf16.mxu1 %v13973_v45  ;;  %v14036_v40 = vld [vmem:[%s20309_s1 + $0x168c] ss:$28 sps:$4 sm:$0xff]  }
  0xf2   :  { %9109 = vmatprep.subr.bf16.mxu0 %v13970_v44  ;;  %v14034_v44 = vld [vmem:[%s20309_s1 + $0x1688] ss:$28 sps:$4 sm:$0xff]   ;;  %v14037_v45 = vld [vmem:[%s20309_s1 + $0x890] ss:$28 sps:$4 sm:$0xff]  }
  0xf4   :  { %9479 = vmatpush1.bf16.msra.mxu1 %v13971_v47  ;;  %v14045_v47 = vld [vmem:[%s20309_s1 + $0x8cc] ss:$28 sps:$4 sm:$0xff]  }
  0xf5   :  { %9110 = vmatpush1.bf16.msra.mxu0 %v13968_v46  ;;  %9480 = vmatprep.subr.bf16.mxu1 %v13979_v51  ;;  %v14042_v46 = vld [vmem:[%s20309_s1 + $0x16c4] ss:$28 sps:$4 sm:$0xff]  }
  0xf6   :  { %9111 = vmatprep.subr.bf16.mxu0 %v13976_v50  ;;  %v14040_v50 = vld [vmem:[%s20309_s1 + $0x16c0] ss:$28 sps:$4 sm:$0xff]   ;;  %v14043_v51 = vld [vmem:[%s20309_s1 + $0x8c8] ss:$28 sps:$4 sm:$0xff]  }
  0xf8   :  { %9481 = vmatpush1.bf16.msra.mxu1 %v13977_v35  ;;  %v14051_v35 = vld [vmem:[%s20309_s1 + $0x904] ss:$28 sps:$4 sm:$0xff]  }
  0xf9   :  { %9112 = vmatpush1.bf16.msra.mxu0 %v13974_v52  ;;  %9482 = vmatprep.subr.bf16.mxu1 %v13985_v55  ;;  %v14048_v52 = vld [vmem:[%s20309_s1 + $0x16fc] ss:$28 sps:$4 sm:$0xff]  }
  0xfa   :  { %9113 = vmatprep.subr.bf16.mxu0 %v13982_v54  ;;  %v14046_v54 = vld [vmem:[%s20309_s1 + $0x16f8] ss:$28 sps:$4 sm:$0xff]   ;;  %v14049_v55 = vld [vmem:[%s20309_s1 + $0x900] ss:$28 sps:$4 sm:$0xff]  }
  0xfc   :  { %9483 = vmatpush1.bf16.msra.mxu1 %v13983_v58  ;;  %v14052_v58 = vld [vmem:[%s20309_s1 + $0x1730] ss:$28 sps:$4 sm:$0xff]  }
  0xfd   :  { %9114 = vmatpush1.bf16.msra.mxu0 %v13980_v57  ;;  %9484 = vmatprep.subr.bf16.mxu1 %v13991_v32  ;;  %v14057_v57 = vld [vmem:[%s20309_s1 + $0x93c] ss:$28 sps:$4 sm:$0xff]   ;;  %v14060_v32 = vld [vmem:[%s20309_s1 + $0x176c] ss:$28 sps:$4 sm:$0xff]  }
  0xfe   :  { %9115 = vmatprep.subr.bf16.mxu0 %v13988_v59  ;;  %v14055_v59 = vld [vmem:[%s20309_s1 + $0x938] ss:$28 sps:$4 sm:$0xff]  }
 0x100   :  { %9485 = vmatpush1.bf16.msra.mxu1 %v13989_v63  ;;  %v14058_v63 = vld [vmem:[%s20309_s1 + $0x1768] ss:$28 sps:$4 sm:$0xff]  }
 0x101   :  { %9116 = vmatpush1.bf16.msra.mxu0 %v13986_v61  ;;  %9495 = vmatprep.subr.bf16.mxu1 %v13997_v1  ;;  %v14063_v61 = vld [vmem:[%s20309_s1 + $0x974] ss:$28 sps:$4 sm:$0xff]   ;;  %v14066_v1 = vld [vmem:[%s20309_s1 + $0x17a4] ss:$28 sps:$4 sm:$0xff]  }
 0x102   :  { %9126 = vmatprep.subr.bf16.mxu0 %v13994_v0  ;;  %v14061_v0 = vld [vmem:[%s20309_s1 + $0x970] ss:$28 sps:$4 sm:$0xff]  }
 0x103   :  { %9487 = vmatmul.mubr.bf16.vlgmr.msra.gmra.mrb[4].mxu1 %v16120_v29 }
 0x104   :  { %9118 = vmatmul.mubr.bf16.vlgmr.msra.gmra.mrb[0].mxu0 %v16546_v4  ;;  %9496 = vmatpush1.bf16.msra.mxu1 %v13995_v6  ;;  %v14067_v6 = vld [vmem:[%s20309_s1 + $0x9a8] ss:$28 sps:$4 sm:$0xff]  }
 0x105   :  { %9127 = vmatpush1.bf16.msra.mxu0 %v13992_v5  ;;  %9497 = vmatprep.subr.bf16.mxu1 %v14003_v8  ;;  %v14064_v5 = vld [vmem:[%s20309_s1 + $0x17a0] ss:$28 sps:$4 sm:$0xff]  }
 0x106   :  { %9128 = vmatprep.subr.bf16.mxu0 %v14000_v7  ;;  %9158 = vmatprep.mubr.bf16.mxu0 %v16561_v9  ;;  %v14072_v7 = vld [vmem:[%s20309_s1 + $0x17dc] ss:$28 sps:$4 sm:$0xff]   ;;  %v14075_v8 = vld [vmem:[%s20309_s1 + $0x9e4] ss:$28 sps:$4 sm:$0xff]  }
 0x107   :  { %9527 = vmatprep.mubr.bf16.mxu1 %v15865_v3 }
 0x108   :  { %9498 = vmatpush1.bf16.msra.mxu1 %v14001_v11  ;;  %v14073_v11 = vld [vmem:[%s20309_s1 + $0x9e0] ss:$28 sps:$4 sm:$0xff]  }
 0x109   :  { %9129 = vmatpush1.bf16.msra.mxu0 %v13998_v10  ;;  %9499 = vmatprep.subr.bf16.mxu1 %v14009_v13  ;;  %v14070_v10 = vld [vmem:[%s20309_s1 + $0x17d8] ss:$28 sps:$4 sm:$0xff]  }
 0x10a   :  { %9130 = vmatprep.subr.bf16.mxu0 %v14006_v12  ;;  %v14078_v12 = vld [vmem:[%s20309_s1 + $0x1814] ss:$28 sps:$4 sm:$0xff]   ;;  %v14081_v13 = vld [vmem:[%s20309_s1 + $0xa1c] ss:$28 sps:$4 sm:$0xff]  }
 0x10c   :  { %9500 = vmatpush1.bf16.msra.mxu1 %v14007_v15  ;;  %v14079_v15 = vld [vmem:[%s20309_s1 + $0xa18] ss:$28 sps:$4 sm:$0xff]  }
 0x10d   :  { %9131 = vmatpush1.bf16.msra.mxu0 %v14004_v14  ;;  %9501 = vmatprep.subr.bf16.mxu1 %v14015_v19  ;;  %v14076_v14 = vld [vmem:[%s20309_s1 + $0x1810] ss:$28 sps:$4 sm:$0xff]  }
 0x10e   :  { %9132 = vmatprep.subr.bf16.mxu0 %v14012_v16  ;;  %v14084_v16 = vld [vmem:[%s20309_s1 + $0x184c] ss:$28 sps:$4 sm:$0xff]   ;;  %v14087_v19 = vld [vmem:[%s20309_s1 + $0xa54] ss:$28 sps:$4 sm:$0xff]  }
 0x110   :  { %9502 = vmatpush1.bf16.msra.mxu1 %v14013_v21  ;;  %v14085_v21 = vld [vmem:[%s20309_s1 + $0xa50] ss:$28 sps:$4 sm:$0xff]  }
 0x111   :  { %9133 = vmatpush1.bf16.msra.mxu0 %v14010_v20  ;;  %9503 = vmatprep.subr.bf16.mxu1 %v14021_v25  ;;  %v14082_v20 = vld [vmem:[%s20309_s1 + $0x1848] ss:$28 sps:$4 sm:$0xff]  }
 0x112   :  { %9134 = vmatprep.subr.bf16.mxu0 %v14018_v24  ;;  %v14091_v24 = vld [vmem:[%s20309_s1 + $0x1884] ss:$28 sps:$4 sm:$0xff]   ;;  %v14094_v25 = vld [vmem:[%s20309_s1 + $0xa8c] ss:$28 sps:$4 sm:$0xff]  }
 0x114   :  { %9504 = vmatpush1.bf16.msra.mxu1 %v14019_v27  ;;  %v14089_v27 = vld [vmem:[%s20309_s1 + $0x1880] ss:$28 sps:$4 sm:$0xff]  }
 0x115   :  { %9135 = vmatpush1.bf16.msra.mxu0 %v14016_v26  ;;  %9505 = vmatprep.subr.bf16.mxu1 %v14027_v31  ;;  %v16749_v26 = vrot.slane %v16528_v60, %v15824_v49  ;;  %v14097_v31 = vld [vmem:[%s20309_s1 + $0x18bc] ss:$28 sps:$4 sm:$0xff]   ;;  %v14100_v60 = vld [vmem:[%s20309_s1 + $0xac4] ss:$28 sps:$4 sm:$0xff]  }
 0x116   :  { %9136 = vmatprep.subr.bf16.mxu0 %v14024_v28  ;;  %v14092_v28 = vld [vmem:[%s20309_s1 + $0xa88] ss:$28 sps:$4 sm:$0xff]  }
 0x118   :  { %9506 = vmatpush1.bf16.msra.mxu1 %v14025_v34  ;;  %v14095_v34 = vld [vmem:[%s20309_s1 + $0x18b8] ss:$28 sps:$4 sm:$0xff]  }
 0x119   :  { %9137 = vmatpush1.bf16.msra.mxu0 %v14022_v33  ;;  %9507 = vmatprep.subr.bf16.mxu1 %v14033_v37  ;;  %v16765_v33 = vcombine.high %v16561_v9, %v16561_v9  ;;  %v14103_v37 = vld [vmem:[%s20309_s1 + $0x18f4] ss:$28 sps:$4 sm:$0xff]  }
 0x11a   :  { %9138 = vmatprep.subr.bf16.mxu0 %v14030_v36  ;;  %v14098_v36 = vld [vmem:[%s20309_s1 + $0xac0] ss:$28 sps:$4 sm:$0xff]  }
 0x11c   :  { %9508 = vmatpush1.bf16.msra.mxu1 %v14031_v39  ;;  %v14101_v39 = vld [vmem:[%s20309_s1 + $0x18f0] ss:$28 sps:$4 sm:$0xff]  }
 0x11d   :  { %9139 = vmatpush1.bf16.msra.mxu0 %v14028_v38  ;;  %9509 = vmatprep.subr.bf16.mxu1 %v14039_v43  ;;  %v14106_v38 = vld [vmem:[%s20309_s1 + $0xafc] ss:$28 sps:$4 sm:$0xff]   ;;  %v14109_v43 = vld [vmem:[%s20309_s1 + $0x192c] ss:$28 sps:$4 sm:$0xff]  }
 0x11e   :  { %9140 = vmatprep.subr.bf16.mxu0 %v14036_v40  ;;  %v14104_v40 = vld [vmem:[%s20309_s1 + $0xaf8] ss:$28 sps:$4 sm:$0xff]  }
 0x120   :  { %9510 = vmatpush1.bf16.msra.mxu1 %v14037_v45  ;;  %v14107_v45 = vld [vmem:[%s20309_s1 + $0x1928] ss:$28 sps:$4 sm:$0xff]  }
 0x121   :  { %9141 = vmatpush1.bf16.msra.mxu0 %v14034_v44  ;;  %9511 = vmatprep.subr.bf16.mxu1 %v14045_v47  ;;  %v14112_v44 = vld [vmem:[%s20309_s1 + $0xb34] ss:$28 sps:$4 sm:$0xff]   ;;  %v14115_v47 = vld [vmem:[%s20309_s1 + $0x1964] ss:$28 sps:$4 sm:$0xff]  }
 0x122   :  { %9142 = vmatprep.subr.bf16.mxu0 %v14042_v46  ;;  %v14110_v46 = vld [vmem:[%s20309_s1 + $0xb30] ss:$28 sps:$4 sm:$0xff]  }
 0x124   :  { %9512 = vmatpush1.bf16.msra.mxu1 %v14043_v51  ;;  %v14113_v51 = vld [vmem:[%s20309_s1 + $0x1960] ss:$28 sps:$4 sm:$0xff]  }
 0x125   :  { %9143 = vmatpush1.bf16.msra.mxu0 %v14040_v50  ;;  %9513 = vmatprep.subr.bf16.mxu1 %v14051_v35  ;;  %v14118_v50 = vld [vmem:[%s20309_s1 + $0xb6c] ss:$28 sps:$4 sm:$0xff]   ;;  %v14121_v35 = vld [vmem:[%s20309_s1 + $0x199c] ss:$28 sps:$4 sm:$0xff]  }
 0x126   :  { %9144 = vmatprep.subr.bf16.mxu0 %v14048_v52  ;;  %v14116_v52 = vld [vmem:[%s20309_s1 + $0xb68] ss:$28 sps:$4 sm:$0xff]  }
 0x128   :  { %9514 = vmatpush1.bf16.msra.mxu1 %v14049_v55  ;;  %v14119_v55 = vld [vmem:[%s20309_s1 + $0x1998] ss:$28 sps:$4 sm:$0xff]  }
 0x129   :  { %9145 = vmatpush1.bf16.msra.mxu0 %v14046_v54  ;;  %9515 = vmatprep.subr.bf16.mxu1 %v14057_v57  ;;  %v14124_v54 = vld [vmem:[%s20309_s1 + $0xba4] ss:$28 sps:$4 sm:$0xff]   ;;  %v14127_v57 = vld [vmem:[%s20309_s1 + $0x19d4] ss:$28 sps:$4 sm:$0xff]  }
 0x12a   :  { %9146 = vmatprep.subr.bf16.mxu0 %v14054_v56  ;;  %v14122_v56 = vld [vmem:[%s20309_s1 + $0xba0] ss:$28 sps:$4 sm:$0xff]  }
 0x12c   :  { %9516 = vmatpush1.bf16.msra.mxu1 %v14055_v59 }
 0x12d   :  { %9147 = vmatpush1.bf16.msra.mxu0 %v14052_v58  ;;  %9517 = vmatprep.subr.bf16.mxu1 %v14063_v61  ;;  %v14130_v58 = vld [vmem:[%s20309_s1 + $0xbdc] ss:$28 sps:$4 sm:$0xff]   ;;  %v14125_v61 = vld [vmem:[%s20309_s1 + $0x19d0] ss:$28 sps:$4 sm:$0xff]  }
 0x12e   :  { %9148 = vmatprep.subr.bf16.mxu0 %v14060_v32 }
 0x130   :  { %9518 = vmatpush1.bf16.msra.mxu1 %v14061_v0 }
 0x131   :  { %9149 = vmatpush1.bf16.msra.mxu0 %v14058_v63  ;;  %9519 = vmatprep.subr.bf16.mxu1 %v14069_v2  ;;  %v14128_v63 = vld [vmem:[%s20309_s1 + $0xbd8] ss:$28 sps:$4 sm:$0xff]  }
 0x132   :  { %9150 = vmatprep.subr.bf16.mxu0 %v14066_v1  ;;  %v14133_v1 = vld [vmem:[%s20309_s1 + $0x1a0c] ss:$28 sps:$4 sm:$0xff]   ;;  %v14136_v2 = vld [vmem:[%s20309_s1 + $0xc14] ss:$28 sps:$4 sm:$0xff]  }
 0x134   :  { %9520 = vmatpush1.bf16.msra.mxu1 %v14067_v6  ;;  %v14131_v6 = vld [vmem:[%s20309_s1 + $0x1a08] ss:$28 sps:$4 sm:$0xff]  }
 0x135   :  { %9151 = vmatpush1.bf16.msra.mxu0 %v14064_v5  ;;  %9521 = vmatprep.subr.bf16.mxu1 %v14075_v8  ;;  %v14139_v8 = vld [vmem:[%s20309_s1 + $0x1a44] ss:$28 sps:$4 sm:$0xff]  }
 0x136   :  { %9152 = vmatprep.subr.bf16.mxu0 %v14072_v7  ;;  %v14134_v7 = vld [vmem:[%s20309_s1 + $0xc10] ss:$28 sps:$4 sm:$0xff]  }
 0x138   :  { %9522 = vmatpush1.bf16.msra.mxu1 %v14073_v11  ;;  %v14137_v11 = vld [vmem:[%s20309_s1 + $0x1a40] ss:$28 sps:$4 sm:$0xff]  }
 0x139   :  { %9153 = vmatpush1.bf16.msra.mxu0 %v14070_v10  ;;  %9523 = vmatprep.subr.bf16.mxu1 %v14081_v13  ;;  %v14142_v10 = vld [vmem:[%s20309_s1 + $0xc4c] ss:$28 sps:$4 sm:$0xff]   ;;  %v14145_v13 = vld [vmem:[%s20309_s1 + $0x1a7c] ss:$28 sps:$4 sm:$0xff]  }
 0x13a   :  { %9154 = vmatprep.subr.bf16.mxu0 %v14078_v12  ;;  %v14140_v12 = vld [vmem:[%s20309_s1 + $0xc48] ss:$28 sps:$4 sm:$0xff]  }
 0x13c   :  { %9524 = vmatpush1.bf16.msra.mxu1 %v14079_v15  ;;  %v14143_v15 = vld [vmem:[%s20309_s1 + $0x1a78] ss:$28 sps:$4 sm:$0xff]  }
 0x13d   :  { %9155 = vmatpush1.bf16.msra.mxu0 %v14076_v14  ;;  %9525 = vmatprep.subr.bf16.mxu1 %v14087_v19  ;;  %v14148_v14 = vld [vmem:[%s20309_s1 + $0xc84] ss:$28 sps:$4 sm:$0xff]   ;;  %v14151_v19 = vld [vmem:[%s20309_s1 + $0x1ab4] ss:$28 sps:$4 sm:$0xff]  }
 0x13e   :  { %9156 = vmatprep.subr.bf16.mxu0 %v14084_v16  ;;  %v14146_v16 = vld [vmem:[%s20309_s1 + $0xc80] ss:$28 sps:$4 sm:$0xff]  }
 0x140   :  { %9526 = vmatpush1.bf16.msra.mxu1 %v14085_v21  ;;  %v14149_v21 = vld [vmem:[%s20309_s1 + $0x1ab0] ss:$28 sps:$4 sm:$0xff]  }
 0x141   :  { %9157 = vmatpush1.bf16.msra.mxu0 %v14082_v20  ;;  %9536 = vmatprep.subr.bf16.mxu1 %v14094_v25  ;;  %v14154_v20 = vld [vmem:[%s20309_s1 + $0xcbc] ss:$28 sps:$4 sm:$0xff]   ;;  %v14157_v25 = vld [vmem:[%s20309_s1 + $0x1aec] ss:$28 sps:$4 sm:$0xff]  }
 0x142   :  { %9167 = vmatprep.subr.bf16.mxu0 %v14091_v24  ;;  %v14152_v24 = vld [vmem:[%s20309_s1 + $0xcb8] ss:$28 sps:$4 sm:$0xff]  }
 0x143   :  { %9528 = vmatmul.mubr.bf16.vlgmr.msra.gmra.mrb[4].mxu1 %v15912_v18 }
 0x144   :  { %9159 = vmatmul.mubr.bf16.vlgmr.msra.gmra.mrb[0].mxu0 %v16749_v26  ;;  %9537 = vmatpush1.bf16.msra.mxu1 %v14092_v28  ;;  %v14155_v28 = vld [vmem:[%s20309_s1 + $0x1ae8] ss:$28 sps:$4 sm:$0xff]  }
 0x145   :  { %9168 = vmatpush1.bf16.msra.mxu0 %v14089_v27  ;;  %9538 = vmatprep.subr.bf16.mxu1 %v14100_v60  ;;  %v14160_v27 = vld [vmem:[%s20309_s1 + $0xcf4] ss:$28 sps:$4 sm:$0xff]   ;;  %v14163_v60 = vld [vmem:[%s20309_s1 + $0x1b24] ss:$28 sps:$4 sm:$0xff]  }
 0x146   :  { %9169 = vmatprep.subr.bf16.mxu0 %v14097_v31  ;;  %9199 = vmatprep.mubr.bf16.mxu0 %v16765_v33  ;;  %v14158_v31 = vld [vmem:[%s20309_s1 + $0xcf0] ss:$28 sps:$4 sm:$0xff]  }
 0x147   :  { %9568 = vmatprep.mubr.bf16.mxu1 %v15929_v23 }
 0x148   :  { %9539 = vmatpush1.bf16.msra.mxu1 %v14098_v36  ;;  %v14161_v36 = vld [vmem:[%s20309_s1 + $0x1b20] ss:$28 sps:$4 sm:$0xff]  }
 0x149   :  { %9170 = vmatpush1.bf16.msra.mxu0 %v14095_v34  ;;  %9540 = vmatprep.subr.bf16.mxu1 %v14106_v38  ;;  %v14166_v34 = vld [vmem:[%s20309_s1 + $0xd2c] ss:$28 sps:$4 sm:$0xff]   ;;  %v14169_v38 = vld [vmem:[%s20309_s1 + $0x1b5c] ss:$28 sps:$4 sm:$0xff]  }
 0x14a   :  { %9171 = vmatprep.subr.bf16.mxu0 %v14103_v37  ;;  %v14164_v37 = vld [vmem:[%s20309_s1 + $0xd28] ss:$28 sps:$4 sm:$0xff]  }
 0x14c   :  { %9541 = vmatpush1.bf16.msra.mxu1 %v14104_v40  ;;  %v14167_v40 = vld [vmem:[%s20309_s1 + $0x1b58] ss:$28 sps:$4 sm:$0xff]  }
 0x14d   :  { %9172 = vmatpush1.bf16.msra.mxu0 %v14101_v39  ;;  %9542 = vmatprep.subr.bf16.mxu1 %v14112_v44  ;;  %v14172_v39 = vld [vmem:[%s20309_s1 + $0xd64] ss:$28 sps:$4 sm:$0xff]   ;;  %v14175_v44 = vld [vmem:[%s20309_s1 + $0x1b94] ss:$28 sps:$4 sm:$0xff]  }
 0x14e   :  { %9173 = vmatprep.subr.bf16.mxu0 %v14109_v43  ;;  %v14170_v43 = vld [vmem:[%s20309_s1 + $0xd60] ss:$28 sps:$4 sm:$0xff]  }
 0x150   :  { %9543 = vmatpush1.bf16.msra.mxu1 %v14110_v46  ;;  %v16934_v46 = vld.sshfl [vmem:[%s20308_s0 + $0x10] sm:$0xff pattern:$0x75316420] }
 0x151   :  { %9174 = vmatpush1.bf16.msra.mxu0 %v14107_v45  ;;  %9544 = vmatprep.subr.bf16.mxu1 %v14118_v50  ;;  %v14178_v45 = vld [vmem:[%s20309_s1 + $0xd9c] ss:$28 sps:$4 sm:$0xff]  }
 0x152   :  { %9175 = vmatprep.subr.bf16.mxu0 %v14115_v47  ;;  %v14173_v47 = vld [vmem:[%s20309_s1 + $0x1b90] ss:$28 sps:$4 sm:$0xff]   ;;  %v14176_v50 = vld [vmem:[%s20309_s1 + $0xd98] ss:$28 sps:$4 sm:$0xff]  }
 0x154   :  { %9545 = vmatpush1.bf16.msra.mxu1 %v14116_v52  ;;  %v14184_v52 = vld [vmem:[%s20309_s1 + $0xdd4] ss:$28 sps:$4 sm:$0xff]  }
 0x155   :  { %9176 = vmatpush1.bf16.msra.mxu0 %v14113_v51  ;;  %9546 = vmatprep.subr.bf16.mxu1 %v14124_v54  ;;  %v14181_v51 = vld [vmem:[%s20309_s1 + $0x1bcc] ss:$28 sps:$4 sm:$0xff]  }
 0x156   :  { %9177 = vmatprep.subr.bf16.mxu0 %v14121_v35  ;;  %v16831_v59 = vpop.f32.mrb[0].mxu1  ;;  %v14179_v35 = vld [vmem:[%s20309_s1 + $0x1bc8] ss:$28 sps:$4 sm:$0xff]   ;;  %v14182_v54 = vld [vmem:[%s20309_s1 + $0xdd0] ss:$28 sps:$4 sm:$0xff]  }
 0x157   :  { %v16833_v32 = vpop.f32.mrb[1].mxu1 }
 0x158   :  { %9547 = vmatpush1.bf16.msra.mxu1 %v14122_v56  ;;  %v8959_v0 = vpop.f32.mrb[2].mxu1  ;;  %v14190_v56 = vld [vmem:[%s20309_s1 + $0xe0c] ss:$28 sps:$4 sm:$0xff]  }
 0x159   :  { %9178 = vmatpush1.bf16.msra.mxu0 %v14119_v55  ;;  %9548 = vmatprep.subr.bf16.mxu1 %v14130_v58  ;;  %v8960_v5 = vpop.f32.mrb[3].mxu1  ;;  %v14187_v55 = vld [vmem:[%s20309_s1 + $0x1c04] ss:$28 sps:$4 sm:$0xff]   ;;  %v16964_v58 = vcombine.high %v16749_v26, %v16749_v26  ;;  %v14193_v0 = vld [vmem:[%s20309_s1 + $0x1c3c] ss:$28 sps:$4 sm:$0xff]  }
 0x15a   :  { %9179 = vmatprep.subr.bf16.mxu0 %v14127_v57  ;;  %v1748_v57 = vcombine.high %v16934_v46, %v16934_v46  ;;  %v14191_v5 = vld [vmem:[%s20309_s1 + $0x1c38] ss:$28 sps:$4 sm:$0xff]  }
 0x15c   :  { %9549 = vmatpush1.bf16.msra.mxu1 %v14128_v63  ;;  %v14188_v63 = vld [vmem:[%s20309_s1 + $0xe08] ss:$28 sps:$4 sm:$0xff]  }
 0x15d   :  { %9180 = vmatpush1.bf16.msra.mxu0 %v14125_v61  ;;  %9550 = vmatprep.subr.bf16.mxu1 %v14136_v2  ;;  %v14185_v61 = vld [vmem:[%s20309_s1 + $0x1c00] ss:$28 sps:$4 sm:$0xff]   ;;  %v16979_v2 = vrot.slane %v1748_v57, %v15824_v49  ;;  %v14248_v57 = vld [vmem:[%s20309_s1 + $0x1038] ss:$28 sps:$4 sm:$0xff]  }
 0x15e   :  { %9181 = vmatprep.subr.bf16.mxu0 %v14133_v1  ;;  %v14196_v1 = vld [vmem:[%s20309_s1 + $0xe44] ss:$28 sps:$4 sm:$0xff]  }
 0x160   :  { %9551 = vmatpush1.bf16.msra.mxu1 %v14134_v7  ;;  %v14199_v7 = vld [vmem:[%s20309_s1 + $0x1c74] ss:$28 sps:$4 sm:$0xff]  }
 0x161   :  { %9182 = vmatpush1.bf16.msra.mxu0 %v14131_v6  ;;  %9552 = vmatprep.subr.bf16.mxu1 %v14142_v10  ;;  %v14194_v6 = vld [vmem:[%s20309_s1 + $0xe40] ss:$28 sps:$4 sm:$0xff]   ;;  %v14197_v10 = vld [vmem:[%s20309_s1 + $0x1c70] ss:$28 sps:$4 sm:$0xff]  }
 0x162   :  { %9183 = vmatprep.subr.bf16.mxu0 %v14139_v8  ;;  %v14202_v8 = vld [vmem:[%s20309_s1 + $0xe7c] ss:$28 sps:$4 sm:$0xff]  }
 0x164   :  { %9553 = vmatpush1.bf16.msra.mxu1 %v14140_v12  ;;  %v14205_v12 = vld [vmem:[%s20309_s1 + $0x1cac] ss:$28 sps:$4 sm:$0xff]  }
 0x165   :  { %9184 = vmatpush1.bf16.msra.mxu0 %v14137_v11  ;;  %9554 = vmatprep.subr.bf16.mxu1 %v14148_v14  ;;  %v14200_v11 = vld [vmem:[%s20309_s1 + $0xe78] ss:$28 sps:$4 sm:$0xff]   ;;  %v14203_v14 = vld [vmem:[%s20309_s1 + $0x1ca8] ss:$28 sps:$4 sm:$0xff]  }
 0x166   :  { %9185 = vmatprep.subr.bf16.mxu0 %v14145_v13  ;;  %v14208_v13 = vld [vmem:[%s20309_s1 + $0xeb4] ss:$28 sps:$4 sm:$0xff]  }
 0x168   :  { %9555 = vmatpush1.bf16.msra.mxu1 %v14146_v16  ;;  %v14211_v16 = vld [vmem:[%s20309_s1 + $0x1ce4] ss:$28 sps:$4 sm:$0xff]  }
 0x169   :  { %9186 = vmatpush1.bf16.msra.mxu0 %v14143_v15  ;;  %9556 = vmatprep.subr.bf16.mxu1 %v14154_v20  ;;  %v14206_v15 = vld [vmem:[%s20309_s1 + $0xeb0] ss:$28 sps:$4 sm:$0xff]   ;;  %v14209_v20 = vld [vmem:[%s20309_s1 + $0x1ce0] ss:$28 sps:$4 sm:$0xff]  }
 0x16a   :  { %9187 = vmatprep.subr.bf16.mxu0 %v14151_v19  ;;  %v14214_v19 = vld [vmem:[%s20309_s1 + $0xeec] ss:$28 sps:$4 sm:$0xff]  }
 0x16c   :  { %9557 = vmatpush1.bf16.msra.mxu1 %v14152_v24  ;;  %v14217_v24 = vld [vmem:[%s20309_s1 + $0x1d1c] ss:$28 sps:$4 sm:$0xff]  }
 0x16d   :  { %9188 = vmatpush1.bf16.msra.mxu0 %v14149_v21  ;;  %9558 = vmatprep.subr.bf16.mxu1 %v14160_v27  ;;  %v14212_v21 = vld [vmem:[%s20309_s1 + $0xee8] ss:$28 sps:$4 sm:$0xff]   ;;  %v14215_v27 = vld [vmem:[%s20309_s1 + $0x1d18] ss:$28 sps:$4 sm:$0xff]  }
 0x16e   :  { %9189 = vmatprep.subr.bf16.mxu0 %v14157_v25  ;;  %v14220_v25 = vld [vmem:[%s20309_s1 + $0xf24] ss:$28 sps:$4 sm:$0xff]  }
 0x170   :  { %9559 = vmatpush1.bf16.msra.mxu1 %v14158_v31  ;;  %v14223_v31 = vld [vmem:[%s20309_s1 + $0x1d54] ss:$28 sps:$4 sm:$0xff]  }
 0x171   :  { %9190 = vmatpush1.bf16.msra.mxu0 %v14155_v28  ;;  %9560 = vmatprep.subr.bf16.mxu1 %v14166_v34  ;;  %v14218_v28 = vld [vmem:[%s20309_s1 + $0xf20] ss:$28 sps:$4 sm:$0xff]   ;;  %v14221_v34 = vld [vmem:[%s20309_s1 + $0x1d50] ss:$28 sps:$4 sm:$0xff]  }
 0x172   :  { %9191 = vmatprep.subr.bf16.mxu0 %v14163_v60  ;;  %v14226_v60 = vld [vmem:[%s20309_s1 + $0xf5c] ss:$28 sps:$4 sm:$0xff]  }
 0x174   :  { %9561 = vmatpush1.bf16.msra.mxu1 %v14164_v37  ;;  %v14229_v37 = vld [vmem:[%s20309_s1 + $0x1d8c] ss:$28 sps:$4 sm:$0xff]  }
 0x175   :  { %9192 = vmatpush1.bf16.msra.mxu0 %v14161_v36  ;;  %9562 = vmatprep.subr.bf16.mxu1 %v14172_v39  ;;  %v14224_v36 = vld [vmem:[%s20309_s1 + $0xf58] ss:$28 sps:$4 sm:$0xff]   ;;  %v14227_v39 = vld [vmem:[%s20309_s1 + $0x1d88] ss:$28 sps:$4 sm:$0xff]  }
 0x176   :  { %9193 = vmatprep.subr.bf16.mxu0 %v14169_v38  ;;  %v14232_v38 = vld [vmem:[%s20309_s1 + $0xf94] ss:$28 sps:$4 sm:$0xff]  }
 0x178   :  { %9563 = vmatpush1.bf16.msra.mxu1 %v14170_v43  ;;  %v14235_v43 = vld [vmem:[%s20309_s1 + $0x1dc4] ss:$28 sps:$4 sm:$0xff]  }
 0x179   :  { %9194 = vmatpush1.bf16.msra.mxu0 %v14167_v40  ;;  %9564 = vmatprep.subr.bf16.mxu1 %v14178_v45  ;;  %v14230_v40 = vld [vmem:[%s20309_s1 + $0xf90] ss:$28 sps:$4 sm:$0xff]   ;;  %v14233_v45 = vld [vmem:[%s20309_s1 + $0x1dc0] ss:$28 sps:$4 sm:$0xff]  }
 0x17a   :  { %9195 = vmatprep.subr.bf16.mxu0 %v14175_v44  ;;  %v14238_v44 = vld [vmem:[%s20309_s1 + $0xfcc] ss:$28 sps:$4 sm:$0xff]  }
 0x17c   :  { %9565 = vmatpush1.bf16.msra.mxu1 %v14176_v50  ;;  %v14241_v50 = vld [vmem:[%s20309_s1 + $0x1dfc] ss:$28 sps:$4 sm:$0xff]  }
 0x17d   :  { %9196 = vmatpush1.bf16.msra.mxu0 %v14173_v47  ;;  %9566 = vmatprep.subr.bf16.mxu1 %v14184_v52  ;;  %v14236_v47 = vld [vmem:[%s20309_s1 + $0xfc8] ss:$28 sps:$4 sm:$0xff]   ;;  %v14239_v52 = vld [vmem:[%s20309_s1 + $0x1df8] ss:$28 sps:$4 sm:$0xff]  }
 0x17e   :  { %9197 = vmatprep.subr.bf16.mxu0 %v14181_v51  ;;  %v14244_v51 = vld [vmem:[%s20309_s1 + $0x1004] ss:$28 sps:$4 sm:$0xff]  }
 0x180   :  { %9567 = vmatpush1.bf16.msra.mxu1 %v14182_v54  ;;  %v14247_v54 = vld [vmem:[%s20309_s1 + $0x1e34] ss:$28 sps:$4 sm:$0xff]  }
 0x181   :  { %9198 = vmatpush1.bf16.msra.mxu0 %v14179_v35  ;;  %9577 = vmatprep.subr.bf16.mxu1 %v14190_v56  ;;  %v14242_v35 = vld [vmem:[%s20309_s1 + $0x1000] ss:$28 sps:$4 sm:$0xff]   ;;  %v14245_v56 = vld [vmem:[%s20309_s1 + $0x1e30] ss:$28 sps:$4 sm:$0xff]  }
 0x182   :  { %9208 = vmatprep.subr.bf16.mxu0 %v14187_v55  ;;  %v14250_v55 = vld [vmem:[%s20309_s1 + $0x103c] ss:$28 sps:$4 sm:$0xff]  }
 0x183   :  { %9569 = vmatmul.mubr.bf16.vlgmr.msra.gmra.mrb[4].mxu1 %v16124_v30 }
 0x184   :  { %9200 = vmatmul.mubr.bf16.vlgmr.msra.gmra.mrb[0].mxu0 %v16964_v58  ;;  %9578 = vmatpush1.bf16.msra.mxu1 %v14188_v63  ;;  %v14256_v63 = vld [vmem:[%s20309_s1 + $0x1074] ss:$28 sps:$4 sm:$0xff]  }
 0x185   :  { %9209 = vmatpush1.bf16.msra.mxu0 %v14185_v61  ;;  %9579 = vmatprep.subr.bf16.mxu1 %v14196_v1  ;;  %v14253_v61 = vld [vmem:[%s20309_s1 + $0x1e6c] ss:$28 sps:$4 sm:$0xff]  }
 0x186   :  { %9210 = vmatprep.subr.bf16.mxu0 %v14193_v0  ;;  %9240 = vmatprep.mubr.bf16.mxu0 %v16979_v2  ;;  %v14251_v0 = vld [vmem:[%s20309_s1 + $0x1e68] ss:$28 sps:$4 sm:$0xff]   ;;  %v14254_v1 = vld [vmem:[%s20309_s1 + $0x1070] ss:$28 sps:$4 sm:$0xff]  }
 0x187   :  { %9609 = vmatprep.mubr.bf16.mxu1 %v16161_v41 }
 0x188   :  { %9580 = vmatpush1.bf16.msra.mxu1 %v14194_v6  ;;  %v14262_v6 = vld [vmem:[%s20309_s1 + $0x10ac] ss:$28 sps:$4 sm:$0xff]  }
 0x189   :  { %9211 = vmatpush1.bf16.msra.mxu0 %v14191_v5  ;;  %9581 = vmatprep.subr.bf16.mxu1 %v14202_v8  ;;  %v14259_v5 = vld [vmem:[%s20309_s1 + $0x1ea4] ss:$28 sps:$4 sm:$0xff]  }
 0x18a   :  { %9212 = vmatprep.subr.bf16.mxu0 %v14199_v7  ;;  %v14257_v7 = vld [vmem:[%s20309_s1 + $0x1ea0] ss:$28 sps:$4 sm:$0xff]   ;;  %v14260_v8 = vld [vmem:[%s20309_s1 + $0x10a8] ss:$28 sps:$4 sm:$0xff]  }
 0x18c   :  { %9582 = vmatpush1.bf16.msra.mxu1 %v14200_v11  ;;  %v14268_v11 = vld [vmem:[%s20309_s1 + $0x10e4] ss:$28 sps:$4 sm:$0xff]  }
 0x18d   :  { %9213 = vmatpush1.bf16.msra.mxu0 %v14197_v10  ;;  %9583 = vmatprep.subr.bf16.mxu1 %v14208_v13  ;;  %v14265_v10 = vld [vmem:[%s20309_s1 + $0x1edc] ss:$28 sps:$4 sm:$0xff]  }
 0x18e   :  { %9214 = vmatprep.subr.bf16.mxu0 %v14205_v12  ;;  %v14263_v12 = vld [vmem:[%s20309_s1 + $0x1ed8] ss:$28 sps:$4 sm:$0xff]   ;;  %v14266_v13 = vld [vmem:[%s20309_s1 + $0x10e0] ss:$28 sps:$4 sm:$0xff]  }
 0x190   :  { %9584 = vmatpush1.bf16.msra.mxu1 %v14206_v15  ;;  %v14274_v15 = vld [vmem:[%s20309_s1 + $0x111c] ss:$28 sps:$4 sm:$0xff]  }
 0x191   :  { %9215 = vmatpush1.bf16.msra.mxu0 %v14203_v14  ;;  %9585 = vmatprep.subr.bf16.mxu1 %v14214_v19  ;;  %v14271_v14 = vld [vmem:[%s20309_s1 + $0x1f14] ss:$28 sps:$4 sm:$0xff]  }
 0x192   :  { %9216 = vmatprep.subr.bf16.mxu0 %v14211_v16  ;;  %v14269_v16 = vld [vmem:[%s20309_s1 + $0x1f10] ss:$28 sps:$4 sm:$0xff]   ;;  %v14272_v19 = vld [vmem:[%s20309_s1 + $0x1118] ss:$28 sps:$4 sm:$0xff]  }
 0x194   :  { %9586 = vmatpush1.bf16.msra.mxu1 %v14212_v21  ;;  %v14280_v21 = vld [vmem:[%s20309_s1 + $0x1154] ss:$28 sps:$4 sm:$0xff]  }
 0x195   :  { %9217 = vmatpush1.bf16.msra.mxu0 %v14209_v20  ;;  %9587 = vmatprep.subr.bf16.mxu1 %v14220_v25  ;;  %v14277_v20 = vld [vmem:[%s20309_s1 + $0x1f4c] ss:$28 sps:$4 sm:$0xff]  }
 0x196   :  { %9218 = vmatprep.subr.bf16.mxu0 %v14217_v24  ;;  %v14275_v24 = vld [vmem:[%s20309_s1 + $0x1f48] ss:$28 sps:$4 sm:$0xff]   ;;  %v14278_v25 = vld [vmem:[%s20309_s1 + $0x1150] ss:$28 sps:$4 sm:$0xff]  }
 0x198   :  { %9588 = vmatpush1.bf16.msra.mxu1 %v14218_v28  ;;  %v14286_v28 = vld [vmem:[%s20309_s1 + $0x118c] ss:$28 sps:$4 sm:$0xff]  }
 0x199   :  { %9219 = vmatpush1.bf16.msra.mxu0 %v14215_v27  ;;  %9589 = vmatprep.subr.bf16.mxu1 %v14226_v60  ;;  %v14283_v27 = vld [vmem:[%s20309_s1 + $0x1f84] ss:$28 sps:$4 sm:$0xff]  }
 0x19a   :  { %9220 = vmatprep.subr.bf16.mxu0 %v14223_v31  ;;  %v17167_v31 = vrot.slane %v16934_v46, %v15824_v49  ;;  %v14281_v60 = vld [vmem:[%s20309_s1 + $0x1f80] ss:$28 sps:$4 sm:$0xff]  }
 0x19b   :  { %v14292_v46 = vld [vmem:[%s20309_s1 + $0x11c4] ss:$28 sps:$4 sm:$0xff]  }
 0x19c   :  { %9590 = vmatpush1.bf16.msra.mxu1 %v14224_v36  ;;  %v14289_v36 = vld [vmem:[%s20309_s1 + $0x1fbc] ss:$28 sps:$4 sm:$0xff]  }
 0x19d   :  { %9221 = vmatpush1.bf16.msra.mxu0 %v14221_v34  ;;  %9591 = vmatprep.subr.bf16.mxu1 %v14232_v38  ;;  %v14284_v34 = vld [vmem:[%s20309_s1 + $0x1188] ss:$28 sps:$4 sm:$0xff]   ;;  %v14287_v38 = vld [vmem:[%s20309_s1 + $0x1fb8] ss:$28 sps:$4 sm:$0xff]  }
 0x19e   :  { %9222 = vmatprep.subr.bf16.mxu0 %v14229_v37  ;;  %v17183_v37 = vcombine.high %v16979_v2, %v16979_v2 }
 0x1a0   :  { %9592 = vmatpush1.bf16.msra.mxu1 %v14230_v40  ;;  %v14295_v40 = vld [vmem:[%s20309_s1 + $0x1ff4] ss:$28 sps:$4 sm:$0xff]  }
 0x1a1   :  { %9223 = vmatpush1.bf16.msra.mxu0 %v14227_v39  ;;  %9593 = vmatprep.subr.bf16.mxu1 %v14238_v44  ;;  %v14290_v39 = vld [vmem:[%s20309_s1 + $0x11c0] ss:$28 sps:$4 sm:$0xff]   ;;  %v14293_v44 = vld [vmem:[%s20309_s1 + $0x1ff0] ss:$28 sps:$4 sm:$0xff]  }
 0x1a2   :  { %9224 = vmatprep.subr.bf16.mxu0 %v14235_v43  ;;  %v14298_v43 = vld [vmem:[%s20309_s1 + $0x11fc] ss:$28 sps:$4 sm:$0xff]  }
 0x1a4   :  { %9594 = vmatpush1.bf16.msra.mxu1 %v14236_v47  ;;  %v14301_v47 = vld [vmem:[%s20309_s1 + $0x202c] ss:$28 sps:$4 sm:$0xff]  }
 0x1a5   :  { %9225 = vmatpush1.bf16.msra.mxu0 %v14233_v45  ;;  %9595 = vmatprep.subr.bf16.mxu1 %v14244_v51  ;;  %v14296_v45 = vld [vmem:[%s20309_s1 + $0x11f8] ss:$28 sps:$4 sm:$0xff]   ;;  %v14299_v51 = vld [vmem:[%s20309_s1 + $0x2028] ss:$28 sps:$4 sm:$0xff]  }
 0x1a6   :  { %9226 = vmatprep.subr.bf16.mxu0 %v14241_v50  ;;  %v14304_v50 = vld [vmem:[%s20309_s1 + $0x1234] ss:$28 sps:$4 sm:$0xff]  }
 0x1a8   :  { %9596 = vmatpush1.bf16.msra.mxu1 %v14242_v35  ;;  %v14307_v35 = vld [vmem:[%s20309_s1 + $0x2064] ss:$28 sps:$4 sm:$0xff]  }
 0x1a9   :  { %9227 = vmatpush1.bf16.msra.mxu0 %v14239_v52  ;;  %9597 = vmatprep.subr.bf16.mxu1 %v14250_v55  ;;  %v14302_v52 = vld [vmem:[%s20309_s1 + $0x1230] ss:$28 sps:$4 sm:$0xff]   ;;  %v14305_v55 = vld [vmem:[%s20309_s1 + $0x2060] ss:$28 sps:$4 sm:$0xff]  }
 0x1aa   :  { %9228 = vmatprep.subr.bf16.mxu0 %v14247_v54  ;;  %v14310_v54 = vld [vmem:[%s20309_s1 + $0x126c] ss:$28 sps:$4 sm:$0xff]  }
 0x1ac   :  { %9598 = vmatpush1.bf16.msra.mxu1 %v14248_v57  ;;  %v14313_v57 = vld [vmem:[%s20309_s1 + $0x209c] ss:$28 sps:$4 sm:$0xff]  }
 0x1ad   :  { %9229 = vmatpush1.bf16.msra.mxu0 %v14245_v56  ;;  %9599 = vmatprep.subr.bf16.mxu1 %v14256_v63  ;;  %v14308_v56 = vld [vmem:[%s20309_s1 + $0x1268] ss:$28 sps:$4 sm:$0xff]   ;;  %v14311_v63 = vld [vmem:[%s20309_s1 + $0x2098] ss:$28 sps:$4 sm:$0xff]  }
 0x1ae   :  { %9230 = vmatprep.subr.bf16.mxu0 %v14253_v61  ;;  %v14316_v61 = vld [vmem:[%s20309_s1 + $0x12a4] ss:$28 sps:$4 sm:$0xff]  }
 0x1b0   :  { %9600 = vmatpush1.bf16.msra.mxu1 %v14254_v1  ;;  %v14319_v1 = vld [vmem:[%s20309_s1 + $0x20d4] ss:$28 sps:$4 sm:$0xff]  }
 0x1b1   :  { %9231 = vmatpush1.bf16.msra.mxu0 %v14251_v0  ;;  %9601 = vmatprep.subr.bf16.mxu1 %v14262_v6  ;;  %v14314_v0 = vld [vmem:[%s20309_s1 + $0x12a0] ss:$28 sps:$4 sm:$0xff]   ;;  %v14317_v6 = vld [vmem:[%s20309_s1 + $0x20d0] ss:$28 sps:$4 sm:$0xff]  }
 0x1b2   :  { %9232 = vmatprep.subr.bf16.mxu0 %v14259_v5  ;;  %v14322_v5 = vld [vmem:[%s20309_s1 + $0x12dc] ss:$28 sps:$4 sm:$0xff]  }
 0x1b4   :  { %9602 = vmatpush1.bf16.msra.mxu1 %v14260_v8  ;;  %v14325_v8 = vld [vmem:[%s20309_s1 + $0x210c] ss:$28 sps:$4 sm:$0xff]  }
 0x1b5   :  { %9233 = vmatpush1.bf16.msra.mxu0 %v14257_v7  ;;  %9603 = vmatprep.subr.bf16.mxu1 %v14268_v11  ;;  %v14320_v7 = vld [vmem:[%s20309_s1 + $0x12d8] ss:$28 sps:$4 sm:$0xff]   ;;  %v14323_v11 = vld [vmem:[%s20309_s1 + $0x2108] ss:$28 sps:$4 sm:$0xff]  }
 0x1b6   :  { %9234 = vmatprep.subr.bf16.mxu0 %v14265_v10  ;;  %v14328_v10 = vld [vmem:[%s20309_s1 + $0x1314] ss:$28 sps:$4 sm:$0xff]  }
 0x1b8   :  { %9604 = vmatpush1.bf16.msra.mxu1 %v14266_v13  ;;  %v14331_v13 = vld [vmem:[%s20309_s1 + $0x2144] ss:$28 sps:$4 sm:$0xff]  }
 0x1b9   :  { %9235 = vmatpush1.bf16.msra.mxu0 %v14263_v12  ;;  %9605 = vmatprep.subr.bf16.mxu1 %v14274_v15  ;;  %v14326_v12 = vld [vmem:[%s20309_s1 + $0x1310] ss:$28 sps:$4 sm:$0xff]   ;;  %v14329_v15 = vld [vmem:[%s20309_s1 + $0x2140] ss:$28 sps:$4 sm:$0xff]  }
 0x1ba   :  { %9236 = vmatprep.subr.bf16.mxu0 %v14271_v14  ;;  %v14334_v14 = vld [vmem:[%s20309_s1 + $0x134c] ss:$28 sps:$4 sm:$0xff]  }
 0x1bc   :  { %9606 = vmatpush1.bf16.msra.mxu1 %v14272_v19  ;;  %v14337_v19 = vld [vmem:[%s20309_s1 + $0x217c] ss:$28 sps:$4 sm:$0xff]  }
 0x1bd   :  { %9237 = vmatpush1.bf16.msra.mxu0 %v14269_v16  ;;  %9607 = vmatprep.subr.bf16.mxu1 %v14280_v21  ;;  %v14332_v16 = vld [vmem:[%s20309_s1 + $0x1348] ss:$28 sps:$4 sm:$0xff]   ;;  %v14335_v21 = vld [vmem:[%s20309_s1 + $0x2178] ss:$28 sps:$4 sm:$0xff]  }
 0x1be   :  { %9238 = vmatprep.subr.bf16.mxu0 %v14277_v20  ;;  %v14340_v20 = vld [vmem:[%s20309_s1 + $0x1384] ss:$28 sps:$4 sm:$0xff]  }
 0x1c0   :  { %9608 = vmatpush1.bf16.msra.mxu1 %v14278_v25  ;;  %v14343_v25 = vld [vmem:[%s20309_s1 + $0x21b4] ss:$28 sps:$4 sm:$0xff]  }
 0x1c1   :  { %9239 = vmatpush1.bf16.msra.mxu0 %v14275_v24  ;;  %9618 = vmatprep.subr.bf16.mxu1 %v14286_v28  ;;  %v14338_v24 = vld [vmem:[%s20309_s1 + $0x1380] ss:$28 sps:$4 sm:$0xff]   ;;  %v14341_v28 = vld [vmem:[%s20309_s1 + $0x21b0] ss:$28 sps:$4 sm:$0xff]  }
 0x1c2   :  { %9249 = vmatprep.subr.bf16.mxu0 %v14283_v27  ;;  %v14346_v27 = vld [vmem:[%s20309_s1 + $0x13bc] ss:$28 sps:$4 sm:$0xff]  }
 0x1c3   :  { %9610 = vmatmul.mubr.bf16.vlgmr.msra.gmra.mrb[4].mxu1 %v16335_v48 }
 0x1c4   :  { %9241 = vmatmul.mubr.bf16.vlgmr.msra.gmra.mrb[0].mxu0 %v17167_v31  ;;  %9619 = vmatpush1.bf16.msra.mxu1 %v14284_v34  ;;  %v14349_v34 = vld [vmem:[%s20309_s1 + $0x21ec] ss:$28 sps:$4 sm:$0xff]  }
 0x1c5   :  { %9250 = vmatpush1.bf16.msra.mxu0 %v14281_v60  ;;  %9620 = vmatprep.subr.bf16.mxu1 %v14292_v46  ;;  %v14344_v60 = vld [vmem:[%s20309_s1 + $0x13b8] ss:$28 sps:$4 sm:$0xff]   ;;  %v14347_v46 = vld [vmem:[%s20309_s1 + $0x21e8] ss:$28 sps:$4 sm:$0xff]  }
 0x1c6   :  { %9251 = vmatprep.subr.bf16.mxu0 %v14289_v36  ;;  %9281 = vmatprep.mubr.bf16.mxu0 %v17183_v37  ;;  %v14352_v36 = vld [vmem:[%s20309_s1 + $0x13f4] ss:$28 sps:$4 sm:$0xff]  }
 0x1c7   :  { %9650 = vmatprep.mubr.bf16.mxu1 %v16351_v53 }
 0x1c8   :  { %9621 = vmatpush1.bf16.msra.mxu1 %v14290_v39  ;;  %v14355_v39 = vld [vmem:[%s20309_s1 + $0x2224] ss:$28 sps:$4 sm:$0xff]  }
 0x1c9   :  { %9252 = vmatpush1.bf16.msra.mxu0 %v14287_v38  ;;  %9622 = vmatprep.subr.bf16.mxu1 %v14298_v43  ;;  %v14350_v38 = vld [vmem:[%s20309_s1 + $0x13f0] ss:$28 sps:$4 sm:$0xff]   ;;  %v14353_v43 = vld [vmem:[%s20309_s1 + $0x2220] ss:$28 sps:$4 sm:$0xff]  }
 0x1ca   :  { %9253 = vmatprep.subr.bf16.mxu0 %v14295_v40  ;;  %v14358_v40 = vld [vmem:[%s20309_s1 + $0x142c] ss:$28 sps:$4 sm:$0xff]  }
 0x1cc   :  { %9623 = vmatpush1.bf16.msra.mxu1 %v14296_v45  ;;  %v14361_v45 = vld [vmem:[%s20309_s1 + $0x225c] ss:$28 sps:$4 sm:$0xff]  }
 0x1cd   :  { %9254 = vmatpush1.bf16.msra.mxu0 %v14293_v44  ;;  %9624 = vmatprep.subr.bf16.mxu1 %v14304_v50  ;;  %v14356_v44 = vld [vmem:[%s20309_s1 + $0x1428] ss:$28 sps:$4 sm:$0xff]   ;;  %v14359_v50 = vld [vmem:[%s20309_s1 + $0x2258] ss:$28 sps:$4 sm:$0xff]  }
 0x1ce   :  { %9255 = vmatprep.subr.bf16.mxu0 %v14301_v47  ;;  %v14364_v47 = vld [vmem:[%s20309_s1 + $0x1464] ss:$28 sps:$4 sm:$0xff]  }
 0x1d0   :  { %9625 = vmatpush1.bf16.msra.mxu1 %v14302_v52  ;;  %v14367_v52 = vld [vmem:[%s20309_s1 + $0x2294] ss:$28 sps:$4 sm:$0xff]  }
 0x1d1   :  { %9256 = vmatpush1.bf16.msra.mxu0 %v14299_v51  ;;  %9626 = vmatprep.subr.bf16.mxu1 %v14310_v54  ;;  %v14362_v51 = vld [vmem:[%s20309_s1 + $0x1460] ss:$28 sps:$4 sm:$0xff]   ;;  %v15626_v54 = vld [vmem:[%s20308_s0 + $0x10] sm:$0xff] }
 0x1d2   :  { %9257 = vmatprep.subr.bf16.mxu0 %v14307_v35  ;;  %v14370_v35 = vld [vmem:[%s20309_s1 + $0x149c] ss:$28 sps:$4 sm:$0xff]  }
 0x1d4   :  { %9627 = vmatpush1.bf16.msra.mxu1 %v14308_v56  ;;  %v14365_v56 = vld [vmem:[%s20309_s1 + $0x2290] ss:$28 sps:$4 sm:$0xff]  }
 0x1d5   :  { %9258 = vmatpush1.bf16.msra.mxu0 %v14305_v55  ;;  %9628 = vmatprep.subr.bf16.mxu1 %v14316_v61  ;;  %v1733_v55 = vcombine.high %v15626_v54, %v15626_v54  ;;  %v14373_v61 = vld [vmem:[%s20309_s1 + $0x22cc] ss:$28 sps:$4 sm:$0xff]   ;;  %v14424_v54 = vld [vmem:[%s20309_s1 + $0x1694] ss:$28 sps:$4 sm:$0xff]  }
 0x1d6   :  { %9259 = vmatprep.subr.bf16.mxu0 %v14313_v57  ;;  %v14368_v57 = vld [vmem:[%s20309_s1 + $0x1498] ss:$28 sps:$4 sm:$0xff]  }
 0x1d8   :  { %9629 = vmatpush1.bf16.msra.mxu1 %v14314_v0  ;;  %v17361_v0 = vrot.slane %v1733_v55, %v15824_v49  ;;  %v14419_v55 = vld [vmem:[%s20309_s1 + $0x2488] ss:$28 sps:$4 sm:$0xff]  }
 0x1d9   :  { %9260 = vmatpush1.bf16.msra.mxu0 %v14311_v63  ;;  %9630 = vmatprep.subr.bf16.mxu1 %v14322_v5  ;;  %v14376_v63 = vld [vmem:[%s20309_s1 + $0x14d4] ss:$28 sps:$4 sm:$0xff]  }
 0x1da   :  { %9261 = vmatprep.subr.bf16.mxu0 %v14319_v1  ;;  %v14371_v1 = vld [vmem:[%s20309_s1 + $0x22c8] ss:$28 sps:$4 sm:$0xff]   ;;  %v14374_v5 = vld [vmem:[%s20309_s1 + $0x14d0] ss:$28 sps:$4 sm:$0xff]  }
 0x1dc   :  { %9631 = vmatpush1.bf16.msra.mxu1 %v14320_v7  ;;  %v14382_v7 = vld [vmem:[%s20309_s1 + $0x150c] ss:$28 sps:$4 sm:$0xff]  }
 0x1dd   :  { %9262 = vmatpush1.bf16.msra.mxu0 %v14317_v6  ;;  %9632 = vmatprep.subr.bf16.mxu1 %v14328_v10  ;;  %v14379_v6 = vld [vmem:[%s20309_s1 + $0x2304] ss:$28 sps:$4 sm:$0xff]   ;;  %v17379_v10 = vcombine.high %v17167_v31, %v17167_v31 }
 0x1de   :  { %9263 = vmatprep.subr.bf16.mxu0 %v14325_v8  ;;  %v1749_v8 = vcombine.high %v17361_v0, %v17361_v0 }
 0x1e0   :  { %9633 = vmatpush1.bf16.msra.mxu1 %v14326_v12  ;;  %v14380_v12 = vld [vmem:[%s20309_s1 + $0x1508] ss:$28 sps:$4 sm:$0xff]  }
 0x1e1   :  { %9264 = vmatpush1.bf16.msra.mxu0 %v14323_v11  ;;  %9634 = vmatprep.subr.bf16.mxu1 %v14334_v14  ;;  %v14377_v11 = vld [vmem:[%s20309_s1 + $0x2300] ss:$28 sps:$4 sm:$0xff]  }
 0x1e2   :  { %9265 = vmatprep.subr.bf16.mxu0 %v14331_v13  ;;  %v14385_v13 = vld [vmem:[%s20309_s1 + $0x233c] ss:$28 sps:$4 sm:$0xff]   ;;  %v14388_v14 = vld [vmem:[%s20309_s1 + $0x1544] ss:$28 sps:$4 sm:$0xff]  }
 0x1e4   :  { %9635 = vmatpush1.bf16.msra.mxu1 %v14332_v16  ;;  %v14383_v16 = vld [vmem:[%s20309_s1 + $0x2338] ss:$28 sps:$4 sm:$0xff]  }
 0x1e5   :  { %9266 = vmatpush1.bf16.msra.mxu0 %v14329_v15  ;;  %9636 = vmatprep.subr.bf16.mxu1 %v14340_v20  ;;  %v17394_v15 = vrot.slane %v1749_v8, %v15824_v49  ;;  %v14391_v20 = vld [vmem:[%s20309_s1 + $0x2374] ss:$28 sps:$4 sm:$0xff]   ;;  %v14434_v8 = vld [vmem:[%s20309_s1 + $0x1700] ss:$28 sps:$4 sm:$0xff]  }
 0x1e6   :  { %9267 = vmatprep.subr.bf16.mxu0 %v14337_v19  ;;  %v14386_v19 = vld [vmem:[%s20309_s1 + $0x1540] ss:$28 sps:$4 sm:$0xff]  }
 0x1e8   :  { %9637 = vmatpush1.bf16.msra.mxu1 %v14338_v24  ;;  %v14389_v24 = vld [vmem:[%s20309_s1 + $0x2370] ss:$28 sps:$4 sm:$0xff]  }
 0x1e9   :  { %9268 = vmatpush1.bf16.msra.mxu0 %v14335_v21  ;;  %9638 = vmatprep.subr.bf16.mxu1 %v14346_v27  ;;  %v14394_v21 = vld [vmem:[%s20309_s1 + $0x157c] ss:$28 sps:$4 sm:$0xff]   ;;  %v14397_v27 = vld [vmem:[%s20309_s1 + $0x23ac] ss:$28 sps:$4 sm:$0xff]  }
 0x1ea   :  { %9269 = vmatprep.subr.bf16.mxu0 %v14343_v25  ;;  %v14392_v25 = vld [vmem:[%s20309_s1 + $0x1578] ss:$28 sps:$4 sm:$0xff]  }
 0x1ec   :  { %9639 = vmatpush1.bf16.msra.mxu1 %v14344_v60  ;;  %v14395_v60 = vld [vmem:[%s20309_s1 + $0x23a8] ss:$28 sps:$4 sm:$0xff]  }
 0x1ed   :  { %9270 = vmatpush1.bf16.msra.mxu0 %v14341_v28  ;;  %9640 = vmatprep.subr.bf16.mxu1 %v14352_v36  ;;  %v14400_v28 = vld [vmem:[%s20309_s1 + $0x15b4] ss:$28 sps:$4 sm:$0xff]   ;;  %v14403_v36 = vld [vmem:[%s20309_s1 + $0x23e4] ss:$28 sps:$4 sm:$0xff]  }
 0x1ee   :  { %9271 = vmatprep.subr.bf16.mxu0 %v14349_v34  ;;  %v14398_v34 = vld [vmem:[%s20309_s1 + $0x15b0] ss:$28 sps:$4 sm:$0xff]  }
 0x1f0   :  { %9641 = vmatpush1.bf16.msra.mxu1 %v14350_v38  ;;  %v14401_v38 = vld [vmem:[%s20309_s1 + $0x23e0] ss:$28 sps:$4 sm:$0xff]  }
 0x1f1   :  { %9272 = vmatpush1.bf16.msra.mxu0 %v14347_v46  ;;  %9642 = vmatprep.subr.bf16.mxu1 %v14358_v40  ;;  %v14406_v46 = vld [vmem:[%s20309_s1 + $0x15ec] ss:$28 sps:$4 sm:$0xff]   ;;  %v14409_v40 = vld [vmem:[%s20309_s1 + $0x241c] ss:$28 sps:$4 sm:$0xff]  }
 0x1f2   :  { %9273 = vmatprep.subr.bf16.mxu0 %v14355_v39  ;;  %v14404_v39 = vld [vmem:[%s20309_s1 + $0x15e8] ss:$28 sps:$4 sm:$0xff]  }
 0x1f4   :  { %9643 = vmatpush1.bf16.msra.mxu1 %v14356_v44  ;;  %v14407_v44 = vld [vmem:[%s20309_s1 + $0x2418] ss:$28 sps:$4 sm:$0xff]  }
 0x1f5   :  { %9274 = vmatpush1.bf16.msra.mxu0 %v14353_v43  ;;  %9644 = vmatprep.subr.bf16.mxu1 %v14364_v47  ;;  %v14412_v43 = vld [vmem:[%s20309_s1 + $0x1624] ss:$28 sps:$4 sm:$0xff]   ;;  %v14415_v47 = vld [vmem:[%s20309_s1 + $0x2454] ss:$28 sps:$4 sm:$0xff]  }
 0x1f6   :  { %9275 = vmatprep.subr.bf16.mxu0 %v14361_v45  ;;  %v14410_v45 = vld [vmem:[%s20309_s1 + $0x1620] ss:$28 sps:$4 sm:$0xff]  }
 0x1f8   :  { %9645 = vmatpush1.bf16.msra.mxu1 %v14362_v51  ;;  %v14413_v51 = vld [vmem:[%s20309_s1 + $0x2450] ss:$28 sps:$4 sm:$0xff]  }
 0x1f9   :  { %9276 = vmatpush1.bf16.msra.mxu0 %v14359_v50  ;;  %9646 = vmatprep.subr.bf16.mxu1 %v14370_v35  ;;  %v14418_v50 = vld [vmem:[%s20309_s1 + $0x165c] ss:$28 sps:$4 sm:$0xff]   ;;  %v14421_v35 = vld [vmem:[%s20309_s1 + $0x248c] ss:$28 sps:$4 sm:$0xff]  }
 0x1fa   :  { %9277 = vmatprep.subr.bf16.mxu0 %v14367_v52  ;;  %v14416_v52 = vld [vmem:[%s20309_s1 + $0x1658] ss:$28 sps:$4 sm:$0xff]  }
 0x1fc   :  { %9647 = vmatpush1.bf16.msra.mxu1 %v14368_v57  ;;  %v14427_v57 = vld [vmem:[%s20309_s1 + $0x24c4] ss:$28 sps:$4 sm:$0xff]  }
 0x1fd   :  { %9278 = vmatpush1.bf16.msra.mxu0 %v14365_v56  ;;  %9648 = vmatprep.subr.bf16.mxu1 %v14376_v63  ;;  %v14422_v56 = vld [vmem:[%s20309_s1 + $0x1690] ss:$28 sps:$4 sm:$0xff]   ;;  %v14425_v63 = vld [vmem:[%s20309_s1 + $0x24c0] ss:$28 sps:$4 sm:$0xff]  }
 0x1fe   :  { %9279 = vmatprep.subr.bf16.mxu0 %v14373_v61  ;;  %v14430_v61 = vld [vmem:[%s20309_s1 + $0x16cc] ss:$28 sps:$4 sm:$0xff]  }
 0x200   :  { %9649 = vmatpush1.bf16.msra.mxu1 %v14374_v5  ;;  %v14433_v5 = vld [vmem:[%s20309_s1 + $0x24fc] ss:$28 sps:$4 sm:$0xff]  }
 0x201   :  { %9280 = vmatpush1.bf16.msra.mxu0 %v14371_v1  ;;  %9659 = vmatprep.subr.bf16.mxu1 %v14382_v7  ;;  %v14428_v1 = vld [vmem:[%s20309_s1 + $0x16c8] ss:$28 sps:$4 sm:$0xff]   ;;  %v14431_v7 = vld [vmem:[%s20309_s1 + $0x24f8] ss:$28 sps:$4 sm:$0xff]  }
 0x202   :  { %9290 = vmatprep.subr.bf16.mxu0 %v14379_v6  ;;  %v14436_v6 = vld [vmem:[%s20309_s1 + $0x1704] ss:$28 sps:$4 sm:$0xff]  }
 0x203   :  { %9651 = vmatmul.mubr.bf16.vlgmr.msra.gmra.mrb[4].mxu1 %v16546_v4 }
 0x204   :  { %9282 = vmatmul.mubr.bf16.vlgmr.msra.gmra.mrb[0].mxu0 %v17379_v10  ;;  %9660 = vmatpush1.bf16.msra.mxu1 %v14380_v12  ;;  %v14442_v12 = vld [vmem:[%s20309_s1 + $0x173c] ss:$28 sps:$4 sm:$0xff]  }
 0x205   :  { %9291 = vmatpush1.bf16.msra.mxu0 %v14377_v11  ;;  %9661 = vmatprep.subr.bf16.mxu1 %v14388_v14  ;;  %v14439_v11 = vld [vmem:[%s20309_s1 + $0x2534] ss:$28 sps:$4 sm:$0xff]  }
 0x206   :  { %9292 = vmatprep.subr.bf16.mxu0 %v14385_v13  ;;  %9322 = vmatprep.mubr.bf16.mxu0 %v17394_v15  ;;  %v14437_v13 = vld [vmem:[%s20309_s1 + $0x2530] ss:$28 sps:$4 sm:$0xff]   ;;  %v14440_v14 = vld [vmem:[%s20309_s1 + $0x1738] ss:$28 sps:$4 sm:$0xff]  }
 0x207   :  { %9691 = vmatprep.mubr.bf16.mxu1 %v16561_v9 }
 0x208   :  { %9662 = vmatpush1.bf16.msra.mxu1 %v14386_v19  ;;  %v14448_v19 = vld [vmem:[%s20309_s1 + $0x1774] ss:$28 sps:$4 sm:$0xff]  }
 0x209   :  { %9293 = vmatpush1.bf16.msra.mxu0 %v14383_v16  ;;  %9663 = vmatprep.subr.bf16.mxu1 %v14394_v21  ;;  %v14445_v16 = vld [vmem:[%s20309_s1 + $0x256c] ss:$28 sps:$4 sm:$0xff]  }
 0x20a   :  { %9294 = vmatprep.subr.bf16.mxu0 %v14391_v20  ;;  %v14443_v20 = vld [vmem:[%s20309_s1 + $0x2568] ss:$28 sps:$4 sm:$0xff]   ;;  %v14446_v21 = vld [vmem:[%s20309_s1 + $0x1770] ss:$28 sps:$4 sm:$0xff]  }
 0x20c   :  { %9664 = vmatpush1.bf16.msra.mxu1 %v14392_v25  ;;  %v14454_v25 = vld [vmem:[%s20309_s1 + $0x17ac] ss:$28 sps:$4 sm:$0xff]  }
 0x20d   :  { %9295 = vmatpush1.bf16.msra.mxu0 %v14389_v24  ;;  %9665 = vmatprep.subr.bf16.mxu1 %v14400_v28  ;;  %v14451_v24 = vld [vmem:[%s20309_s1 + $0x25a4] ss:$28 sps:$4 sm:$0xff]  }
 0x20e   :  { %9296 = vmatprep.subr.bf16.mxu0 %v14397_v27  ;;  %v14449_v27 = vld [vmem:[%s20309_s1 + $0x25a0] ss:$28 sps:$4 sm:$0xff]   ;;  %v14452_v28 = vld [vmem:[%s20309_s1 + $0x17a8] ss:$28 sps:$4 sm:$0xff]  }
 0x210   :  { %9666 = vmatpush1.bf16.msra.mxu1 %v14398_v34  ;;  %v14460_v34 = vld [vmem:[%s20309_s1 + $0x17e4] ss:$28 sps:$4 sm:$0xff]  }
 0x211   :  { %9297 = vmatpush1.bf16.msra.mxu0 %v14395_v60  ;;  %9667 = vmatprep.subr.bf16.mxu1 %v14406_v46  ;;  %v14457_v60 = vld [vmem:[%s20309_s1 + $0x25dc] ss:$28 sps:$4 sm:$0xff]  }
 0x212   :  { %9298 = vmatprep.subr.bf16.mxu0 %v14403_v36  ;;  %v14455_v36 = vld [vmem:[%s20309_s1 + $0x25d8] ss:$28 sps:$4 sm:$0xff]   ;;  %v14458_v46 = vld [vmem:[%s20309_s1 + $0x17e0] ss:$28 sps:$4 sm:$0xff]  }
 0x214   :  { %9668 = vmatpush1.bf16.msra.mxu1 %v14404_v39  ;;  %v14466_v39 = vld [vmem:[%s20309_s1 + $0x181c] ss:$28 sps:$4 sm:$0xff]  }
 0x215   :  { %9299 = vmatpush1.bf16.msra.mxu0 %v14401_v38  ;;  %9669 = vmatprep.subr.bf16.mxu1 %v14412_v43  ;;  %v14463_v38 = vld [vmem:[%s20309_s1 + $0x2614] ss:$28 sps:$4 sm:$0xff]  }
 0x216   :  { %9300 = vmatprep.subr.bf16.mxu0 %v14409_v40  ;;  %v14461_v40 = vld [vmem:[%s20309_s1 + $0x2610] ss:$28 sps:$4 sm:$0xff]   ;;  %v14464_v43 = vld [vmem:[%s20309_s1 + $0x1818] ss:$28 sps:$4 sm:$0xff]  }
 0x218   :  { %9670 = vmatpush1.bf16.msra.mxu1 %v14410_v45  ;;  %v14472_v45 = vld [vmem:[%s20309_s1 + $0x1854] ss:$28 sps:$4 sm:$0xff]  }
 0x219   :  { %9301 = vmatpush1.bf16.msra.mxu0 %v14407_v44  ;;  %9671 = vmatprep.subr.bf16.mxu1 %v14418_v50  ;;  %v14469_v44 = vld [vmem:[%s20309_s1 + $0x264c] ss:$28 sps:$4 sm:$0xff]  }
 0x21a   :  { %9302 = vmatprep.subr.bf16.mxu0 %v14415_v47  ;;  %v14467_v47 = vld [vmem:[%s20309_s1 + $0x2648] ss:$28 sps:$4 sm:$0xff]   ;;  %v14470_v50 = vld [vmem:[%s20309_s1 + $0x1850] ss:$28 sps:$4 sm:$0xff]  }
 0x21c   :  { %9672 = vmatpush1.bf16.msra.mxu1 %v14416_v52  ;;  %v14479_v52 = vld [vmem:[%s20309_s1 + $0x188c] ss:$28 sps:$4 sm:$0xff]  }
 0x21d   :  { %9303 = vmatpush1.bf16.msra.mxu0 %v14413_v51  ;;  %9673 = vmatprep.subr.bf16.mxu1 %v14424_v54  ;;  %v14476_v51 = vld [vmem:[%s20309_s1 + $0x2684] ss:$28 sps:$4 sm:$0xff]  }
 0x21e   :  { %9304 = vmatprep.subr.bf16.mxu0 %v14421_v35  ;;  %v17582_v35 = vrot.slane %v17361_v0, %v15824_v49  ;;  %v14474_v54 = vld [vmem:[%s20309_s1 + $0x2680] ss:$28 sps:$4 sm:$0xff]  }
 0x21f   :  { %v14485_v0 = vld [vmem:[%s20309_s1 + $0x18c4] ss:$28 sps:$4 sm:$0xff]  }
 0x220   :  { %9674 = vmatpush1.bf16.msra.mxu1 %v14422_v56  ;;  %v14482_v56 = vld [vmem:[%s20309_s1 + $0x26bc] ss:$28 sps:$4 sm:$0xff]  }
 0x221   :  { %9305 = vmatpush1.bf16.msra.mxu0 %v14419_v55  ;;  %9675 = vmatprep.subr.bf16.mxu1 %v14430_v61  ;;  %v14477_v55 = vld [vmem:[%s20309_s1 + $0x1888] ss:$28 sps:$4 sm:$0xff]   ;;  %v14480_v61 = vld [vmem:[%s20309_s1 + $0x26b8] ss:$28 sps:$4 sm:$0xff]  }
 0x222   :  { %9306 = vmatprep.subr.bf16.mxu0 %v14427_v57  ;;  %v17598_v57 = vcombine.high %v17394_v15, %v17394_v15 }
 0x224   :  { %9676 = vmatpush1.bf16.msra.mxu1 %v14428_v1  ;;  %v14488_v1 = vld [vmem:[%s20309_s1 + $0x26f4] ss:$28 sps:$4 sm:$0xff]  }
 0x225   :  { %9307 = vmatpush1.bf16.msra.mxu0 %v14425_v63  ;;  %9677 = vmatprep.subr.bf16.mxu1 %v14436_v6  ;;  %v14483_v63 = vld [vmem:[%s20309_s1 + $0x18c0] ss:$28 sps:$4 sm:$0xff]   ;;  %v14486_v6 = vld [vmem:[%s20309_s1 + $0x26f0] ss:$28 sps:$4 sm:$0xff]  }
 0x226   :  { %9308 = vmatprep.subr.bf16.mxu0 %v14433_v5  ;;  %v14491_v5 = vld [vmem:[%s20309_s1 + $0x18fc] ss:$28 sps:$4 sm:$0xff]  }
 0x228   :  { %9678 = vmatpush1.bf16.msra.mxu1 %v14434_v8  ;;  %v14494_v8 = vld [vmem:[%s20309_s1 + $0x272c] ss:$28 sps:$4 sm:$0xff]  }
 0x229   :  { %9309 = vmatpush1.bf16.msra.mxu0 %v14431_v7  ;;  %9679 = vmatprep.subr.bf16.mxu1 %v14442_v12  ;;  %v14489_v7 = vld [vmem:[%s20309_s1 + $0x18f8] ss:$28 sps:$4 sm:$0xff]   ;;  %v14492_v12 = vld [vmem:[%s20309_s1 + $0x2728] ss:$28 sps:$4 sm:$0xff]  }
 0x22a   :  { %9310 = vmatprep.subr.bf16.mxu0 %v14439_v11  ;;  %v14497_v11 = vld [vmem:[%s20309_s1 + $0x1934] ss:$28 sps:$4 sm:$0xff]  }
 0x22c   :  { %9680 = vmatpush1.bf16.msra.mxu1 %v14440_v14  ;;  %v14500_v14 = vld [vmem:[%s20309_s1 + $0x2764] ss:$28 sps:$4 sm:$0xff]  }
 0x22d   :  { %9311 = vmatpush1.bf16.msra.mxu0 %v14437_v13  ;;  %9681 = vmatprep.subr.bf16.mxu1 %v14448_v19  ;;  %v14495_v13 = vld [vmem:[%s20309_s1 + $0x1930] ss:$28 sps:$4 sm:$0xff]   ;;  %v14498_v19 = vld [vmem:[%s20309_s1 + $0x2760] ss:$28 sps:$4 sm:$0xff]  }
 0x22e   :  { %9312 = vmatprep.subr.bf16.mxu0 %v14445_v16  ;;  %v14503_v16 = vld [vmem:[%s20309_s1 + $0x196c] ss:$28 sps:$4 sm:$0xff]  }
 0x230   :  { %9682 = vmatpush1.bf16.msra.mxu1 %v14446_v21  ;;  %v14506_v21 = vld [vmem:[%s20309_s1 + $0x279c] ss:$28 sps:$4 sm:$0xff]  }
 0x231   :  { %9313 = vmatpush1.bf16.msra.mxu0 %v14443_v20  ;;  %9683 = vmatprep.subr.bf16.mxu1 %v14454_v25  ;;  %v14501_v20 = vld [vmem:[%s20309_s1 + $0x1968] ss:$28 sps:$4 sm:$0xff]   ;;  %v14504_v25 = vld [vmem:[%s20309_s1 + $0x2798] ss:$28 sps:$4 sm:$0xff]  }
 0x232   :  { %9314 = vmatprep.subr.bf16.mxu0 %v14451_v24  ;;  %v14509_v24 = vld [vmem:[%s20309_s1 + $0x19a4] ss:$28 sps:$4 sm:$0xff]  }
 0x234   :  { %9684 = vmatpush1.bf16.msra.mxu1 %v14452_v28  ;;  %v14512_v28 = vld [vmem:[%s20309_s1 + $0x27d4] ss:$28 sps:$4 sm:$0xff]  }
 0x235   :  { %9315 = vmatpush1.bf16.msra.mxu0 %v14449_v27  ;;  %9685 = vmatprep.subr.bf16.mxu1 %v14460_v34  ;;  %v14507_v27 = vld [vmem:[%s20309_s1 + $0x19a0] ss:$28 sps:$4 sm:$0xff]   ;;  %v14510_v34 = vld [vmem:[%s20309_s1 + $0x27d0] ss:$28 sps:$4 sm:$0xff]  }
 0x236   :  { %9316 = vmatprep.subr.bf16.mxu0 %v14457_v60  ;;  %v14515_v60 = vld [vmem:[%s20309_s1 + $0x19dc] ss:$28 sps:$4 sm:$0xff]  }
 0x238   :  { %9686 = vmatpush1.bf16.msra.mxu1 %v14458_v46  ;;  %v14518_v46 = vld [vmem:[%s20309_s1 + $0x280c] ss:$28 sps:$4 sm:$0xff]  }
 0x239   :  { %9317 = vmatpush1.bf16.msra.mxu0 %v14455_v36  ;;  %9687 = vmatprep.subr.bf16.mxu1 %v14466_v39  ;;  %v14513_v36 = vld [vmem:[%s20309_s1 + $0x19d8] ss:$28 sps:$4 sm:$0xff]   ;;  %v14516_v39 = vld [vmem:[%s20309_s1 + $0x2808] ss:$28 sps:$4 sm:$0xff]  }
 0x23a   :  { %9318 = vmatprep.subr.bf16.mxu0 %v14463_v38  ;;  %v14521_v38 = vld [vmem:[%s20309_s1 + $0x1a14] ss:$28 sps:$4 sm:$0xff]  }
 0x23c   :  { %9688 = vmatpush1.bf16.msra.mxu1 %v14464_v43  ;;  %v14524_v43 = vld [vmem:[%s20309_s1 + $0x2844] ss:$28 sps:$4 sm:$0xff]  }
 0x23d   :  { %9319 = vmatpush1.bf16.msra.mxu0 %v14461_v40  ;;  %9689 = vmatprep.subr.bf16.mxu1 %v14472_v45  ;;  %v14519_v40 = vld [vmem:[%s20309_s1 + $0x1a10] ss:$28 sps:$4 sm:$0xff]   ;;  %v14522_v45 = vld [vmem:[%s20309_s1 + $0x2840] ss:$28 sps:$4 sm:$0xff]  }
 0x23e   :  { %9320 = vmatprep.subr.bf16.mxu0 %v14469_v44  ;;  %v14527_v44 = vld [vmem:[%s20309_s1 + $0x1a4c] ss:$28 sps:$4 sm:$0xff]  }
 0x240   :  { %9690 = vmatpush1.bf16.msra.mxu1 %v14470_v50  ;;  %v14530_v50 = vld [vmem:[%s20309_s1 + $0x287c] ss:$28 sps:$4 sm:$0xff]  }
 0x241   :  { %9321 = vmatpush1.bf16.msra.mxu0 %v14467_v47  ;;  %9700 = vmatprep.subr.bf16.mxu1 %v14479_v52  ;;  %v14525_v47 = vld [vmem:[%s20309_s1 + $0x1a48] ss:$28 sps:$4 sm:$0xff]   ;;  %v14528_v52 = vld [vmem:[%s20309_s1 + $0x2878] ss:$28 sps:$4 sm:$0xff]  }
 0x242   :  { %9331 = vmatprep.subr.bf16.mxu0 %v14476_v51  ;;  %v14533_v51 = vld [vmem:[%s20309_s1 + $0x1a84] ss:$28 sps:$4 sm:$0xff]  }
 0x243   :  { %9692 = vmatmul.mubr.bf16.vlgmr.msra.gmra.mrb[4].mxu1 %v16749_v26 }
 0x244   :  { %9323 = vmatmul.mubr.bf16.vlgmr.msra.gmra.mrb[0].mxu0 %v17582_v35  ;;  %9701 = vmatpush1.bf16.msra.mxu1 %v14477_v55  ;;  %v14536_v55 = vld [vmem:[%s20309_s1 + $0x28b4] ss:$28 sps:$4 sm:$0xff]  }
 0x245   :  { %9332 = vmatpush1.bf16.msra.mxu0 %v14474_v54  ;;  %9702 = vmatprep.subr.bf16.mxu1 %v14485_v0  ;;  %v14531_v54 = vld [vmem:[%s20309_s1 + $0x1a80] ss:$28 sps:$4 sm:$0xff]   ;;  %v14534_v0 = vld [vmem:[%s20309_s1 + $0x28b0] ss:$28 sps:$4 sm:$0xff]  }
 0x246   :  { %9333 = vmatprep.subr.bf16.mxu0 %v14482_v56  ;;  %9363 = vmatprep.mubr.bf16.mxu0 %v17598_v57  ;;  %v14539_v56 = vld [vmem:[%s20309_s1 + $0x1abc] ss:$28 sps:$4 sm:$0xff]  }
 0x247   :  { %9732 = vmatprep.mubr.bf16.mxu1 %v16765_v33 }
 0x248   :  { %9703 = vmatpush1.bf16.msra.mxu1 %v14483_v63  ;;  %v14542_v63 = vld [vmem:[%s20309_s1 + $0x28ec] ss:$28 sps:$4 sm:$0xff]  }
 0x249   :  { %9334 = vmatpush1.bf16.msra.mxu0 %v14480_v61  ;;  %9704 = vmatprep.subr.bf16.mxu1 %v14491_v5  ;;  %v14537_v61 = vld [vmem:[%s20309_s1 + $0x1ab8] ss:$28 sps:$4 sm:$0xff]   ;;  %v14540_v5 = vld [vmem:[%s20309_s1 + $0x28e8] ss:$28 sps:$4 sm:$0xff]  }
 0x24a   :  { %9335 = vmatprep.subr.bf16.mxu0 %v14488_v1  ;;  %v14545_v1 = vld [vmem:[%s20309_s1 + $0x1af4] ss:$28 sps:$4 sm:$0xff]  }
 0x24c   :  { %9705 = vmatpush1.bf16.msra.mxu1 %v14489_v7  ;;  %v14548_v7 = vld [vmem:[%s20309_s1 + $0x2924] ss:$28 sps:$4 sm:$0xff]  }
 0x24d   :  { %9336 = vmatpush1.bf16.msra.mxu0 %v14486_v6  ;;  %9706 = vmatprep.subr.bf16.mxu1 %v14497_v11  ;;  %v14543_v6 = vld [vmem:[%s20309_s1 + $0x1af0] ss:$28 sps:$4 sm:$0xff]   ;;  %v14546_v11 = vld [vmem:[%s20309_s1 + $0x2920] ss:$28 sps:$4 sm:$0xff]  }
 0x24e   :  { %9337 = vmatprep.subr.bf16.mxu0 %v14494_v8  ;;  %v14551_v8 = vld [vmem:[%s20309_s1 + $0x1b2c] ss:$28 sps:$4 sm:$0xff]  }
 0x250   :  { %9707 = vmatpush1.bf16.msra.mxu1 %v14495_v13  ;;  %v14554_v13 = vld [vmem:[%s20309_s1 + $0x295c] ss:$28 sps:$4 sm:$0xff]  }
 0x251   :  { %9338 = vmatpush1.bf16.msra.mxu0 %v14492_v12  ;;  %9708 = vmatprep.subr.bf16.mxu1 %v14503_v16  ;;  %v14549_v12 = vld [vmem:[%s20309_s1 + $0x1b28] ss:$28 sps:$4 sm:$0xff]   ;;  %v14552_v16 = vld [vmem:[%s20309_s1 + $0x2958] ss:$28 sps:$4 sm:$0xff]  }
 0x252   :  { %9339 = vmatprep.subr.bf16.mxu0 %v14500_v14  ;;  %v14557_v14 = vld [vmem:[%s20309_s1 + $0x1b64] ss:$28 sps:$4 sm:$0xff]  }
 0x254   :  { %9709 = vmatpush1.bf16.msra.mxu1 %v14501_v20  ;;  %v14560_v20 = vld [vmem:[%s20309_s1 + $0x2994] ss:$28 sps:$4 sm:$0xff]  }
 0x255   :  { %9340 = vmatpush1.bf16.msra.mxu0 %v14498_v19  ;;  %9710 = vmatprep.subr.bf16.mxu1 %v14509_v24  ;;  %v14555_v19 = vld [vmem:[%s20309_s1 + $0x1b60] ss:$28 sps:$4 sm:$0xff]   ;;  %v14558_v24 = vld [vmem:[%s20309_s1 + $0x2990] ss:$28 sps:$4 sm:$0xff]  }
 0x256   :  { %9341 = vmatprep.subr.bf16.mxu0 %v14506_v21  ;;  %v14563_v21 = vld [vmem:[%s20309_s1 + $0x1b9c] ss:$28 sps:$4 sm:$0xff]  }
 0x258   :  { %9711 = vmatpush1.bf16.msra.mxu1 %v14507_v27  ;;  %v14566_v27 = vld [vmem:[%s20309_s1 + $0x29cc] ss:$28 sps:$4 sm:$0xff]  }
 0x259   :  { %9342 = vmatpush1.bf16.msra.mxu0 %v14504_v25  ;;  %9712 = vmatprep.subr.bf16.mxu1 %v14515_v60  ;;  %v14561_v25 = vld [vmem:[%s20309_s1 + $0x1b98] ss:$28 sps:$4 sm:$0xff]   ;;  %v14564_v60 = vld [vmem:[%s20309_s1 + $0x29c8] ss:$28 sps:$4 sm:$0xff]  }
 0x25a   :  { %9343 = vmatprep.subr.bf16.mxu0 %v14512_v28  ;;  %v14569_v28 = vld [vmem:[%s20309_s1 + $0x1bd4] ss:$28 sps:$4 sm:$0xff]  }
 0x25c   :  { %9713 = vmatpush1.bf16.msra.mxu1 %v14513_v36  ;;  %v14572_v36 = vld [vmem:[%s20309_s1 + $0x2a04] ss:$28 sps:$4 sm:$0xff]  }
 0x25d   :  { %9344 = vmatpush1.bf16.msra.mxu0 %v14510_v34  ;;  %9714 = vmatprep.subr.bf16.mxu1 %v14521_v38  ;;  %v14567_v34 = vld [vmem:[%s20309_s1 + $0x1bd0] ss:$28 sps:$4 sm:$0xff]   ;;  %v17786_v38 = vcombine.high %v17582_v35, %v17582_v35 }
 0x25e   :  { %9345 = vmatprep.subr.bf16.mxu0 %v14518_v46  ;;  %v14575_v46 = vld [vmem:[%s20309_s1 + $0x1c0c] ss:$28 sps:$4 sm:$0xff]  }
 0x260   :  { %9715 = vmatpush1.bf16.msra.mxu1 %v14519_v40  ;;  %v14573_v40 = vld [vmem:[%s20309_s1 + $0x1c08] ss:$28 sps:$4 sm:$0xff]  }
 0x261   :  { %9346 = vmatpush1.bf16.msra.mxu0 %v14516_v39  ;;  %9716 = vmatprep.subr.bf16.mxu1 %v14527_v44  ;;  %v14570_v39 = vld [vmem:[%s20309_s1 + $0x2a00] ss:$28 sps:$4 sm:$0xff]  }
 0x262   :  { %9347 = vmatprep.subr.bf16.mxu0 %v14524_v43  ;;  %v14578_v43 = vld [vmem:[%s20309_s1 + $0x2a3c] ss:$28 sps:$4 sm:$0xff]   ;;  %v14581_v44 = vld [vmem:[%s20309_s1 + $0x1c44] ss:$28 sps:$4 sm:$0xff]  }
 0x264   :  { %9717 = vmatpush1.bf16.msra.mxu1 %v14525_v47  ;;  %v14579_v47 = vld [vmem:[%s20309_s1 + $0x1c40] ss:$28 sps:$4 sm:$0xff]  }
 0x265   :  { %9348 = vmatpush1.bf16.msra.mxu0 %v14522_v45  ;;  %9718 = vmatprep.subr.bf16.mxu1 %v14533_v51  ;;  %v14576_v45 = vld [vmem:[%s20309_s1 + $0x2a38] ss:$28 sps:$4 sm:$0xff]  }
 0x266   :  { %9349 = vmatprep.subr.bf16.mxu0 %v14530_v50  ;;  %v14584_v50 = vld [vmem:[%s20309_s1 + $0x2a74] ss:$28 sps:$4 sm:$0xff]   ;;  %v14587_v51 = vld [vmem:[%s20309_s1 + $0x1c7c] ss:$28 sps:$4 sm:$0xff]  }
 0x268   :  { %9719 = vmatpush1.bf16.msra.mxu1 %v14531_v54  ;;  %v14582_v54 = vld [vmem:[%s20309_s1 + $0x2a70] ss:$28 sps:$4 sm:$0xff]  }
 0x269   :  { %9350 = vmatpush1.bf16.msra.mxu0 %v14528_v52  ;;  %9720 = vmatprep.subr.bf16.mxu1 %v14539_v56  ;;  %v15655_v52 = vmov 0   ;;  %v14590_v56 = vld [vmem:[%s20309_s1 + $0x2aac] ss:$28 sps:$4 sm:$0xff]  }
 0x26a   :  { %9351 = vmatprep.subr.bf16.mxu0 %v14536_v55  ;;  %v14585_v55 = vld [vmem:[%s20309_s1 + $0x1c78] ss:$28 sps:$4 sm:$0xff]  }
 0x26c   :  { %9721 = vmatpush1.bf16.msra.mxu1 %v14537_v61  ;;  %v14588_v61 = vld [vmem:[%s20309_s1 + $0x2aa8] ss:$28 sps:$4 sm:$0xff]  }
 0x26d   :  { %9352 = vmatpush1.bf16.msra.mxu0 %v14534_v0  ;;  %9722 = vmatprep.subr.bf16.mxu1 %v14545_v1  ;;  %v14593_v0 = vld [vmem:[%s20309_s1 + $0x1cb4] ss:$28 sps:$4 sm:$0xff]   ;;  %v11644_v1 = vld.sshfl [vmem:[%s20308_s0 + $0x18] sm:$0x1 pattern:$0x75316420] }
 0x26e   :  { %9353 = vmatprep.subr.bf16.mxu0 %v14542_v63  ;;  %v14591_v63 = vld [vmem:[%s20309_s1 + $0x1cb0] ss:$28 sps:$4 sm:$0xff]  }
 0x270   :  { %9723 = vmatpush1.bf16.msra.mxu1 %v14543_v6  ;;  %v14599_v6 = vld [vmem:[%s20309_s1 + $0x14] ss:$28 sps:$4 sm:$0xff]  }
 0x271   :  { %9354 = vmatpush1.bf16.msra.mxu0 %v14540_v5  ;;  %9724 = vmatprep.subr.bf16.mxu1 %v14551_v8  ;;  %v14596_v5 = vld [vmem:[%s20309_s1 + $0x1cec] ss:$28 sps:$4 sm:$0xff]  }
 0x272   :  { %9355 = vmatprep.subr.bf16.mxu0 %v14548_v7  ;;  %v17844_v7 = vrot.slane %v11644_v1, %v15824_v49  ;;  %v14594_v8 = vld [vmem:[%s20309_s1 + $0x1ce8] ss:$28 sps:$4 sm:$0xff]  }
 0x273   :  { %v14605_v49 = vld [vmem:[%s20309_s1 + $0x4c] ss:$28 sps:$4 sm:$0xff]  }
 0x274   :  { %9725 = vmatpush1.bf16.msra.mxu1 %v14549_v12  ;;  %v14602_v12 = vld [vmem:[%s20309_s1 + $0x1d24] ss:$28 sps:$4 sm:$0xff]  }
 0x275   :  { %9356 = vmatpush1.bf16.msra.mxu0 %v14546_v11  ;;  %9726 = vmatprep.subr.bf16.mxu1 %v14557_v14  ;;  %v14597_v11 = vld [vmem:[%s20309_s1 + $0x10] ss:$28 sps:$4 sm:$0xff]   ;;  %v14603_v14 = vld [vmem:[%s20309_s1 + $0x48] ss:$28 sps:$4 sm:$0xff]  }
 0x276   :  { %9357 = vmatprep.subr.bf16.mxu0 %v14554_v13  ;;  %v14600_v13 = vld [vmem:[%s20309_s1 + $0x1d20] ss:$28 sps:$4 sm:$0xff]   ;;  %v14642_v1 = vld [vmem:[%s20309_s1 + $0x1ea8] ss:$28 sps:$4 sm:$0xff]  }
 0x278   :  { %9727 = vmatpush1.bf16.msra.mxu1 %v14555_v19  ;;  %v14611_v19 = vld [vmem:[%s20309_s1 + $0x84] ss:$28 sps:$4 sm:$0xff]  }
 0x279   :  { %9358 = vmatpush1.bf16.msra.mxu0 %v14552_v16  ;;  %9728 = vmatprep.subr.bf16.mxu1 %v14563_v21  ;;  %v14608_v16 = vld [vmem:[%s20309_s1 + $0x1d5c] ss:$28 sps:$4 sm:$0xff]  }
 0x27a   :  { %9359 = vmatprep.subr.bf16.mxu0 %v14560_v20  ;;  %v14606_v20 = vld [vmem:[%s20309_s1 + $0x1d58] ss:$28 sps:$4 sm:$0xff]   ;;  %v14609_v21 = vld [vmem:[%s20309_s1 + $0x80] ss:$28 sps:$4 sm:$0xff]  }
 0x27c   :  { %9729 = vmatpush1.bf16.msra.mxu1 %v14561_v25  ;;  %v14617_v25 = vld [vmem:[%s20309_s1 + $0xbc] ss:$28 sps:$4 sm:$0xff]  }
 0x27d   :  { %9360 = vmatpush1.bf16.msra.mxu0 %v14558_v24  ;;  %9730 = vmatprep.subr.bf16.mxu1 %v14569_v28  ;;  %v14614_v24 = vld [vmem:[%s20309_s1 + $0x1d94] ss:$28 sps:$4 sm:$0xff]  }
 0x27e   :  { %9361 = vmatprep.subr.bf16.mxu0 %v14566_v27  ;;  %v14612_v27 = vld [vmem:[%s20309_s1 + $0x1d90] ss:$28 sps:$4 sm:$0xff]   ;;  %v14615_v28 = vld [vmem:[%s20309_s1 + $0xb8] ss:$28 sps:$4 sm:$0xff]  }
 0x280   :  { %9731 = vmatpush1.bf16.msra.mxu1 %v14567_v34  ;;  %v14623_v34 = vld [vmem:[%s20309_s1 + $0xf4] ss:$28 sps:$4 sm:$0xff]  }
 0x281   :  { %9362 = vmatpush1.bf16.msra.mxu0 %v14564_v60  ;;  %9741 = vmatprep.subr.bf16.mxu1 %v14575_v46  ;;  %v14620_v60 = vld [vmem:[%s20309_s1 + $0x1dcc] ss:$28 sps:$4 sm:$0xff]  }
 0x282   :  { %9372 = vmatprep.subr.bf16.mxu0 %v14572_v36  ;;  %v14618_v36 = vld [vmem:[%s20309_s1 + $0x1dc8] ss:$28 sps:$4 sm:$0xff]   ;;  %v14621_v46 = vld [vmem:[%s20309_s1 + $0xf0] ss:$28 sps:$4 sm:$0xff]  }
 0x283   :  { %9733 = vmatmul.mubr.bf16.vlgmr.msra.gmra.mrb[4].mxu1 %v16964_v58 }
 0x284   :  { %9364 = vmatmul.mubr.bf16.vlgmr.msra.gmra.mrb[0].mxu0 %v17786_v38  ;;  %9742 = vmatpush1.bf16.msra.mxu1 %v14573_v40  ;;  %v14629_v40 = vld [vmem:[%s20309_s1 + $0x12c] ss:$28 sps:$4 sm:$0xff]  }
 0x285   :  { %9373 = vmatpush1.bf16.msra.mxu0 %v14570_v39  ;;  %9743 = vmatprep.subr.bf16.mxu1 %v14581_v44  ;;  %v14626_v39 = vld [vmem:[%s20309_s1 + $0x1e04] ss:$28 sps:$4 sm:$0xff]  }
 0x286   :  { %9374 = vmatprep.subr.bf16.mxu0 %v14578_v43  ;;  %9404 = vmatprep.mubr.bf16.mxu0 %v15655_v52  ;;  %v14624_v43 = vld [vmem:[%s20309_s1 + $0x1e00] ss:$28 sps:$4 sm:$0xff]   ;;  %v14627_v44 = vld [vmem:[%s20309_s1 + $0x128] ss:$28 sps:$4 sm:$0xff]  }
 0x287   :  { %9773 = vmatprep.mubr.bf16.mxu1 %v16979_v2 }
 0x288   :  { %9744 = vmatpush1.bf16.msra.mxu1 %v14579_v47  ;;  %v14635_v47 = vld [vmem:[%s20309_s1 + $0x164] ss:$28 sps:$4 sm:$0xff]  }
 0x289   :  { %9375 = vmatpush1.bf16.msra.mxu0 %v14576_v45  ;;  %9745 = vmatprep.subr.bf16.mxu1 %v14587_v51  ;;  %v14632_v45 = vld [vmem:[%s20309_s1 + $0x1e3c] ss:$28 sps:$4 sm:$0xff]  }
 0x28a   :  { %9376 = vmatprep.subr.bf16.mxu0 %v14584_v50  ;;  %v14630_v50 = vld [vmem:[%s20309_s1 + $0x1e38] ss:$28 sps:$4 sm:$0xff]   ;;  %v14633_v51 = vld [vmem:[%s20309_s1 + $0x160] ss:$28 sps:$4 sm:$0xff]  }
 0x28c   :  { %9746 = vmatpush1.bf16.msra.mxu1 %v14585_v55  ;;  %v14641_v55 = vld [vmem:[%s20309_s1 + $0x19c] ss:$28 sps:$4 sm:$0xff]  }
 0x28d   :  { %9377 = vmatpush1.bf16.msra.mxu0 %v14582_v54  ;;  %9747 = vmatprep.subr.bf16.mxu1 %v14593_v0  ;;  %v14638_v54 = vld [vmem:[%s20309_s1 + $0x1e74] ss:$28 sps:$4 sm:$0xff]  }
 0x28e   :  { %9378 = vmatprep.subr.bf16.mxu0 %v14590_v56  ;;  %v14636_v56 = vld [vmem:[%s20309_s1 + $0x1e70] ss:$28 sps:$4 sm:$0xff]   ;;  %v14639_v0 = vld [vmem:[%s20309_s1 + $0x198] ss:$28 sps:$4 sm:$0xff]  }
 0x290   :  { %9748 = vmatpush1.bf16.msra.mxu1 %v14591_v63  ;;  %v14647_v63 = vld [vmem:[%s20309_s1 + $0x1d4] ss:$28 sps:$4 sm:$0xff]  }
 0x291   :  { %9379 = vmatpush1.bf16.msra.mxu0 %v14588_v61  ;;  %9749 = vmatprep.subr.bf16.mxu1 %v14596_v5  ;;  %v14644_v61 = vld [vmem:[%s20309_s1 + $0x1eac] ss:$28 sps:$4 sm:$0xff]  }
 0x292   :  { %9946 = vmatprep.subr.bf16.mxu0 %v14599_v6  ;;  %v14645_v5 = vld [vmem:[%s20309_s1 + $0x1d0] ss:$28 sps:$4 sm:$0xff]   ;;  %v14650_v6 = vld [vmem:[%s20309_s1 + $0x1ee4] ss:$28 sps:$4 sm:$0xff]  }
 0x294   :  { %13017 = vmatmul.mubr.msk.bf16.vlgmr.msra.gmra.mrb[0].mxu0 %vm8876_vm0, %v17844_v7  ;;  %9750 = vmatpush1.bf16.msra.mxu1 %v14594_v8  ;;  %v14653_v8 = vld [vmem:[%s20309_s1 + $0x20c] ss:$28 sps:$4 sm:$0xff]  }
 0x295   :  { %9947 = vmatpush1.bf16.msra.mxu0 %v14597_v11  ;;  %9751 = vmatprep.subr.bf16.mxu1 %v14602_v12  ;;  %v14648_v11 = vld [vmem:[%s20309_s1 + $0x1ee0] ss:$28 sps:$4 sm:$0xff]   ;;  %v14651_v12 = vld [vmem:[%s20309_s1 + $0x208] ss:$28 sps:$4 sm:$0xff]  }
 0x296   :  { %9948 = vmatprep.subr.bf16.mxu0 %v14605_v49  ;;  %9978 = vmatprep.mubr.bf16.mxu0 %v15853_v62  ;;  %v14656_v49 = vld [vmem:[%s20309_s1 + $0x1f1c] ss:$28 sps:$4 sm:$0xff]  }
 0x298   :  { %9752 = vmatpush1.bf16.msra.mxu1 %v14600_v13  ;;  %v14659_v13 = vld [vmem:[%s20309_s1 + $0x244] ss:$28 sps:$4 sm:$0xff]  }
 0x299   :  { %9949 = vmatpush1.bf16.msra.mxu0 %v14603_v14  ;;  %9753 = vmatprep.subr.bf16.mxu1 %v14608_v16  ;;  %v14654_v14 = vld [vmem:[%s20309_s1 + $0x1f18] ss:$28 sps:$4 sm:$0xff]   ;;  %v14657_v16 = vld [vmem:[%s20309_s1 + $0x240] ss:$28 sps:$4 sm:$0xff]  }
 0x29a   :  { %9950 = vmatprep.subr.bf16.mxu0 %v14611_v19  ;;  %v14662_v19 = vld [vmem:[%s20309_s1 + $0x1f54] ss:$28 sps:$4 sm:$0xff]  }
 0x29c   :  { %9754 = vmatpush1.bf16.msra.mxu1 %v14606_v20  ;;  %v14665_v20 = vld [vmem:[%s20309_s1 + $0x27c] ss:$28 sps:$4 sm:$0xff]  }
 0x29d   :  { %9951 = vmatpush1.bf16.msra.mxu0 %v14609_v21  ;;  %9755 = vmatprep.subr.bf16.mxu1 %v14614_v24  ;;  %v14660_v21 = vld [vmem:[%s20309_s1 + $0x1f50] ss:$28 sps:$4 sm:$0xff]   ;;  %v14663_v24 = vld [vmem:[%s20309_s1 + $0x278] ss:$28 sps:$4 sm:$0xff]  }
 0x29e   :  { %9952 = vmatprep.subr.bf16.mxu0 %v14617_v25  ;;  %v14668_v25 = vld [vmem:[%s20309_s1 + $0x1f8c] ss:$28 sps:$4 sm:$0xff]  }
 0x2a0   :  { %9756 = vmatpush1.bf16.msra.mxu1 %v14612_v27  ;;  %v14671_v27 = vld [vmem:[%s20309_s1 + $0x2b4] ss:$28 sps:$4 sm:$0xff]  }
 0x2a1   :  { %9953 = vmatpush1.bf16.msra.mxu0 %v14615_v28  ;;  %9757 = vmatprep.subr.bf16.mxu1 %v14620_v60  ;;  %v14666_v28 = vld [vmem:[%s20309_s1 + $0x1f88] ss:$28 sps:$4 sm:$0xff]   ;;  %v14669_v60 = vld [vmem:[%s20309_s1 + $0x2b0] ss:$28 sps:$4 sm:$0xff]  }
 0x2a2   :  { %9954 = vmatprep.subr.bf16.mxu0 %v14623_v34  ;;  %v14674_v34 = vld [vmem:[%s20309_s1 + $0x1fc4] ss:$28 sps:$4 sm:$0xff]  }
 0x2a4   :  { %9758 = vmatpush1.bf16.msra.mxu1 %v14618_v36  ;;  %v14677_v36 = vld [vmem:[%s20309_s1 + $0x2ec] ss:$28 sps:$4 sm:$0xff]  }
 0x2a5   :  { %9955 = vmatpush1.bf16.msra.mxu0 %v14621_v46  ;;  %9759 = vmatprep.subr.bf16.mxu1 %v14626_v39  ;;  %v14672_v46 = vld [vmem:[%s20309_s1 + $0x1fc0] ss:$28 sps:$4 sm:$0xff]   ;;  %v14675_v39 = vld [vmem:[%s20309_s1 + $0x2e8] ss:$28 sps:$4 sm:$0xff]  }
 0x2a6   :  { %9956 = vmatprep.subr.bf16.mxu0 %v14629_v40  ;;  %v14680_v40 = vld [vmem:[%s20309_s1 + $0x1ffc] ss:$28 sps:$4 sm:$0xff]  }
 0x2a8   :  { %9760 = vmatpush1.bf16.msra.mxu1 %v14624_v43  ;;  %v14683_v43 = vld [vmem:[%s20309_s1 + $0x324] ss:$28 sps:$4 sm:$0xff]  }
 0x2a9   :  { %9957 = vmatpush1.bf16.msra.mxu0 %v14627_v44  ;;  %9761 = vmatprep.subr.bf16.mxu1 %v14632_v45  ;;  %v14678_v44 = vld [vmem:[%s20309_s1 + $0x1ff8] ss:$28 sps:$4 sm:$0xff]   ;;  %v14681_v45 = vld [vmem:[%s20309_s1 + $0x320] ss:$28 sps:$4 sm:$0xff]  }
 0x2aa   :  { %9958 = vmatprep.subr.bf16.mxu0 %v14635_v47  ;;  %v14686_v47 = vld [vmem:[%s20309_s1 + $0x2034] ss:$28 sps:$4 sm:$0xff]  }
 0x2ac   :  { %9762 = vmatpush1.bf16.msra.mxu1 %v14630_v50  ;;  %v14689_v50 = vld [vmem:[%s20309_s1 + $0x35c] ss:$28 sps:$4 sm:$0xff]  }
 0x2ad   :  { %9959 = vmatpush1.bf16.msra.mxu0 %v14633_v51  ;;  %9763 = vmatprep.subr.bf16.mxu1 %v14638_v54  ;;  %v14684_v51 = vld [vmem:[%s20309_s1 + $0x2030] ss:$28 sps:$4 sm:$0xff]   ;;  %v14687_v54 = vld [vmem:[%s20309_s1 + $0x358] ss:$28 sps:$4 sm:$0xff]  }
 0x2ae   :  { %9960 = vmatprep.subr.bf16.mxu0 %v14641_v55  ;;  %v14692_v55 = vld [vmem:[%s20309_s1 + $0x206c] ss:$28 sps:$4 sm:$0xff]  }
 0x2b0   :  { %9764 = vmatpush1.bf16.msra.mxu1 %v14636_v56  ;;  %v14695_v56 = vld [vmem:[%s20309_s1 + $0x394] ss:$28 sps:$4 sm:$0xff]  }
 0x2b1   :  { %9961 = vmatpush1.bf16.msra.mxu0 %v14639_v0  ;;  %9765 = vmatprep.subr.bf16.mxu1 %v14644_v61  ;;  %v14690_v0 = vld [vmem:[%s20309_s1 + $0x2068] ss:$28 sps:$4 sm:$0xff]   ;;  %v14693_v61 = vld [vmem:[%s20309_s1 + $0x390] ss:$28 sps:$4 sm:$0xff]  }
 0x2b2   :  { %9962 = vmatprep.subr.bf16.mxu0 %v14647_v63  ;;  %v14698_v63 = vld [vmem:[%s20309_s1 + $0x20a4] ss:$28 sps:$4 sm:$0xff]  }
 0x2b4   :  { %9766 = vmatpush1.bf16.msra.mxu1 %v14642_v1  ;;  %v14701_v1 = vld [vmem:[%s20309_s1 + $0x3cc] ss:$28 sps:$4 sm:$0xff]  }
 0x2b5   :  { %9963 = vmatpush1.bf16.msra.mxu0 %v14645_v5  ;;  %9767 = vmatprep.subr.bf16.mxu1 %v14650_v6  ;;  %v14696_v5 = vld [vmem:[%s20309_s1 + $0x20a0] ss:$28 sps:$4 sm:$0xff]   ;;  %v14699_v6 = vld [vmem:[%s20309_s1 + $0x3c8] ss:$28 sps:$4 sm:$0xff]  }
 0x2b6   :  { %9964 = vmatprep.subr.bf16.mxu0 %v14653_v8  ;;  %v14704_v8 = vld [vmem:[%s20309_s1 + $0x20dc] ss:$28 sps:$4 sm:$0xff]  }
 0x2b8   :  { %9768 = vmatpush1.bf16.msra.mxu1 %v14648_v11  ;;  %v14707_v11 = vld [vmem:[%s20309_s1 + $0x404] ss:$28 sps:$4 sm:$0xff]  }
 0x2b9   :  { %9965 = vmatpush1.bf16.msra.mxu0 %v14651_v12  ;;  %9769 = vmatprep.subr.bf16.mxu1 %v14656_v49  ;;  %v14702_v12 = vld [vmem:[%s20309_s1 + $0x20d8] ss:$28 sps:$4 sm:$0xff]   ;;  %v14705_v49 = vld [vmem:[%s20309_s1 + $0x400] ss:$28 sps:$4 sm:$0xff]  }
 0x2ba   :  { %9966 = vmatprep.subr.bf16.mxu0 %v14659_v13  ;;  %v14710_v13 = vld [vmem:[%s20309_s1 + $0x2114] ss:$28 sps:$4 sm:$0xff]  }
 0x2bc   :  { %9770 = vmatpush1.bf16.msra.mxu1 %v14654_v14  ;;  %v14713_v14 = vld [vmem:[%s20309_s1 + $0x43c] ss:$28 sps:$4 sm:$0xff]  }
 0x2bd   :  { %9967 = vmatpush1.bf16.msra.mxu0 %v14657_v16  ;;  %9771 = vmatprep.subr.bf16.mxu1 %v14662_v19  ;;  %v14708_v16 = vld [vmem:[%s20309_s1 + $0x2110] ss:$28 sps:$4 sm:$0xff]   ;;  %v14711_v19 = vld [vmem:[%s20309_s1 + $0x438] ss:$28 sps:$4 sm:$0xff]  }
 0x2be   :  { %9968 = vmatprep.subr.bf16.mxu0 %v14665_v20  ;;  %v14716_v20 = vld [vmem:[%s20309_s1 + $0x214c] ss:$28 sps:$4 sm:$0xff]  }
 0x2c0   :  { %9772 = vmatpush1.bf16.msra.mxu1 %v14660_v21  ;;  %v14719_v21 = vld [vmem:[%s20309_s1 + $0x474] ss:$28 sps:$4 sm:$0xff]  }
 0x2c1   :  { %9969 = vmatpush1.bf16.msra.mxu0 %v14663_v24  ;;  %9782 = vmatprep.subr.bf16.mxu1 %v14668_v25  ;;  %v14714_v24 = vld [vmem:[%s20309_s1 + $0x2148] ss:$28 sps:$4 sm:$0xff]   ;;  %v14717_v25 = vld [vmem:[%s20309_s1 + $0x470] ss:$28 sps:$4 sm:$0xff]  }
 0x2c2   :  { %9970 = vmatprep.subr.bf16.mxu0 %v14671_v27  ;;  %v14722_v27 = vld [vmem:[%s20309_s1 + $0x2184] ss:$28 sps:$4 sm:$0xff]  }
 0x2c3   :  { %9774 = vmatmul.mubr.bf16.vlgmr.msra.gmra.mrb[4].mxu1 %v17167_v31 }
 0x2c4   :  { %9783 = vmatpush1.bf16.msra.mxu1 %v14666_v28  ;;  %9814 = vmatprep.mubr.bf16.mxu1 %v17183_v37  ;;  %v14725_v28 = vld [vmem:[%s20309_s1 + $0x4ac] ss:$28 sps:$4 sm:$0xff]  }
 0x2c5   :  { %9971 = vmatpush1.bf16.msra.mxu0 %v14669_v60  ;;  %9784 = vmatprep.subr.bf16.mxu1 %v14674_v34  ;;  %v14720_v60 = vld [vmem:[%s20309_s1 + $0x2180] ss:$28 sps:$4 sm:$0xff]   ;;  %v14723_v34 = vld [vmem:[%s20309_s1 + $0x4a8] ss:$28 sps:$4 sm:$0xff]  }
 0x2c6   :  { %9972 = vmatprep.subr.bf16.mxu0 %v14677_v36  ;;  %v14728_v36 = vld [vmem:[%s20309_s1 + $0x21bc] ss:$28 sps:$4 sm:$0xff]  }
 0x2c8   :  { %9785 = vmatpush1.bf16.msra.mxu1 %v14672_v46  ;;  %v14731_v46 = vld [vmem:[%s20309_s1 + $0x4e4] ss:$28 sps:$4 sm:$0xff]  }
 0x2c9   :  { %9973 = vmatpush1.bf16.msra.mxu0 %v14675_v39  ;;  %9786 = vmatprep.subr.bf16.mxu1 %v14680_v40  ;;  %v14726_v39 = vld [vmem:[%s20309_s1 + $0x21b8] ss:$28 sps:$4 sm:$0xff]   ;;  %v14729_v40 = vld [vmem:[%s20309_s1 + $0x4e0] ss:$28 sps:$4 sm:$0xff]  }
 0x2ca   :  { %9974 = vmatprep.subr.bf16.mxu0 %v14683_v43  ;;  %v14734_v43 = vld [vmem:[%s20309_s1 + $0x21f4] ss:$28 sps:$4 sm:$0xff]  }
 0x2cc   :  { %9787 = vmatpush1.bf16.msra.mxu1 %v14678_v44  ;;  %v14737_v44 = vld [vmem:[%s20309_s1 + $0x51c] ss:$28 sps:$4 sm:$0xff]  }
 0x2cd   :  { %9975 = vmatpush1.bf16.msra.mxu0 %v14681_v45  ;;  %9788 = vmatprep.subr.bf16.mxu1 %v14686_v47  ;;  %v14732_v45 = vld [vmem:[%s20309_s1 + $0x21f0] ss:$28 sps:$4 sm:$0xff]   ;;  %v14735_v47 = vld [vmem:[%s20309_s1 + $0x518] ss:$28 sps:$4 sm:$0xff]  }
 0x2ce   :  { %9976 = vmatprep.subr.bf16.mxu0 %v14689_v50  ;;  %v14740_v50 = vld [vmem:[%s20309_s1 + $0x222c] ss:$28 sps:$4 sm:$0xff]  }
 0x2d0   :  { %9789 = vmatpush1.bf16.msra.mxu1 %v14684_v51  ;;  %v14743_v51 = vld [vmem:[%s20309_s1 + $0x554] ss:$28 sps:$4 sm:$0xff]  }
 0x2d1   :  { %9977 = vmatpush1.bf16.msra.mxu0 %v14687_v54  ;;  %9790 = vmatprep.subr.bf16.mxu1 %v14692_v55  ;;  %v14738_v54 = vld [vmem:[%s20309_s1 + $0x2228] ss:$28 sps:$4 sm:$0xff]   ;;  %v14741_v55 = vld [vmem:[%s20309_s1 + $0x550] ss:$28 sps:$4 sm:$0xff]  }
 0x2d2   :  { %9987 = vmatprep.subr.bf16.mxu0 %v14695_v56  ;;  %v14746_v56 = vld [vmem:[%s20309_s1 + $0x2264] ss:$28 sps:$4 sm:$0xff]  }
 0x2d4   :  { %9979 = vmatmul.mubr.bf16.vlgmr.msra.gmra.mrb[4].mxu0 %v15909_v17  ;;  %9791 = vmatpush1.bf16.msra.mxu1 %v14690_v0  ;;  %v14749_v0 = vld [vmem:[%s20309_s1 + $0x58c] ss:$28 sps:$4 sm:$0xff]  }
 0x2d5   :  { %9988 = vmatpush1.bf16.msra.mxu0 %v14693_v61  ;;  %9792 = vmatprep.subr.bf16.mxu1 %v14698_v63  ;;  %v14744_v61 = vld [vmem:[%s20309_s1 + $0x2260] ss:$28 sps:$4 sm:$0xff]   ;;  %v14747_v63 = vld [vmem:[%s20309_s1 + $0x588] ss:$28 sps:$4 sm:$0xff]  }
 0x2d6   :  { %9989 = vmatprep.subr.bf16.mxu0 %v14701_v1  ;;  %10019 = vmatprep.mubr.bf16.mxu0 %v15925_v22  ;;  %v14752_v1 = vld [vmem:[%s20309_s1 + $0x229c] ss:$28 sps:$4 sm:$0xff]  }
 0x2d8   :  { %9793 = vmatpush1.bf16.msra.mxu1 %v14696_v5  ;;  %v14755_v5 = vld [vmem:[%s20309_s1 + $0x5c4] ss:$28 sps:$4 sm:$0xff]  }
 0x2d9   :  { %9990 = vmatpush1.bf16.msra.mxu0 %v14699_v6  ;;  %9794 = vmatprep.subr.bf16.mxu1 %v14704_v8  ;;  %v14750_v6 = vld [vmem:[%s20309_s1 + $0x2298] ss:$28 sps:$4 sm:$0xff]   ;;  %v14753_v8 = vld [vmem:[%s20309_s1 + $0x5c0] ss:$28 sps:$4 sm:$0xff]  }
 0x2da   :  { %9991 = vmatprep.subr.bf16.mxu0 %v14707_v11  ;;  %v14758_v11 = vld [vmem:[%s20309_s1 + $0x22d4] ss:$28 sps:$4 sm:$0xff]  }
 0x2dc   :  { %9795 = vmatpush1.bf16.msra.mxu1 %v14702_v12  ;;  %v14761_v12 = vld [vmem:[%s20309_s1 + $0x5fc] ss:$28 sps:$4 sm:$0xff]  }
 0x2dd   :  { %9992 = vmatpush1.bf16.msra.mxu0 %v14705_v49  ;;  %9796 = vmatprep.subr.bf16.mxu1 %v14710_v13  ;;  %v14756_v49 = vld [vmem:[%s20309_s1 + $0x22d0] ss:$28 sps:$4 sm:$0xff]   ;;  %v14759_v13 = vld [vmem:[%s20309_s1 + $0x5f8] ss:$28 sps:$4 sm:$0xff]  }
 0x2de   :  { %9993 = vmatprep.subr.bf16.mxu0 %v14713_v14  ;;  %v14764_v14 = vld [vmem:[%s20309_s1 + $0x230c] ss:$28 sps:$4 sm:$0xff]  }
 0x2e0   :  { %9797 = vmatpush1.bf16.msra.mxu1 %v14708_v16  ;;  %v14767_v16 = vld [vmem:[%s20309_s1 + $0x634] ss:$28 sps:$4 sm:$0xff]  }
 0x2e1   :  { %9994 = vmatpush1.bf16.msra.mxu0 %v14711_v19  ;;  %9798 = vmatprep.subr.bf16.mxu1 %v14716_v20  ;;  %v14762_v19 = vld [vmem:[%s20309_s1 + $0x2308] ss:$28 sps:$4 sm:$0xff]   ;;  %v14765_v20 = vld [vmem:[%s20309_s1 + $0x630] ss:$28 sps:$4 sm:$0xff]  }
 0x2e2   :  { %9995 = vmatprep.subr.bf16.mxu0 %v14719_v21  ;;  %v14770_v21 = vld [vmem:[%s20309_s1 + $0x2344] ss:$28 sps:$4 sm:$0xff]  }
 0x2e4   :  { %9799 = vmatpush1.bf16.msra.mxu1 %v14714_v24  ;;  %v14773_v24 = vld [vmem:[%s20309_s1 + $0x66c] ss:$28 sps:$4 sm:$0xff]  }
 0x2e5   :  { %9996 = vmatpush1.bf16.msra.mxu0 %v14717_v25  ;;  %9800 = vmatprep.subr.bf16.mxu1 %v14722_v27  ;;  %v14768_v25 = vld [vmem:[%s20309_s1 + $0x2340] ss:$28 sps:$4 sm:$0xff]   ;;  %v14771_v27 = vld [vmem:[%s20309_s1 + $0x668] ss:$28 sps:$4 sm:$0xff]  }
 0x2e6   :  { %9997 = vmatprep.subr.bf16.mxu0 %v14725_v28  ;;  %v14776_v28 = vld [vmem:[%s20309_s1 + $0x237c] ss:$28 sps:$4 sm:$0xff]  }
 0x2e8   :  { %9801 = vmatpush1.bf16.msra.mxu1 %v14720_v60  ;;  %v14779_v60 = vld [vmem:[%s20309_s1 + $0x6a4] ss:$28 sps:$4 sm:$0xff]  }
 0x2e9   :  { %9998 = vmatpush1.bf16.msra.mxu0 %v14723_v34  ;;  %9802 = vmatprep.subr.bf16.mxu1 %v14728_v36  ;;  %v14774_v34 = vld [vmem:[%s20309_s1 + $0x2378] ss:$28 sps:$4 sm:$0xff]   ;;  %v14777_v36 = vld [vmem:[%s20309_s1 + $0x6a0] ss:$28 sps:$4 sm:$0xff]  }
 0x2ea   :  { %9999 = vmatprep.subr.bf16.mxu0 %v14731_v46  ;;  %v14782_v46 = vld [vmem:[%s20309_s1 + $0x23b4] ss:$28 sps:$4 sm:$0xff]  }
 0x2ec   :  { %9803 = vmatpush1.bf16.msra.mxu1 %v14726_v39  ;;  %v14785_v39 = vld [vmem:[%s20309_s1 + $0x6dc] ss:$28 sps:$4 sm:$0xff]  }
 0x2ed   :  { %10000 = vmatpush1.bf16.msra.mxu0 %v14729_v40  ;;  %9804 = vmatprep.subr.bf16.mxu1 %v14734_v43  ;;  %v14780_v40 = vld [vmem:[%s20309_s1 + $0x23b0] ss:$28 sps:$4 sm:$0xff]   ;;  %v14783_v43 = vld [vmem:[%s20309_s1 + $0x6d8] ss:$28 sps:$4 sm:$0xff]  }
 0x2ee   :  { %10001 = vmatprep.subr.bf16.mxu0 %v14737_v44  ;;  %v14788_v44 = vld [vmem:[%s20309_s1 + $0x23ec] ss:$28 sps:$4 sm:$0xff]  }
 0x2f0   :  { %9805 = vmatpush1.bf16.msra.mxu1 %v14732_v45  ;;  %v14791_v45 = vld [vmem:[%s20309_s1 + $0x714] ss:$28 sps:$4 sm:$0xff]  }
 0x2f1   :  { %10002 = vmatpush1.bf16.msra.mxu0 %v14735_v47  ;;  %9806 = vmatprep.subr.bf16.mxu1 %v14740_v50  ;;  %v14786_v47 = vld [vmem:[%s20309_s1 + $0x23e8] ss:$28 sps:$4 sm:$0xff]   ;;  %v14789_v50 = vld [vmem:[%s20309_s1 + $0x710] ss:$28 sps:$4 sm:$0xff]  }
 0x2f2   :  { %10003 = vmatprep.subr.bf16.mxu0 %v14743_v51  ;;  %v14794_v51 = vld [vmem:[%s20309_s1 + $0x2424] ss:$28 sps:$4 sm:$0xff]  }
 0x2f4   :  { %9807 = vmatpush1.bf16.msra.mxu1 %v14738_v54  ;;  %v14797_v54 = vld [vmem:[%s20309_s1 + $0x74c] ss:$28 sps:$4 sm:$0xff]  }
 0x2f5   :  { %10004 = vmatpush1.bf16.msra.mxu0 %v14741_v55  ;;  %9808 = vmatprep.subr.bf16.mxu1 %v14746_v56  ;;  %v14792_v55 = vld [vmem:[%s20309_s1 + $0x2420] ss:$28 sps:$4 sm:$0xff]   ;;  %v14795_v56 = vld [vmem:[%s20309_s1 + $0x748] ss:$28 sps:$4 sm:$0xff]  }
 0x2f6   :  { %10005 = vmatprep.subr.bf16.mxu0 %v14749_v0  ;;  %v14800_v0 = vld [vmem:[%s20309_s1 + $0x245c] ss:$28 sps:$4 sm:$0xff]  }
 0x2f8   :  { %9809 = vmatpush1.bf16.msra.mxu1 %v14744_v61  ;;  %v14803_v61 = vld [vmem:[%s20309_s1 + $0x784] ss:$28 sps:$4 sm:$0xff]  }
 0x2f9   :  { %10006 = vmatpush1.bf16.msra.mxu0 %v14747_v63  ;;  %9810 = vmatprep.subr.bf16.mxu1 %v14752_v1  ;;  %v14798_v63 = vld [vmem:[%s20309_s1 + $0x2458] ss:$28 sps:$4 sm:$0xff]   ;;  %v14801_v1 = vld [vmem:[%s20309_s1 + $0x780] ss:$28 sps:$4 sm:$0xff]  }
 0x2fa   :  { %10007 = vmatprep.subr.bf16.mxu0 %v14755_v5  ;;  %v14806_v5 = vld [vmem:[%s20309_s1 + $0x2494] ss:$28 sps:$4 sm:$0xff]  }
 0x2fc   :  { %9811 = vmatpush1.bf16.msra.mxu1 %v14750_v6  ;;  %v14809_v6 = vld [vmem:[%s20309_s1 + $0x7bc] ss:$28 sps:$4 sm:$0xff]  }
 0x2fd   :  { %10008 = vmatpush1.bf16.msra.mxu0 %v14753_v8  ;;  %9812 = vmatprep.subr.bf16.mxu1 %v14758_v11  ;;  %v14804_v8 = vld [vmem:[%s20309_s1 + $0x2490] ss:$28 sps:$4 sm:$0xff]   ;;  %v14807_v11 = vld [vmem:[%s20309_s1 + $0x7b8] ss:$28 sps:$4 sm:$0xff]  }
 0x2fe   :  { %10009 = vmatprep.subr.bf16.mxu0 %v14761_v12  ;;  %v14812_v12 = vld [vmem:[%s20309_s1 + $0x24cc] ss:$28 sps:$4 sm:$0xff]  }
 0x300   :  { %9813 = vmatpush1.bf16.msra.mxu1 %v14756_v49  ;;  %v14815_v49 = vld [vmem:[%s20309_s1 + $0x7f4] ss:$28 sps:$4 sm:$0xff]  }
 0x301   :  { %10010 = vmatpush1.bf16.msra.mxu0 %v14759_v13  ;;  %9823 = vmatprep.subr.bf16.mxu1 %v14764_v14  ;;  %v14810_v13 = vld [vmem:[%s20309_s1 + $0x24c8] ss:$28 sps:$4 sm:$0xff]   ;;  %v14813_v14 = vld [vmem:[%s20309_s1 + $0x7f0] ss:$28 sps:$4 sm:$0xff]  }
 0x302   :  { %10011 = vmatprep.subr.bf16.mxu0 %v14767_v16  ;;  %v14818_v16 = vld [vmem:[%s20309_s1 + $0x2504] ss:$28 sps:$4 sm:$0xff]  }
 0x303   :  { %9815 = vmatmul.mubr.bf16.vlgmr.msra.gmra.mrb[4].mxu1 %v17379_v10 }
 0x304   :  { %9824 = vmatpush1.bf16.msra.mxu1 %v14762_v19  ;;  %9855 = vmatprep.mubr.bf16.mxu1 %v17394_v15  ;;  %v14821_v19 = vld [vmem:[%s20309_s1 + $0x82c] ss:$28 sps:$4 sm:$0xff]  }
 0x305   :  { %10012 = vmatpush1.bf16.msra.mxu0 %v14765_v20  ;;  %9825 = vmatprep.subr.bf16.mxu1 %v14770_v21  ;;  %v14816_v20 = vld [vmem:[%s20309_s1 + $0x2500] ss:$28 sps:$4 sm:$0xff]   ;;  %v14819_v21 = vld [vmem:[%s20309_s1 + $0x828] ss:$28 sps:$4 sm:$0xff]  }
 0x306   :  { %10013 = vmatprep.subr.bf16.mxu0 %v14773_v24  ;;  %v14824_v24 = vld [vmem:[%s20309_s1 + $0x253c] ss:$28 sps:$4 sm:$0xff]  }
 0x308   :  { %9826 = vmatpush1.bf16.msra.mxu1 %v14768_v25  ;;  %v14827_v25 = vld [vmem:[%s20309_s1 + $0x864] ss:$28 sps:$4 sm:$0xff]  }
 0x309   :  { %10014 = vmatpush1.bf16.msra.mxu0 %v14771_v27  ;;  %9827 = vmatprep.subr.bf16.mxu1 %v14776_v28  ;;  %v14822_v27 = vld [vmem:[%s20309_s1 + $0x2538] ss:$28 sps:$4 sm:$0xff]   ;;  %v14825_v28 = vld [vmem:[%s20309_s1 + $0x860] ss:$28 sps:$4 sm:$0xff]  }
 0x30a   :  { %10015 = vmatprep.subr.bf16.mxu0 %v14779_v60  ;;  %v14830_v60 = vld [vmem:[%s20309_s1 + $0x2574] ss:$28 sps:$4 sm:$0xff]  }
 0x30c   :  { %9828 = vmatpush1.bf16.msra.mxu1 %v14774_v34  ;;  %v14833_v34 = vld [vmem:[%s20309_s1 + $0x89c] ss:$28 sps:$4 sm:$0xff]  }
 0x30d   :  { %10016 = vmatpush1.bf16.msra.mxu0 %v14777_v36  ;;  %9829 = vmatprep.subr.bf16.mxu1 %v14782_v46  ;;  %v14828_v36 = vld [vmem:[%s20309_s1 + $0x2570] ss:$28 sps:$4 sm:$0xff]   ;;  %v14831_v46 = vld [vmem:[%s20309_s1 + $0x898] ss:$28 sps:$4 sm:$0xff]  }
 0x30e   :  { %10017 = vmatprep.subr.bf16.mxu0 %v14785_v39  ;;  %v14836_v39 = vld [vmem:[%s20309_s1 + $0x25ac] ss:$28 sps:$4 sm:$0xff]  }
 0x310   :  { %9830 = vmatpush1.bf16.msra.mxu1 %v14780_v40  ;;  %v14839_v40 = vld [vmem:[%s20309_s1 + $0x8d4] ss:$28 sps:$4 sm:$0xff]  }
 0x311   :  { %10018 = vmatpush1.bf16.msra.mxu0 %v14783_v43  ;;  %9831 = vmatprep.subr.bf16.mxu1 %v14788_v44  ;;  %v14834_v43 = vld [vmem:[%s20309_s1 + $0x25a8] ss:$28 sps:$4 sm:$0xff]   ;;  %v14837_v44 = vld [vmem:[%s20309_s1 + $0x8d0] ss:$28 sps:$4 sm:$0xff]  }
 0x312   :  { %10028 = vmatprep.subr.bf16.mxu0 %v14791_v45  ;;  %v14842_v45 = vld [vmem:[%s20309_s1 + $0x25e4] ss:$28 sps:$4 sm:$0xff]  }
 0x314   :  { %10020 = vmatmul.mubr.bf16.vlgmr.msra.gmra.mrb[4].mxu0 %v16120_v29  ;;  %9832 = vmatpush1.bf16.msra.mxu1 %v14786_v47  ;;  %v14845_v47 = vld [vmem:[%s20309_s1 + $0x90c] ss:$28 sps:$4 sm:$0xff]  }
 0x315   :  { %10029 = vmatpush1.bf16.msra.mxu0 %v14789_v50  ;;  %9833 = vmatprep.subr.bf16.mxu1 %v14794_v51  ;;  %v14840_v50 = vld [vmem:[%s20309_s1 + $0x25e0] ss:$28 sps:$4 sm:$0xff]   ;;  %v14843_v51 = vld [vmem:[%s20309_s1 + $0x908] ss:$28 sps:$4 sm:$0xff]  }
 0x316   :  { %10030 = vmatprep.subr.bf16.mxu0 %v14797_v54  ;;  %10060 = vmatprep.mubr.bf16.mxu0 %v15865_v3  ;;  %v14848_v54 = vld [vmem:[%s20309_s1 + $0x261c] ss:$28 sps:$4 sm:$0xff]  }
 0x318   :  { %9834 = vmatpush1.bf16.msra.mxu1 %v14792_v55  ;;  %v14851_v55 = vld [vmem:[%s20309_s1 + $0x944] ss:$28 sps:$4 sm:$0xff]  }
 0x319   :  { %10031 = vmatpush1.bf16.msra.mxu0 %v14795_v56  ;;  %9835 = vmatprep.subr.bf16.mxu1 %v14800_v0  ;;  %v14846_v56 = vld [vmem:[%s20309_s1 + $0x2618] ss:$28 sps:$4 sm:$0xff]   ;;  %v14849_v0 = vld [vmem:[%s20309_s1 + $0x940] ss:$28 sps:$4 sm:$0xff]  }
 0x31a   :  { %10032 = vmatprep.subr.bf16.mxu0 %v14803_v61  ;;  %v14854_v61 = vld [vmem:[%s20309_s1 + $0x2654] ss:$28 sps:$4 sm:$0xff]  }
 0x31c   :  { %9836 = vmatpush1.bf16.msra.mxu1 %v14798_v63  ;;  %v14857_v63 = vld [vmem:[%s20309_s1 + $0x97c] ss:$28 sps:$4 sm:$0xff]  }
 0x31d   :  { %10033 = vmatpush1.bf16.msra.mxu0 %v14801_v1  ;;  %9837 = vmatprep.subr.bf16.mxu1 %v14806_v5  ;;  %v14852_v1 = vld [vmem:[%s20309_s1 + $0x2650] ss:$28 sps:$4 sm:$0xff]   ;;  %v14855_v5 = vld [vmem:[%s20309_s1 + $0x978] ss:$28 sps:$4 sm:$0xff]  }
 0x31e   :  { %10034 = vmatprep.subr.bf16.mxu0 %v14809_v6  ;;  %v14860_v6 = vld [vmem:[%s20309_s1 + $0x268c] ss:$28 sps:$4 sm:$0xff]  }
 0x320   :  { %9838 = vmatpush1.bf16.msra.mxu1 %v14804_v8  ;;  %v14863_v8 = vld [vmem:[%s20309_s1 + $0x9b4] ss:$28 sps:$4 sm:$0xff]  }
 0x321   :  { %10035 = vmatpush1.bf16.msra.mxu0 %v14807_v11  ;;  %9839 = vmatprep.subr.bf16.mxu1 %v14812_v12  ;;  %v14858_v11 = vld [vmem:[%s20309_s1 + $0x2688] ss:$28 sps:$4 sm:$0xff]   ;;  %v14861_v12 = vld [vmem:[%s20309_s1 + $0x9b0] ss:$28 sps:$4 sm:$0xff]  }
 0x322   :  { %10036 = vmatprep.subr.bf16.mxu0 %v14815_v49  ;;  %v14866_v49 = vld [vmem:[%s20309_s1 + $0x26c4] ss:$28 sps:$4 sm:$0xff]  }
 0x324   :  { %9840 = vmatpush1.bf16.msra.mxu1 %v14810_v13  ;;  %v14869_v13 = vld [vmem:[%s20309_s1 + $0x9ec] ss:$28 sps:$4 sm:$0xff]  }
 0x325   :  { %10037 = vmatpush1.bf16.msra.mxu0 %v14813_v14  ;;  %9841 = vmatprep.subr.bf16.mxu1 %v14818_v16  ;;  %v14864_v14 = vld [vmem:[%s20309_s1 + $0x26c0] ss:$28 sps:$4 sm:$0xff]   ;;  %v14867_v16 = vld [vmem:[%s20309_s1 + $0x9e8] ss:$28 sps:$4 sm:$0xff]  }
 0x326   :  { %10038 = vmatprep.subr.bf16.mxu0 %v14821_v19  ;;  %v14872_v19 = vld [vmem:[%s20309_s1 + $0x26fc] ss:$28 sps:$4 sm:$0xff]  }
 0x328   :  { %9842 = vmatpush1.bf16.msra.mxu1 %v14816_v20  ;;  %v14875_v20 = vld [vmem:[%s20309_s1 + $0xa24] ss:$28 sps:$4 sm:$0xff]  }
 0x329   :  { %10039 = vmatpush1.bf16.msra.mxu0 %v14819_v21  ;;  %9843 = vmatprep.subr.bf16.mxu1 %v14824_v24  ;;  %v14870_v21 = vld [vmem:[%s20309_s1 + $0x26f8] ss:$28 sps:$4 sm:$0xff]   ;;  %v14873_v24 = vld [vmem:[%s20309_s1 + $0xa20] ss:$28 sps:$4 sm:$0xff]  }
 0x32a   :  { %10040 = vmatprep.subr.bf16.mxu0 %v14827_v25  ;;  %v14878_v25 = vld [vmem:[%s20309_s1 + $0x2734] ss:$28 sps:$4 sm:$0xff]  }
 0x32c   :  { %9844 = vmatpush1.bf16.msra.mxu1 %v14822_v27  ;;  %v14881_v27 = vld [vmem:[%s20309_s1 + $0xa5c] ss:$28 sps:$4 sm:$0xff]  }
 0x32d   :  { %10041 = vmatpush1.bf16.msra.mxu0 %v14825_v28  ;;  %9845 = vmatprep.subr.bf16.mxu1 %v14830_v60  ;;  %v14876_v28 = vld [vmem:[%s20309_s1 + $0x2730] ss:$28 sps:$4 sm:$0xff]   ;;  %v14879_v60 = vld [vmem:[%s20309_s1 + $0xa58] ss:$28 sps:$4 sm:$0xff]  }
 0x32e   :  { %10042 = vmatprep.subr.bf16.mxu0 %v14833_v34  ;;  %v14884_v34 = vld [vmem:[%s20309_s1 + $0x276c] ss:$28 sps:$4 sm:$0xff]  }
 0x330   :  { %9846 = vmatpush1.bf16.msra.mxu1 %v14828_v36  ;;  %v14887_v36 = vld [vmem:[%s20309_s1 + $0xa94] ss:$28 sps:$4 sm:$0xff]  }
 0x331   :  { %10043 = vmatpush1.bf16.msra.mxu0 %v14831_v46  ;;  %9847 = vmatprep.subr.bf16.mxu1 %v14836_v39  ;;  %v14882_v46 = vld [vmem:[%s20309_s1 + $0x2768] ss:$28 sps:$4 sm:$0xff]   ;;  %v14885_v39 = vld [vmem:[%s20309_s1 + $0xa90] ss:$28 sps:$4 sm:$0xff]  }
 0x332   :  { %10044 = vmatprep.subr.bf16.mxu0 %v14839_v40  ;;  %v14890_v40 = vld [vmem:[%s20309_s1 + $0x27a4] ss:$28 sps:$4 sm:$0xff]  }
 0x334   :  { %9848 = vmatpush1.bf16.msra.mxu1 %v14834_v43  ;;  %v14893_v43 = vld [vmem:[%s20309_s1 + $0xacc] ss:$28 sps:$4 sm:$0xff]  }
 0x335   :  { %10045 = vmatpush1.bf16.msra.mxu0 %v14837_v44  ;;  %9849 = vmatprep.subr.bf16.mxu1 %v14842_v45  ;;  %v14888_v44 = vld [vmem:[%s20309_s1 + $0x27a0] ss:$28 sps:$4 sm:$0xff]   ;;  %v14891_v45 = vld [vmem:[%s20309_s1 + $0xac8] ss:$28 sps:$4 sm:$0xff]  }
 0x336   :  { %10046 = vmatprep.subr.bf16.mxu0 %v14845_v47  ;;  %v14896_v47 = vld [vmem:[%s20309_s1 + $0x27dc] ss:$28 sps:$4 sm:$0xff]  }
 0x338   :  { %9850 = vmatpush1.bf16.msra.mxu1 %v14840_v50  ;;  %v14899_v50 = vld [vmem:[%s20309_s1 + $0xb04] ss:$28 sps:$4 sm:$0xff]  }
 0x339   :  { %10047 = vmatpush1.bf16.msra.mxu0 %v14843_v51  ;;  %9851 = vmatprep.subr.bf16.mxu1 %v14848_v54  ;;  %v14894_v51 = vld [vmem:[%s20309_s1 + $0x27d8] ss:$28 sps:$4 sm:$0xff]   ;;  %v14897_v54 = vld [vmem:[%s20309_s1 + $0xb00] ss:$28 sps:$4 sm:$0xff]  }
 0x33a   :  { %10048 = vmatprep.subr.bf16.mxu0 %v14851_v55  ;;  %v14902_v55 = vld [vmem:[%s20309_s1 + $0x2814] ss:$28 sps:$4 sm:$0xff]  }
 0x33c   :  { %9852 = vmatpush1.bf16.msra.mxu1 %v14846_v56  ;;  %v14905_v56 = vld [vmem:[%s20309_s1 + $0xb3c] ss:$28 sps:$4 sm:$0xff]  }
 0x33d   :  { %10049 = vmatpush1.bf16.msra.mxu0 %v14849_v0  ;;  %9853 = vmatprep.subr.bf16.mxu1 %v14854_v61  ;;  %v14900_v0 = vld [vmem:[%s20309_s1 + $0x2810] ss:$28 sps:$4 sm:$0xff]   ;;  %v1598_v61 = vsub.s32 0, %v15806_v42 }
 0x33e   :  { %10050 = vmatprep.subr.bf16.mxu0 %v14857_v63  ;;  %v1594_v63 = vld [vmem:[%s20310_s2] sm:$0xff] }
 0x340   :  { %9854 = vmatpush1.bf16.msra.mxu1 %v14852_v1  ;;  %v14903_v1 = vld [vmem:[%s20309_s1 + $0xb38] ss:$28 sps:$4 sm:$0xff]  }
 0x341   :  { %10051 = vmatpush1.bf16.msra.mxu0 %v14855_v5  ;;  %9864 = vmatprep.subr.bf16.mxu1 %v14860_v6  ;;  %v14908_v5 = vld [vmem:[%s20309_s1 + $0x284c] ss:$28 sps:$4 sm:$0xff]   ;;  %v14911_v6 = vld [vmem:[%s20309_s1 + $0xb74] ss:$28 sps:$4 sm:$0xff]  }
 0x342   :  { %10052 = vmatprep.subr.bf16.mxu0 %v14863_v8  ;;  %v1602_v8 = vsub.s32 1, %v15806_v42 }
 0x343   :  { %9856 = vmatmul.mubr.bf16.vlgmr.msra.gmra.mrb[4].mxu1 %v17582_v35 }
 0x344   :  { %9865 = vmatpush1.bf16.msra.mxu1 %v14858_v11  ;;  %9896 = vmatprep.mubr.bf16.mxu1 %v17598_v57  ;;  %v14906_v11 = vld [vmem:[%s20309_s1 + $0x2848] ss:$28 sps:$4 sm:$0xff]  }
 0x345   :  { %10053 = vmatpush1.bf16.msra.mxu0 %v14861_v12  ;;  %9866 = vmatprep.subr.bf16.mxu1 %v14866_v49  ;;  %v14909_v12 = vld [vmem:[%s20309_s1 + $0xb70] ss:$28 sps:$4 sm:$0xff]   ;;  %v14914_v49 = vld [vmem:[%s20309_s1 + $0x2884] ss:$28 sps:$4 sm:$0xff]  }
 0x346   :  { %10054 = vmatprep.subr.bf16.mxu0 %v14869_v13  ;;  %v1599_v13 = vrot.slane %v1594_v63, %v1598_v61  ;;  %v14939_v61 = vld [vmem:[%s20309_s1 + $0xc88] ss:$28 sps:$4 sm:$0xff]  }
 0x348   :  { %9867 = vmatpush1.bf16.msra.mxu1 %v14864_v14  ;;  %v14917_v14 = vld [vmem:[%s20309_s1 + $0xbac] ss:$28 sps:$4 sm:$0xff]  }
 0x349   :  { %10055 = vmatpush1.bf16.msra.mxu0 %v14867_v16  ;;  %9868 = vmatprep.subr.bf16.mxu1 %v14872_v19  ;;  %v1603_v16 = vrot.slane %v1594_v63, %v1602_v8  ;;  %v14912_v19 = vld [vmem:[%s20309_s1 + $0x2880] ss:$28 sps:$4 sm:$0xff]   ;;  %v14950_v8 = vld [vmem:[%s20309_s1 + $0x29d4] ss:$28 sps:$4 sm:$0xff]  }
 0x34a   :  { %10056 = vmatprep.subr.bf16.mxu0 %v14875_v20  ;;  %v14915_v20 = vld [vmem:[%s20309_s1 + $0xba8] ss:$28 sps:$4 sm:$0xff]   ;;  %v14944_v63 = vld [vmem:[%s20309_s1 + $0x299c] ss:$28 sps:$4 sm:$0xff]  }
 0x34c   :  { %9869 = vmatpush1.bf16.msra.mxu1 %v14870_v21  ;;  %v14920_v21 = vld [vmem:[%s20309_s1 + $0x28bc] ss:$28 sps:$4 sm:$0xff]  }
 0x34d   :  { %10057 = vmatpush1.bf16.msra.mxu0 %v14873_v24  ;;  %9870 = vmatprep.subr.bf16.mxu1 %v14878_v25  ;;  %v13454_v24 = vadd.f32 %v16831_v59, %v1599_v13  ;;  %v14923_v25 = vld [vmem:[%s20309_s1 + $0xbe4] ss:$28 sps:$4 sm:$0xff]   ;;  %v14956_v13 = vld [vmem:[%s20309_s1 + $0x2a0c] ss:$28 sps:$4 sm:$0xff]  }
 0x34e   :  { %10058 = vmatprep.subr.bf16.mxu0 %v14881_v27  ;;  %v13456_v27 = vadd.f32 %v16833_v32, %v1603_v16  ;;  %v14921_v59 = vld [vmem:[%s20309_s1 + $0xbe0] ss:$28 sps:$4 sm:$0xff]   ;;  %v14926_v32 = vld [vmem:[%s20309_s1 + $0x28f4] ss:$28 sps:$4 sm:$0xff]   ;;  %v14954_v16 = vld [vmem:[%s20309_s1 + $0x2a08] ss:$28 sps:$4 sm:$0xff]  }
 0x350   :  { %9871 = vmatpush1.bf16.msra.mxu1 %v14876_v28 }
 0x351   :  { %10059 = vmatpush1.bf16.msra.mxu0 %v14879_v60  ;;  %9872 = vmatprep.subr.bf16.mxu1 %v14884_v34  ;;  %v14918_v60 = vld [vmem:[%s20309_s1 + $0x28b8] ss:$28 sps:$4 sm:$0xff]  }
 0x352   :  { %10069 = vmatprep.subr.bf16.mxu0 %v14887_v36 }
 0x354   :  { %10061 = vmatmul.mubr.bf16.vlgmr.msra.gmra.mrb[4].mxu0 %v15912_v18  ;;  %9873 = vmatpush1.bf16.msra.mxu1 %v14882_v46 }
 0x355   :  { %10070 = vmatpush1.bf16.msra.mxu0 %v14885_v39  ;;  %9874 = vmatprep.subr.bf16.mxu1 %v14890_v40 }
 0x356   :  { %10071 = vmatprep.subr.bf16.mxu0 %v14893_v43  ;;  %10101 = vmatprep.mubr.bf16.mxu0 %v15929_v23  ;;  %v14929_v43 = vld [vmem:[%s20309_s1 + $0xc1c] ss:$28 sps:$4 sm:$0xff]  }
 0x358   :  { %9875 = vmatpush1.bf16.msra.mxu1 %v14888_v44  ;;  %v14924_v44 = vld [vmem:[%s20309_s1 + $0x28f0] ss:$28 sps:$4 sm:$0xff]  }
 0x359   :  { %10072 = vmatpush1.bf16.msra.mxu0 %v14891_v45  ;;  %9876 = vmatprep.subr.bf16.mxu1 %v14896_v47  ;;  %v14927_v45 = vld [vmem:[%s20309_s1 + $0xc18] ss:$28 sps:$4 sm:$0xff]   ;;  %v14932_v47 = vld [vmem:[%s20309_s1 + $0x292c] ss:$28 sps:$4 sm:$0xff]  }
 0x35a   :  { %10073 = vmatprep.subr.bf16.mxu0 %v14899_v50  ;;  %v14935_v50 = vld [vmem:[%s20309_s1 + $0xc54] ss:$28 sps:$4 sm:$0xff]  }
 0x35c   :  { %9877 = vmatpush1.bf16.msra.mxu1 %v14894_v51  ;;  %v14930_v51 = vld [vmem:[%s20309_s1 + $0x2928] ss:$28 sps:$4 sm:$0xff]  }
 0x35d   :  { %10074 = vmatpush1.bf16.msra.mxu0 %v14897_v54  ;;  %9878 = vmatprep.subr.bf16.mxu1 %v14902_v55  ;;  %v14933_v54 = vld [vmem:[%s20309_s1 + $0xc50] ss:$28 sps:$4 sm:$0xff]   ;;  %v14938_v55 = vld [vmem:[%s20309_s1 + $0x2964] ss:$28 sps:$4 sm:$0xff]  }
 0x35e   :  { %10075 = vmatprep.subr.bf16.mxu0 %v14905_v56  ;;  %v14941_v56 = vld [vmem:[%s20309_s1 + $0xc8c] ss:$28 sps:$4 sm:$0xff]  }
 0x360   :  { %9879 = vmatpush1.bf16.msra.mxu1 %v14900_v0  ;;  %v14936_v0 = vld [vmem:[%s20309_s1 + $0x2960] ss:$28 sps:$4 sm:$0xff]  }
 0x361   :  { %10076 = vmatpush1.bf16.msra.mxu0 %v14903_v1  ;;  %9880 = vmatprep.subr.bf16.mxu1 %v14908_v5  ;;  %v14947_v1 = vld [vmem:[%s20309_s1 + $0xcc4] ss:$28 sps:$4 sm:$0xff]   ;;  %v14942_v5 = vld [vmem:[%s20309_s1 + $0x2998] ss:$28 sps:$4 sm:$0xff]  }
 0x362   :  { %10077 = vmatprep.subr.bf16.mxu0 %v14911_v6  ;;  %v14945_v6 = vld [vmem:[%s20309_s1 + $0xcc0] ss:$28 sps:$4 sm:$0xff]  }
 0x364   :  { %9881 = vmatpush1.bf16.msra.mxu1 %v14906_v11  ;;  %v14953_v11 = vld [vmem:[%s20309_s1 + $0xcfc] ss:$28 sps:$4 sm:$0xff]  }
 0x365   :  { %10078 = vmatpush1.bf16.msra.mxu0 %v14909_v12  ;;  %9882 = vmatprep.subr.bf16.mxu1 %v14914_v49  ;;  %v14948_v12 = vld [vmem:[%s20309_s1 + $0x29d0] ss:$28 sps:$4 sm:$0xff]   ;;  %v14951_v49 = vld [vmem:[%s20309_s1 + $0xcf8] ss:$28 sps:$4 sm:$0xff]  }
 0x366   :  { %10079 = vmatprep.subr.bf16.mxu0 %v14917_v14  ;;  %v14959_v14 = vld [vmem:[%s20309_s1 + $0xd34] ss:$28 sps:$4 sm:$0xff]  }
 0x367   :  { %v9406_v28 = vpop.f32.mrb[0].mxu0 }
 0x368   :  { %v18519_v34 = vadd.f32 %v13454_v24, %v9406_v28  ;;  %v9408_v36 = vpop.f32.mrb[1].mxu0  ;;  %9883 = vmatpush1.bf16.msra.mxu1 %v14912_v19  ;;  %v14957_v19 = vld [vmem:[%s20309_s1 + $0xd30] ss:$28 sps:$4 sm:$0xff]   ;;  %v14960_v24 = vld [vmem:[%s20309_s1 + $0x2a40] ss:$28 sps:$4 sm:$0xff]  }
 0x369   :  { %v18521_v46 = vadd.f32 %v13456_v27, %v9408_v36  ;;  %v9410_v39 = vpop.f32.mrb[2].mxu0  ;;  %10080 = vmatpush1.bf16.msra.mxu0 %v14915_v20  ;;  %9884 = vmatprep.subr.bf16.mxu1 %v14920_v21  ;;  %v14962_v20 = vld [vmem:[%s20309_s1 + $0x2a44] ss:$28 sps:$4 sm:$0xff]   ;;  %v14965_v21 = vld [vmem:[%s20309_s1 + $0xd6c] ss:$28 sps:$4 sm:$0xff]  }
 0x36a   :  { %v9411_v40 = vpop.f32.mrb[3].mxu0  ;;  %10081 = vmatprep.subr.bf16.mxu0 %v14923_v25  ;;  %v14963_v25 = vld [vmem:[%s20309_s1 + $0xd68] ss:$28 sps:$4 sm:$0xff]   ;;  %v14968_v27 = vld [vmem:[%s20309_s1 + $0x2a7c] ss:$28 sps:$4 sm:$0xff]  }
 0x36b   :  { %v14971_v28 = vld [vmem:[%s20309_s1 + $0xda4] ss:$28 sps:$4 sm:$0xff]   ;;  %v14974_v39 = vld [vmem:[%s20309_s1 + $0x2ab4] ss:$28 sps:$4 sm:$0xff]  }
 0x36c   :  { %9885 = vmatpush1.bf16.msra.mxu1 %v14918_v60  ;;  %v14966_v60 = vld [vmem:[%s20309_s1 + $0x2a78] ss:$28 sps:$4 sm:$0xff]   ;;  %v14969_v36 = vld [vmem:[%s20309_s1 + $0xda0] ss:$28 sps:$4 sm:$0xff]  }
 0x36d   :  { %10082 = vmatpush1.bf16.msra.mxu0 %v14921_v59  ;;  %9886 = vmatprep.subr.bf16.mxu1 %v14926_v32  ;;  %v14977_v59 = vld [vmem:[%s20309_s1 + $0xddc] ss:$28 sps:$4 sm:$0xff]  }
 0x36e   :  { %10083 = vmatprep.subr.bf16.mxu0 %v14929_v43 }
 0x370   :  { %9887 = vmatpush1.bf16.msra.mxu1 %v14924_v44 }
 0x371   :  { %10084 = vmatpush1.bf16.msra.mxu0 %v14927_v45  ;;  %9888 = vmatprep.subr.bf16.mxu1 %v14932_v47 }
 0x372   :  { %10085 = vmatprep.subr.bf16.mxu0 %v14935_v50 }
 0x374   :  { %9889 = vmatpush1.bf16.msra.mxu1 %v14930_v51 }
 0x375   :  { %10086 = vmatpush1.bf16.msra.mxu0 %v14933_v54  ;;  %9890 = vmatprep.subr.bf16.mxu1 %v14938_v55 }
 0x376   :  { %10087 = vmatprep.subr.bf16.mxu0 %v14941_v56 }
 0x378   :  { %9891 = vmatpush1.bf16.msra.mxu1 %v14936_v0 }
 0x379   :  { %10088 = vmatpush1.bf16.msra.mxu0 %v14939_v61  ;;  %9892 = vmatprep.subr.bf16.mxu1 %v14944_v63 }
 0x37a   :  { %10089 = vmatprep.subr.bf16.mxu0 %v14947_v1 }
 0x37c   :  { %9893 = vmatpush1.bf16.msra.mxu1 %v14942_v5 }
 0x37d   :  { %10090 = vmatpush1.bf16.msra.mxu0 %v14945_v6  ;;  %9894 = vmatprep.subr.bf16.mxu1 %v14950_v8 }
 0x37e   :  { %10091 = vmatprep.subr.bf16.mxu0 %v14953_v11 }
 0x380   :  { %9895 = vmatpush1.bf16.msra.mxu1 %v14948_v12 }
 0x381   :  { %10092 = vmatpush1.bf16.msra.mxu0 %v14951_v49  ;;  %9905 = vmatprep.subr.bf16.mxu1 %v14956_v13 }
 0x382   :  { %10093 = vmatprep.subr.bf16.mxu0 %v14959_v14 }
 0x383   :  { %9897 = vmatmul.mubr.bf16.vlgmr.msra.gmra.mrb[4].mxu1 %v17786_v38 }
 0x384   :  { %9906 = vmatpush1.bf16.msra.mxu1 %v14954_v16  ;;  %9937 = vmatprep.mubr.bf16.mxu1 %v15655_v52 }
 0x385   :  { %10094 = vmatpush1.bf16.msra.mxu0 %v14957_v19  ;;  %9907 = vmatprep.subr.bf16.mxu1 %v14962_v20 }
 0x386   :  { %10095 = vmatprep.subr.bf16.mxu0 %v14965_v21 }
 0x388   :  { %9908 = vmatpush1.bf16.msra.mxu1 %v14960_v24 }
 0x389   :  { %10096 = vmatpush1.bf16.msra.mxu0 %v14963_v25  ;;  %9909 = vmatprep.subr.bf16.mxu1 %v14968_v27 }
 0x38a   :  { %10097 = vmatprep.subr.bf16.mxu0 %v14971_v28 }
 0x38b   :  { %10 = vsyncpa [#allocation3], 0  ;;  %v14972_v32 = vld [vmem:[%s20309_s1 + $0x2ab0] ss:$28 sps:$4 sm:$0xff]   ;;  %v14975_v40 = vld [vmem:[%s20309_s1 + $0xdd8] ss:$28 sps:$4 sm:$0xff]  }
 0x38c   :  { %9910 = vmatpush1.bf16.msra.mxu1 %v14966_v60  ;;  %v14980_v43 = vld [vmem:[%s20309_s1 + $0xe14] ss:$28 sps:$4 sm:$0xff]   ;;  %v14985_v50 = vld [vmem:[%s20309_s1 + $0xe4c] ss:$28 sps:$4 sm:$0xff]   ;;  %v14990_v56 = vld [vmem:[%s20309_s1 + $0xe84] ss:$28 sps:$4 sm:$0xff]  }
 0x38d   :  { %10098 = vmatpush1.bf16.msra.mxu0 %v14969_v36  ;;  %9911 = vmatprep.subr.bf16.mxu1 %v14974_v39  ;;  %v14981_v44 = vld [vmem:[%s20309_s1 + $0x1d8] ss:$28 sps:$4 sm:$0xff]   ;;  %v14978_v45 = vld [vmem:[%s20309_s1 + $0xe10] ss:$28 sps:$4 sm:$0xff]   ;;  %v14983_v54 = vld [vmem:[%s20309_s1 + $0xe48] ss:$28 sps:$4 sm:$0xff]  }
 0x38e   :  { %10099 = vmatprep.subr.bf16.mxu0 %v14977_v59  ;;  %v14982_v47 = vld [vmem:[%s20309_s1 + $0x18] ss:$28 sps:$4 sm:$0xff]   ;;  %v14986_v51 = vld [vmem:[%s20309_s1 + $0x210] ss:$28 sps:$4 sm:$0xff]   ;;  %v14991_v0 = vld [vmem:[%s20309_s1 + $0x248] ss:$28 sps:$4 sm:$0xff]  }
 0x38f   :  { %v14987_v55 = vld [vmem:[%s20309_s1 + $0x50] ss:$28 sps:$4 sm:$0xff]   ;;  %v14988_v61 = vld [vmem:[%s20309_s1 + $0xe80] ss:$28 sps:$4 sm:$0xff]   ;;  %v14992_v63 = vld [vmem:[%s20309_s1 + $0x88] ss:$28 sps:$4 sm:$0xff]  }
 0x390   :  { %9912 = vmatpush1.bf16.msra.mxu1 %v14972_v32  ;;  %v14995_v1 = vld [vmem:[%s20309_s1 + $0xebc] ss:$28 sps:$4 sm:$0xff]   ;;  %v15000_v8 = vld [vmem:[%s20309_s1 + $0xef4] ss:$28 sps:$4 sm:$0xff]   ;;  %v15005_v13 = vld [vmem:[%s20309_s1 + $0xf2c] ss:$28 sps:$4 sm:$0xff]  }
 0x391   :  { %10100 = vmatpush1.bf16.msra.mxu0 %v14975_v40  ;;  %13078 = vmatprep.subr.bf16.mxu1 %v14981_v44  ;;  %v14993_v5 = vld [vmem:[%s20309_s1 + $0xeb8] ss:$28 sps:$4 sm:$0xff]   ;;  %v14997_v6 = vld [vmem:[%s20309_s1 + $0xc0] ss:$28 sps:$4 sm:$0xff]   ;;  %v14998_v12 = vld [vmem:[%s20309_s1 + $0xef0] ss:$28 sps:$4 sm:$0xff]  }
 0x392   :  { %10110 = vmatprep.subr.bf16.mxu0 %v14980_v43  ;;  %v15001_v11 = vld [vmem:[%s20309_s1 + $0x2b8] ss:$28 sps:$4 sm:$0xff]   ;;  %v15006_v14 = vld [vmem:[%s20309_s1 + $0x2f0] ss:$28 sps:$4 sm:$0xff]   ;;  %v15003_v16 = vld [vmem:[%s20309_s1 + $0xf28] ss:$28 sps:$4 sm:$0xff]  }
 0x393   :  { %13018 = vmatmul.mubr.msk.bf16.vlgmr.msra.gmra.mrb[4].mxu1 %vm8876_vm0, %v17844_v7  ;;  %v15002_v49 = vld [vmem:[%s20309_s1 + $0xf8] ss:$28 sps:$4 sm:$0xff]   ;;  %v15007_v19 = vld [vmem:[%s20309_s1 + $0x130] ss:$28 sps:$4 sm:$0xff]   ;;  %v15010_v20 = vld [vmem:[%s20309_s1 + $0xf64] ss:$28 sps:$4 sm:$0xff]  }
 0x394   :  { %10102 = vmatmul.mubr.bf16.vlgmr.msra.gmra.mrb[4].mxu0 %v16124_v30  ;;  %13079 = vmatpush3.bf16.msra.mxu1 %v14982_v47  ;;  %v15011_v21 = vld [vmem:[%s20309_s1 + $0x328] ss:$28 sps:$4 sm:$0xff]   ;;  %v15008_v24 = vld [vmem:[%s20309_s1 + $0xf60] ss:$28 sps:$4 sm:$0xff]   ;;  %v15013_v60 = vld [vmem:[%s20309_s1 + $0xf98] ss:$28 sps:$4 sm:$0xff]  }
 0x395   :  { %10111 = vmatpush1.bf16.msra.mxu0 %v14978_v45  ;;  %13080 = vmatprep.subr.bf16.mxu1 %v14986_v51  ;;  %v15012_v25 = vld [vmem:[%s20309_s1 + $0x168] ss:$28 sps:$4 sm:$0xff]   ;;  %v15015_v27 = vld [vmem:[%s20309_s1 + $0xf9c] ss:$28 sps:$4 sm:$0xff]   ;;  %v15020_v39 = vld [vmem:[%s20309_s1 + $0xfd4] ss:$28 sps:$4 sm:$0xff]  }
 0x396   :  { %10112 = vmatprep.subr.bf16.mxu0 %v14985_v50  ;;  %10511 = vmatprep.mubr.bf16.mxu1 %v15853_v62  ;;  %v14996_v62 = vld [vmem:[%s20309_s1 + $0x280] ss:$28 sps:$4 sm:$0xff]   ;;  %v15021_v59 = vld [vmem:[%s20309_s1 + $0x558] ss:$28 sps:$4 sm:$0xff]   ;;  %v15018_v32 = vld [vmem:[%s20309_s1 + $0xfd0] ss:$28 sps:$4 sm:$0xff]  }
 0x397   :  { %10142 = vmatprep.mubr.bf16.mxu0 %v16161_v41  ;;  %v15016_v28 = vld [vmem:[%s20309_s1 + $0x360] ss:$28 sps:$4 sm:$0xff]   ;;  %v15022_v40 = vld [vmem:[%s20309_s1 + $0x398] ss:$28 sps:$4 sm:$0xff]   ;;  %v15025_v43 = vld [vmem:[%s20309_s1 + $0x100c] ss:$28 sps:$4 sm:$0xff]  }
 0x398   :  { %13081 = vmatpush3.bf16.msra.mxu1 %v14987_v55  ;;  %v15017_v36 = vld [vmem:[%s20309_s1 + $0x1a0] ss:$28 sps:$4 sm:$0xff]   ;;  %v15026_v44 = vld [vmem:[%s20309_s1 + $0x590] ss:$28 sps:$4 sm:$0xff]   ;;  %v15023_v45 = vld [vmem:[%s20309_s1 + $0x1008] ss:$28 sps:$4 sm:$0xff]  }
 0x399   :  { %10113 = vmatpush1.bf16.msra.mxu0 %v14983_v54  ;;  %13082 = vmatprep.subr.bf16.mxu1 %v14991_v0  ;;  %v15027_v47 = vld [vmem:[%s20309_s1 + $0x3d0] ss:$28 sps:$4 sm:$0xff]   ;;  %v15030_v50 = vld [vmem:[%s20309_s1 + $0x1044] ss:$28 sps:$4 sm:$0xff]   ;;  %v15035_v55 = vld [vmem:[%s20309_s1 + $0x107c] ss:$28 sps:$4 sm:$0xff]  }
 0x39a   :  { %10114 = vmatprep.subr.bf16.mxu0 %v14990_v56  ;;  %v15028_v51 = vld [vmem:[%s20309_s1 + $0x1040] ss:$28 sps:$4 sm:$0xff]   ;;  %v15032_v54 = vld [vmem:[%s20309_s1 + $0x408] ss:$28 sps:$4 sm:$0xff]   ;;  %v15033_v56 = vld [vmem:[%s20309_s1 + $0x1078] ss:$28 sps:$4 sm:$0xff]  }
 0x39b   :  { %v15037_v0 = vld [vmem:[%s20309_s1 + $0x440] ss:$28 sps:$4 sm:$0xff]   ;;  %vm15657_vm1 = vmmov 0   ;;  %s15658_s28 = smov [#allocation2]   ;;  %vm11628_vm2 = vcmask 17408  }
 0x39c   :  { %13083 = vmatpush3.bf16.msra.mxu1 %v14992_v63  ;;  %v15041_v63 = vld [vmem:[%s20309_s1 + $0x638] ss:$28 sps:$4 sm:$0xff]   ;;  %s11636_s29 = sshll.u32 %s15658_s28, 4  ;;  %s11637_s29 = int_to_ptr.vmem [resolvable:$true] %s11636_s29 }
 0x39d   :  { %10115 = vmatpush1.bf16.msra.mxu0 %v14988_v61  ;;  %13084 = vmatprep.subr.bf16.mxu1 %v14996_v62  ;;  %v15040_v61 = vld [vmem:[%s20309_s1 + $0x10b4] ss:$28 sps:$4 sm:$0xff]   ;;  %p15635_p1 = scmp.lt.s32.totalorder %s11637_s29, %s11637_s29 }
 0x39e   :  { %10116 = vmatprep.subr.bf16.mxu0 %v14995_v1  ;;  %v15038_v1 = vld [vmem:[%s20309_s1 + $0x10b0] ss:$28 sps:$4 sm:$0xff]   ;;  %v15042_v62 = vld [vmem:[%s20309_s1 + $0x478] ss:$28 sps:$4 sm:$0xff]  }
 0x3a0   :  { %13085 = vmatpush3.bf16.msra.mxu1 %v14997_v6  ;;  %v15046_v6 = vld [vmem:[%s20309_s1 + $0x670] ss:$28 sps:$4 sm:$0xff]  }
 0x3a1   :  { %10117 = vmatpush1.bf16.msra.mxu0 %v14993_v5  ;;  %13086 = vmatprep.subr.bf16.mxu1 %v15001_v11  ;;  %v15045_v5 = vld [vmem:[%s20309_s1 + $0x10ec] ss:$28 sps:$4 sm:$0xff]  }
 0x3a2   :  { %10118 = vmatprep.subr.bf16.mxu0 %v15000_v8  ;;  %v15043_v8 = vld [vmem:[%s20309_s1 + $0x10e8] ss:$28 sps:$4 sm:$0xff]   ;;  %v15047_v11 = vld [vmem:[%s20309_s1 + $0x4b0] ss:$28 sps:$4 sm:$0xff]  }
 0x3a4   :  { %13087 = vmatpush3.bf16.msra.mxu1 %v15002_v49  ;;  %v15051_v49 = vld [vmem:[%s20309_s1 + $0x6a8] ss:$28 sps:$4 sm:$0xff]  }
 0x3a5   :  { %10119 = vmatpush1.bf16.msra.mxu0 %v14998_v12  ;;  %13088 = vmatprep.subr.bf16.mxu1 %v15006_v14  ;;  %v15050_v12 = vld [vmem:[%s20309_s1 + $0x1124] ss:$28 sps:$4 sm:$0xff]  }
 0x3a6   :  { %10120 = vmatprep.subr.bf16.mxu0 %v15005_v13  ;;  %v15048_v13 = vld [vmem:[%s20309_s1 + $0x1120] ss:$28 sps:$4 sm:$0xff]   ;;  %v15052_v14 = vld [vmem:[%s20309_s1 + $0x4e8] ss:$28 sps:$4 sm:$0xff]  }
 0x3a8   :  { %13089 = vmatpush3.bf16.msra.mxu1 %v15007_v19  ;;  %v15056_v19 = vld [vmem:[%s20309_s1 + $0x6e0] ss:$28 sps:$4 sm:$0xff]  }
 0x3a9   :  { %10121 = vmatpush1.bf16.msra.mxu0 %v15003_v16  ;;  %13090 = vmatprep.subr.bf16.mxu1 %v15011_v21  ;;  %v15055_v16 = vld [vmem:[%s20309_s1 + $0x115c] ss:$28 sps:$4 sm:$0xff]  }
 0x3aa   :  { %10122 = vmatprep.subr.bf16.mxu0 %v15010_v20  ;;  %v15053_v20 = vld [vmem:[%s20309_s1 + $0x1158] ss:$28 sps:$4 sm:$0xff]   ;;  %v15057_v21 = vld [vmem:[%s20309_s1 + $0x520] ss:$28 sps:$4 sm:$0xff]  }
 0x3ac   :  { %13091 = vmatpush3.bf16.msra.mxu1 %v15012_v25  ;;  %v15061_v25 = vld [vmem:[%s20309_s1 + $0x8d8] ss:$28 sps:$4 sm:$0xff]  }
 0x3ad   :  { %10123 = vmatpush1.bf16.msra.mxu0 %v15008_v24  ;;  %13092 = vmatprep.subr.bf16.mxu1 %v15016_v28  ;;  %v15060_v24 = vld [vmem:[%s20309_s1 + $0x1194] ss:$28 sps:$4 sm:$0xff]  }
 0x3ae   :  { %10124 = vmatprep.subr.bf16.mxu0 %v15015_v27  ;;  %v15058_v27 = vld [vmem:[%s20309_s1 + $0x1190] ss:$28 sps:$4 sm:$0xff]   ;;  %v15062_v28 = vld [vmem:[%s20309_s1 + $0x718] ss:$28 sps:$4 sm:$0xff]  }
 0x3b0   :  { %13093 = vmatpush3.bf16.msra.mxu1 %v15017_v36  ;;  %v15066_v36 = vld [vmem:[%s20309_s1 + $0x910] ss:$28 sps:$4 sm:$0xff]  }
 0x3b1   :  { %10125 = vmatpush1.bf16.msra.mxu0 %v15013_v60  ;;  %13100 = vmatprep.subr.bf16.mxu1 %v15021_v59  ;;  %v15065_v60 = vld [vmem:[%s20309_s1 + $0x11cc] ss:$28 sps:$4 sm:$0xff]  }
 0x3b2   :  { %10126 = vmatprep.subr.bf16.mxu0 %v15020_v39  ;;  %v15063_v39 = vld [vmem:[%s20309_s1 + $0x11c8] ss:$28 sps:$4 sm:$0xff]   ;;  %v15067_v59 = vld [vmem:[%s20309_s1 + $0x750] ss:$28 sps:$4 sm:$0xff]  }
 0x3b3   :  { %10512 = vmatmul.mubr.bf16.vlgmr.msra.gmra.mrb[8].mxu1 %v15909_v17  ;;  %v15031_v17 = vld [vmem:[%s20309_s1 + $0x5c8] ss:$28 sps:$4 sm:$0xff]  }
 0x3b4   :  { %13101 = vmatpush3.bf16.msra.mxu1 %v15022_v40  ;;  %10551 = vmatprep.mubr.bf16.mxu1 %v15925_v22  ;;  %v15036_v22 = vld [vmem:[%s20309_s1 + $0x600] ss:$28 sps:$4 sm:$0xff]  }
 0x3b5   :  { %10127 = vmatpush1.bf16.msra.mxu0 %v15018_v32  ;;  %13102 = vmatprep.subr.bf16.mxu1 %v15026_v44  ;;  %v15070_v32 = vld [vmem:[%s20309_s1 + $0x1204] ss:$28 sps:$4 sm:$0xff]   ;;  %v15075_v44 = vld [vmem:[%s20309_s1 + $0x123c] ss:$28 sps:$4 sm:$0xff]  }
 0x3b6   :  { %10128 = vmatprep.subr.bf16.mxu0 %v15025_v43  ;;  %v15068_v40 = vld [vmem:[%s20309_s1 + $0x1200] ss:$28 sps:$4 sm:$0xff]   ;;  %v15072_v43 = vld [vmem:[%s20309_s1 + $0x788] ss:$28 sps:$4 sm:$0xff]  }
 0x3b8   :  { %13103 = vmatpush3.bf16.msra.mxu1 %v15027_v47  ;;  %v15077_v47 = vld [vmem:[%s20309_s1 + $0x7c0] ss:$28 sps:$4 sm:$0xff]  }
 0x3b9   :  { %10129 = vmatpush1.bf16.msra.mxu0 %v15023_v45  ;;  %13104 = vmatprep.subr.bf16.mxu1 %v15031_v17  ;;  %v15073_v45 = vld [vmem:[%s20309_s1 + $0x1238] ss:$28 sps:$4 sm:$0xff]  }
 0x3ba   :  { %10130 = vmatprep.subr.bf16.mxu0 %v15030_v50  ;;  %v15080_v50 = vld [vmem:[%s20309_s1 + $0x1274] ss:$28 sps:$4 sm:$0xff]  }
 0x3bb   :  { %v15081_v17 = vld [vmem:[%s20309_s1 + $0x9b8] ss:$28 sps:$4 sm:$0xff]  }
 0x3bc   :  { %13105 = vmatpush3.bf16.msra.mxu1 %v15032_v54  ;;  %v15082_v54 = vld [vmem:[%s20309_s1 + $0x7f8] ss:$28 sps:$4 sm:$0xff]  }
 0x3bd   :  { %10131 = vmatpush1.bf16.msra.mxu0 %v15028_v51  ;;  %13106 = vmatprep.subr.bf16.mxu1 %v15036_v22  ;;  %v15078_v51 = vld [vmem:[%s20309_s1 + $0x1270] ss:$28 sps:$4 sm:$0xff]  }
 0x3be   :  { %10132 = vmatprep.subr.bf16.mxu0 %v15035_v55  ;;  %v15085_v55 = vld [vmem:[%s20309_s1 + $0x12ac] ss:$28 sps:$4 sm:$0xff]  }
 0x3bf   :  { %v15086_v22 = vld [vmem:[%s20309_s1 + $0x9f0] ss:$28 sps:$4 sm:$0xff]  }
 0x3c0   :  { %13107 = vmatpush3.bf16.msra.mxu1 %v15037_v0  ;;  %v15087_v0 = vld [vmem:[%s20309_s1 + $0x830] ss:$28 sps:$4 sm:$0xff]  }
 0x3c1   :  { %10133 = vmatpush1.bf16.msra.mxu0 %v15033_v56  ;;  %13108 = vmatprep.subr.bf16.mxu1 %v15041_v63  ;;  %v15083_v56 = vld [vmem:[%s20309_s1 + $0x12a8] ss:$28 sps:$4 sm:$0xff]  }
 0x3c2   :  { %10134 = vmatprep.subr.bf16.mxu0 %v15040_v61  ;;  %v15090_v61 = vld [vmem:[%s20309_s1 + $0x12e4] ss:$28 sps:$4 sm:$0xff]  }
 0x3c3   :  { %v15091_v63 = vld [vmem:[%s20309_s1 + $0xa28] ss:$28 sps:$4 sm:$0xff]  }
 0x3c4   :  { %13109 = vmatpush3.bf16.msra.mxu1 %v15042_v62  ;;  %v15092_v62 = vld [vmem:[%s20309_s1 + $0x868] ss:$28 sps:$4 sm:$0xff]  }
 0x3c5   :  { %10135 = vmatpush1.bf16.msra.mxu0 %v15038_v1  ;;  %13110 = vmatprep.subr.bf16.mxu1 %v15046_v6  ;;  %v15088_v1 = vld [vmem:[%s20309_s1 + $0x12e0] ss:$28 sps:$4 sm:$0xff]  }
 0x3c6   :  { %10136 = vmatprep.subr.bf16.mxu0 %v15045_v5  ;;  %v15095_v5 = vld [vmem:[%s20309_s1 + $0x131c] ss:$28 sps:$4 sm:$0xff]  }
 0x3c7   :  { %v15096_v6 = vld [vmem:[%s20309_s1 + $0xa60] ss:$28 sps:$4 sm:$0xff]  }
 0x3c8   :  { %13111 = vmatpush3.bf16.msra.mxu1 %v15047_v11  ;;  %v15097_v11 = vld [vmem:[%s20309_s1 + $0x8a0] ss:$28 sps:$4 sm:$0xff]  }
 0x3c9   :  { %10137 = vmatpush1.bf16.msra.mxu0 %v15043_v8  ;;  %13112 = vmatprep.subr.bf16.mxu1 %v15051_v49  ;;  %v15093_v8 = vld [vmem:[%s20309_s1 + $0x1318] ss:$28 sps:$4 sm:$0xff]  }
 0x3ca   :  { %10138 = vmatprep.subr.bf16.mxu0 %v15050_v12  ;;  %v15100_v12 = vld [vmem:[%s20309_s1 + $0x1354] ss:$28 sps:$4 sm:$0xff]  }
 0x3cb   :  { %v15101_v49 = vld [vmem:[%s20309_s1 + $0xc58] ss:$28 sps:$4 sm:$0xff]  }
 0x3cc   :  { %13113 = vmatpush3.bf16.msra.mxu1 %v15052_v14  ;;  %v15102_v14 = vld [vmem:[%s20309_s1 + $0xa98] ss:$28 sps:$4 sm:$0xff]  }
 0x3cd   :  { %10139 = vmatpush1.bf16.msra.mxu0 %v15048_v13  ;;  %13114 = vmatprep.subr.bf16.mxu1 %v15056_v19  ;;  %v15098_v13 = vld [vmem:[%s20309_s1 + $0x1350] ss:$28 sps:$4 sm:$0xff]  }
 0x3ce   :  { %10140 = vmatprep.subr.bf16.mxu0 %v15055_v16  ;;  %v15105_v16 = vld [vmem:[%s20309_s1 + $0x138c] ss:$28 sps:$4 sm:$0xff]  }
 0x3cf   :  { %v15106_v19 = vld [vmem:[%s20309_s1 + $0xc90] ss:$28 sps:$4 sm:$0xff]  }
 0x3d0   :  { %13115 = vmatpush3.bf16.msra.mxu1 %v15057_v21  ;;  %v15107_v21 = vld [vmem:[%s20309_s1 + $0xad0] ss:$28 sps:$4 sm:$0xff]  }
 0x3d1   :  { %10141 = vmatpush1.bf16.msra.mxu0 %v15053_v20  ;;  %13122 = vmatprep.subr.bf16.mxu1 %v15061_v25  ;;  %v15103_v20 = vld [vmem:[%s20309_s1 + $0x1388] ss:$28 sps:$4 sm:$0xff]   ;;  %v15108_v25 = vld [vmem:[%s20309_s1 + $0x13c0] ss:$28 sps:$4 sm:$0xff]  }
 0x3d2   :  { %10151 = vmatprep.subr.bf16.mxu0 %v15060_v24  ;;  %v15110_v24 = vld [vmem:[%s20309_s1 + $0x13c4] ss:$28 sps:$4 sm:$0xff]  }
 0x3d3   :  { %10552 = vmatmul.mubr.bf16.vlgmr.msra.gmra.mrb[12].mxu1 %v16120_v29  ;;  %v15071_v29 = vld [vmem:[%s20309_s1 + $0x948] ss:$28 sps:$4 sm:$0xff]  }
 0x3d4   :  { %10143 = vmatmul.mubr.bf16.vlgmr.msra.gmra.mrb[4].mxu0 %v16335_v48  ;;  %13123 = vmatpush3.bf16.msra.mxu1 %v15062_v28  ;;  %v15115_v28 = vld [vmem:[%s20309_s1 + $0x13fc] ss:$28 sps:$4 sm:$0xff]  }
 0x3d5   :  { %10152 = vmatpush1.bf16.msra.mxu0 %v15058_v27  ;;  %13124 = vmatprep.subr.bf16.mxu1 %v15066_v36  ;;  %v15112_v27 = vld [vmem:[%s20309_s1 + $0xb08] ss:$28 sps:$4 sm:$0xff]   ;;  %v15117_v36 = vld [vmem:[%s20309_s1 + $0xb40] ss:$28 sps:$4 sm:$0xff]  }
 0x3d6   :  { %10153 = vmatprep.subr.bf16.mxu0 %v15065_v60  ;;  %10591 = vmatprep.mubr.bf16.mxu1 %v15865_v3  ;;  %v15076_v3 = vld [vmem:[%s20309_s1 + $0x980] ss:$28 sps:$4 sm:$0xff]   ;;  %v15113_v60 = vld [vmem:[%s20309_s1 + $0x13f8] ss:$28 sps:$4 sm:$0xff]  }
 0x3d7   :  { %10183 = vmatprep.mubr.bf16.mxu0 %v16351_v53 }
 0x3d8   :  { %13125 = vmatpush3.bf16.msra.mxu1 %v15067_v59  ;;  %v15121_v59 = vld [vmem:[%s20309_s1 + $0xd38] ss:$28 sps:$4 sm:$0xff]  }
 0x3d9   :  { %10154 = vmatpush1.bf16.msra.mxu0 %v15063_v39  ;;  %13126 = vmatprep.subr.bf16.mxu1 %v15071_v29  ;;  %v15120_v39 = vld [vmem:[%s20309_s1 + $0x1434] ss:$28 sps:$4 sm:$0xff]  }
 0x3da   :  { %10155 = vmatprep.subr.bf16.mxu0 %v15070_v32  ;;  %v15118_v32 = vld [vmem:[%s20309_s1 + $0x1430] ss:$28 sps:$4 sm:$0xff]   ;;  %v15122_v29 = vld [vmem:[%s20309_s1 + $0xb78] ss:$28 sps:$4 sm:$0xff]  }
 0x3dc   :  { %13127 = vmatpush3.bf16.msra.mxu1 %v15072_v43  ;;  %v15126_v43 = vld [vmem:[%s20309_s1 + $0xd70] ss:$28 sps:$4 sm:$0xff]  }
 0x3dd   :  { %10156 = vmatpush1.bf16.msra.mxu0 %v15068_v40  ;;  %13128 = vmatprep.subr.bf16.mxu1 %v15076_v3  ;;  %v15125_v40 = vld [vmem:[%s20309_s1 + $0x146c] ss:$28 sps:$4 sm:$0xff]  }
 0x3de   :  { %10157 = vmatprep.subr.bf16.mxu0 %v15075_v44  ;;  %v15123_v44 = vld [vmem:[%s20309_s1 + $0x1468] ss:$28 sps:$4 sm:$0xff]   ;;  %v15127_v3 = vld [vmem:[%s20309_s1 + $0xbb0] ss:$28 sps:$4 sm:$0xff]  }
 0x3e0   :  { %13129 = vmatpush3.bf16.msra.mxu1 %v15077_v47  ;;  %v15131_v47 = vld [vmem:[%s20309_s1 + $0xda8] ss:$28 sps:$4 sm:$0xff]  }
 0x3e1   :  { %10158 = vmatpush1.bf16.msra.mxu0 %v15073_v45  ;;  %13130 = vmatprep.subr.bf16.mxu1 %v15081_v17  ;;  %v15130_v45 = vld [vmem:[%s20309_s1 + $0x14a4] ss:$28 sps:$4 sm:$0xff]  }
 0x3e2   :  { %10159 = vmatprep.subr.bf16.mxu0 %v15080_v50  ;;  %v15128_v50 = vld [vmem:[%s20309_s1 + $0x14a0] ss:$28 sps:$4 sm:$0xff]   ;;  %v15132_v17 = vld [vmem:[%s20309_s1 + $0xbe8] ss:$28 sps:$4 sm:$0xff]  }
 0x3e4   :  { %13131 = vmatpush3.bf16.msra.mxu1 %v15082_v54  ;;  %v15136_v54 = vld [vmem:[%s20309_s1 + $0xde0] ss:$28 sps:$4 sm:$0xff]  }
 0x3e5   :  { %10160 = vmatpush1.bf16.msra.mxu0 %v15078_v51  ;;  %13132 = vmatprep.subr.bf16.mxu1 %v15086_v22  ;;  %v15135_v51 = vld [vmem:[%s20309_s1 + $0x14dc] ss:$28 sps:$4 sm:$0xff]  }
 0x3e6   :  { %10161 = vmatprep.subr.bf16.mxu0 %v15085_v55  ;;  %v15133_v55 = vld [vmem:[%s20309_s1 + $0x14d8] ss:$28 sps:$4 sm:$0xff]   ;;  %v15137_v22 = vld [vmem:[%s20309_s1 + $0xc20] ss:$28 sps:$4 sm:$0xff]  }
 0x3e8   :  { %13133 = vmatpush3.bf16.msra.mxu1 %v15087_v0  ;;  %v15141_v0 = vld [vmem:[%s20309_s1 + $0xfd8] ss:$28 sps:$4 sm:$0xff]  }
 0x3e9   :  { %10162 = vmatpush1.bf16.msra.mxu0 %v15083_v56  ;;  %13134 = vmatprep.subr.bf16.mxu1 %v15091_v63  ;;  %v15140_v56 = vld [vmem:[%s20309_s1 + $0x1514] ss:$28 sps:$4 sm:$0xff]  }
 0x3ea   :  { %10163 = vmatprep.subr.bf16.mxu0 %v15090_v61  ;;  %v15138_v61 = vld [vmem:[%s20309_s1 + $0x1510] ss:$28 sps:$4 sm:$0xff]   ;;  %v15142_v63 = vld [vmem:[%s20309_s1 + $0xe18] ss:$28 sps:$4 sm:$0xff]  }
 0x3ec   :  { %13135 = vmatpush3.bf16.msra.mxu1 %v15092_v62  ;;  %v15146_v62 = vld [vmem:[%s20309_s1 + $0x1010] ss:$28 sps:$4 sm:$0xff]  }
 0x3ed   :  { %10164 = vmatpush1.bf16.msra.mxu0 %v15088_v1  ;;  %13136 = vmatprep.subr.bf16.mxu1 %v15096_v6  ;;  %v15145_v1 = vld [vmem:[%s20309_s1 + $0x154c] ss:$28 sps:$4 sm:$0xff]  }
 0x3ee   :  { %10165 = vmatprep.subr.bf16.mxu0 %v15095_v5  ;;  %v15143_v5 = vld [vmem:[%s20309_s1 + $0x1548] ss:$28 sps:$4 sm:$0xff]   ;;  %v15147_v6 = vld [vmem:[%s20309_s1 + $0xe50] ss:$28 sps:$4 sm:$0xff]  }
 0x3f0   :  { %13137 = vmatpush3.bf16.msra.mxu1 %v15097_v11  ;;  %v15148_v11 = vld [vmem:[%s20309_s1 + $0x1580] ss:$28 sps:$4 sm:$0xff]  }
 0x3f1   :  { %10166 = vmatpush1.bf16.msra.mxu0 %v15093_v8  ;;  %13144 = vmatprep.subr.bf16.mxu1 %v15101_v49  ;;  %v15150_v8 = vld [vmem:[%s20309_s1 + $0x1584] ss:$28 sps:$4 sm:$0xff]   ;;  %v15155_v49 = vld [vmem:[%s20309_s1 + $0x15bc] ss:$28 sps:$4 sm:$0xff]  }
 0x3f2   :  { %10167 = vmatprep.subr.bf16.mxu0 %v15100_v12  ;;  %v15152_v12 = vld [vmem:[%s20309_s1 + $0xe88] ss:$28 sps:$4 sm:$0xff]  }
 0x3f3   :  { %10592 = vmatmul.mubr.bf16.vlgmr.msra.gmra.mrb[16].mxu1 %v15912_v18  ;;  %v15111_v18 = vld [vmem:[%s20309_s1 + $0xcc8] ss:$28 sps:$4 sm:$0xff]  }
 0x3f4   :  { %13145 = vmatpush3.bf16.msra.mxu1 %v15102_v14  ;;  %10631 = vmatprep.mubr.bf16.mxu1 %v15929_v23  ;;  %v15116_v23 = vld [vmem:[%s20309_s1 + $0xd00] ss:$28 sps:$4 sm:$0xff]  }
 0x3f5   :  { %10168 = vmatpush1.bf16.msra.mxu0 %v15098_v13  ;;  %13146 = vmatprep.subr.bf16.mxu1 %v15106_v19  ;;  %v15153_v13 = vld [vmem:[%s20309_s1 + $0x15b8] ss:$28 sps:$4 sm:$0xff]   ;;  %v15157_v14 = vld [vmem:[%s20309_s1 + $0xec0] ss:$28 sps:$4 sm:$0xff]  }
 0x3f6   :  { %10169 = vmatprep.subr.bf16.mxu0 %v15105_v16  ;;  %v15160_v16 = vld [vmem:[%s20309_s1 + $0x15f4] ss:$28 sps:$4 sm:$0xff]  }
 0x3f7   :  { %v15161_v19 = vld [vmem:[%s20309_s1 + $0x10b8] ss:$28 sps:$4 sm:$0xff]  }
 0x3f8   :  { %13147 = vmatpush3.bf16.msra.mxu1 %v15107_v21  ;;  %v15162_v21 = vld [vmem:[%s20309_s1 + $0xef8] ss:$28 sps:$4 sm:$0xff]  }
 0x3f9   :  { %10170 = vmatpush1.bf16.msra.mxu0 %v15103_v20  ;;  %13148 = vmatprep.subr.bf16.mxu1 %v15111_v18  ;;  %v15158_v20 = vld [vmem:[%s20309_s1 + $0x15f0] ss:$28 sps:$4 sm:$0xff]  }
 0x3fa   :  { %10171 = vmatprep.subr.bf16.mxu0 %v15110_v24  ;;  %v15165_v24 = vld [vmem:[%s20309_s1 + $0x162c] ss:$28 sps:$4 sm:$0xff]  }
 0x3fb   :  { %v15166_v18 = vld [vmem:[%s20309_s1 + $0x10f0] ss:$28 sps:$4 sm:$0xff]  }
 0x3fc   :  { %13149 = vmatpush3.bf16.msra.mxu1 %v15112_v27  ;;  %v15167_v27 = vld [vmem:[%s20309_s1 + $0xf30] ss:$28 sps:$4 sm:$0xff]  }
 0x3fd   :  { %10172 = vmatpush1.bf16.msra.mxu0 %v15108_v25  ;;  %13150 = vmatprep.subr.bf16.mxu1 %v15116_v23  ;;  %v15163_v25 = vld [vmem:[%s20309_s1 + $0x1628] ss:$28 sps:$4 sm:$0xff]  }
 0x3fe   :  { %10173 = vmatprep.subr.bf16.mxu0 %v15115_v28  ;;  %v15170_v28 = vld [vmem:[%s20309_s1 + $0x1664] ss:$28 sps:$4 sm:$0xff]  }
 0x3ff   :  { %v15171_v23 = vld [vmem:[%s20309_s1 + $0x1128] ss:$28 sps:$4 sm:$0xff]  }
 0x400   :  { %13151 = vmatpush3.bf16.msra.mxu1 %v15117_v36  ;;  %v15172_v36 = vld [vmem:[%s20309_s1 + $0xf68] ss:$28 sps:$4 sm:$0xff]  }
 0x401   :  { %10174 = vmatpush1.bf16.msra.mxu0 %v15113_v60  ;;  %13152 = vmatprep.subr.bf16.mxu1 %v15121_v59  ;;  %v15168_v60 = vld [vmem:[%s20309_s1 + $0x1660] ss:$28 sps:$4 sm:$0xff]  }
 0x402   :  { %10175 = vmatprep.subr.bf16.mxu0 %v15120_v39  ;;  %v15175_v39 = vld [vmem:[%s20309_s1 + $0x169c] ss:$28 sps:$4 sm:$0xff]  }
 0x403   :  { %v15176_v59 = vld [vmem:[%s20309_s1 + $0x1160] ss:$28 sps:$4 sm:$0xff]  }
 0x404   :  { %13153 = vmatpush3.bf16.msra.mxu1 %v15122_v29  ;;  %v15177_v29 = vld [vmem:[%s20309_s1 + $0xfa0] ss:$28 sps:$4 sm:$0xff]  }
 0x405   :  { %10176 = vmatpush1.bf16.msra.mxu0 %v15118_v32  ;;  %13154 = vmatprep.subr.bf16.mxu1 %v15126_v43  ;;  %v15173_v32 = vld [vmem:[%s20309_s1 + $0x1698] ss:$28 sps:$4 sm:$0xff]  }
 0x406   :  { %10177 = vmatprep.subr.bf16.mxu0 %v15125_v40  ;;  %v15180_v40 = vld [vmem:[%s20309_s1 + $0x16d4] ss:$28 sps:$4 sm:$0xff]  }
 0x407   :  { %v15181_v43 = vld [vmem:[%s20309_s1 + $0x1358] ss:$28 sps:$4 sm:$0xff]  }
 0x408   :  { %13155 = vmatpush3.bf16.msra.mxu1 %v15127_v3  ;;  %v15182_v3 = vld [vmem:[%s20309_s1 + $0x1198] ss:$28 sps:$4 sm:$0xff]  }
 0x409   :  { %10178 = vmatpush1.bf16.msra.mxu0 %v15123_v44  ;;  %13156 = vmatprep.subr.bf16.mxu1 %v15131_v47  ;;  %v15178_v44 = vld [vmem:[%s20309_s1 + $0x16d0] ss:$28 sps:$4 sm:$0xff]  }
 0x40a   :  { %10179 = vmatprep.subr.bf16.mxu0 %v15130_v45  ;;  %v15185_v45 = vld [vmem:[%s20309_s1 + $0x170c] ss:$28 sps:$4 sm:$0xff]  }
 0x40b   :  { %v15186_v47 = vld [vmem:[%s20309_s1 + $0x1390] ss:$28 sps:$4 sm:$0xff]  }
 0x40c   :  { %13157 = vmatpush3.bf16.msra.mxu1 %v15132_v17  ;;  %v15187_v17 = vld [vmem:[%s20309_s1 + $0x11d0] ss:$28 sps:$4 sm:$0xff]  }
 0x40d   :  { %10180 = vmatpush1.bf16.msra.mxu0 %v15128_v50  ;;  %13158 = vmatprep.subr.bf16.mxu1 %v15136_v54  ;;  %v15183_v50 = vld [vmem:[%s20309_s1 + $0x1708] ss:$28 sps:$4 sm:$0xff]   ;;  %v15188_v54 = vld [vmem:[%s20309_s1 + $0x1740] ss:$28 sps:$4 sm:$0xff]  }
 0x40e   :  { %10181 = vmatprep.subr.bf16.mxu0 %v15135_v51  ;;  %v15190_v51 = vld [vmem:[%s20309_s1 + $0x1744] ss:$28 sps:$4 sm:$0xff]  }
 0x410   :  { %13159 = vmatpush3.bf16.msra.mxu1 %v15137_v22  ;;  %v15195_v22 = vld [vmem:[%s20309_s1 + $0x177c] ss:$28 sps:$4 sm:$0xff]  }
 0x411   :  { %10182 = vmatpush1.bf16.msra.mxu0 %v15133_v55  ;;  %13166 = vmatprep.subr.bf16.mxu1 %v15141_v0  ;;  %v15192_v55 = vld [vmem:[%s20309_s1 + $0x1208] ss:$28 sps:$4 sm:$0xff]   ;;  %v15197_v0 = vld [vmem:[%s20309_s1 + $0x1240] ss:$28 sps:$4 sm:$0xff]  }
 0x412   :  { %10192 = vmatprep.subr.bf16.mxu0 %v15140_v56  ;;  %v15193_v56 = vld [vmem:[%s20309_s1 + $0x1778] ss:$28 sps:$4 sm:$0xff]  }
 0x413   :  { %10632 = vmatmul.mubr.bf16.vlgmr.msra.gmra.mrb[20].mxu1 %v16124_v30  ;;  %v15151_v30 = vld [vmem:[%s20309_s1 + $0x1048] ss:$28 sps:$4 sm:$0xff]  }
 0x414   :  { %10184 = vmatmul.mubr.bf16.vlgmr.msra.gmra.mrb[4].mxu0 %v16546_v4  ;;  %13167 = vmatpush3.bf16.msra.mxu1 %v15142_v63  ;;  %v15201_v63 = vld [vmem:[%s20309_s1 + $0x1438] ss:$28 sps:$4 sm:$0xff]  }
 0x415   :  { %10193 = vmatpush1.bf16.msra.mxu0 %v15138_v61  ;;  %13168 = vmatprep.subr.bf16.mxu1 %v15146_v62  ;;  %v15200_v61 = vld [vmem:[%s20309_s1 + $0x17b4] ss:$28 sps:$4 sm:$0xff]  }
 0x416   :  { %10194 = vmatprep.subr.bf16.mxu0 %v15145_v1  ;;  %10671 = vmatprep.mubr.bf16.mxu1 %v16161_v41  ;;  %v15156_v41 = vld [vmem:[%s20309_s1 + $0x1080] ss:$28 sps:$4 sm:$0xff]   ;;  %v15198_v1 = vld [vmem:[%s20309_s1 + $0x17b0] ss:$28 sps:$4 sm:$0xff]   ;;  %v15202_v62 = vld [vmem:[%s20309_s1 + $0x1278] ss:$28 sps:$4 sm:$0xff]  }
 0x417   :  { %10224 = vmatprep.mubr.bf16.mxu0 %v16561_v9 }
 0x418   :  { %13169 = vmatpush3.bf16.msra.mxu1 %v15147_v6  ;;  %v15206_v6 = vld [vmem:[%s20309_s1 + $0x1470] ss:$28 sps:$4 sm:$0xff]  }
 0x419   :  { %10195 = vmatpush1.bf16.msra.mxu0 %v15143_v5  ;;  %13170 = vmatprep.subr.bf16.mxu1 %v15151_v30  ;;  %v15205_v5 = vld [vmem:[%s20309_s1 + $0x17ec] ss:$28 sps:$4 sm:$0xff]  }
 0x41a   :  { %10196 = vmatprep.subr.bf16.mxu0 %v15150_v8  ;;  %v15203_v8 = vld [vmem:[%s20309_s1 + $0x17e8] ss:$28 sps:$4 sm:$0xff]   ;;  %v15207_v30 = vld [vmem:[%s20309_s1 + $0x12b0] ss:$28 sps:$4 sm:$0xff]  }
 0x41c   :  { %13171 = vmatpush3.bf16.msra.mxu1 %v15152_v12  ;;  %v15211_v12 = vld [vmem:[%s20309_s1 + $0x14a8] ss:$28 sps:$4 sm:$0xff]  }
 0x41d   :  { %10197 = vmatpush1.bf16.msra.mxu0 %v15148_v11  ;;  %13172 = vmatprep.subr.bf16.mxu1 %v15156_v41  ;;  %v15210_v11 = vld [vmem:[%s20309_s1 + $0x1824] ss:$28 sps:$4 sm:$0xff]  }
 0x41e   :  { %10198 = vmatprep.subr.bf16.mxu0 %v15155_v49  ;;  %v15208_v49 = vld [vmem:[%s20309_s1 + $0x1820] ss:$28 sps:$4 sm:$0xff]   ;;  %v15212_v41 = vld [vmem:[%s20309_s1 + $0x12e8] ss:$28 sps:$4 sm:$0xff]  }
 0x420   :  { %13173 = vmatpush3.bf16.msra.mxu1 %v15157_v14  ;;  %v15216_v14 = vld [vmem:[%s20309_s1 + $0x14e0] ss:$28 sps:$4 sm:$0xff]  }
 0x421   :  { %10199 = vmatpush1.bf16.msra.mxu0 %v15153_v13  ;;  %13174 = vmatprep.subr.bf16.mxu1 %v15161_v19  ;;  %v15215_v13 = vld [vmem:[%s20309_s1 + $0x185c] ss:$28 sps:$4 sm:$0xff]  }
 0x422   :  { %10200 = vmatprep.subr.bf16.mxu0 %v15160_v16  ;;  %v15213_v16 = vld [vmem:[%s20309_s1 + $0x1858] ss:$28 sps:$4 sm:$0xff]   ;;  %v15217_v19 = vld [vmem:[%s20309_s1 + $0x1320] ss:$28 sps:$4 sm:$0xff]  }
 0x424   :  { %13175 = vmatpush3.bf16.msra.mxu1 %v15162_v21  ;;  %v15221_v21 = vld [vmem:[%s20309_s1 + $0x16d8] ss:$28 sps:$4 sm:$0xff]  }
 0x425   :  { %10201 = vmatpush1.bf16.msra.mxu0 %v15158_v20  ;;  %13176 = vmatprep.subr.bf16.mxu1 %v15166_v18  ;;  %v15220_v20 = vld [vmem:[%s20309_s1 + $0x1894] ss:$28 sps:$4 sm:$0xff]  }
 0x426   :  { %10202 = vmatprep.subr.bf16.mxu0 %v15165_v24  ;;  %v15218_v24 = vld [vmem:[%s20309_s1 + $0x1890] ss:$28 sps:$4 sm:$0xff]   ;;  %v15222_v18 = vld [vmem:[%s20309_s1 + $0x1518] ss:$28 sps:$4 sm:$0xff]  }
 0x428   :  { %13177 = vmatpush3.bf16.msra.mxu1 %v15167_v27  ;;  %v15226_v27 = vld [vmem:[%s20309_s1 + $0x1710] ss:$28 sps:$4 sm:$0xff]  }
 0x429   :  { %10203 = vmatpush1.bf16.msra.mxu0 %v15163_v25  ;;  %13178 = vmatprep.subr.bf16.mxu1 %v15171_v23  ;;  %v15225_v25 = vld [vmem:[%s20309_s1 + $0x18cc] ss:$28 sps:$4 sm:$0xff]  }
 0x42a   :  { %10204 = vmatprep.subr.bf16.mxu0 %v15170_v28  ;;  %v15223_v28 = vld [vmem:[%s20309_s1 + $0x18c8] ss:$28 sps:$4 sm:$0xff]   ;;  %v15227_v23 = vld [vmem:[%s20309_s1 + $0x1550] ss:$28 sps:$4 sm:$0xff]  }
 0x42c   :  { %13179 = vmatpush3.bf16.msra.mxu1 %v15172_v36  ;;  %v15228_v36 = vld [vmem:[%s20309_s1 + $0x1900] ss:$28 sps:$4 sm:$0xff]  }
 0x42d   :  { %10205 = vmatpush1.bf16.msra.mxu0 %v15168_v60  ;;  %13180 = vmatprep.subr.bf16.mxu1 %v15176_v59  ;;  %v15230_v60 = vld [vmem:[%s20309_s1 + $0x1904] ss:$28 sps:$4 sm:$0xff]   ;;  %v15235_v59 = vld [vmem:[%s20309_s1 + $0x193c] ss:$28 sps:$4 sm:$0xff]  }
 0x42e   :  { %10206 = vmatprep.subr.bf16.mxu0 %v15175_v39  ;;  %v15232_v39 = vld [vmem:[%s20309_s1 + $0x1588] ss:$28 sps:$4 sm:$0xff]  }
 0x430   :  { %13181 = vmatpush3.bf16.msra.mxu1 %v15177_v29  ;;  %v15237_v29 = vld [vmem:[%s20309_s1 + $0x15c0] ss:$28 sps:$4 sm:$0xff]  }
 0x431   :  { %10207 = vmatpush1.bf16.msra.mxu0 %v15173_v32  ;;  %13188 = vmatprep.subr.bf16.mxu1 %v15181_v43  ;;  %v15233_v32 = vld [vmem:[%s20309_s1 + $0x1938] ss:$28 sps:$4 sm:$0xff]  }
 0x432   :  { %10208 = vmatprep.subr.bf16.mxu0 %v15180_v40  ;;  %v15240_v40 = vld [vmem:[%s20309_s1 + $0x1974] ss:$28 sps:$4 sm:$0xff]  }
 0x433   :  { %10672 = vmatmul.mubr.bf16.vlgmr.msra.gmra.mrb[24].mxu1 %v16335_v48  ;;  %v15191_v48 = vld [vmem:[%s20309_s1 + $0x13c8] ss:$28 sps:$4 sm:$0xff]   ;;  %v15241_v43 = vld [vmem:[%s20309_s1 + $0x17b8] ss:$28 sps:$4 sm:$0xff]  }
 0x434   :  { %13189 = vmatpush3.bf16.msra.mxu1 %v15182_v3  ;;  %10711 = vmatprep.mubr.bf16.mxu1 %v16351_v53  ;;  %v15196_v53 = vld [vmem:[%s20309_s1 + $0x1400] ss:$28 sps:$4 sm:$0xff]   ;;  %v15242_v3 = vld [vmem:[%s20309_s1 + $0x15f8] ss:$28 sps:$4 sm:$0xff]  }
 0x435   :  { %10209 = vmatpush1.bf16.msra.mxu0 %v15178_v44  ;;  %13190 = vmatprep.subr.bf16.mxu1 %v15186_v47  ;;  %v15238_v44 = vld [vmem:[%s20309_s1 + $0x1970] ss:$28 sps:$4 sm:$0xff]  }
 0x436   :  { %10210 = vmatprep.subr.bf16.mxu0 %v15185_v45  ;;  %v15245_v45 = vld [vmem:[%s20309_s1 + $0x19ac] ss:$28 sps:$4 sm:$0xff]  }
 0x437   :  { %v15246_v47 = vld [vmem:[%s20309_s1 + $0x17f0] ss:$28 sps:$4 sm:$0xff]  }
 0x438   :  { %13191 = vmatpush3.bf16.msra.mxu1 %v15187_v17  ;;  %v15247_v17 = vld [vmem:[%s20309_s1 + $0x1630] ss:$28 sps:$4 sm:$0xff]  }
 0x439   :  { %10211 = vmatpush1.bf16.msra.mxu0 %v15183_v50  ;;  %13192 = vmatprep.subr.bf16.mxu1 %v15191_v48  ;;  %v15243_v50 = vld [vmem:[%s20309_s1 + $0x19a8] ss:$28 sps:$4 sm:$0xff]  }
 0x43a   :  { %10212 = vmatprep.subr.bf16.mxu0 %v15190_v51  ;;  %v15250_v51 = vld [vmem:[%s20309_s1 + $0x19e4] ss:$28 sps:$4 sm:$0xff]  }
 0x43b   :  { %v15251_v48 = vld [vmem:[%s20309_s1 + $0x1828] ss:$28 sps:$4 sm:$0xff]  }
 0x43c   :  { %13193 = vmatpush3.bf16.msra.mxu1 %v15192_v55 }
 0x43d   :  { %10213 = vmatpush1.bf16.msra.mxu0 %v15188_v54  ;;  %13194 = vmatprep.subr.bf16.mxu1 %v15196_v53  ;;  %v15248_v53 = vld [vmem:[%s20309_s1 + $0x19e0] ss:$28 sps:$4 sm:$0xff]  }
 0x43e   :  { %10214 = vmatprep.subr.bf16.mxu0 %v15195_v22 }
 0x440   :  { %13195 = vmatpush3.bf16.msra.mxu1 %v15197_v0 }
 0x441   :  { %10215 = vmatpush1.bf16.msra.mxu0 %v15193_v56  ;;  %13196 = vmatprep.subr.bf16.mxu1 %v15201_v63  ;;  %v15252_v56 = vld [vmem:[%s20309_s1 + $0x1668] ss:$28 sps:$4 sm:$0xff]   ;;  %v15256_v63 = vld [vmem:[%s20309_s1 + $0x1860] ss:$28 sps:$4 sm:$0xff]  }
 0x442   :  { %10216 = vmatprep.subr.bf16.mxu0 %v15200_v61  ;;  %v15255_v61 = vld [vmem:[%s20309_s1 + $0x1a1c] ss:$28 sps:$4 sm:$0xff]  }
 0x444   :  { %13197 = vmatpush3.bf16.msra.mxu1 %v15202_v62  ;;  %v15257_v62 = vld [vmem:[%s20309_s1 + $0x16a0] ss:$28 sps:$4 sm:$0xff]  }
 0x445   :  { %10217 = vmatpush1.bf16.msra.mxu0 %v15198_v1  ;;  %13198 = vmatprep.subr.bf16.mxu1 %v15206_v6  ;;  %v15253_v1 = vld [vmem:[%s20309_s1 + $0x1a18] ss:$28 sps:$4 sm:$0xff]  }
 0x446   :  { %10218 = vmatprep.subr.bf16.mxu0 %v15205_v5  ;;  %v15260_v5 = vld [vmem:[%s20309_s1 + $0x1a54] ss:$28 sps:$4 sm:$0xff]  }
 0x447   :  { %v15261_v6 = vld [vmem:[%s20309_s1 + $0x1a58] ss:$28 sps:$4 sm:$0xff]  }
 0x448   :  { %13199 = vmatpush3.bf16.msra.mxu1 %v15207_v30  ;;  %v15262_v30 = vld [vmem:[%s20309_s1 + $0x1898] ss:$28 sps:$4 sm:$0xff]  }
 0x449   :  { %10219 = vmatpush1.bf16.msra.mxu0 %v15203_v8  ;;  %13200 = vmatprep.subr.bf16.mxu1 %v15211_v12  ;;  %v15258_v8 = vld [vmem:[%s20309_s1 + $0x1a50] ss:$28 sps:$4 sm:$0xff]  }
 0x44a   :  { %10220 = vmatprep.subr.bf16.mxu0 %v15210_v11  ;;  %v15265_v11 = vld [vmem:[%s20309_s1 + $0x1a8c] ss:$28 sps:$4 sm:$0xff]  }
 0x44b   :  { %v15266_v12 = vld [vmem:[%s20309_s1 + $0x1a90] ss:$28 sps:$4 sm:$0xff]  }
 0x44c   :  { %13201 = vmatpush3.bf16.msra.mxu1 %v15212_v41  ;;  %v15267_v41 = vld [vmem:[%s20309_s1 + $0x18d0] ss:$28 sps:$4 sm:$0xff]  }
 0x44d   :  { %10221 = vmatpush1.bf16.msra.mxu0 %v15208_v49  ;;  %13202 = vmatprep.subr.bf16.mxu1 %v15216_v14  ;;  %v15263_v49 = vld [vmem:[%s20309_s1 + $0x1a88] ss:$28 sps:$4 sm:$0xff]   ;;  %v15268_v14 = vld [vmem:[%s20309_s1 + $0x1ac0] ss:$28 sps:$4 sm:$0xff]  }
 0x44e   :  { %10222 = vmatprep.subr.bf16.mxu0 %v15215_v13  ;;  %v15270_v13 = vld [vmem:[%s20309_s1 + $0x1ac4] ss:$28 sps:$4 sm:$0xff]  }
 0x450   :  { %13203 = vmatpush3.bf16.msra.mxu1 %v15217_v19  ;;  %v15275_v19 = vld [vmem:[%s20309_s1 + $0x1afc] ss:$28 sps:$4 sm:$0xff]  }
 0x451   :  { %10223 = vmatpush1.bf16.msra.mxu0 %v15213_v16  ;;  %13210 = vmatprep.subr.bf16.mxu1 %v15221_v21  ;;  %v15272_v16 = vld [vmem:[%s20309_s1 + $0x1908] ss:$28 sps:$4 sm:$0xff]   ;;  %v15277_v21 = vld [vmem:[%s20309_s1 + $0x1940] ss:$28 sps:$4 sm:$0xff]  }
 0x452   :  { %10233 = vmatprep.subr.bf16.mxu0 %v15220_v20  ;;  %v15273_v20 = vld [vmem:[%s20309_s1 + $0x1af8] ss:$28 sps:$4 sm:$0xff]  }
 0x453   :  { %10712 = vmatmul.mubr.bf16.vlgmr.msra.gmra.mrb[28].mxu1 %v16546_v4  ;;  %v15231_v4 = vld [vmem:[%s20309_s1 + $0x1748] ss:$28 sps:$4 sm:$0xff]  }
 0x454   :  { %10225 = vmatmul.mubr.bf16.vlgmr.msra.gmra.mrb[4].mxu0 %v16749_v26  ;;  %13211 = vmatpush3.bf16.msra.mxu1 %v15222_v18  ;;  %v15281_v18 = vld [vmem:[%s20309_s1 + $0x1b38] ss:$28 sps:$4 sm:$0xff]  }
 0x455   :  { %10234 = vmatpush1.bf16.msra.mxu0 %v15218_v24  ;;  %13212 = vmatprep.subr.bf16.mxu1 %v15226_v27  ;;  %v15280_v24 = vld [vmem:[%s20309_s1 + $0x1b34] ss:$28 sps:$4 sm:$0xff]  }
 0x456   :  { %10235 = vmatprep.subr.bf16.mxu0 %v15225_v25  ;;  %10751 = vmatprep.mubr.bf16.mxu1 %v16561_v9  ;;  %v15236_v9 = vld [vmem:[%s20309_s1 + $0x1780] ss:$28 sps:$4 sm:$0xff]   ;;  %v15278_v25 = vld [vmem:[%s20309_s1 + $0x1b30] ss:$28 sps:$4 sm:$0xff]   ;;  %v15282_v27 = vld [vmem:[%s20309_s1 + $0x1978] ss:$28 sps:$4 sm:$0xff]  }
 0x457   :  { %10265 = vmatprep.mubr.bf16.mxu0 %v16765_v33 }
 0x458   :  { %13213 = vmatpush3.bf16.msra.mxu1 %v15227_v23  ;;  %v15286_v23 = vld [vmem:[%s20309_s1 + $0x1b70] ss:$28 sps:$4 sm:$0xff]  }
 0x459   :  { %10236 = vmatpush1.bf16.msra.mxu0 %v15223_v28  ;;  %13214 = vmatprep.subr.bf16.mxu1 %v15231_v4  ;;  %v15285_v28 = vld [vmem:[%s20309_s1 + $0x1b6c] ss:$28 sps:$4 sm:$0xff]  }
 0x45a   :  { %10237 = vmatprep.subr.bf16.mxu0 %v15230_v60  ;;  %v15283_v60 = vld [vmem:[%s20309_s1 + $0x1b68] ss:$28 sps:$4 sm:$0xff]   ;;  %v15287_v4 = vld [vmem:[%s20309_s1 + $0x19b0] ss:$28 sps:$4 sm:$0xff]  }
 0x45c   :  { %13215 = vmatpush3.bf16.msra.mxu1 %v15232_v39  ;;  %v15291_v39 = vld [vmem:[%s20309_s1 + $0x1ba8] ss:$28 sps:$4 sm:$0xff]  }
 0x45d   :  { %10238 = vmatpush1.bf16.msra.mxu0 %v15228_v36  ;;  %13216 = vmatprep.subr.bf16.mxu1 %v15236_v9  ;;  %v15290_v36 = vld [vmem:[%s20309_s1 + $0x1ba4] ss:$28 sps:$4 sm:$0xff]  }
 0x45e   :  { %10239 = vmatprep.subr.bf16.mxu0 %v15235_v59  ;;  %v15288_v59 = vld [vmem:[%s20309_s1 + $0x1ba0] ss:$28 sps:$4 sm:$0xff]   ;;  %v15292_v9 = vld [vmem:[%s20309_s1 + $0x19e8] ss:$28 sps:$4 sm:$0xff]  }
 0x460   :  { %13217 = vmatpush3.bf16.msra.mxu1 %v15237_v29  ;;  %v15296_v29 = vld [vmem:[%s20309_s1 + $0x1be0] ss:$28 sps:$4 sm:$0xff]  }
 0x461   :  { %10240 = vmatpush1.bf16.msra.mxu0 %v15233_v32  ;;  %13218 = vmatprep.subr.bf16.mxu1 %v15241_v43  ;;  %v15295_v32 = vld [vmem:[%s20309_s1 + $0x1bdc] ss:$28 sps:$4 sm:$0xff]  }
 0x462   :  { %10241 = vmatprep.subr.bf16.mxu0 %v15240_v40  ;;  %v15293_v40 = vld [vmem:[%s20309_s1 + $0x1bd8] ss:$28 sps:$4 sm:$0xff]   ;;  %v15297_v43 = vld [vmem:[%s20309_s1 + $0x1a20] ss:$28 sps:$4 sm:$0xff]  }
 0x464   :  { %13219 = vmatpush3.bf16.msra.mxu1 %v15242_v3  ;;  %v15301_v3 = vld [vmem:[%s20309_s1 + $0x1dd8] ss:$28 sps:$4 sm:$0xff]  }
 0x465   :  { %10242 = vmatpush1.bf16.msra.mxu0 %v15238_v44  ;;  %13220 = vmatprep.subr.bf16.mxu1 %v15246_v47  ;;  %v15300_v44 = vld [vmem:[%s20309_s1 + $0x1c14] ss:$28 sps:$4 sm:$0xff]  }
 0x466   :  { %10243 = vmatprep.subr.bf16.mxu0 %v15245_v45  ;;  %v19313_v54 = vpop.f32.mrb[4].mxu1  ;;  %v15298_v45 = vld [vmem:[%s20309_s1 + $0x1c10] ss:$28 sps:$4 sm:$0xff]   ;;  %v15302_v47 = vld [vmem:[%s20309_s1 + $0x1c18] ss:$28 sps:$4 sm:$0xff]  }
 0x467   :  { %v19315_v55 = vpop.f32.mrb[5].mxu1 }
 0x468   :  { %v9943_v22 = vpop.f32.mrb[6].mxu1  ;;  %13221 = vmatpush3.bf16.msra.mxu1 %v15247_v17  ;;  %v15306_v17 = vld [vmem:[%s20309_s1 + $0x1e10] ss:$28 sps:$4 sm:$0xff]  }
 0x469   :  { %10244 = vmatpush1.bf16.msra.mxu0 %v15243_v50  ;;  %v9944_v0 = vpop.f32.mrb[7].mxu1  ;;  %13222 = vmatprep.subr.bf16.mxu1 %v15251_v48  ;;  %v15305_v50 = vld [vmem:[%s20309_s1 + $0x1c4c] ss:$28 sps:$4 sm:$0xff]   ;;  %v15310_v22 = vld [vmem:[%s20309_s1 + $0x1c84] ss:$28 sps:$4 sm:$0xff]  }
 0x46a   :  { %10245 = vmatprep.subr.bf16.mxu0 %v15250_v51  ;;  %v15303_v51 = vld [vmem:[%s20309_s1 + $0x1c48] ss:$28 sps:$4 sm:$0xff]   ;;  %v15307_v48 = vld [vmem:[%s20309_s1 + $0x1c50] ss:$28 sps:$4 sm:$0xff]   ;;  %v15315_v0 = vld [vmem:[%s20309_s1 + $0x1cbc] ss:$28 sps:$4 sm:$0xff]  }
 0x46c   :  { %13223 = vmatpush3.bf16.msra.mxu1 %v15252_v56  ;;  %v15312_v56 = vld [vmem:[%s20309_s1 + $0x1c88] ss:$28 sps:$4 sm:$0xff]  }
 0x46d   :  { %10246 = vmatpush1.bf16.msra.mxu0 %v15248_v53  ;;  %13224 = vmatprep.subr.bf16.mxu1 %v15256_v63  ;;  %v15308_v53 = vld [vmem:[%s20309_s1 + $0x1c80] ss:$28 sps:$4 sm:$0xff]  }
 0x46e   :  { %10247 = vmatprep.subr.bf16.mxu0 %v15255_v61  ;;  %v15313_v61 = vld [vmem:[%s20309_s1 + $0x1cb8] ss:$28 sps:$4 sm:$0xff]   ;;  %v15317_v63 = vld [vmem:[%s20309_s1 + $0x1cc0] ss:$28 sps:$4 sm:$0xff]  }
 0x470   :  { %13225 = vmatpush3.bf16.msra.mxu1 %v15257_v62  ;;  %v15320_v62 = vld [vmem:[%s20309_s1 + $0x1cf4] ss:$28 sps:$4 sm:$0xff]  }
 0x471   :  { %10248 = vmatpush1.bf16.msra.mxu0 %v15253_v1  ;;  %13232 = vmatprep.subr.bf16.mxu1 %v15261_v6 }
 0x472   :  { %10249 = vmatprep.subr.bf16.mxu0 %v15260_v5  ;;  %v15321_v5 = vld [vmem:[%s20309_s1 + $0x1eb8] ss:$28 sps:$4 sm:$0xff]  }
 0x473   :  { %10752 = vmatmul.mubr.bf16.vlgmr.msra.gmra.mrb[32].mxu1 %v16749_v26  ;;  %v15271_v26 = vld [vmem:[%s20309_s1 + $0x1ac8] ss:$28 sps:$4 sm:$0xff]  }
 0x474   :  { %13233 = vmatpush3.bf16.msra.mxu1 %v15262_v30  ;;  %10791 = vmatprep.mubr.bf16.mxu1 %v16765_v33  ;;  %v15276_v33 = vld [vmem:[%s20309_s1 + $0x1b00] ss:$28 sps:$4 sm:$0xff]  }
 0x475   :  { %10250 = vmatpush1.bf16.msra.mxu0 %v15258_v8  ;;  %13234 = vmatprep.subr.bf16.mxu1 %v15266_v12  ;;  %v1622_v8 = vsub.s32 6, %v15806_v42 }
 0x476   :  { %10251 = vmatprep.subr.bf16.mxu0 %v15265_v11 }
 0x478   :  { %13235 = vmatpush3.bf16.msra.mxu1 %v15267_v41  ;;  %v15322_v41 = vld [vmem:[%s20309_s1 + $0x1cf8] ss:$28 sps:$4 sm:$0xff]  }
 0x479   :  { %10252 = vmatpush1.bf16.msra.mxu0 %v15263_v49  ;;  %13236 = vmatprep.subr.bf16.mxu1 %v15271_v26  ;;  %v15318_v49 = vld [vmem:[%s20309_s1 + $0x1cf0] ss:$28 sps:$4 sm:$0xff]  }
 0x47a   :  { %10253 = vmatprep.subr.bf16.mxu0 %v15270_v13  ;;  %v15325_v13 = vld [vmem:[%s20309_s1 + $0x1d2c] ss:$28 sps:$4 sm:$0xff]  }
 0x47b   :  { %v15326_v26 = vld [vmem:[%s20309_s1 + $0x1ef0] ss:$28 sps:$4 sm:$0xff]  }
 0x47c   :  { %13237 = vmatpush3.bf16.msra.mxu1 %v15272_v16 }
 0x47d   :  { %10254 = vmatpush1.bf16.msra.mxu0 %v15268_v14  ;;  %13238 = vmatprep.subr.bf16.mxu1 %v15276_v33  ;;  %v19507_v14 = vld [vmem:[%s20310_s2] sm:$0xff]  ;;  %v15327_v33 = vld [vmem:[%s20309_s1 + $0x1d30] ss:$28 sps:$4 sm:$0xff]  }
 0x47e   :  { %10255 = vmatprep.subr.bf16.mxu0 %v15275_v19  ;;  %v1623_v16 = vrot.slane %v19507_v14, %v1622_v8  ;;  %v15323_v19 = vld [vmem:[%s20309_s1 + $0x1d28] ss:$28 sps:$4 sm:$0xff]   ;;  %v15367_v8 = vld [vmem:[%s20309_s1 + $0x20b0] ss:$28 sps:$4 sm:$0xff]  }
 0x480   :  { %13239 = vmatpush3.bf16.msra.mxu1 %v15277_v21  ;;  %v15331_v21 = vld [vmem:[%s20309_s1 + $0x1f28] ss:$28 sps:$4 sm:$0xff]  }
 0x481   :  { %10256 = vmatpush1.bf16.msra.mxu0 %v15273_v20  ;;  %13240 = vmatprep.subr.bf16.mxu1 %v15281_v18  ;;  %v15330_v20 = vld [vmem:[%s20309_s1 + $0x1d64] ss:$28 sps:$4 sm:$0xff]  }
 0x482   :  { %10257 = vmatprep.subr.bf16.mxu0 %v15280_v24 }
 0x484   :  { %13241 = vmatpush3.bf16.msra.mxu1 %v15282_v27  ;;  %v15328_v27 = vld [vmem:[%s20309_s1 + $0x1d60] ss:$28 sps:$4 sm:$0xff]  }
 0x485   :  { %10258 = vmatpush1.bf16.msra.mxu0 %v15278_v25  ;;  %13242 = vmatprep.subr.bf16.mxu1 %v15286_v23 }
 0x486   :  { %10259 = vmatprep.subr.bf16.mxu0 %v15285_v28  ;;  %v13094_v1 = vpop.f32.mrb[8].mxu1  ;;  %v15332_v28 = vld [vmem:[%s20309_s1 + $0x1d68] ss:$28 sps:$4 sm:$0xff]  }
 0x487   :  { %v13095_v6 = vpop.f32.mrb[9].mxu1 }
 0x488   :  { %13243 = vmatpush3.bf16.msra.mxu1 %v15287_v4  ;;  %v13096_v30 = vadd.f32 %v13095_v6, %v13094_v1  ;;  %v13097_v11 = vpop.f32.mrb[10].mxu1  ;;  %v15335_v4 = vld [vmem:[%s20309_s1 + $0x1d9c] ss:$28 sps:$4 sm:$0xff]   ;;  %v15363_v6 = vld [vmem:[%s20309_s1 + $0x1ee8] ss:$28 sps:$4 sm:$0xff]  }
 0x489   :  { %10260 = vmatpush1.bf16.msra.mxu0 %v15283_v60  ;;  %13244 = vmatprep.subr.bf16.mxu1 %v15291_v39  ;;  %v13098_v12 = vpop.f32.mrb[11].mxu1  ;;  %v15362_v1 = vld [vmem:[%s20309_s1 + $0x2078] ss:$28 sps:$4 sm:$0xff]   ;;  %v15371_v11 = vld [vmem:[%s20309_s1 + $0x22a8] ss:$28 sps:$4 sm:$0xff]  }
 0x48a   :  { %10261 = vmatprep.subr.bf16.mxu0 %v15290_v36  ;;  %v10514_v24 = vadd.f32 %v13096_v30, %v1623_v16  ;;  %v15336_v36 = vld [vmem:[%s20309_s1 + $0x1f60] ss:$28 sps:$4 sm:$0xff]  }
 0x48b   :  { %v15370_v30 = vld [vmem:[%s20309_s1 + $0x1f24] ss:$28 sps:$4 sm:$0xff]  }
 0x48c   :  { %13245 = vmatpush3.bf16.msra.mxu1 %v15292_v9  ;;  %v15333_v9 = vld [vmem:[%s20309_s1 + $0x1d98] ss:$28 sps:$4 sm:$0xff]  }
 0x48d   :  { %10262 = vmatpush1.bf16.msra.mxu0 %v15288_v59  ;;  %13246 = vmatprep.subr.bf16.mxu1 %v15296_v29  ;;  %v15340_v29 = vld [vmem:[%s20309_s1 + $0x1dd4] ss:$28 sps:$4 sm:$0xff]  }
 0x48e   :  { %10263 = vmatprep.subr.bf16.mxu0 %v15295_v32  ;;  %v15337_v32 = vld [vmem:[%s20309_s1 + $0x1da0] ss:$28 sps:$4 sm:$0xff]  }
 0x490   :  { %13247 = vmatpush3.bf16.msra.mxu1 %v15297_v43  ;;  %v15338_v43 = vld [vmem:[%s20309_s1 + $0x1dd0] ss:$28 sps:$4 sm:$0xff]  }
 0x491   :  { %10264 = vmatpush1.bf16.msra.mxu0 %v15293_v40  ;;  %13254 = vmatprep.subr.bf16.mxu1 %v15301_v3  ;;  %v15341_v40 = vld [vmem:[%s20309_s1 + $0x2158] ss:$28 sps:$4 sm:$0xff]   ;;  %v15345_v3 = vld [vmem:[%s20309_s1 + $0x1e0c] ss:$28 sps:$4 sm:$0xff]  }
 0x492   :  { %10274 = vmatprep.subr.bf16.mxu0 %v15300_v44  ;;  %v15342_v44 = vld [vmem:[%s20309_s1 + $0x1f98] ss:$28 sps:$4 sm:$0xff]  }
 0x493   :  { %10792 = vmatmul.mubr.bf16.vlgmr.msra.gmra.mrb[36].mxu1 %v16964_v58 }
 0x494   :  { %10266 = vmatmul.mubr.bf16.vlgmr.msra.gmra.mrb[4].mxu0 %v16964_v58  ;;  %13255 = vmatpush3.bf16.msra.mxu1 %v15302_v47  ;;  %v15311_v58 = vld [vmem:[%s20309_s1 + $0x1e48] ss:$28 sps:$4 sm:$0xff]  }
 0x495   :  { %10275 = vmatpush1.bf16.msra.mxu0 %v15298_v45  ;;  %13256 = vmatprep.subr.bf16.mxu1 %v15306_v17  ;;  %v15346_v45 = vld [vmem:[%s20309_s1 + $0x2190] ss:$28 sps:$4 sm:$0xff]   ;;  %v15343_v47 = vld [vmem:[%s20309_s1 + $0x1e08] ss:$28 sps:$4 sm:$0xff]  }
 0x496   :  { %10276 = vmatprep.subr.bf16.mxu0 %v15305_v50  ;;  %10831 = vmatprep.mubr.bf16.mxu1 %v16979_v2  ;;  %v15347_v50 = vld [vmem:[%s20309_s1 + $0x1fd0] ss:$28 sps:$4 sm:$0xff]   ;;  %v15350_v17 = vld [vmem:[%s20309_s1 + $0x1e44] ss:$28 sps:$4 sm:$0xff]  }
 0x497   :  { %10306 = vmatprep.mubr.bf16.mxu0 %v16979_v2  ;;  %v15316_v2 = vld [vmem:[%s20309_s1 + $0x1e80] ss:$28 sps:$4 sm:$0xff]  }
 0x498   :  { %13257 = vmatpush3.bf16.msra.mxu1 %v15307_v48  ;;  %v15348_v48 = vld [vmem:[%s20309_s1 + $0x1e40] ss:$28 sps:$4 sm:$0xff]  }
 0x499   :  { %10277 = vmatpush1.bf16.msra.mxu0 %v15303_v51  ;;  %13258 = vmatprep.subr.bf16.mxu1 %v15311_v58  ;;  %v15351_v51 = vld [vmem:[%s20309_s1 + $0x21c8] ss:$28 sps:$4 sm:$0xff]   ;;  %v15355_v58 = vld [vmem:[%s20309_s1 + $0x1e7c] ss:$28 sps:$4 sm:$0xff]  }
 0x49a   :  { %10278 = vmatprep.subr.bf16.mxu0 %v15310_v22  ;;  %v15352_v22 = vld [vmem:[%s20309_s1 + $0x2008] ss:$28 sps:$4 sm:$0xff]  }
 0x49c   :  { %13259 = vmatpush3.bf16.msra.mxu1 %v15312_v56  ;;  %v15353_v56 = vld [vmem:[%s20309_s1 + $0x1e78] ss:$28 sps:$4 sm:$0xff]  }
 0x49d   :  { %10279 = vmatpush1.bf16.msra.mxu0 %v15308_v53  ;;  %13260 = vmatprep.subr.bf16.mxu1 %v15316_v2  ;;  %v15356_v53 = vld [vmem:[%s20309_s1 + $0x2200] ss:$28 sps:$4 sm:$0xff]   ;;  %v15360_v2 = vld [vmem:[%s20309_s1 + $0x1eb4] ss:$28 sps:$4 sm:$0xff]  }
 0x49e   :  { %10280 = vmatprep.subr.bf16.mxu0 %v15315_v0  ;;  %v15357_v0 = vld [vmem:[%s20309_s1 + $0x2040] ss:$28 sps:$4 sm:$0xff]  }
 0x4a0   :  { %13261 = vmatpush3.bf16.msra.mxu1 %v15317_v63  ;;  %v15358_v63 = vld [vmem:[%s20309_s1 + $0x1eb0] ss:$28 sps:$4 sm:$0xff]  }
 0x4a1   :  { %10281 = vmatpush1.bf16.msra.mxu0 %v15313_v61  ;;  %13262 = vmatprep.subr.bf16.mxu1 %v15321_v5  ;;  %v15361_v61 = vld [vmem:[%s20309_s1 + $0x2238] ss:$28 sps:$4 sm:$0xff]   ;;  %v15366_v5 = vld [vmem:[%s20309_s1 + $0x2270] ss:$28 sps:$4 sm:$0xff]  }
 0x4a2   :  { %10282 = vmatprep.subr.bf16.mxu0 %v15320_v62  ;;  %v15365_v62 = vld [vmem:[%s20309_s1 + $0x1eec] ss:$28 sps:$4 sm:$0xff]  }
 0x4a4   :  { %13263 = vmatpush3.bf16.msra.mxu1 %v15322_v41  ;;  %v15368_v41 = vld [vmem:[%s20309_s1 + $0x1f20] ss:$28 sps:$4 sm:$0xff]  }
 0x4a5   :  { %10283 = vmatpush1.bf16.msra.mxu0 %v15318_v49  ;;  %13264 = vmatprep.subr.bf16.mxu1 %v15326_v26 }
 0x4a6   :  { %10284 = vmatprep.subr.bf16.mxu0 %v15325_v13  ;;  %v13116_v18 = vpop.f32.mrb[12].mxu1  ;;  %v15372_v13 = vld [vmem:[%s20309_s1 + $0x20e8] ss:$28 sps:$4 sm:$0xff]  }
 0x4a7   :  { %v13117_v25 = vpop.f32.mrb[13].mxu1 }
 0x4a8   :  { %13265 = vmatpush3.bf16.msra.mxu1 %v15327_v33  ;;  %v13118_v23 = vadd.f32 %v13117_v25, %v13116_v18  ;;  %v13119_v60 = vpop.f32.mrb[14].mxu1  ;;  %v15376_v33 = vld [vmem:[%s20309_s1 + $0x22e0] ss:$28 sps:$4 sm:$0xff]   ;;  %v15380_v25 = vld [vmem:[%s20309_s1 + $0x1f94] ss:$28 sps:$4 sm:$0xff]  }
 0x4a9   :  { %10285 = vmatpush1.bf16.msra.mxu0 %v15323_v19  ;;  %13266 = vmatprep.subr.bf16.mxu1 %v15331_v21  ;;  %v13120_v39 = vpop.f32.mrb[15].mxu1  ;;  %v15375_v19 = vld [vmem:[%s20309_s1 + $0x1f5c] ss:$28 sps:$4 sm:$0xff]   ;;  %v15385_v60 = vld [vmem:[%s20309_s1 + $0x1fcc] ss:$28 sps:$4 sm:$0xff]  }
 0x4aa   :  { %10286 = vmatprep.subr.bf16.mxu0 %v15330_v20  ;;  %v19534_v59 = vadd.f32 %v13118_v23, %v10514_v24  ;;  %v15373_v24 = vld [vmem:[%s20309_s1 + $0x1f58] ss:$28 sps:$4 sm:$0xff]   ;;  %v15377_v18 = vld [vmem:[%s20309_s1 + $0x2120] ss:$28 sps:$4 sm:$0xff]   ;;  %v15387_v39 = vld [vmem:[%s20309_s1 + $0x2350] ss:$28 sps:$4 sm:$0xff]  }
 0x4ab   :  { %v15382_v23 = vld [vmem:[%s20309_s1 + $0x2318] ss:$28 sps:$4 sm:$0xff]  }
 0x4ac   :  { %13267 = vmatpush3.bf16.msra.mxu1 %v15332_v28  ;;  %v15378_v28 = vld [vmem:[%s20309_s1 + $0x1f90] ss:$28 sps:$4 sm:$0xff]  }
 0x4ad   :  { %10287 = vmatpush1.bf16.msra.mxu0 %v15328_v27  ;;  %13268 = vmatprep.subr.bf16.mxu1 %v15336_v36  ;;  %v15381_v27 = vld [vmem:[%s20309_s1 + $0x24d8] ss:$28 sps:$4 sm:$0xff]   ;;  %v15383_v36 = vld [vmem:[%s20309_s1 + $0x1fc8] ss:$28 sps:$4 sm:$0xff]  }
 0x4ae   :  { %10288 = vmatprep.subr.bf16.mxu0 %v15335_v4  ;;  %v15386_v4 = vld [vmem:[%s20309_s1 + $0x2510] ss:$28 sps:$4 sm:$0xff]  }
 0x4b0   :  { %13269 = vmatpush3.bf16.msra.mxu1 %v15337_v32  ;;  %v15392_v32 = vld [vmem:[%s20309_s1 + $0x2388] ss:$28 sps:$4 sm:$0xff]  }
 0x4b1   :  { %10289 = vmatpush1.bf16.msra.mxu0 %v15333_v9  ;;  %13276 = vmatprep.subr.bf16.mxu1 %v15341_v40  ;;  %v15388_v9 = vld [vmem:[%s20309_s1 + $0x2000] ss:$28 sps:$4 sm:$0xff]   ;;  %v15393_v40 = vld [vmem:[%s20309_s1 + $0x2038] ss:$28 sps:$4 sm:$0xff]  }
 0x4b2   :  { %10290 = vmatprep.subr.bf16.mxu0 %v15340_v29  ;;  %v15395_v29 = vld [vmem:[%s20309_s1 + $0x203c] ss:$28 sps:$4 sm:$0xff]  }
 0x4b3   :  { %10832 = vmatmul.mubr.bf16.vlgmr.msra.gmra.mrb[40].mxu1 %v17167_v31 }
 0x4b4   :  { %13277 = vmatpush3.bf16.msra.mxu1 %v15342_v44  ;;  %10871 = vmatprep.mubr.bf16.mxu1 %v17183_v37  ;;  %v15400_v44 = vld [vmem:[%s20309_s1 + $0x2074] ss:$28 sps:$4 sm:$0xff]  }
 0x4b5   :  { %10291 = vmatpush1.bf16.msra.mxu0 %v15338_v43  ;;  %13278 = vmatprep.subr.bf16.mxu1 %v15346_v45  ;;  %v15397_v43 = vld [vmem:[%s20309_s1 + $0x23c0] ss:$28 sps:$4 sm:$0xff]   ;;  %v15398_v45 = vld [vmem:[%s20309_s1 + $0x2070] ss:$28 sps:$4 sm:$0xff]  }
 0x4b6   :  { %10292 = vmatprep.subr.bf16.mxu0 %v15345_v3  ;;  %v15401_v3 = vld [vmem:[%s20309_s1 + $0x25b8] ss:$28 sps:$4 sm:$0xff]  }
 0x4b8   :  { %13279 = vmatpush3.bf16.msra.mxu1 %v15347_v50  ;;  %v15405_v50 = vld [vmem:[%s20309_s1 + $0x20ac] ss:$28 sps:$4 sm:$0xff]  }
 0x4b9   :  { %10293 = vmatpush1.bf16.msra.mxu0 %v15343_v47  ;;  %13280 = vmatprep.subr.bf16.mxu1 %v15351_v51  ;;  %v15402_v47 = vld [vmem:[%s20309_s1 + $0x23f8] ss:$28 sps:$4 sm:$0xff]   ;;  %v15403_v51 = vld [vmem:[%s20309_s1 + $0x20a8] ss:$28 sps:$4 sm:$0xff]  }
 0x4ba   :  { %10294 = vmatprep.subr.bf16.mxu0 %v15350_v17  ;;  %v15406_v17 = vld [vmem:[%s20309_s1 + $0x25f0] ss:$28 sps:$4 sm:$0xff]  }
 0x4bc   :  { %13281 = vmatpush3.bf16.msra.mxu1 %v15352_v22  ;;  %v15410_v22 = vld [vmem:[%s20309_s1 + $0x20e4] ss:$28 sps:$4 sm:$0xff]  }
 0x4bd   :  { %10295 = vmatpush1.bf16.msra.mxu0 %v15348_v48  ;;  %13282 = vmatprep.subr.bf16.mxu1 %v15356_v53  ;;  %v15407_v48 = vld [vmem:[%s20309_s1 + $0x2430] ss:$28 sps:$4 sm:$0xff]  }
 0x4be   :  { %10296 = vmatprep.subr.bf16.mxu0 %v15355_v58  ;;  %v15411_v58 = vld [vmem:[%s20309_s1 + $0x2628] ss:$28 sps:$4 sm:$0xff]  }
 0x4c0   :  { %13283 = vmatpush3.bf16.msra.mxu1 %v15357_v0  ;;  %v15408_v0 = vld [vmem:[%s20309_s1 + $0x20e0] ss:$28 sps:$4 sm:$0xff]  }
 0x4c1   :  { %10297 = vmatpush1.bf16.msra.mxu0 %v15353_v56  ;;  %13284 = vmatprep.subr.bf16.mxu1 %v15361_v61 }
 0x4c2   :  { %10298 = vmatprep.subr.bf16.mxu0 %v15360_v2  ;;  %v15412_v2 = vld [vmem:[%s20309_s1 + $0x2468] ss:$28 sps:$4 sm:$0xff]  }
 0x4c4   :  { %13285 = vmatpush3.bf16.msra.mxu1 %v15362_v1  ;;  %v15415_v1 = vld [vmem:[%s20309_s1 + $0x211c] ss:$28 sps:$4 sm:$0xff]  }
 0x4c5   :  { %10299 = vmatpush1.bf16.msra.mxu0 %v15358_v63  ;;  %13286 = vmatprep.subr.bf16.mxu1 %v15366_v5 }
 0x4c6   :  { %10300 = vmatprep.subr.bf16.mxu0 %v15365_v62  ;;  %v13138_v12 = vpop.f32.mrb[16].mxu1  ;;  %v15416_v62 = vld [vmem:[%s20309_s1 + $0x2660] ss:$28 sps:$4 sm:$0xff]  }
 0x4c7   :  { %v13139_v49 = vpop.f32.mrb[17].mxu1 }
 0x4c8   :  { %13287 = vmatpush3.bf16.msra.mxu1 %v15367_v8  ;;  %v13140_v26 = vadd.f32 %v13139_v49, %v13138_v12  ;;  %v13141_v16 = vpop.f32.mrb[18].mxu1  ;;  %v15413_v8 = vld [vmem:[%s20309_s1 + $0x2118] ss:$28 sps:$4 sm:$0xff]   ;;  %v15418_v49 = vld [vmem:[%s20309_s1 + $0x2150] ss:$28 sps:$4 sm:$0xff]  }
 0x4c9   :  { %10301 = vmatpush1.bf16.msra.mxu0 %v15363_v6  ;;  %13288 = vmatprep.subr.bf16.mxu1 %v15371_v11  ;;  %v13142_v20 = vpop.f32.mrb[19].mxu1  ;;  %v15420_v11 = vld [vmem:[%s20309_s1 + $0x2154] ss:$28 sps:$4 sm:$0xff]   ;;  %v15423_v16 = vld [vmem:[%s20309_s1 + $0x2188] ss:$28 sps:$4 sm:$0xff]  }
 0x4ca   :  { %10302 = vmatprep.subr.bf16.mxu0 %v15370_v30  ;;  %v19635_v21 = vadd.f32 %v13140_v26, %v19534_v59  ;;  %v15390_v59 = vld [vmem:[%s20309_s1 + $0x2004] ss:$28 sps:$4 sm:$0xff]   ;;  %v15421_v12 = vld [vmem:[%s20309_s1 + $0x2858] ss:$28 sps:$4 sm:$0xff]   ;;  %v15426_v26 = vld [vmem:[%s20309_s1 + $0x2890] ss:$28 sps:$4 sm:$0xff]  }
 0x4cb   :  { %v15417_v30 = vld [vmem:[%s20309_s1 + $0x24a0] ss:$28 sps:$4 sm:$0xff]   ;;  %v15431_v20 = vld [vmem:[%s20309_s1 + $0x28c8] ss:$28 sps:$4 sm:$0xff]  }
 0x4cc   :  { %13289 = vmatpush3.bf16.msra.mxu1 %v15372_v13  ;;  %v15425_v13 = vld [vmem:[%s20309_s1 + $0x218c] ss:$28 sps:$4 sm:$0xff]  }
 0x4cd   :  { %10303 = vmatpush1.bf16.msra.mxu0 %v15368_v41  ;;  %13290 = vmatprep.subr.bf16.mxu1 %v15376_v33  ;;  %v15422_v41 = vld [vmem:[%s20309_s1 + $0x2698] ss:$28 sps:$4 sm:$0xff]   ;;  %v15430_v33 = vld [vmem:[%s20309_s1 + $0x21c4] ss:$28 sps:$4 sm:$0xff]  }
 0x4ce   :  { %10304 = vmatprep.subr.bf16.mxu0 %v15375_v19  ;;  %v15427_v19 = vld [vmem:[%s20309_s1 + $0x26d0] ss:$28 sps:$4 sm:$0xff]  }
 0x4d0   :  { %13291 = vmatpush3.bf16.msra.mxu1 %v15377_v18  ;;  %v15435_v18 = vld [vmem:[%s20309_s1 + $0x21fc] ss:$28 sps:$4 sm:$0xff]  }
 0x4d1   :  { %10305 = vmatpush1.bf16.msra.mxu0 %v15373_v24  ;;  %13298 = vmatprep.subr.bf16.mxu1 %v15381_v27  ;;  %v15432_v24 = vld [vmem:[%s20309_s1 + $0x2708] ss:$28 sps:$4 sm:$0xff]   ;;  %v15433_v27 = vld [vmem:[%s20309_s1 + $0x21f8] ss:$28 sps:$4 sm:$0xff]  }
 0x4d2   :  { %10315 = vmatprep.subr.bf16.mxu0 %v15380_v25  ;;  %v15436_v25 = vld [vmem:[%s20309_s1 + $0x2900] ss:$28 sps:$4 sm:$0xff]  }
 0x4d3   :  { %10872 = vmatmul.mubr.bf16.vlgmr.msra.gmra.mrb[44].mxu1 %v17379_v10 }
 0x4d4   :  { %10307 = vmatmul.mubr.bf16.vlgmr.msra.gmra.mrb[4].mxu0 %v17167_v31  ;;  %13299 = vmatpush3.bf16.msra.mxu1 %v15382_v23  ;;  %v15391_v31 = vld [vmem:[%s20309_s1 + $0x2548] ss:$28 sps:$4 sm:$0xff]   ;;  %v15440_v23 = vld [vmem:[%s20309_s1 + $0x2234] ss:$28 sps:$4 sm:$0xff]  }
 0x4d5   :  { %10316 = vmatpush1.bf16.msra.mxu0 %v15378_v28  ;;  %13300 = vmatprep.subr.bf16.mxu1 %v15386_v4  ;;  %v15437_v28 = vld [vmem:[%s20309_s1 + $0x2740] ss:$28 sps:$4 sm:$0xff]   ;;  %v15438_v4 = vld [vmem:[%s20309_s1 + $0x2230] ss:$28 sps:$4 sm:$0xff]  }
 0x4d6   :  { %10317 = vmatprep.subr.bf16.mxu0 %v15385_v60  ;;  %10911 = vmatprep.mubr.bf16.mxu1 %v17394_v15  ;;  %v15441_v60 = vld [vmem:[%s20309_s1 + $0x2938] ss:$28 sps:$4 sm:$0xff]  }
 0x4d7   :  { %10347 = vmatprep.mubr.bf16.mxu0 %v17183_v37  ;;  %v15396_v37 = vld [vmem:[%s20309_s1 + $0x2580] ss:$28 sps:$4 sm:$0xff]  }
 0x4d8   :  { %13301 = vmatpush3.bf16.msra.mxu1 %v15387_v39  ;;  %v15445_v39 = vld [vmem:[%s20309_s1 + $0x226c] ss:$28 sps:$4 sm:$0xff]  }
 0x4d9   :  { %10318 = vmatpush1.bf16.msra.mxu0 %v15383_v36  ;;  %13302 = vmatprep.subr.bf16.mxu1 %v15391_v31  ;;  %v15442_v36 = vld [vmem:[%s20309_s1 + $0x2778] ss:$28 sps:$4 sm:$0xff]   ;;  %v15443_v31 = vld [vmem:[%s20309_s1 + $0x2268] ss:$28 sps:$4 sm:$0xff]  }
 0x4da   :  { %10319 = vmatprep.subr.bf16.mxu0 %v15390_v59  ;;  %v15446_v59 = vld [vmem:[%s20309_s1 + $0x2970] ss:$28 sps:$4 sm:$0xff]  }
 0x4dc   :  { %13303 = vmatpush3.bf16.msra.mxu1 %v15392_v32  ;;  %v15450_v32 = vld [vmem:[%s20309_s1 + $0x22a4] ss:$28 sps:$4 sm:$0xff]  }
 0x4dd   :  { %10320 = vmatpush1.bf16.msra.mxu0 %v15388_v9  ;;  %13304 = vmatprep.subr.bf16.mxu1 %v15396_v37  ;;  %v15447_v9 = vld [vmem:[%s20309_s1 + $0x27b0] ss:$28 sps:$4 sm:$0xff]  }
 0x4de   :  { %10321 = vmatprep.subr.bf16.mxu0 %v15395_v29  ;;  %v15451_v29 = vld [vmem:[%s20309_s1 + $0x29a8] ss:$28 sps:$4 sm:$0xff]  }
 0x4e0   :  { %13305 = vmatpush3.bf16.msra.mxu1 %v15397_v43  ;;  %v15448_v43 = vld [vmem:[%s20309_s1 + $0x22a0] ss:$28 sps:$4 sm:$0xff]  }
 0x4e1   :  { %10322 = vmatpush1.bf16.msra.mxu0 %v15393_v40  ;;  %13306 = vmatprep.subr.bf16.mxu1 %v15401_v3 }
 0x4e2   :  { %10323 = vmatprep.subr.bf16.mxu0 %v15400_v44  ;;  %v15452_v44 = vld [vmem:[%s20309_s1 + $0x27e8] ss:$28 sps:$4 sm:$0xff]  }
 0x4e4   :  { %13307 = vmatpush3.bf16.msra.mxu1 %v15402_v47  ;;  %v15455_v47 = vld [vmem:[%s20309_s1 + $0x22dc] ss:$28 sps:$4 sm:$0xff]  }
 0x4e5   :  { %10324 = vmatpush1.bf16.msra.mxu0 %v15398_v45  ;;  %13308 = vmatprep.subr.bf16.mxu1 %v15406_v17 }
 0x4e6   :  { %10325 = vmatprep.subr.bf16.mxu0 %v15405_v50  ;;  %v13160_v53 = vpop.f32.mrb[20].mxu1  ;;  %v15456_v50 = vld [vmem:[%s20309_s1 + $0x29e0] ss:$28 sps:$4 sm:$0xff]  }
 0x4e7   :  { %v13161_v56 = vpop.f32.mrb[21].mxu1 }
 0x4e8   :  { %13309 = vmatpush3.bf16.msra.mxu1 %v15407_v48  ;;  %v13162_v61 = vadd.f32 %v13161_v56, %v13160_v53  ;;  %v13163_v63 = vpop.f32.mrb[22].mxu1  ;;  %v15453_v48 = vld [vmem:[%s20309_s1 + $0x22d8] ss:$28 sps:$4 sm:$0xff]   ;;  %v15458_v53 = vld [vmem:[%s20309_s1 + $0x2310] ss:$28 sps:$4 sm:$0xff]  }
 0x4e9   :  { %10326 = vmatpush1.bf16.msra.mxu0 %v15403_v51  ;;  %13310 = vmatprep.subr.bf16.mxu1 %v15411_v58  ;;  %v13164_v5 = vpop.f32.mrb[23].mxu1  ;;  %v15460_v58 = vld [vmem:[%s20309_s1 + $0x2314] ss:$28 sps:$4 sm:$0xff]  }
 0x4ea   :  { %10327 = vmatprep.subr.bf16.mxu0 %v15410_v22  ;;  %v19738_v6 = vadd.f32 %v13162_v61, %v19635_v21  ;;  %v15428_v21 = vld [vmem:[%s20309_s1 + $0x21c0] ss:$28 sps:$4 sm:$0xff]   ;;  %v15461_v56 = vld [vmem:[%s20309_s1 + $0x2a18] ss:$28 sps:$4 sm:$0xff]   ;;  %v15462_v61 = vld [vmem:[%s20309_s1 + $0x2348] ss:$28 sps:$4 sm:$0xff]  }
 0x4eb   :  { %v15457_v22 = vld [vmem:[%s20309_s1 + $0x2820] ss:$28 sps:$4 sm:$0xff]   ;;  %v15465_v63 = vld [vmem:[%s20309_s1 + $0x2a50] ss:$28 sps:$4 sm:$0xff]  }
 0x4ec   :  { %13311 = vmatpush3.bf16.msra.mxu1 %v15412_v2  ;;  %v15464_v2 = vld [vmem:[%s20309_s1 + $0x234c] ss:$28 sps:$4 sm:$0xff]   ;;  %v15472_v5 = vld [vmem:[%s20309_s1 + $0x23bc] ss:$28 sps:$4 sm:$0xff]  }
 0x4ed   :  { %10328 = vmatpush1.bf16.msra.mxu0 %v15408_v0  ;;  %13312 = vmatprep.subr.bf16.mxu1 %v15416_v62  ;;  %v15656_v0 = vmov 0.0   ;;  %v15469_v62 = vld [vmem:[%s20309_s1 + $0x2a88] ss:$28 sps:$4 sm:$0xff]  }
 0x4ee   :  { %10329 = vmatprep.subr.bf16.mxu0 %v15415_v1  ;;  %v15468_v1 = vld [vmem:[%s20309_s1 + $0x2384] ss:$28 sps:$4 sm:$0xff]  }
 0x4f0   :  { %13313 = vmatpush3.bf16.msra.mxu1 %v15417_v30  ;;  %v15477_v30 = vld [vmem:[%s20311_s3 + $0x40] sm:$0xff]  }
 0x4f1   :  { %10330 = vmatpush1.bf16.msra.mxu0 %v15413_v8  ;;  %13320 = vmatprep.subr.bf16.mxu1 %v15421_v12  ;;  %v15476_v8 = vld [vmem:[%s20309_s1 + $0x23f4] ss:$28 sps:$4 sm:$0xff]  }
 0x4f2   :  { %10331 = vmatprep.subr.bf16.mxu0 %v15420_v11  ;;  %v11000_v11 = vmax.f32 %v18521_v46, 0.0  ;;  %v15474_v12 = vld [vmem:[%s20309_s1 + $0x23f0] ss:$28 sps:$4 sm:$0xff]  }
 0x4f3   :  { %10912 = vmatmul.mubr.bf16.vlgmr.msra.gmra.mrb[48].mxu1 %v17582_v35  ;;  %v15482_v46 = vld [vmem:[%s20311_s3 + $0x48] sm:$0xff]  }
 0x4f4   :  { %13321 = vmatpush3.bf16.msra.mxu1 %v15422_v41  ;;  %10951 = vmatprep.mubr.bf16.mxu1 %v17598_v57  ;;  %v15481_v41 = vld [vmem:[%s20309_s1 + $0x242c] ss:$28 sps:$4 sm:$0xff]  }
 0x4f5   :  { %10332 = vmatpush1.bf16.msra.mxu0 %v15418_v49  ;;  %13322 = vmatprep.subr.bf16.mxu1 %v15426_v26  ;;  %v15478_v49 = vld [vmem:[%s20311_s3] sm:$0xff]  }
 0x4f6   :  { %10333 = vmatprep.subr.bf16.mxu0 %v15425_v13  ;;  %v11007_v13 = vpack.c.bf16 %v11000_v11, %v11000_v11  ;;  %v15479_v26 = vld [vmem:[%s20309_s1 + $0x2428] ss:$28 sps:$4 sm:$0xff]  }
 0x4f8   :  { %13323 = vmatpush3.bf16.msra.mxu1 %v15427_v19  ;;  %v15486_v19 = vld [vmem:[%s20309_s1 + $0x2464] ss:$28 sps:$4 sm:$0xff]  }
 0x4f9   :  { %10334 = vmatpush1.bf16.msra.mxu0 %v15423_v16  ;;  %13324 = vmatprep.subr.bf16.mxu1 %v15431_v20  ;;  %v15483_v16 = vld [vmem:[%s20311_s3 + $0x8] sm:$0xff]  }
 0x4fa   :  { %10335 = vmatprep.subr.bf16.mxu0 %v15430_v33  ;;  %v15487_v33 = vld [vmem:[%s20311_s3 + $0x50] sm:$0xff]  }
 0x4fc   :  { %13325 = vmatpush3.bf16.msra.mxu1 %v15432_v24  ;;  %v15484_v24 = vld [vmem:[%s20309_s1 + $0x2460] ss:$28 sps:$4 sm:$0xff]  }
 0x4fd   :  { %10336 = vmatpush1.bf16.msra.mxu0 %v15428_v21  ;;  %13326 = vmatprep.subr.bf16.mxu1 %v15436_v25 }
 0x4fe   :  { %10337 = vmatprep.subr.bf16.mxu0 %v15435_v18  ;;  %v15488_v18 = vld [vmem:[%s20311_s3 + $0x10] sm:$0xff]  }
 0x500   :  { %13327 = vmatpush3.bf16.msra.mxu1 %v15437_v28  ;;  %v15491_v28 = vld [vmem:[%s20309_s1 + $0x249c] ss:$28 sps:$4 sm:$0xff]  }
 0x501   :  { %10338 = vmatpush1.bf16.msra.mxu0 %v15433_v27  ;;  %13328 = vmatprep.subr.bf16.mxu1 %v15441_v60 }
 0x502   :  { %10339 = vmatprep.subr.bf16.mxu0 %v15440_v23  ;;  %v15492_v23 = vld [vmem:[%s20311_s3 + $0x58] sm:$0xff]  }
 0x504   :  { %13329 = vmatpush3.bf16.msra.mxu1 %v15442_v36  ;;  %v15489_v36 = vld [vmem:[%s20309_s1 + $0x2498] ss:$28 sps:$4 sm:$0xff]  }
 0x505   :  { %10340 = vmatpush1.bf16.msra.mxu0 %v15438_v4  ;;  %13330 = vmatprep.subr.bf16.mxu1 %v15446_v59  ;;  %v15496_v59 = vld [vmem:[%s20309_s1 + $0x24d4] ss:$28 sps:$4 sm:$0xff]  }
 0x506   :  { %10341 = vmatprep.subr.bf16.mxu0 %v15445_v39  ;;  %v13182_v37 = vpop.f32.mrb[24].mxu1  ;;  %v15493_v39 = vld [vmem:[%s20311_s3 + $0x18] sm:$0xff]  }
 0x507   :  { %v13183_v40 = vpop.f32.mrb[25].mxu1 }
 0x508   :  { %13331 = vmatpush3.bf16.msra.mxu1 %v15447_v9  ;;  %v13184_v3 = vadd.f32 %v13183_v40, %v13182_v37  ;;  %v13185_v45 = vpop.f32.mrb[26].mxu1  ;;  %v15494_v9 = vld [vmem:[%s20309_s1 + $0x24d0] ss:$28 sps:$4 sm:$0xff]   ;;  %v1610_v40 = vsub.s32 3, %v15806_v42 }
 0x509   :  { %10342 = vmatpush1.bf16.msra.mxu0 %v15443_v31  ;;  %13332 = vmatprep.subr.bf16.mxu1 %v15451_v29  ;;  %v13186_v17 = vpop.f32.mrb[27].mxu1  ;;  %v15497_v31 = vld [vmem:[%s20311_s3 + $0x60] sm:$0xff]   ;;  %v15501_v29 = vld [vmem:[%s20309_s1 + $0x250c] ss:$28 sps:$4 sm:$0xff]   ;;  %v15507_v45 = vld [vmem:[%s20311_s3 + $0x70] sm:$0xff]  }
 0x50a   :  { %10343 = vmatprep.subr.bf16.mxu0 %v15450_v32  ;;  %v19839_v51 = vadd.f32 %v13184_v3, %v19738_v6  ;;  %v15473_v6 = vld [vmem:[%s20309_s1 + $0x2ac0] ss:$28 sps:$4 sm:$0xff]   ;;  %v15502_v37 = vld [vmem:[%s20311_s3 + $0x68] sm:$0xff]   ;;  %v15508_v17 = vld [vmem:[%s20311_s3 + $0x30] sm:$0xff]  }
 0x50b   :  { %v15498_v32 = vld [vmem:[%s20311_s3 + $0x20] sm:$0xff]  }
 0x50c   :  { %13333 = vmatpush3.bf16.msra.mxu1 %v15452_v44  ;;  %v15503_v44 = vld [vmem:[%s20311_s3 + $0x28] sm:$0xff]   ;;  %v15506_v3 = vld [vmem:[%s20309_s1 + $0x2544] ss:$28 sps:$4 sm:$0xff]  }
 0x50d   :  { %10344 = vmatpush1.bf16.msra.mxu0 %v15448_v43  ;;  %13334 = vmatprep.subr.bf16.mxu1 %v15456_v50  ;;  %v15499_v43 = vld [vmem:[%s20309_s1 + $0x2508] ss:$28 sps:$4 sm:$0xff]   ;;  %v15504_v50 = vld [vmem:[%s20309_s1 + $0x2540] ss:$28 sps:$4 sm:$0xff]  }
 0x50e   :  { %10345 = vmatprep.subr.bf16.mxu0 %v15455_v47  ;;  %v1611_v47 = vrot.slane %v19507_v14, %v1610_v40  ;;  %v15556_v40 = vld [vmem:[%s20309_s1 + $0x2774] ss:$28 sps:$4 sm:$0xff]  }
 0x510   :  { %13335 = vmatpush3.bf16.msra.mxu1 %v15457_v22  ;;  %v13459_v22 = vadd.f32 %v19315_v55, %v1611_v47  ;;  %v15517_v55 = vld [vmem:[%s20311_s3 + $0xc0] sm:$0xff]  }
 0x511   :  { %10346 = vmatpush1.bf16.msra.mxu0 %v15453_v48  ;;  %13422 = vmatprep.subr.bf16.mxu1 %v15656_v0  ;;  %v15512_v48 = vld [vmem:[%s20311_s3 + $0x78] sm:$0xff]   ;;  %v15562_v47 = vld [vmem:[%s20309_s1 + $0x27e4] ss:$28 sps:$4 sm:$0xff]  }
 0x512   :  { %10356 = vmatprep.subr.bf16.mxu0 %v15460_v58  ;;  %v15509_v58 = vld [vmem:[%s20309_s1 + $0x2578] ss:$28 sps:$4 sm:$0xff]  }
 0x513   :  { %10952 = vmatmul.mubr.bf16.vlgmr.msra.gmra.mrb[52].mxu1 %v17786_v38 }
 0x514   :  { %10348 = vmatmul.mubr.bf16.vlgmr.msra.gmra.mrb[4].mxu0 %v17379_v10  ;;  %13423 = vmatpush3.bf16.msra.mxu1 %v15461_v56  ;;  %v15466_v10 = vld [vmem:[%s20309_s1 + $0x2380] ss:$28 sps:$4 sm:$0xff]   ;;  %v10999_v56 = vmax.f32 %v18519_v34, 0.0 }
 0x515   :  { %10357 = vmatpush1.bf16.msra.mxu0 %v15458_v53  ;;  %13424 = vmatprep.subr.bf16.mxu1 %v15656_v0  ;;  %v15513_v53 = vld [vmem:[%s20311_s3 + $0x38] sm:$0xff]   ;;  %v15518_v34 = vld [vmem:[%s20311_s3 + $0x80] sm:$0xff]  }
 0x516   :  { %10358 = vmatprep.subr.bf16.mxu0 %v15464_v2  ;;  %13430 = vmatprep.mubr.msk.bf16.mxu1 %vm15657_vm1, %v15656_v0  ;;  %v15516_v2 = vld [vmem:[%s20309_s1 + $0x25b4] ss:$28 sps:$4 sm:$0xff]  }
 0x517   :  { %10388 = vmatprep.mubr.bf16.mxu0 %v17394_v15  ;;  %v15470_v15 = vld [vmem:[%s20309_s1 + $0x23b8] ss:$28 sps:$4 sm:$0xff]  }
 0x518   :  { %13425 = vmatpush3.bf16.msra.mxu1 %v15465_v63  ;;  %v15514_v63 = vld [vmem:[%s20309_s1 + $0x25b0] ss:$28 sps:$4 sm:$0xff]  }
 0x519   :  { %10359 = vmatpush1.bf16.msra.mxu0 %v15462_v61  ;;  %13426 = vmatprep.subr.bf16.mxu1 %v15656_v0  ;;  %v11002_v61 = vmax.f32 %v13459_v22, 0.0 }
 0x51a   :  { %10360 = vmatprep.subr.bf16.mxu0 %v15468_v1  ;;  %v11006_v1 = vpack.c.bf16 %v10999_v56, %v10999_v56 }
 0x51c   :  { %13427 = vmatpush3.bf16.msra.mxu1 %v15469_v62  ;;  %v15522_v62 = vld [vmem:[%s20311_s3 + $0xc8] sm:$0xff]  }
 0x51d   :  { %10361 = vmatpush1.bf16.msra.mxu0 %v15466_v10  ;;  %13428 = vmatprep.subr.bf16.mxu1 %v15656_v0  ;;  %v15521_v10 = vld [vmem:[%s20309_s1 + $0x25ec] ss:$28 sps:$4 sm:$0xff]  }
 0x51e   :  { %10362 = vmatprep.subr.bf16.mxu0 %v15472_v5  ;;  %v11009_v5 = vpack.c.bf16 %v11002_v61, %v11002_v61  ;;  %v15566_v61 = vld [vmem:[%s20309_s1 + $0x2850] ss:$28 sps:$4 sm:$0xff]  }
 0x520   :  { %13429 = vmatpush3.bf16.msra.mxu1 %v15473_v6  ;;  %v15523_v6 = vld [vmem:[%s20311_s3 + $0x88] sm:$0xff]  }
 0x521   :  { %10363 = vmatpush1.bf16.msra.mxu0 %v15470_v15  ;;  %13347 = vmatprep.subr.bf16.mxu1 %v15477_v30  ;;  %v15519_v15 = vld [vmem:[%s20309_s1 + $0x25e8] ss:$28 sps:$4 sm:$0xff]   ;;  %v15527_v30 = vld [vmem:[%s20311_s3 + $0xd0] sm:$0xff]  }
 0x522   :  { %10364 = vmatprep.subr.bf16.mxu0 %v15476_v8  ;;  %v15526_v8 = vld [vmem:[%s20309_s1 + $0x2624] ss:$28 sps:$4 sm:$0xff]  }
 0x523   :  { %13431 = vmatmul.mubr.msk.bf16.vlgmr.msra.gmra.mrb[56].mxu1 %vm8876_vm0, %v17844_v7 }
 0x524   :  { %13348 = vmatpush3.bf16.msra.mxu1 %v15478_v49  ;;  %11500 = vmatprep.mubr.bf16.mxu1 %v11007_v13 }
 0x525   :  { %10365 = vmatpush1.bf16.msra.mxu0 %v15474_v12  ;;  %13349 = vmatprep.subr.bf16.mxu1 %v15482_v46  ;;  %v15528_v46 = vld [vmem:[%s20311_s3 + $0x90] sm:$0xff]  }
 0x526   :  { %10366 = vmatprep.subr.bf16.mxu0 %v15481_v41  ;;  %v13204_v20 = vpop.f32.mrb[28].mxu1  ;;  %v15524_v41 = vld [vmem:[%s20309_s1 + $0x2620] ss:$28 sps:$4 sm:$0xff]  }
 0x527   :  { %v13205_v21 = vpop.f32.mrb[29].mxu1 }
 0x528   :  { %13350 = vmatpush3.bf16.msra.mxu1 %v15483_v16  ;;  %v13206_v25 = vadd.f32 %v13205_v21, %v13204_v20  ;;  %v13207_v27 = vpop.f32.mrb[30].mxu1  ;;  %v15532_v16 = vld [vmem:[%s20311_s3 + $0xd8] sm:$0xff]  }
 0x529   :  { %10367 = vmatpush1.bf16.msra.mxu0 %v15479_v26  ;;  %13351 = vmatprep.subr.bf16.mxu1 %v15487_v33  ;;  %v13208_v60 = vpop.f32.mrb[31].mxu1  ;;  %v15531_v26 = vld [vmem:[%s20309_s1 + $0x265c] ss:$28 sps:$4 sm:$0xff]   ;;  %v15538_v27 = vld [vmem:[%s20311_s3 + $0xa0] sm:$0xff]  }
 0x52a   :  { %10368 = vmatprep.subr.bf16.mxu0 %v15486_v19  ;;  %v19938_v4 = vadd.f32 %v13206_v25, %v19839_v51  ;;  %v15511_v51 = vld [vmem:[%s20309_s1 + $0x257c] ss:$28 sps:$4 sm:$0xff]   ;;  %v15534_v25 = vld [vmem:[%s20309_s1 + $0x2690] ss:$28 sps:$4 sm:$0xff]  }
 0x52b   :  { %v15529_v20 = vld [vmem:[%s20309_s1 + $0x2658] ss:$28 sps:$4 sm:$0xff]   ;;  %v15542_v60 = vld [vmem:[%s20311_s3 + $0xe8] sm:$0xff]  }
 0x52c   :  { %13352 = vmatpush3.bf16.msra.mxu1 %v15488_v18  ;;  %v15533_v21 = vld [vmem:[%s20311_s3 + $0x98] sm:$0xff]   ;;  %v15537_v18 = vld [vmem:[%s20311_s3 + $0xe0] sm:$0xff]  }
 0x52d   :  { %10369 = vmatpush1.bf16.msra.mxu0 %v15484_v24  ;;  %13353 = vmatprep.subr.bf16.mxu1 %v15492_v23  ;;  %v15536_v24 = vld [vmem:[%s20309_s1 + $0x2694] ss:$28 sps:$4 sm:$0xff]   ;;  %v15541_v23 = vld [vmem:[%s20309_s1 + $0x26cc] ss:$28 sps:$4 sm:$0xff]  }
 0x52e   :  { %10370 = vmatprep.subr.bf16.mxu0 %v15491_v28  ;;  %v1606_v28 = vsub.s32 2, %v15806_v42 }
 0x530   :  { %13354 = vmatpush3.bf16.msra.mxu1 %v15493_v39  ;;  %v1607_v39 = vrot.slane %v19507_v14, %v1606_v28  ;;  %v15548_v14 = vld [vmem:[%s20311_s3 + $0xb0] sm:$0xff]  }
 0x531   :  { %10371 = vmatpush1.bf16.msra.mxu0 %v15489_v36  ;;  %13355 = vmatprep.subr.bf16.mxu1 %v15497_v31  ;;  %v15543_v36 = vld [vmem:[%s20311_s3 + $0xa8] sm:$0xff]   ;;  %v15544_v31 = vld [vmem:[%s20309_s1 + $0x2700] ss:$28 sps:$4 sm:$0xff]  }
 0x532   :  { %10372 = vmatprep.subr.bf16.mxu0 %v15496_v59  ;;  %v15546_v59 = vld [vmem:[%s20309_s1 + $0x2704] ss:$28 sps:$4 sm:$0xff]  }
 0x534   :  { %13356 = vmatpush3.bf16.msra.mxu1 %v15498_v32  ;;  %v15551_v32 = vld [vmem:[%s20309_s1 + $0x273c] ss:$28 sps:$4 sm:$0xff]  }
 0x535   :  { %10373 = vmatpush1.bf16.msra.mxu0 %v15494_v9  ;;  %13357 = vmatprep.subr.bf16.mxu1 %v15502_v37  ;;  %v13458_v9 = vadd.f32 %v19313_v54, %v1607_v39  ;;  %v15553_v54 = vld [vmem:[%s20311_s3 + $0xb8] sm:$0xff]  }
 0x536   :  { %10374 = vmatprep.subr.bf16.mxu0 %v15501_v29  ;;  %v15549_v29 = vld [vmem:[%s20309_s1 + $0x2738] ss:$28 sps:$4 sm:$0xff]  }
 0x537   :  { %v11001_v37 = vmax.f32 %v13458_v9, 0.0  ;;  %v15607_v9 = vld [vmem:[%s20311_s3 + $0x110] sm:$0xff]  }
 0x538   :  { %13358 = vmatpush3.bf16.msra.mxu1 %v15503_v44 }
 0x539   :  { %10375 = vmatpush1.bf16.msra.mxu0 %v15499_v43  ;;  %13359 = vmatprep.subr.bf16.mxu1 %v15507_v45  ;;  %v15554_v43 = vld [vmem:[%s20309_s1 + $0x2770] ss:$28 sps:$4 sm:$0xff]   ;;  %v11008_v44 = vpack.c.bf16 %v11001_v37, %v11001_v37  ;;  %v15557_v45 = vld [vmem:[%s20309_s1 + $0x27a8] ss:$28 sps:$4 sm:$0xff]  }
 0x53a   :  { %10376 = vmatprep.subr.bf16.mxu0 %v15506_v3  ;;  %v15559_v3 = vld [vmem:[%s20309_s1 + $0x27ac] ss:$28 sps:$4 sm:$0xff]  }
 0x53c   :  { %13360 = vmatpush3.bf16.msra.mxu1 %v15508_v17 }
 0x53d   :  { %10377 = vmatpush1.bf16.msra.mxu0 %v15504_v50  ;;  %13361 = vmatprep.subr.bf16.mxu1 %v15512_v48  ;;  %v15560_v48 = vld [vmem:[%s20309_s1 + $0x27e0] ss:$28 sps:$4 sm:$0xff]  }
 0x53e   :  { %10378 = vmatprep.subr.bf16.mxu0 %v15511_v51 }
 0x540   :  { %13362 = vmatpush3.bf16.msra.mxu1 %v15513_v53 }
 0x541   :  { %10379 = vmatpush1.bf16.msra.mxu0 %v15509_v58  ;;  %13369 = vmatprep.subr.bf16.mxu1 %v15517_v55  ;;  %v15565_v58 = vld [vmem:[%s20309_s1 + $0x281c] ss:$28 sps:$4 sm:$0xff]   ;;  %v15568_v55 = vld [vmem:[%s20309_s1 + $0x2854] ss:$28 sps:$4 sm:$0xff]  }
 0x542   :  { %10380 = vmatprep.subr.bf16.mxu0 %v15516_v2  ;;  %v15563_v2 = vld [vmem:[%s20309_s1 + $0x2818] ss:$28 sps:$4 sm:$0xff]  }
 0x543   :  { %11501 = vmatmul.mubr.bf16.vlgmr.msra.gmra.mrb[60].mxu1 %v11006_v1  ;;  %v15574_v1 = vld [vmem:[%s20309_s1 + $0x28c4] ss:$28 sps:$4 sm:$0xff]  }
 0x544   :  { %13370 = vmatpush3.bf16.msra.mxu1 %v15518_v34  ;;  %11540 = vmatprep.mubr.bf16.mxu1 %v11009_v5  ;;  %v15569_v34 = vld [vmem:[%s20309_s1 + $0x2888] ss:$28 sps:$4 sm:$0xff]   ;;  %v15575_v5 = vld [vmem:[%s20309_s1 + $0x28f8] ss:$28 sps:$4 sm:$0xff]  }
 0x545   :  { %10381 = vmatpush1.bf16.msra.mxu0 %v15514_v63  ;;  %13371 = vmatprep.subr.bf16.mxu1 %v15522_v62  ;;  %v15571_v63 = vld [vmem:[%s20309_s1 + $0x288c] ss:$28 sps:$4 sm:$0xff]   ;;  %v15577_v62 = vld [vmem:[%s20309_s1 + $0x28fc] ss:$28 sps:$4 sm:$0xff]  }
 0x546   :  { %10382 = vmatprep.subr.bf16.mxu0 %v15521_v10  ;;  %v13226_v11 = vpop.f32.mrb[32].mxu1  ;;  %v15572_v10 = vld [vmem:[%s20309_s1 + $0x28c0] ss:$28 sps:$4 sm:$0xff]  }
 0x547   :  { %v13227_v12 = vpop.f32.mrb[33].mxu1 }
 0x548   :  { %v13228_v49 = vadd.f32 %v13227_v12, %v13226_v11  ;;  %13372 = vmatpush3.bf16.msra.mxu1 %v15523_v6  ;;  %v13229_v13 = vpop.f32.mrb[34].mxu1  ;;  %v15578_v6 = vld [vmem:[%s20309_s1 + $0x2930] ss:$28 sps:$4 sm:$0xff]   ;;  %v15586_v11 = vld [vmem:[%s20309_s1 + $0x29a4] ss:$28 sps:$4 sm:$0xff]  }
 0x549   :  { %10383 = vmatpush1.bf16.msra.mxu0 %v15519_v15  ;;  %13373 = vmatprep.subr.bf16.mxu1 %v15527_v30  ;;  %v13230_v19 = vpop.f32.mrb[35].mxu1  ;;  %v15580_v15 = vld [vmem:[%s20309_s1 + $0x2934] ss:$28 sps:$4 sm:$0xff]   ;;  %v15581_v30 = vld [vmem:[%s20309_s1 + $0x2968] ss:$28 sps:$4 sm:$0xff]  }
 0x54a   :  { %10384 = vmatprep.subr.bf16.mxu0 %v15526_v8  ;;  %v20041_v33 = vadd.f32 %v13228_v49, %v19938_v4  ;;  %v15539_v4 = vld [vmem:[%s20309_s1 + $0x26c8] ss:$28 sps:$4 sm:$0xff]  }
 0x54b   :  { %v15583_v8 = vld [vmem:[%s20309_s1 + $0x296c] ss:$28 sps:$4 sm:$0xff]  }
 0x54c   :  { %13374 = vmatpush3.bf16.msra.mxu1 %v15528_v46  ;;  %v15584_v46 = vld [vmem:[%s20309_s1 + $0x29a0] ss:$28 sps:$4 sm:$0xff]  }
 0x54d   :  { %10385 = vmatpush1.bf16.msra.mxu0 %v15524_v41  ;;  %13375 = vmatprep.subr.bf16.mxu1 %v15532_v16 }
 0x54e   :  { %10386 = vmatprep.subr.bf16.mxu0 %v15531_v26  ;;  %v15589_v26 = vld [vmem:[%s20309_s1 + $0x29dc] ss:$28 sps:$4 sm:$0xff]  }
 0x550   :  { %13376 = vmatpush3.bf16.msra.mxu1 %v15533_v21  ;;  %v15590_v21 = vld [vmem:[%s20309_s1 + $0x2a10] ss:$28 sps:$4 sm:$0xff]  }
 0x551   :  { %10387 = vmatpush1.bf16.msra.mxu0 %v15529_v20  ;;  %13377 = vmatprep.subr.bf16.mxu1 %v15537_v18  ;;  %v15592_v20 = vld [vmem:[%s20309_s1 + $0x2a14] ss:$28 sps:$4 sm:$0xff]   ;;  %v15593_v18 = vld [vmem:[%s20309_s1 + $0x2a48] ss:$28 sps:$4 sm:$0xff]  }
 0x552   :  { %10397 = vmatprep.subr.bf16.mxu0 %v15536_v24  ;;  %v15595_v24 = vld [vmem:[%s20309_s1 + $0x2a4c] ss:$28 sps:$4 sm:$0xff]  }
 0x554   :  { %10389 = vmatmul.mubr.bf16.vlgmr.msra.gmra.mrb[4].mxu0 %v17582_v35  ;;  %13378 = vmatpush3.bf16.msra.mxu1 %v15538_v27  ;;  %v15547_v35 = vld [vmem:[%s20311_s3 + $0xf0] sm:$0xff]   ;;  %v15596_v27 = vld [vmem:[%s20309_s1 + $0x2a80] ss:$28 sps:$4 sm:$0xff]  }
 0x555   :  { %10398 = vmatpush1.bf16.msra.mxu0 %v15534_v25  ;;  %13379 = vmatprep.subr.bf16.mxu1 %v15542_v60  ;;  %v15598_v25 = vld [vmem:[%s20309_s1 + $0x2a84] ss:$28 sps:$4 sm:$0xff]  }
 0x556   :  { %10399 = vmatprep.subr.bf16.mxu0 %v15541_v23  ;;  %10429 = vmatprep.mubr.bf16.mxu0 %v17598_v57  ;;  %v15552_v57 = vld [vmem:[%s20311_s3 + $0xf8] sm:$0xff]  }
 0x558   :  { %13380 = vmatpush3.bf16.msra.mxu1 %v15543_v36 }
 0x559   :  { %10400 = vmatpush1.bf16.msra.mxu0 %v15539_v4  ;;  %13381 = vmatprep.subr.bf16.mxu1 %v15547_v35  ;;  %v15603_v35 = vld [vmem:[%s20311_s3 + $0x100] sm:$0xff]  }
 0x55a   :  { %10401 = vmatprep.subr.bf16.mxu0 %v15546_v59  ;;  %v15602_v59 = vld [vmem:[%s20311_s3 + $0x140] sm:$0xff]  }
 0x55c   :  { %13382 = vmatpush3.bf16.msra.mxu1 %v15548_v14  ;;  %v15606_v14 = vld [vmem:[%s20311_s3 + $0x150] sm:$0xff]  }
 0x55d   :  { %10402 = vmatpush1.bf16.msra.mxu0 %v15544_v31  ;;  %13383 = vmatprep.subr.bf16.mxu1 %v15552_v57  ;;  %v15604_v31 = vld [vmem:[%s20311_s3 + $0x148] sm:$0xff]   ;;  %v15609_v57 = vld [vmem:[%s20311_s3 + $0x118] sm:$0xff]  }
 0x55e   :  { %10403 = vmatprep.subr.bf16.mxu0 %v15551_v32  ;;  %v15608_v32 = vld [vmem:[%s20311_s3 + $0x158] sm:$0xff]  }
 0x560   :  { %13384 = vmatpush3.bf16.msra.mxu1 %v15553_v54  ;;  %v15610_v54 = vld [vmem:[%s20311_s3 + $0x160] sm:$0xff]  }
 0x561   :  { %10404 = vmatpush1.bf16.msra.mxu0 %v15549_v29  ;;  %13391 = vmatprep.subr.bf16.mxu1 %v15602_v59  ;;  %v15620_v59 = vld [vmem:[%s20311_s3 + $0x190] sm:$0xff]  }
 0x562   :  { %10405 = vmatprep.subr.bf16.mxu0 %v15556_v40 }
 0x563   :  { %11541 = vmatmul.mubr.bf16.vlgmr.msra.gmra.mrb[64].mxu1 %v11008_v44 }
 0x564   :  { %13392 = vmatpush3.bf16.msra.mxu1 %v15603_v35  ;;  %v15621_v35 = vld [vmem:[%s20311_s3 + $0x198] sm:$0xff]  }
 0x565   :  { %10406 = vmatpush1.bf16.msra.mxu0 %v15554_v43  ;;  %13393 = vmatprep.subr.bf16.mxu1 %v15604_v31  ;;  %v15622_v31 = vld [vmem:[%s20311_s3 + $0x1a0] sm:$0xff]  }
 0x566   :  { %10407 = vmatprep.subr.bf16.mxu0 %v15559_v3  ;;  %v13248_v50 = vpop.f32.mrb[36].mxu1  ;;  %v15611_v3 = vld [vmem:[%s20311_s3 + $0x120] sm:$0xff]  }
 0x567   :  { %v13249_v17 = vpop.f32.mrb[37].mxu1 }
 0x568   :  { %v13250_v51 = vadd.f32 %v13249_v17, %v13248_v50  ;;  %v13251_v22 = vpop.f32.mrb[38].mxu1  ;;  %v15613_v50 = vld [vmem:[%s20311_s3 + $0x128] sm:$0xff]  }
 0x569   :  { %10408 = vmatpush1.bf16.msra.mxu0 %v15557_v45  ;;  %v13252_v53 = vpop.f32.mrb[39].mxu1 }
 0x56a   :  { %10409 = vmatprep.subr.bf16.mxu0 %v15562_v47  ;;  %v10794_v56 = vadd.f32 %v13250_v51, %v20041_v33  ;;  %v15587_v33 = vld [vmem:[%s20309_s1 + $0x29d8] ss:$28 sps:$4 sm:$0xff]   ;;  %v15612_v47 = vld [vmem:[%s20311_s3 + $0x168] sm:$0xff]  }
 0x56d   :  { %10410 = vmatpush1.bf16.msra.mxu0 %v15560_v48 }
 0x56e   :  { %10411 = vmatprep.subr.bf16.mxu0 %v15565_v58 }
 0x571   :  { %10412 = vmatpush1.bf16.msra.mxu0 %v15563_v2 }
 0x572   :  { %10413 = vmatprep.subr.bf16.mxu0 %v15568_v55  ;;  %v15615_v55 = vld [vmem:[%s20311_s3 + $0x130] sm:$0xff]  }
 0x575   :  { %10414 = vmatpush1.bf16.msra.mxu0 %v15566_v61 }
 0x576   :  { %10415 = vmatprep.subr.bf16.mxu0 %v15571_v63 }
 0x579   :  { %10416 = vmatpush1.bf16.msra.mxu0 %v15569_v34 }
 0x57a   :  { %10417 = vmatprep.subr.bf16.mxu0 %v15574_v1 }
 0x57d   :  { %10418 = vmatpush1.bf16.msra.mxu0 %v15572_v10  ;;  %v15616_v10 = vld [vmem:[%s20311_s3 + $0x178] sm:$0xff]  }
 0x57e   :  { %10419 = vmatprep.subr.bf16.mxu0 %v15577_v62  ;;  %v15617_v62 = vld [vmem:[%s20311_s3 + $0x138] sm:$0xff]  }
 0x581   :  { %10420 = vmatpush1.bf16.msra.mxu0 %v15575_v5 }
 0x582   :  { %10421 = vmatprep.subr.bf16.mxu0 %v15580_v15 }
 0x585   :  { %10422 = vmatpush1.bf16.msra.mxu0 %v15578_v6 }
 0x586   :  { %10423 = vmatprep.subr.bf16.mxu0 %v15583_v8  ;;  %v13270_v12 = vpop.f32.mrb[40].mxu1 }
 0x587   :  { %v13271_v49 = vpop.f32.mrb[41].mxu1 }
 0x588   :  { %v13272_v41 = vadd.f32 %v13271_v49, %v13270_v12  ;;  %v13273_v13 = vpop.f32.mrb[42].mxu1 }
 0x589   :  { %10424 = vmatpush1.bf16.msra.mxu0 %v15581_v30  ;;  %v13274_v16 = vpop.f32.mrb[43].mxu1 }
 0x58a   :  { %10425 = vmatprep.subr.bf16.mxu0 %v15586_v11  ;;  %v10834_v19 = vadd.f32 %v13272_v41, %v10794_v56  ;;  %v15614_v56 = vld [vmem:[%s20311_s3 + $0x170] sm:$0xff]   ;;  %v13021_v11 = vld [vmem:[%s20312_s4] ss:$0 sm:$0xff] }
 0x58d   :  { %10426 = vmatpush1.bf16.msra.mxu0 %v15584_v46 }
 0x58e   :  { %10427 = vmatprep.subr.bf16.mxu0 %v15589_v26 }
 0x591   :  { %10428 = vmatpush1.bf16.msra.mxu0 %v15587_v33  ;;  %v1618_v33 = vsub.s32 5, %v15806_v42 }
 0x592   :  { %10438 = vmatprep.subr.bf16.mxu0 %v15592_v20  ;;  %v15628_v20 = vld [vmem:[%s20310_s2] sm:$0xff] }
 0x594   :  { %10430 = vmatmul.mubr.bf16.vlgmr.msra.gmra.mrb[4].mxu0 %v17786_v38  ;;  %v15601_v38 = vld [vmem:[%s20309_s1 + $0x2abc] ss:$28 sps:$4 sm:$0xff]  }
 0x595   :  { %10439 = vmatpush1.bf16.msra.mxu0 %v15590_v21  ;;  %10470 = vmatprep.mubr.bf16.mxu0 %v15655_v52  ;;  %v15599_v52 = vld [vmem:[%s20309_s1 + $0x2ab8] ss:$28 sps:$4 sm:$0xff]  }
 0x596   :  { %10440 = vmatprep.subr.bf16.mxu0 %v15595_v24  ;;  %v1619_v24 = vrot.slane %v15628_v20, %v1618_v33 }
 0x599   :  { %10441 = vmatpush1.bf16.msra.mxu0 %v15593_v18 }
 0x59a   :  { %10442 = vmatprep.subr.bf16.mxu0 %v15598_v25 }
 0x59d   :  { %10443 = vmatpush1.bf16.msra.mxu0 %v15596_v27 }
 0x59e   :  { %10444 = vmatprep.subr.bf16.mxu0 %v15601_v38 }
 0x5a1   :  { %10445 = vmatpush1.bf16.msra.mxu0 %v15599_v52 }
 0x5a4   :  { %13019 = vmatmul.mubr.msk.bf16.vlgmr.msra.gmra.mrb[4].mxu0 %vm8876_vm0, %v17844_v7  ;;  %v15605_v7 = vld [vmem:[%s20311_s3 + $0x108] sm:$0xff]  }
 0x5a5   :  { %13394 = vmatpush3.bf16.msra.mxu1 %v15605_v7  ;;  %v15623_v7 = vld [vmem:[%s20311_s3 + $0x1a8] sm:$0xff]  }
 0x5a6   :  { %v13292_v28 = vpop.f32.mrb[44].mxu1  ;;  %13395 = vmatprep.subr.bf16.mxu1 %v15606_v14  ;;  %v15624_v14 = vld [vmem:[%s20311_s3 + $0x1b0] sm:$0xff]  }
 0x5a7   :  { %v13293_v23 = vpop.f32.mrb[45].mxu1 }
 0x5a8   :  { %v13294_v60 = vadd.f32 %v13293_v23, %v13292_v28  ;;  %v13295_v4 = vpop.f32.mrb[46].mxu1 }
 0x5a9   :  { %v13296_v36 = vpop.f32.mrb[47].mxu1  ;;  %13396 = vmatpush3.bf16.msra.mxu1 %v15607_v9  ;;  %v15625_v9 = vld [vmem:[%s20311_s3 + $0x1b8] sm:$0xff]  }
 0x5aa   :  { %v10874_v39 = vadd.f32 %v13294_v60, %v10834_v19  ;;  %13397 = vmatprep.subr.bf16.mxu1 %v15608_v32  ;;  %v1614_v19 = vsub.s32 4, %v15806_v42  ;;  %v15618_v36 = vld [vmem:[%s20311_s3 + $0x180] sm:$0xff]  }
 0x5ac   :  { %v1615_v21 = vrot.slane %v15628_v20, %v1614_v19 }
 0x5ad   :  { %13398 = vmatpush3.bf16.msra.mxu1 %v15609_v57 }
 0x5ae   :  { %13399 = vmatprep.subr.bf16.mxu1 %v15610_v54 }
 0x5b1   :  { %13400 = vmatpush3.bf16.msra.mxu1 %v15611_v3 }
 0x5b2   :  { %13401 = vmatprep.subr.bf16.mxu1 %v15612_v47 }
 0x5b5   :  { %13402 = vmatpush3.bf16.msra.mxu1 %v15613_v50 }
 0x5b6   :  { %13403 = vmatprep.subr.bf16.mxu1 %v15614_v56 }
 0x5b9   :  { %13404 = vmatpush3.bf16.msra.mxu1 %v15615_v55 }
 0x5ba   :  { %13405 = vmatprep.subr.bf16.mxu1 %v15616_v10 }
 0x5bd   :  { %13406 = vmatpush3.bf16.msra.mxu1 %v15617_v62 }
 0x5be   :  { %13434 = vmatprep.subr.bf16.mxu1 %v15656_v0 }
 0x5c6   :  { %v13314_v29 = vpop.f32.mrb[48].mxu1 }
 0x5c7   :  { %v13315_v37 = vpop.f32.mrb[49].mxu1 }
 0x5c8   :  { %v13316_v40 = vadd.f32 %v13315_v37, %v13314_v29  ;;  %v13317_v43 = vpop.f32.mrb[50].mxu1 }
 0x5c9   :  { %v13318_v44 = vpop.f32.mrb[51].mxu1 }
 0x5ca   :  { %v10914_v45 = vadd.f32 %v13316_v40, %v10874_v39  ;;  %v15619_v39 = vld [vmem:[%s20311_s3 + $0x188] sm:$0xff]   ;;  %s15630_s3 = scalar_lea.vmem %s11637_s29, 32 }
 0x5cb   :  { %p15631_p0 = scmp.ne.s32.totalorder %s11637_s29, %s15630_s3  ;;  %p15636_p2 = scmp.lt.s32.totalorder %s15630_s3, %s15630_s3 }
 0x5cd   :  { %p15637_p3 = por %p15636_p2, %p15635_p1 }
 0x5cf   :  { %p15638_p4 = pnand %p15637_p3, %p15631_p0 }
 0x5e6   :  { %v13336_v17 = vpop.f32.mrb[52].mxu1 }
 0x5e7   :  { %v13337_v51 = vpop.f32.mrb[53].mxu1 }
 0x5e8   :  { %v13338_v48 = vadd.f32 %v13337_v51, %v13336_v17  ;;  %v13339_v22 = vpop.f32.mrb[54].mxu1 }
 0x5e9   :  { %v13340_v58 = vpop.f32.mrb[55].mxu1 }
 0x5ea   :  { %v10954_v53 = vadd.f32 %v13338_v48, %v10914_v45 }
 0x5f6   :  { %v10993_v2 = vpop.f32.mrb[56].mxu1 }
 0x5f7   :  { %v20245_v61 = vadd.f32 %v10993_v2, %v10954_v53  ;;  %v13432_v63 = vpop.f32.mrb[57].mxu1 }
 0x5f8   :  { %v10996_v34 = vpop.f32.mrb[58].mxu1 }
 0x5f9   :  { %v13433_v1 = vpop.f32.mrb[59].mxu1  ;;  %v11005_v32 = vmax.f32 %v20245_v61, 0.0 }
 0x5fb   :  { %v11012_v57 = vpack.c.bf16 %v11005_v32, %v11005_v32 }
 0x616   :  { %v13363_v5 = vpop.f32.mrb[60].mxu1 }
 0x617   :  { %v13364_v15 = vpop.f32.mrb[61].mxu1 }
 0x618   :  { %v13365_v6 = vadd.f32 %v13364_v15, %v13363_v5  ;;  %v13366_v8 = vpop.f32.mrb[62].mxu1 }
 0x619   :  { %v13367_v30 = vpop.f32.mrb[63].mxu1 }
 0x61a   :  { %v11503_v41 = vadd.f32 %v13365_v6, %v13021_v11 }
 0x636   :  { %v13385_v12 = vpop.f32.mrb[64].mxu1 }
 0x637   :  { %v13386_v49 = vpop.f32.mrb[65].mxu1 }
 0x638   :  { %v13387_v46 = vadd.f32 %v13386_v49, %v13385_v12  ;;  %v13388_v13 = vpop.f32.mrb[66].mxu1 }
 0x639   :  { %v13389_v26 = vpop.f32.mrb[67].mxu1 }
 0x63a   :  { %v11543_v16 = vadd.f32 %v13387_v46, %v11503_v41 }
 0x677   :  { %v10472_v18 = vpop.f32.mrb[4].mxu0 }
 0x678   :  { %v13460_v25 = vadd.f32 %v10472_v18, %v1615_v21  ;;  %v10474_v27 = vpop.f32.mrb[5].mxu0 }
 0x679   :  { %v13461_v38 = vadd.f32 %v10474_v27, %v1619_v24  ;;  %v10476_v52 = vpop.f32.mrb[6].mxu0 }
 0x67a   :  { %v11003_v28 = vmax.f32 %v13460_v25, 0.0  ;;  %v10477_v23 = vpop.f32.mrb[7].mxu0 }
 0x67b   :  { %v11004_v60 = vmax.f32 %v13461_v38, 0.0 }
 0x67c   :  { %v11010_v42 = vpack.c.bf16 %v11003_v28, %v11003_v28 }
 0x67d   :  { %v11011_v4 = vpack.c.bf16 %v11004_v60, %v11004_v60 }
 0x67f   :  { %11580 = vmatprep.mubr.bf16.mxu1 %v11011_v4 }
 0x680   :  { %11581 = vmatmul.mubr.bf16.vlgmr.msra.gmra.mrb[68].mxu1 %v11010_v42 }
 0x681   :  { %13435 = vmatpush3.bf16.msra.mxu1 %v15618_v36  ;;  %13450 = vmatprep.mubr.msk.bf16.mxu1 %vm15657_vm1, %v15656_v0 }
 0x682   :  { %13436 = vmatprep.subr.bf16.mxu1 %v15656_v0 }
 0x685   :  { %13437 = vmatpush3.bf16.msra.mxu1 %v15619_v39 }
 0x686   :  { %13438 = vmatprep.subr.bf16.mxu1 %v15656_v0 }
 0x689   :  { %13439 = vmatpush3.bf16.msra.mxu1 %v15620_v59 }
 0x68a   :  { %13440 = vmatprep.subr.bf16.mxu1 %v15656_v0 }
 0x68d   :  { %13441 = vmatpush3.bf16.msra.mxu1 %v15621_v35 }
 0x68e   :  { %13442 = vmatprep.subr.bf16.mxu1 %v15656_v0 }
 0x691   :  { %13443 = vmatpush3.bf16.msra.mxu1 %v15622_v31 }
 0x692   :  { %13444 = vmatprep.subr.bf16.mxu1 %v15656_v0 }
 0x695   :  { %13445 = vmatpush3.bf16.msra.mxu1 %v15623_v7 }
 0x696   :  { %13446 = vmatprep.subr.bf16.mxu1 %v15656_v0 }
 0x699   :  { %13447 = vmatpush3.bf16.msra.mxu1 %v15624_v14 }
 0x69a   :  { %13448 = vmatprep.subr.bf16.mxu1 %v15656_v0 }
 0x69d   :  { %13449 = vmatpush3.bf16.msra.mxu1 %v15625_v9 }
 0x6a0   :  { %13451 = vmatmul.mubr.bf16.vlgmr.msra.gmra.mrb[72].mxu1 %v11012_v57 }
 0x753   :  { %v13407_v29 = vpop.f32.mrb[68].mxu1 }
 0x754   :  { %v13408_v54 = vpop.f32.mrb[69].mxu1 }
 0x755   :  { %v13409_v37 = vadd.f32 %v13408_v54, %v13407_v29  ;;  %v13410_v40 = vpop.f32.mrb[70].mxu1 }
 0x756   :  { %v13411_v43 = vpop.f32.mrb[71].mxu1 }
 0x757   :  { %v11583_v44 = vadd.f32 %v13409_v37, %v11543_v16 }
 0x773   :  { %v11622_v3 = vpop.f32.mrb[72].mxu1 }
 0x774   :  { %v11623_v45 = vadd.f32 %v11622_v3, %v11583_v44  ;;  %v13452_v47 = vpop.f32.mrb[73].mxu1 }
 0x775   :  { %v11625_v50 = vpop.f32.mrb[74].mxu1 }
 0x776   :  { %v13453_v17 = vpop.f32.mrb[75].mxu1  ;;  %11629 = vst.msk [vmem:[#allocation2] sm:$0x3] %vm11628_vm2, %v11623_v45 }
 0x777   :  { %15641 = shalt.err (!%p15638_p4)
}
 0x778   :  { %s15642_s7 = scalar_lea.hbm %s20313_s5, 32 }
 0x779   :  { %p15643_p5 = scmp.ne.s32.totalorder %s20313_s5, %s15642_s7  ;;  %p15646_p6 = scmp.lt.u32.totalorder %s15642_s7, %s20313_s5 }
 0x77b   :  { %p15648_p7 = pnand %p15646_p6, %p15643_p5 }
 0x77d   :  { %15651 = shalt.err (!%p15648_p7)
}
 0x77e   :  { %11639 = dma.vmem_to_hbm [thread:$0]  %s11637_s29, 32, %s20313_s5, [#allocation3]  }
 0x77f   :  { %15652 = dma.done.wait [#allocation3], 32  }
 0x780   :  { %15653 = vsyncadd [#allocation3], 4294967264 }
 0x781   :  { %11643 = vsyncpa [#allocation3], 1 }

</bundles_post_ra>
